<compile_context>
chip_gen: v5e
topology: v5e:2x2
jax: 0.10.0
libtpu: 0.0.40
codegen_flags: <defaults>
</compile_context>

<pallas_src>
import functools

import jax
import jax.numpy as jnp
from jax.experimental import pallas as pl
from jax.experimental.pallas import tpu as pltpu

BN_EPS = 1e-5                      # nn.BatchNorm2d default
VMEM_LIMIT = 32 * 1024 * 1024      # explicit scoped-VMEM budget (safe on v5e/v6e/v7x)
TM_MAX = 512                       # M-tile rows (multiple of 8/16)


def _round_up(x, m):
    return (x + m - 1) // m * m


def _pick_tiling(m):
    tm = min(TM_MAX, _round_up(m, 8))
    m_pad = _round_up(m, tm)
    return tm, m_pad


def _pad_vec(v, c_pad):
    v = v.reshape(1, -1).astype(jnp.float32)
    return jnp.pad(v, ((0, 0), (0, c_pad - v.shape[1])))


# ----------------------------------------------------------------------------
# Kernel A: N fused tiled GEMMs (bf16 x bf16 -> f32 acc) + per-channel batch stats.
# Used with n=1 (plain conv) or n=2 (conv2 + 1x1 downsample shortcut fused).
# ----------------------------------------------------------------------------
def _matmul_stats_kernel(*refs, n, tm, m_valid, mask_rows):
    ins = refs[:2 * n]                 # x0, w0, x1, w1, ...
    outs = refs[2 * n:5 * n]           # y0, sum0, sq0, y1, sum1, sq1, ...
    scr = refs[5 * n:]                 # acc_s0, acc_q0, acc_s1, acc_q1, ...
    pid = pl.program_id(0)

    @pl.when(pid == 0)
    def _():
        for a in scr:
            a[...] = jnp.zeros_like(a)

    if mask_rows:   # zero padded rows so they don't pollute the batch statistics
        row = pid * tm + jax.lax.broadcasted_iota(jnp.int32, (tm, 1), 0)
        valid = row < m_valid

    for g in range(n):
        x_ref, w_ref = ins[2 * g], ins[2 * g + 1]
        y_ref = outs[3 * g]
        acc_s, acc_q = scr[2 * g], scr[2 * g + 1]
        y = jnp.dot(x_ref[...], w_ref[...], preferred_element_type=jnp.float32)
        y_ref[...] = y.astype(y_ref.dtype)
        ys = jnp.where(valid, y, 0.0) if mask_rows else y
        acc_s[...] += jnp.sum(ys, axis=0, keepdims=True)
        acc_q[...] += jnp.sum(ys * ys, axis=0, keepdims=True)

    @pl.when(pid == pl.num_programs(0) - 1)
    def _():
        for g in range(n):
            outs[3 * g + 1][...] = scr[2 * g][...]
            outs[3 * g + 2][...] = scr[2 * g + 1][...]


def matmul_stats(pairs, *, tm, m_valid):
    """pairs: list of (x2d (m_pad, k_i) bf16, w2d (k_i, c_pad_i) bf16), c_pad_i % 128 == 0.

    Returns, per pair: y = x2d @ w2d (bf16), plus per-channel sum / sum-sq over the
    first m_valid rows (f32, 1 x c_pad)."""
    n = len(pairs)
    m_pad = pairs[0][0].shape[0]
    grid = (m_pad // tm,)
    args, in_specs, out_shape, out_specs, scratch = [], [], [], [], []
    flops, bytes_acc = 0, 0
    for (x2d, w2d) in pairs:
        k, c_pad = x2d.shape[1], w2d.shape[1]
        args += [x2d, w2d]
        in_specs += [pl.BlockSpec((tm, k), lambda i: (i, 0)),
                     pl.BlockSpec((k, c_pad), lambda i: (0, 0))]       # weight stays resident
        out_shape += [jax.ShapeDtypeStruct((m_pad, c_pad), jnp.bfloat16),
                      jax.ShapeDtypeStruct((1, c_pad), jnp.float32),
                      jax.ShapeDtypeStruct((1, c_pad), jnp.float32)]
        out_specs += [pl.BlockSpec((tm, c_pad), lambda i: (i, 0)),
                      pl.BlockSpec((1, c_pad), lambda i: (0, 0)),
                      pl.BlockSpec((1, c_pad), lambda i: (0, 0))]
        scratch += [pltpu.VMEM((1, c_pad), jnp.float32),
                    pltpu.VMEM((1, c_pad), jnp.float32)]
        flops += 2 * m_pad * k * c_pad
        bytes_acc += (x2d.size + w2d.size) * 2 + m_pad * c_pad * 2 + 2 * c_pad * 4
    kernel = functools.partial(_matmul_stats_kernel, n=n, tm=tm, m_valid=m_valid,
                               mask_rows=(m_pad != m_valid))
    return pl.pallas_call(
        kernel,
        out_shape=tuple(out_shape),
        grid_spec=pltpu.PrefetchScalarGridSpec(
            num_scalar_prefetch=0,
            grid=grid,
            in_specs=in_specs,
            out_specs=tuple(out_specs),
            scratch_shapes=scratch),
        compiler_params=pltpu.CompilerParams(
            dimension_semantics=("arbitrary",),       # stats accumulate across M tiles
            vmem_limit_bytes=VMEM_LIMIT),
        cost_estimate=pl.CostEstimate(flops=flops, transcendentals=0,
                                      bytes_accessed=bytes_acc),
    )(*args)


# ----------------------------------------------------------------------------
# Kernel B: apply BatchNorm (batch stats) as y*scale + shift  [+ second BN group]
# [+ raw residual]  [+ ReLU].  Second group = the 1x1 downsample shortcut.
# ----------------------------------------------------------------------------
def _bn_apply_kernel(*refs, n_bn, has_res, relu, inv_count):
    out_ref = refs[-1]
    idx = 0
    acc = None
    for _ in range(n_bn):
        y_ref, s_ref, q_ref, g_ref, b_ref = refs[idx:idx + 5]
        idx += 5
        mean = s_ref[...] * inv_count
        var = jnp.maximum(q_ref[...] * inv_count - mean * mean, 0.0)
        scale = jax.lax.rsqrt(var + BN_EPS) * g_ref[...]
        shift = b_ref[...] - mean * scale
        z = y_ref[...].astype(jnp.float32) * scale + shift
        acc = z if acc is None else acc + z
    if has_res:
        acc = acc + refs[idx][...].astype(jnp.float32)
        idx += 1
    if relu:
        acc = jnp.maximum(acc, 0.0)
    out_ref[...] = acc.astype(out_ref.dtype)


def bn_apply(groups, res=None, *, relu, m_valid, tm, out_dtype=jnp.bfloat16):
    """groups: list of (y, sum, sumsq, gamma, beta); res: optional raw residual."""
    m_pad, c_pad = groups[0][0].shape
    grid = (m_pad // tm,)
    row_spec = pl.BlockSpec((tm, c_pad), lambda i: (i, 0))
    vec_spec = pl.BlockSpec((1, c_pad), lambda i: (0, 0))
    args, in_specs = [], []
    for (y, s, q, g, b) in groups:
        args += [y, s, q, g, b]
        in_specs += [row_spec, vec_spec, vec_spec, vec_spec, vec_spec]
    if res is not None:
        args.append(res)
        in_specs.append(row_spec)
    kernel = functools.partial(_bn_apply_kernel, n_bn=len(groups),
                               has_res=res is not None, relu=relu,
                               inv_count=1.0 / float(m_valid))
    cost = pl.CostEstimate(
        flops=6 * len(groups) * m_pad * c_pad,
        transcendentals=len(groups) * c_pad,
        bytes_accessed=sum(a.size * a.dtype.itemsize for a in args) + m_pad * c_pad * 2)
    return pl.pallas_call(
        kernel,
        out_shape=jax.ShapeDtypeStruct((m_pad, c_pad), out_dtype),
        grid_spec=pltpu.PrefetchScalarGridSpec(
            num_scalar_prefetch=0, grid=grid,
            in_specs=in_specs,
            out_specs=row_spec),
        compiler_params=pltpu.CompilerParams(
            dimension_semantics=("parallel",),        # independent M tiles -> megacore
            vmem_limit_bytes=VMEM_LIMIT),
        cost_estimate=cost,
    )(*args)


# ----------------------------------------------------------------------------
# Kernel C: global average pool (XLU reduction) + Linear head (lane-padded output)
# ----------------------------------------------------------------------------
def _pool_linear_kernel(x_ref, w_ref, b_ref, o_ref, *, inv_hw):
    pooled = jnp.sum(x_ref[...].astype(jnp.float32), axis=1) * inv_hw   # (n_pad, C)
    o_ref[...] = jnp.dot(pooled, w_ref[...],
                         preferred_element_type=jnp.float32) + b_ref[...]


def pool_linear(x_nhwc, fc_w, fc_b):
    n, h, w, c = x_nhwc.shape
    hw = h * w
    n_pad = _round_up(n, 8)
    ncls = fc_w.shape[1]
    ncls_pad = _round_up(ncls, 128)
    x3 = jnp.pad(x_nhwc.reshape(n, hw, c), ((0, n_pad - n), (0, 0), (0, 0)))
    wp = jnp.pad(fc_w.astype(jnp.float32), ((0, 0), (0, ncls_pad - ncls)))
    bp = jnp.pad(fc_b.reshape(1, -1).astype(jnp.float32), ((0, 0), (0, ncls_pad - ncls)))
    vmem = pl.BlockSpec(memory_space=pltpu.MemorySpace.VMEM)
    out = pl.pallas_call(
        functools.partial(_pool_linear_kernel, inv_hw=1.0 / float(hw)),
        out_shape=jax.ShapeDtypeStruct((n_pad, ncls_pad), jnp.float32),
        in_specs=[vmem, vmem, vmem],
        out_specs=vmem,
        compiler_params=pltpu.CompilerParams(vmem_limit_bytes=VMEM_LIMIT),
    )(x3, wp, bp)
    return out[:n, :ncls]


# ----------------------------------------------------------------------------
# Plain-JAX glue: im2col (bf16), padding, block/network plumbing
# ----------------------------------------------------------------------------
def im2col3x3(x, stride):
    """x: (N, H, W, C) NHWC.  Returns ((N*Ho*Wo, 9*C) bf16, (N, Ho, Wo))."""
    n, h, w, c = x.shape
    x = x.astype(jnp.bfloat16)
    xp = jnp.pad(x, ((0, 0), (1, 1), (1, 1), (0, 0)))
    ho = (h + 2 - 3) // stride + 1
    wo = (w + 2 - 3) // stride + 1
    cols = []
    for ky in range(3):
        for kx in range(3):
            cols.append(xp[:, ky:ky + (ho - 1) * stride + 1:stride,
                           kx:kx + (wo - 1) * stride + 1:stride, :])
    patches = jnp.concatenate(cols, axis=-1)          # (N, Ho, Wo, 9*C)
    return patches.reshape(n * ho * wo, 9 * c), (n, ho, wo)


def _prep_conv(x, w, stride):
    """im2col + pad the GEMM operands for a 3x3 conv (padding=1)."""
    patches, (n, ho, wo) = im2col3x3(x, stride)
    m, _ = patches.shape
    cout = w.shape[-1]
    c_pad = _round_up(cout, 128)
    tm, m_pad = _pick_tiling(m)
    patches = jnp.pad(patches, ((0, m_pad - m), (0, 0)))
    w2d = jnp.pad(w.reshape(9 * w.shape[2], cout),
                  ((0, 0), (0, c_pad - cout))).astype(jnp.bfloat16)
    return patches, w2d, (n, ho, wo, cout, c_pad, m, m_pad, tm)


def conv_bn_relu(x, w, gamma, beta, stride, relu=True):
    patches, w2d, (n, ho, wo, cout, c_pad, m, _, tm) = _prep_conv(x, w, stride)
    y, s, q = matmul_stats([(patches, w2d)], tm=tm, m_valid=m)
    out = bn_apply([(y, s, q, _pad_vec(gamma, c_pad), _pad_vec(beta, c_pad))],
                   relu=relu, m_valid=m, tm=tm)
    return out[:m].reshape(n, ho, wo, c_pad)[..., :cout]


def basic_block(x, blk, stride):
    planes = blk['w1'].shape[-1]
    c_pad = _round_up(planes, 128)

    # conv1 -> bn1 -> relu
    h = conv_bn_relu(x, blk['w1'], blk['g1'], blk['b1'], stride, relu=True)

    # conv2 GEMM (+ fused downsample-shortcut GEMM when present) + batch stats
    patches, w2d, (n, ho, wo, _, _, m, m_pad, tm) = _prep_conv(h, blk['w2'], 1)
    g2 = _pad_vec(blk['g2'], c_pad)
    b2 = _pad_vec(blk['b2'], c_pad)

    if 'wsc' in blk:
        # downsample shortcut: 1x1 conv (stride s) + BN; GEMM fused with conv2's,
        # BN + add + ReLU fused into the same epilogue kernel.
        xs = x[:, ::stride, ::stride, :]
        cin = xs.shape[-1]
        xs2d = jnp.pad(xs.reshape(-1, cin).astype(jnp.bfloat16),
                       ((0, m_pad - m), (0, 0)))
        wsc = jnp.pad(blk['wsc'], ((0, 0), (0, c_pad - planes))).astype(jnp.bfloat16)
        y2, s2, q2, ysc, ssc, qsc = matmul_stats([(patches, w2d), (xs2d, wsc)],
                                                 tm=tm, m_valid=m)
        out2d = bn_apply(
            [(y2, s2, q2, g2, b2),
             (ysc, ssc, qsc, _pad_vec(blk['gsc'], c_pad), _pad_vec(blk['bsc'], c_pad))],
            relu=True, m_valid=m, tm=tm)
    else:
        # identity shortcut (raw residual)
        y2, s2, q2 = matmul_stats([(patches, w2d)], tm=tm, m_valid=m)
        cin = x.shape[-1]
        res2d = jnp.pad(x.reshape(-1, cin).astype(jnp.bfloat16),
                        ((0, m_pad - m), (0, c_pad - cin)))
        out2d = bn_apply([(y2, s2, q2, g2, b2)], res=res2d, relu=True,
                         m_valid=m, tm=tm)

    return out2d[:m].reshape(n, ho, wo, c_pad)[..., :planes]


def resnet_forward(params, x_nchw, strides):
    x = jnp.transpose(x_nchw, (0, 2, 3, 1))  # NCHW (PyTorch) -> NHWC
    out = conv_bn_relu(x, params['conv1_w'], params['bn1_g'], params['bn1_b'],
                       1, relu=True)
    for blk, s in zip(params['blocks'], strides):
        out = basic_block(out, blk, s)
    # avg_pool2d(out, out.shape[2]) == global average pool, then Linear
    return pool_linear(out, params['fc_w'], params['fc_b'])


def init_resnet_params(key, nf=8, num_blocks=(2, 2, 2, 2), num_classes=10):
    def nxt():
        nonlocal key
        key, sub = jax.random.split(key)
        return sub

    p = {
        'conv1_w': jax.random.normal(nxt(), (3, 3, 3, nf), jnp.float32) * 0.1,
        'bn1_g': jnp.ones((nf,), jnp.float32),
        'bn1_b': jnp.zeros((nf,), jnp.float32),
    }
    blocks, strides = [], []
    in_planes = nf
    for li, (mult, stride0) in enumerate(zip((1, 2, 4, 8), (1, 2, 2, 2))):
        planes = nf * mult
        layer_strides = [stride0] + [1] * (num_blocks[li] - 1)
        for s in layer_strides:
            blk = {
                'w1': jax.random.normal(nxt(), (3, 3, in_planes, planes),
                                        jnp.float32) * 0.1,
                'g1': jnp.ones((planes,), jnp.float32),
                'b1': jnp.zeros((planes,), jnp.float32),
                'w2': jax.random.normal(nxt(), (3, 3, planes, planes),
                                        jnp.float32) * 0.1,
                'g2': jnp.ones((planes,), jnp.float32),
                'b2': jnp.zeros((planes,), jnp.float32),
            }
            if s != 1 or in_planes != planes:
                blk['wsc'] = jax.random.normal(nxt(), (in_planes, planes),
                                               jnp.float32) * 0.1
                blk['gsc'] = jnp.ones((planes,), jnp.float32)
                blk['bsc'] = jnp.zeros((planes,), jnp.float32)
            blocks.append(blk)
            strides.append(s)
            in_planes = planes
    p['blocks'] = blocks
    p['fc_w'] = jax.random.normal(nxt(), (nf * 8, num_classes), jnp.float32) * 0.1
    p['fc_b'] = jnp.zeros((num_classes,), jnp.float32)
    return p, tuple(strides)


if __name__ == "__main__":
    key = jax.random.PRNGKey(0)
    pkey, xkey = jax.random.split(key)
    NF, NUM_CLASSES = 8, 10
    params, strides = init_resnet_params(pkey, nf=NF, num_blocks=(2, 2, 2, 2),
                                         num_classes=NUM_CLASSES)
    # small CIFAR-like input, NCHW as PyTorch would feed it
    x = jax.random.normal(xkey, (2, 3, 16, 16), jnp.float32)
    forward = jax.jit(functools.partial(resnet_forward, strides=strides))
    logits = forward(params, x)
    jax.block_until_ready(logits)
    assert logits.shape == (2, NUM_CLASSES)
    assert bool(jnp.all(jnp.isfinite(logits)))
    print("KERNEL_OK")
</pallas_src>

<mosaic_0001>
module attributes {stable_mosaic.version = 11 : i64} {
  func.func @_matmul_stats_kernel(%arg0: i32, %arg1: memref<512x27xbf16, #tpu.memory_space<vmem>>, %arg2: memref<27x128xbf16, #tpu.memory_space<vmem>>, %arg3: memref<512x128xbf16, #tpu.memory_space<vmem>>, %arg4: memref<1x128xf32, #tpu.memory_space<vmem>>, %arg5: memref<1x128xf32, #tpu.memory_space<vmem>>, %arg6: memref<1x128xf32, #tpu.memory_space<vmem>>, %arg7: memref<1x128xf32, #tpu.memory_space<vmem>>) attributes {dimension_semantics = [#tpu.dimension_semantics<arbitrary>], iteration_bounds = array<i64: 1>, scalar_prefetch = 0 : i64, scratch_operands = 2 : i64, tpu.core_type = #tpu.core_type<tc>, window_params = [{transform_indices = @transform_0, window_bounds = array<i64: 512, 27>}, {pipeline_mode = #tpu.pipeline_mode<synchronous>, transform_indices = @transform_1, window_bounds = array<i64: 27, 128>}, {transform_indices = @transform_2, window_bounds = array<i64: 512, 128>}, {pipeline_mode = #tpu.pipeline_mode<synchronous>, transform_indices = @transform_3, window_bounds = array<i64: 1, 128>}, {pipeline_mode = #tpu.pipeline_mode<synchronous>, transform_indices = @transform_4, window_bounds = array<i64: 1, 128>}]} {
    %c0_i32 = arith.constant 0 : i32
    %0 = arith.cmpi eq, %arg0, %c0_i32 : i32
    %1 = arith.extui %0 : i1 to i32
    %c0_i32_0 = arith.constant 0 : i32
    %2 = arith.cmpi ne, %1, %c0_i32_0 : i32
    scf.if %2 {
      %cst_18 = arith.constant 0.000000e+00 : f32
      %22 = vector.broadcast %cst_18 : f32 to vector<1x128xf32>
      %c0_19 = arith.constant 0 : index
      %c0_20 = arith.constant 0 : index
      %23 = vector.load %arg6[%c0_19, %c0_20] : memref<1x128xf32, #tpu.memory_space<vmem>>, vector<1x128xf32>
      tpu.vector_store %arg6[%c0_19, %c0_20], %22 {strides = array<i32>} : memref<1x128xf32, #tpu.memory_space<vmem>>, vector<1x128xf32>,
      %cst_21 = arith.constant 0.000000e+00 : f32
      %24 = vector.broadcast %cst_21 : f32 to vector<1x128xf32>
      %c0_22 = arith.constant 0 : index
      %c0_23 = arith.constant 0 : index
      %25 = vector.load %arg7[%c0_22, %c0_23] : memref<1x128xf32, #tpu.memory_space<vmem>>, vector<1x128xf32>
      tpu.vector_store %arg7[%c0_22, %c0_23], %24 {strides = array<i32>} : memref<1x128xf32, #tpu.memory_space<vmem>>, vector<1x128xf32>,
    } else {
    }
    %c0 = arith.constant 0 : index
    %c0_1 = arith.constant 0 : index
    %3 = vector.load %arg1[%c0, %c0_1] : memref<512x27xbf16, #tpu.memory_space<vmem>>, vector<512x27xbf16>
    %c0_2 = arith.constant 0 : index
    %c0_3 = arith.constant 0 : index
    %4 = vector.load %arg2[%c0_2, %c0_3] : memref<27x128xbf16, #tpu.memory_space<vmem>>, vector<27x128xbf16>
    %cst = arith.constant dense<0.000000e+00> : vector<512x128xf32>
    %5 = tpu.matmul %3, %4, %cst {dimension_numbers = #tpu.dot_dimension_numbers<[1], [0], [0], [1], [0, 0, 1, 1], [], []>} : vector<512x27xbf16>, vector<27x128xbf16>, vector<512x128xf32> -> vector<512x128xf32>
    %6 = arith.truncf %5 : vector<512x128xf32> to vector<512x128xbf16>
    %c0_4 = arith.constant 0 : index
    %c0_5 = arith.constant 0 : index
    %7 = vector.load %arg3[%c0_4, %c0_5] : memref<512x128xbf16, #tpu.memory_space<vmem>>, vector<512x128xbf16>
    tpu.vector_store %arg3[%c0_4, %c0_5], %6 {strides = array<i32>} : memref<512x128xbf16, #tpu.memory_space<vmem>>, vector<512x128xbf16>,
    %c0_6 = arith.constant 0 : index
    %c0_7 = arith.constant 0 : index
    %8 = vector.load %arg6[%c0_6, %c0_7] : memref<1x128xf32, #tpu.memory_space<vmem>>, vector<1x128xf32>
    %cst_8 = arith.constant dense<0.000000e+00> : vector<128xf32>
    %9 = vector.multi_reduction <add>, %5, %cst_8 [0] : vector<512x128xf32> to vector<128xf32>
    %10 = vector.shape_cast %9 : vector<128xf32> to vector<1x128xf32>
    %11 = arith.addf %8, %10 : vector<1x128xf32>
    %c0_9 = arith.constant 0 : index
    %c0_10 = arith.constant 0 : index
    %12 = vector.load %arg6[%c0_9, %c0_10] : memref<1x128xf32, #tpu.memory_space<vmem>>, vector<1x128xf32>
    tpu.vector_store %arg6[%c0_9, %c0_10], %11 {strides = array<i32>} : memref<1x128xf32, #tpu.memory_space<vmem>>, vector<1x128xf32>,
    %c0_11 = arith.constant 0 : index
    %c0_12 = arith.constant 0 : index
    %13 = vector.load %arg7[%c0_11, %c0_12] : memref<1x128xf32, #tpu.memory_space<vmem>>, vector<1x128xf32>
    %14 = arith.mulf %5, %5 : vector<512x128xf32>
    %cst_13 = arith.constant dense<0.000000e+00> : vector<128xf32>
    %15 = vector.multi_reduction <add>, %14, %cst_13 [0] : vector<512x128xf32> to vector<128xf32>
    %16 = vector.shape_cast %15 : vector<128xf32> to vector<1x128xf32>
    %17 = arith.addf %13, %16 : vector<1x128xf32>
    %c0_14 = arith.constant 0 : index
    %c0_15 = arith.constant 0 : index
    %18 = vector.load %arg7[%c0_14, %c0_15] : memref<1x128xf32, #tpu.memory_space<vmem>>, vector<1x128xf32>
    tpu.vector_store %arg7[%c0_14, %c0_15], %17 {strides = array<i32>} : memref<1x128xf32, #tpu.memory_space<vmem>>, vector<1x128xf32>,
    %c0_i32_16 = arith.constant 0 : i32
    %19 = arith.cmpi eq, %arg0, %c0_i32_16 : i32
    %20 = arith.extui %19 : i1 to i32
    %c0_i32_17 = arith.constant 0 : i32
    %21 = arith.cmpi ne, %20, %c0_i32_17 : i32
    scf.if %21 {
      %c0_18 = arith.constant 0 : index
      %c0_19 = arith.constant 0 : index
      %22 = vector.load %arg6[%c0_18, %c0_19] : memref<1x128xf32, #tpu.memory_space<vmem>>, vector<1x128xf32>
      %c0_20 = arith.constant 0 : index
      %c0_21 = arith.constant 0 : index
      %23 = vector.load %arg4[%c0_20, %c0_21] : memref<1x128xf32, #tpu.memory_space<vmem>>, vector<1x128xf32>
      tpu.vector_store %arg4[%c0_20, %c0_21], %22 {strides = array<i32>} : memref<1x128xf32, #tpu.memory_space<vmem>>, vector<1x128xf32>,
      %c0_22 = arith.constant 0 : index
      %c0_23 = arith.constant 0 : index
      %24 = vector.load %arg7[%c0_22, %c0_23] : memref<1x128xf32, #tpu.memory_space<vmem>>, vector<1x128xf32>
      %c0_24 = arith.constant 0 : index
      %c0_25 = arith.constant 0 : index
      %25 = vector.load %arg5[%c0_24, %c0_25] : memref<1x128xf32, #tpu.memory_space<vmem>>, vector<1x128xf32>
      tpu.vector_store %arg5[%c0_24, %c0_25], %24 {strides = array<i32>} : memref<1x128xf32, #tpu.memory_space<vmem>>, vector<1x128xf32>,
    } else {
    }
    return
  }
  func.func @transform_0(%arg0: i32) -> (i32, i32) {
    %c0_i32 = arith.constant 0 : i32
    %c0_i32_0 = arith.constant 0 : i32
    return %arg0, %c0_i32 : i32, i32
  }
  func.func @transform_1(%arg0: i32) -> (i32, i32) {
    %c0_i32 = arith.constant 0 : i32
    %c0_i32_0 = arith.constant 0 : i32
    %c0_i32_1 = arith.constant 0 : i32
    return %c0_i32, %c0_i32_0 : i32, i32
  }
  func.func @transform_2(%arg0: i32) -> (i32, i32) {
    %c0_i32 = arith.constant 0 : i32
    %c0_i32_0 = arith.constant 0 : i32
    return %arg0, %c0_i32 : i32, i32
  }
  func.func @transform_3(%arg0: i32) -> (i32, i32) {
    %c0_i32 = arith.constant 0 : i32
    %c0_i32_0 = arith.constant 0 : i32
    %c0_i32_1 = arith.constant 0 : i32
    return %c0_i32, %c0_i32_0 : i32, i32
  }
  func.func @transform_4(%arg0: i32) -> (i32, i32) {
    %c0_i32 = arith.constant 0 : i32
    %c0_i32_0 = arith.constant 0 : i32
    %c0_i32_1 = arith.constant 0 : i32
    return %c0_i32, %c0_i32_0 : i32, i32
  }
}

module attributes {stable_mosaic.version = 11 : i64} {
  func.func @_bn_apply_kernel(%arg0: i32, %arg1: memref<512x128xbf16, #tpu.memory_space<vmem>>, %arg2: memref<1x128xf32, #tpu.memory_space<vmem>>, %arg3: memref<1x128xf32, #tpu.memory_space<vmem>>, %arg4: memref<1x128xf32, #tpu.memory_space<vmem>>, %arg5: memref<1x128xf32, #tpu.memory_space<vmem>>, %arg6: memref<512x128xbf16, #tpu.memory_space<vmem>>) attributes {dimension_semantics = [#tpu.dimension_semantics<parallel>], iteration_bounds = array<i64: 1>, scalar_prefetch = 0 : i64, scratch_operands = 0 : i64, tpu.core_type = #tpu.core_type<tc>, window_params = [{transform_indices = @transform_0, window_bounds = array<i64: 512, 128>}, {pipeline_mode = #tpu.pipeline_mode<synchronous>, transform_indices = @transform_1, window_bounds = array<i64: 1, 128>}, {pipeline_mode = #tpu.pipeline_mode<synchronous>, transform_indices = @transform_2, window_bounds = array<i64: 1, 128>}, {pipeline_mode = #tpu.pipeline_mode<synchronous>, transform_indices = @transform_3, window_bounds = array<i64: 1, 128>}, {pipeline_mode = #tpu.pipeline_mode<synchronous>, transform_indices = @transform_4, window_bounds = array<i64: 1, 128>}, {transform_indices = @transform_5, window_bounds = array<i64: 512, 128>}]} {
    %c0 = arith.constant 0 : index
    %c0_0 = arith.constant 0 : index
    %0 = vector.load %arg2[%c0, %c0_0] : memref<1x128xf32, #tpu.memory_space<vmem>>, vector<1x128xf32>
    %cst = arith.constant 0.001953125 : f32
    %1 = vector.broadcast %cst : f32 to vector<1x128xf32>
    %2 = arith.mulf %0, %1 : vector<1x128xf32>
    %c0_1 = arith.constant 0 : index
    %c0_2 = arith.constant 0 : index
    %3 = vector.load %arg3[%c0_1, %c0_2] : memref<1x128xf32, #tpu.memory_space<vmem>>, vector<1x128xf32>
    %cst_3 = arith.constant 0.001953125 : f32
    %4 = vector.broadcast %cst_3 : f32 to vector<1x128xf32>
    %5 = arith.mulf %3, %4 : vector<1x128xf32>
    %6 = arith.mulf %2, %2 : vector<1x128xf32>
    %7 = arith.subf %5, %6 : vector<1x128xf32>
    %cst_4 = arith.constant 0.000000e+00 : f32
    %8 = vector.broadcast %cst_4 : f32 to vector<1x128xf32>
    %9 = arith.maximumf %7, %8 : vector<1x128xf32>
    %cst_5 = arith.constant 9.99999974E-6 : f32
    %10 = vector.broadcast %cst_5 : f32 to vector<1x128xf32>
    %11 = arith.addf %9, %10 : vector<1x128xf32>
    %12 = math.rsqrt %11 : vector<1x128xf32>
    %c0_6 = arith.constant 0 : index
    %c0_7 = arith.constant 0 : index
    %13 = vector.load %arg4[%c0_6, %c0_7] : memref<1x128xf32, #tpu.memory_space<vmem>>, vector<1x128xf32>
    %14 = arith.mulf %12, %13 : vector<1x128xf32>
    %c0_8 = arith.constant 0 : index
    %c0_9 = arith.constant 0 : index
    %15 = vector.load %arg5[%c0_8, %c0_9] : memref<1x128xf32, #tpu.memory_space<vmem>>, vector<1x128xf32>
    %16 = arith.mulf %2, %14 : vector<1x128xf32>
    %17 = arith.subf %15, %16 : vector<1x128xf32>
    %c0_10 = arith.constant 0 : index
    %c0_11 = arith.constant 0 : index
    %18 = vector.load %arg1[%c0_10, %c0_11] : memref<512x128xbf16, #tpu.memory_space<vmem>>, vector<512x128xbf16>
    %19 = arith.extf %18 : vector<512x128xbf16> to vector<512x128xf32>
    %20 = vector.broadcast %14 : vector<1x128xf32> to vector<512x128xf32>
    %21 = arith.mulf %19, %20 : vector<512x128xf32>
    %22 = vector.broadcast %17 : vector<1x128xf32> to vector<512x128xf32>
    %23 = arith.addf %21, %22 : vector<512x128xf32>
    %cst_12 = arith.constant 0.000000e+00 : f32
    %24 = vector.broadcast %cst_12 : f32 to vector<512x128xf32>
    %25 = arith.maximumf %23, %24 : vector<512x128xf32>
    %26 = arith.truncf %25 : vector<512x128xf32> to vector<512x128xbf16>
    %c0_13 = arith.constant 0 : index
    %c0_14 = arith.constant 0 : index
    %27 = vector.load %arg6[%c0_13, %c0_14] : memref<512x128xbf16, #tpu.memory_space<vmem>>, vector<512x128xbf16>
    tpu.vector_store %arg6[%c0_13, %c0_14], %26 {strides = array<i32>} : memref<512x128xbf16, #tpu.memory_space<vmem>>, vector<512x128xbf16>,
    return
  }
  func.func @transform_0(%arg0: i32) -> (i32, i32) {
    %c0_i32 = arith.constant 0 : i32
    %c0_i32_0 = arith.constant 0 : i32
    return %arg0, %c0_i32 : i32, i32
  }
  func.func @transform_1(%arg0: i32) -> (i32, i32) {
    %c0_i32 = arith.constant 0 : i32
    %c0_i32_0 = arith.constant 0 : i32
    %c0_i32_1 = arith.constant 0 : i32
    return %c0_i32, %c0_i32_0 : i32, i32
  }
  func.func @transform_2(%arg0: i32) -> (i32, i32) {
    %c0_i32 = arith.constant 0 : i32
    %c0_i32_0 = arith.constant 0 : i32
    %c0_i32_1 = arith.constant 0 : i32
    return %c0_i32, %c0_i32_0 : i32, i32
  }
  func.func @transform_3(%arg0: i32) -> (i32, i32) {
    %c0_i32 = arith.constant 0 : i32
    %c0_i32_0 = arith.constant 0 : i32
    %c0_i32_1 = arith.constant 0 : i32
    return %c0_i32, %c0_i32_0 : i32, i32
  }
  func.func @transform_4(%arg0: i32) -> (i32, i32) {
    %c0_i32 = arith.constant 0 : i32
    %c0_i32_0 = arith.constant 0 : i32
    %c0_i32_1 = arith.constant 0 : i32
    return %c0_i32, %c0_i32_0 : i32, i32
  }
  func.func @transform_5(%arg0: i32) -> (i32, i32) {
    %c0_i32 = arith.constant 0 : i32
    %c0_i32_0 = arith.constant 0 : i32
    return %arg0, %c0_i32 : i32, i32
  }
}

module attributes {stable_mosaic.version = 11 : i64} {
  func.func @_matmul_stats_kernel(%arg0: i32, %arg1: memref<512x72xbf16, #tpu.memory_space<vmem>>, %arg2: memref<72x128xbf16, #tpu.memory_space<vmem>>, %arg3: memref<512x128xbf16, #tpu.memory_space<vmem>>, %arg4: memref<1x128xf32, #tpu.memory_space<vmem>>, %arg5: memref<1x128xf32, #tpu.memory_space<vmem>>, %arg6: memref<1x128xf32, #tpu.memory_space<vmem>>, %arg7: memref<1x128xf32, #tpu.memory_space<vmem>>) attributes {dimension_semantics = [#tpu.dimension_semantics<arbitrary>], iteration_bounds = array<i64: 1>, scalar_prefetch = 0 : i64, scratch_operands = 2 : i64, tpu.core_type = #tpu.core_type<tc>, window_params = [{transform_indices = @transform_0, window_bounds = array<i64: 512, 72>}, {pipeline_mode = #tpu.pipeline_mode<synchronous>, transform_indices = @transform_1, window_bounds = array<i64: 72, 128>}, {transform_indices = @transform_2, window_bounds = array<i64: 512, 128>}, {pipeline_mode = #tpu.pipeline_mode<synchronous>, transform_indices = @transform_3, window_bounds = array<i64: 1, 128>}, {pipeline_mode = #tpu.pipeline_mode<synchronous>, transform_indices = @transform_4, window_bounds = array<i64: 1, 128>}]} {
    %c0_i32 = arith.constant 0 : i32
    %0 = arith.cmpi eq, %arg0, %c0_i32 : i32
    %1 = arith.extui %0 : i1 to i32
    %c0_i32_0 = arith.constant 0 : i32
    %2 = arith.cmpi ne, %1, %c0_i32_0 : i32
    scf.if %2 {
      %cst_18 = arith.constant 0.000000e+00 : f32
      %22 = vector.broadcast %cst_18 : f32 to vector<1x128xf32>
      %c0_19 = arith.constant 0 : index
      %c0_20 = arith.constant 0 : index
      %23 = vector.load %arg6[%c0_19, %c0_20] : memref<1x128xf32, #tpu.memory_space<vmem>>, vector<1x128xf32>
      tpu.vector_store %arg6[%c0_19, %c0_20], %22 {strides = array<i32>} : memref<1x128xf32, #tpu.memory_space<vmem>>, vector<1x128xf32>,
      %cst_21 = arith.constant 0.000000e+00 : f32
      %24 = vector.broadcast %cst_21 : f32 to vector<1x128xf32>
      %c0_22 = arith.constant 0 : index
      %c0_23 = arith.constant 0 : index
      %25 = vector.load %arg7[%c0_22, %c0_23] : memref<1x128xf32, #tpu.memory_space<vmem>>, vector<1x128xf32>
      tpu.vector_store %arg7[%c0_22, %c0_23], %24 {strides = array<i32>} : memref<1x128xf32, #tpu.memory_space<vmem>>, vector<1x128xf32>,
    } else {
    }
    %c0 = arith.constant 0 : index
    %c0_1 = arith.constant 0 : index
    %3 = vector.load %arg1[%c0, %c0_1] : memref<512x72xbf16, #tpu.memory_space<vmem>>, vector<512x72xbf16>
    %c0_2 = arith.constant 0 : index
    %c0_3 = arith.constant 0 : index
    %4 = vector.load %arg2[%c0_2, %c0_3] : memref<72x128xbf16, #tpu.memory_space<vmem>>, vector<72x128xbf16>
    %cst = arith.constant dense<0.000000e+00> : vector<512x128xf32>
    %5 = tpu.matmul %3, %4, %cst {dimension_numbers = #tpu.dot_dimension_numbers<[1], [0], [0], [1], [0, 0, 1, 1], [], []>} : vector<512x72xbf16>, vector<72x128xbf16>, vector<512x128xf32> -> vector<512x128xf32>
    %6 = arith.truncf %5 : vector<512x128xf32> to vector<512x128xbf16>
    %c0_4 = arith.constant 0 : index
    %c0_5 = arith.constant 0 : index
    %7 = vector.load %arg3[%c0_4, %c0_5] : memref<512x128xbf16, #tpu.memory_space<vmem>>, vector<512x128xbf16>
    tpu.vector_store %arg3[%c0_4, %c0_5], %6 {strides = array<i32>} : memref<512x128xbf16, #tpu.memory_space<vmem>>, vector<512x128xbf16>,
    %c0_6 = arith.constant 0 : index
    %c0_7 = arith.constant 0 : index
    %8 = vector.load %arg6[%c0_6, %c0_7] : memref<1x128xf32, #tpu.memory_space<vmem>>, vector<1x128xf32>
    %cst_8 = arith.constant dense<0.000000e+00> : vector<128xf32>
    %9 = vector.multi_reduction <add>, %5, %cst_8 [0] : vector<512x128xf32> to vector<128xf32>
    %10 = vector.shape_cast %9 : vector<128xf32> to vector<1x128xf32>
    %11 = arith.addf %8, %10 : vector<1x128xf32>
    %c0_9 = arith.constant 0 : index
    %c0_10 = arith.constant 0 : index
    %12 = vector.load %arg6[%c0_9, %c0_10] : memref<1x128xf32, #tpu.memory_space<vmem>>, vector<1x128xf32>
    tpu.vector_store %arg6[%c0_9, %c0_10], %11 {strides = array<i32>} : memref<1x128xf32, #tpu.memory_space<vmem>>, vector<1x128xf32>,
    %c0_11 = arith.constant 0 : index
    %c0_12 = arith.constant 0 : index
    %13 = vector.load %arg7[%c0_11, %c0_12] : memref<1x128xf32, #tpu.memory_space<vmem>>, vector<1x128xf32>
    %14 = arith.mulf %5, %5 : vector<512x128xf32>
    %cst_13 = arith.constant dense<0.000000e+00> : vector<128xf32>
    %15 = vector.multi_reduction <add>, %14, %cst_13 [0] : vector<512x128xf32> to vector<128xf32>
    %16 = vector.shape_cast %15 : vector<128xf32> to vector<1x128xf32>
    %17 = arith.addf %13, %16 : vector<1x128xf32>
    %c0_14 = arith.constant 0 : index
    %c0_15 = arith.constant 0 : index
    %18 = vector.load %arg7[%c0_14, %c0_15] : memref<1x128xf32, #tpu.memory_space<vmem>>, vector<1x128xf32>
    tpu.vector_store %arg7[%c0_14, %c0_15], %17 {strides = array<i32>} : memref<1x128xf32, #tpu.memory_space<vmem>>, vector<1x128xf32>,
    %c0_i32_16 = arith.constant 0 : i32
    %19 = arith.cmpi eq, %arg0, %c0_i32_16 : i32
    %20 = arith.extui %19 : i1 to i32
    %c0_i32_17 = arith.constant 0 : i32
    %21 = arith.cmpi ne, %20, %c0_i32_17 : i32
    scf.if %21 {
      %c0_18 = arith.constant 0 : index
      %c0_19 = arith.constant 0 : index
      %22 = vector.load %arg6[%c0_18, %c0_19] : memref<1x128xf32, #tpu.memory_space<vmem>>, vector<1x128xf32>
      %c0_20 = arith.constant 0 : index
      %c0_21 = arith.constant 0 : index
      %23 = vector.load %arg4[%c0_20, %c0_21] : memref<1x128xf32, #tpu.memory_space<vmem>>, vector<1x128xf32>
      tpu.vector_store %arg4[%c0_20, %c0_21], %22 {strides = array<i32>} : memref<1x128xf32, #tpu.memory_space<vmem>>, vector<1x128xf32>,
      %c0_22 = arith.constant 0 : index
      %c0_23 = arith.constant 0 : index
      %24 = vector.load %arg7[%c0_22, %c0_23] : memref<1x128xf32, #tpu.memory_space<vmem>>, vector<1x128xf32>
      %c0_24 = arith.constant 0 : index
      %c0_25 = arith.constant 0 : index
      %25 = vector.load %arg5[%c0_24, %c0_25] : memref<1x128xf32, #tpu.memory_space<vmem>>, vector<1x128xf32>
      tpu.vector_store %arg5[%c0_24, %c0_25], %24 {strides = array<i32>} : memref<1x128xf32, #tpu.memory_space<vmem>>, vector<1x128xf32>,
    } else {
    }
    return
  }
  func.func @transform_0(%arg0: i32) -> (i32, i32) {
    %c0_i32 = arith.constant 0 : i32
    %c0_i32_0 = arith.constant 0 : i32
    return %arg0, %c0_i32 : i32, i32
  }
  func.func @transform_1(%arg0: i32) -> (i32, i32) {
    %c0_i32 = arith.constant 0 : i32
    %c0_i32_0 = arith.constant 0 : i32
    %c0_i32_1 = arith.constant 0 : i32
    return %c0_i32, %c0_i32_0 : i32, i32
  }
  func.func @transform_2(%arg0: i32) -> (i32, i32) {
    %c0_i32 = arith.constant 0 : i32
    %c0_i32_0 = arith.constant 0 : i32
    return %arg0, %c0_i32 : i32, i32
  }
  func.func @transform_3(%arg0: i32) -> (i32, i32) {
    %c0_i32 = arith.constant 0 : i32
    %c0_i32_0 = arith.constant 0 : i32
    %c0_i32_1 = arith.constant 0 : i32
    return %c0_i32, %c0_i32_0 : i32, i32
  }
  func.func @transform_4(%arg0: i32) -> (i32, i32) {
    %c0_i32 = arith.constant 0 : i32
    %c0_i32_0 = arith.constant 0 : i32
    %c0_i32_1 = arith.constant 0 : i32
    return %c0_i32, %c0_i32_0 : i32, i32
  }
}

module attributes {stable_mosaic.version = 11 : i64} {
  func.func @_bn_apply_kernel(%arg0: i32, %arg1: memref<512x128xbf16, #tpu.memory_space<vmem>>, %arg2: memref<1x128xf32, #tpu.memory_space<vmem>>, %arg3: memref<1x128xf32, #tpu.memory_space<vmem>>, %arg4: memref<1x128xf32, #tpu.memory_space<vmem>>, %arg5: memref<1x128xf32, #tpu.memory_space<vmem>>, %arg6: memref<512x128xbf16, #tpu.memory_space<vmem>>, %arg7: memref<512x128xbf16, #tpu.memory_space<vmem>>) attributes {dimension_semantics = [#tpu.dimension_semantics<parallel>], iteration_bounds = array<i64: 1>, scalar_prefetch = 0 : i64, scratch_operands = 0 : i64, tpu.core_type = #tpu.core_type<tc>, window_params = [{transform_indices = @transform_0, window_bounds = array<i64: 512, 128>}, {pipeline_mode = #tpu.pipeline_mode<synchronous>, transform_indices = @transform_1, window_bounds = array<i64: 1, 128>}, {pipeline_mode = #tpu.pipeline_mode<synchronous>, transform_indices = @transform_2, window_bounds = array<i64: 1, 128>}, {pipeline_mode = #tpu.pipeline_mode<synchronous>, transform_indices = @transform_3, window_bounds = array<i64: 1, 128>}, {pipeline_mode = #tpu.pipeline_mode<synchronous>, transform_indices = @transform_4, window_bounds = array<i64: 1, 128>}, {transform_indices = @transform_5, window_bounds = array<i64: 512, 128>}, {transform_indices = @transform_6, window_bounds = array<i64: 512, 128>}]} {
    %c0 = arith.constant 0 : index
    %c0_0 = arith.constant 0 : index
    %0 = vector.load %arg2[%c0, %c0_0] : memref<1x128xf32, #tpu.memory_space<vmem>>, vector<1x128xf32>
    %cst = arith.constant 0.001953125 : f32
    %1 = vector.broadcast %cst : f32 to vector<1x128xf32>
    %2 = arith.mulf %0, %1 : vector<1x128xf32>
    %c0_1 = arith.constant 0 : index
    %c0_2 = arith.constant 0 : index
    %3 = vector.load %arg3[%c0_1, %c0_2] : memref<1x128xf32, #tpu.memory_space<vmem>>, vector<1x128xf32>
    %cst_3 = arith.constant 0.001953125 : f32
    %4 = vector.broadcast %cst_3 : f32 to vector<1x128xf32>
    %5 = arith.mulf %3, %4 : vector<1x128xf32>
    %6 = arith.mulf %2, %2 : vector<1x128xf32>
    %7 = arith.subf %5, %6 : vector<1x128xf32>
    %cst_4 = arith.constant 0.000000e+00 : f32
    %8 = vector.broadcast %cst_4 : f32 to vector<1x128xf32>
    %9 = arith.maximumf %7, %8 : vector<1x128xf32>
    %cst_5 = arith.constant 9.99999974E-6 : f32
    %10 = vector.broadcast %cst_5 : f32 to vector<1x128xf32>
    %11 = arith.addf %9, %10 : vector<1x128xf32>
    %12 = math.rsqrt %11 : vector<1x128xf32>
    %c0_6 = arith.constant 0 : index
    %c0_7 = arith.constant 0 : index
    %13 = vector.load %arg4[%c0_6, %c0_7] : memref<1x128xf32, #tpu.memory_space<vmem>>, vector<1x128xf32>
    %14 = arith.mulf %12, %13 : vector<1x128xf32>
    %c0_8 = arith.constant 0 : index
    %c0_9 = arith.constant 0 : index
    %15 = vector.load %arg5[%c0_8, %c0_9] : memref<1x128xf32, #tpu.memory_space<vmem>>, vector<1x128xf32>
    %16 = arith.mulf %2, %14 : vector<1x128xf32>
    %17 = arith.subf %15, %16 : vector<1x128xf32>
    %c0_10 = arith.constant 0 : index
    %c0_11 = arith.constant 0 : index
    %18 = vector.load %arg1[%c0_10, %c0_11] : memref<512x128xbf16, #tpu.memory_space<vmem>>, vector<512x128xbf16>
    %19 = arith.extf %18 : vector<512x128xbf16> to vector<512x128xf32>
    %20 = vector.broadcast %14 : vector<1x128xf32> to vector<512x128xf32>
    %21 = arith.mulf %19, %20 : vector<512x128xf32>
    %22 = vector.broadcast %17 : vector<1x128xf32> to vector<512x128xf32>
    %23 = arith.addf %21, %22 : vector<512x128xf32>
    %c0_12 = arith.constant 0 : index
    %c0_13 = arith.constant 0 : index
    %24 = vector.load %arg6[%c0_12, %c0_13] : memref<512x128xbf16, #tpu.memory_space<vmem>>, vector<512x128xbf16>
    %25 = arith.extf %24 : vector<512x128xbf16> to vector<512x128xf32>
    %26 = arith.addf %23, %25 : vector<512x128xf32>
    %cst_14 = arith.constant 0.000000e+00 : f32
    %27 = vector.broadcast %cst_14 : f32 to vector<512x128xf32>
    %28 = arith.maximumf %26, %27 : vector<512x128xf32>
    %29 = arith.truncf %28 : vector<512x128xf32> to vector<512x128xbf16>
    %c0_15 = arith.constant 0 : index
    %c0_16 = arith.constant 0 : index
    %30 = vector.load %arg7[%c0_15, %c0_16] : memref<512x128xbf16, #tpu.memory_space<vmem>>, vector<512x128xbf16>
    tpu.vector_store %arg7[%c0_15, %c0_16], %29 {strides = array<i32>} : memref<512x128xbf16, #tpu.memory_space<vmem>>, vector<512x128xbf16>,
    return
  }
  func.func @transform_0(%arg0: i32) -> (i32, i32) {
    %c0_i32 = arith.constant 0 : i32
    %c0_i32_0 = arith.constant 0 : i32
    return %arg0, %c0_i32 : i32, i32
  }
  func.func @transform_1(%arg0: i32) -> (i32, i32) {
    %c0_i32 = arith.constant 0 : i32
    %c0_i32_0 = arith.constant 0 : i32
    %c0_i32_1 = arith.constant 0 : i32
    return %c0_i32, %c0_i32_0 : i32, i32
  }
  func.func @transform_2(%arg0: i32) -> (i32, i32) {
    %c0_i32 = arith.constant 0 : i32
    %c0_i32_0 = arith.constant 0 : i32
    %c0_i32_1 = arith.constant 0 : i32
    return %c0_i32, %c0_i32_0 : i32, i32
  }
  func.func @transform_3(%arg0: i32) -> (i32, i32) {
    %c0_i32 = arith.constant 0 : i32
    %c0_i32_0 = arith.constant 0 : i32
    %c0_i32_1 = arith.constant 0 : i32
    return %c0_i32, %c0_i32_0 : i32, i32
  }
  func.func @transform_4(%arg0: i32) -> (i32, i32) {
    %c0_i32 = arith.constant 0 : i32
    %c0_i32_0 = arith.constant 0 : i32
    %c0_i32_1 = arith.constant 0 : i32
    return %c0_i32, %c0_i32_0 : i32, i32
  }
  func.func @transform_5(%arg0: i32) -> (i32, i32) {
    %c0_i32 = arith.constant 0 : i32
    %c0_i32_0 = arith.constant 0 : i32
    return %arg0, %c0_i32 : i32, i32
  }
  func.func @transform_6(%arg0: i32) -> (i32, i32) {
    %c0_i32 = arith.constant 0 : i32
    %c0_i32_0 = arith.constant 0 : i32
    return %arg0, %c0_i32 : i32, i32
  }
}

module attributes {stable_mosaic.version = 11 : i64} {
  func.func @_matmul_stats_kernel(%arg0: i32, %arg1: memref<128x72xbf16, #tpu.memory_space<vmem>>, %arg2: memref<72x128xbf16, #tpu.memory_space<vmem>>, %arg3: memref<128x128xbf16, #tpu.memory_space<vmem>>, %arg4: memref<1x128xf32, #tpu.memory_space<vmem>>, %arg5: memref<1x128xf32, #tpu.memory_space<vmem>>, %arg6: memref<1x128xf32, #tpu.memory_space<vmem>>, %arg7: memref<1x128xf32, #tpu.memory_space<vmem>>) attributes {dimension_semantics = [#tpu.dimension_semantics<arbitrary>], iteration_bounds = array<i64: 1>, scalar_prefetch = 0 : i64, scratch_operands = 2 : i64, tpu.core_type = #tpu.core_type<tc>, window_params = [{transform_indices = @transform_0, window_bounds = array<i64: 128, 72>}, {pipeline_mode = #tpu.pipeline_mode<synchronous>, transform_indices = @transform_1, window_bounds = array<i64: 72, 128>}, {transform_indices = @transform_2, window_bounds = array<i64: 128, 128>}, {pipeline_mode = #tpu.pipeline_mode<synchronous>, transform_indices = @transform_3, window_bounds = array<i64: 1, 128>}, {pipeline_mode = #tpu.pipeline_mode<synchronous>, transform_indices = @transform_4, window_bounds = array<i64: 1, 128>}]} {
    %c0_i32 = arith.constant 0 : i32
    %0 = arith.cmpi eq, %arg0, %c0_i32 : i32
    %1 = arith.extui %0 : i1 to i32
    %c0_i32_0 = arith.constant 0 : i32
    %2 = arith.cmpi ne, %1, %c0_i32_0 : i32
    scf.if %2 {
      %cst_18 = arith.constant 0.000000e+00 : f32
      %22 = vector.broadcast %cst_18 : f32 to vector<1x128xf32>
      %c0_19 = arith.constant 0 : index
      %c0_20 = arith.constant 0 : index
      %23 = vector.load %arg6[%c0_19, %c0_20] : memref<1x128xf32, #tpu.memory_space<vmem>>, vector<1x128xf32>
      tpu.vector_store %arg6[%c0_19, %c0_20], %22 {strides = array<i32>} : memref<1x128xf32, #tpu.memory_space<vmem>>, vector<1x128xf32>,
      %cst_21 = arith.constant 0.000000e+00 : f32
      %24 = vector.broadcast %cst_21 : f32 to vector<1x128xf32>
      %c0_22 = arith.constant 0 : index
      %c0_23 = arith.constant 0 : index
      %25 = vector.load %arg7[%c0_22, %c0_23] : memref<1x128xf32, #tpu.memory_space<vmem>>, vector<1x128xf32>
      tpu.vector_store %arg7[%c0_22, %c0_23], %24 {strides = array<i32>} : memref<1x128xf32, #tpu.memory_space<vmem>>, vector<1x128xf32>,
    } else {
    }
    %c0 = arith.constant 0 : index
    %c0_1 = arith.constant 0 : index
    %3 = vector.load %arg1[%c0, %c0_1] : memref<128x72xbf16, #tpu.memory_space<vmem>>, vector<128x72xbf16>
    %c0_2 = arith.constant 0 : index
    %c0_3 = arith.constant 0 : index
    %4 = vector.load %arg2[%c0_2, %c0_3] : memref<72x128xbf16, #tpu.memory_space<vmem>>, vector<72x128xbf16>
    %cst = arith.constant dense<0.000000e+00> : vector<128x128xf32>
    %5 = tpu.matmul %3, %4, %cst {dimension_numbers = #tpu.dot_dimension_numbers<[1], [0], [0], [1], [0, 0, 1, 1], [], []>} : vector<128x72xbf16>, vector<72x128xbf16>, vector<128x128xf32> -> vector<128x128xf32>
    %6 = arith.truncf %5 : vector<128x128xf32> to vector<128x128xbf16>
    %c0_4 = arith.constant 0 : index
    %c0_5 = arith.constant 0 : index
    %7 = vector.load %arg3[%c0_4, %c0_5] : memref<128x128xbf16, #tpu.memory_space<vmem>>, vector<128x128xbf16>
    tpu.vector_store %arg3[%c0_4, %c0_5], %6 {strides = array<i32>} : memref<128x128xbf16, #tpu.memory_space<vmem>>, vector<128x128xbf16>,
    %c0_6 = arith.constant 0 : index
    %c0_7 = arith.constant 0 : index
    %8 = vector.load %arg6[%c0_6, %c0_7] : memref<1x128xf32, #tpu.memory_space<vmem>>, vector<1x128xf32>
    %cst_8 = arith.constant dense<0.000000e+00> : vector<128xf32>
    %9 = vector.multi_reduction <add>, %5, %cst_8 [0] : vector<128x128xf32> to vector<128xf32>
    %10 = vector.shape_cast %9 : vector<128xf32> to vector<1x128xf32>
    %11 = arith.addf %8, %10 : vector<1x128xf32>
    %c0_9 = arith.constant 0 : index
    %c0_10 = arith.constant 0 : index
    %12 = vector.load %arg6[%c0_9, %c0_10] : memref<1x128xf32, #tpu.memory_space<vmem>>, vector<1x128xf32>
    tpu.vector_store %arg6[%c0_9, %c0_10], %11 {strides = array<i32>} : memref<1x128xf32, #tpu.memory_space<vmem>>, vector<1x128xf32>,
    %c0_11 = arith.constant 0 : index
    %c0_12 = arith.constant 0 : index
    %13 = vector.load %arg7[%c0_11, %c0_12] : memref<1x128xf32, #tpu.memory_space<vmem>>, vector<1x128xf32>
    %14 = arith.mulf %5, %5 : vector<128x128xf32>
    %cst_13 = arith.constant dense<0.000000e+00> : vector<128xf32>
    %15 = vector.multi_reduction <add>, %14, %cst_13 [0] : vector<128x128xf32> to vector<128xf32>
    %16 = vector.shape_cast %15 : vector<128xf32> to vector<1x128xf32>
    %17 = arith.addf %13, %16 : vector<1x128xf32>
    %c0_14 = arith.constant 0 : index
    %c0_15 = arith.constant 0 : index
    %18 = vector.load %arg7[%c0_14, %c0_15] : memref<1x128xf32, #tpu.memory_space<vmem>>, vector<1x128xf32>
    tpu.vector_store %arg7[%c0_14, %c0_15], %17 {strides = array<i32>} : memref<1x128xf32, #tpu.memory_space<vmem>>, vector<1x128xf32>,
    %c0_i32_16 = arith.constant 0 : i32
    %19 = arith.cmpi eq, %arg0, %c0_i32_16 : i32
    %20 = arith.extui %19 : i1 to i32
    %c0_i32_17 = arith.constant 0 : i32
    %21 = arith.cmpi ne, %20, %c0_i32_17 : i32
    scf.if %21 {
      %c0_18 = arith.constant 0 : index
      %c0_19 = arith.constant 0 : index
      %22 = vector.load %arg6[%c0_18, %c0_19] : memref<1x128xf32, #tpu.memory_space<vmem>>, vector<1x128xf32>
      %c0_20 = arith.constant 0 : index
      %c0_21 = arith.constant 0 : index
      %23 = vector.load %arg4[%c0_20, %c0_21] : memref<1x128xf32, #tpu.memory_space<vmem>>, vector<1x128xf32>
      tpu.vector_store %arg4[%c0_20, %c0_21], %22 {strides = array<i32>} : memref<1x128xf32, #tpu.memory_space<vmem>>, vector<1x128xf32>,
      %c0_22 = arith.constant 0 : index
      %c0_23 = arith.constant 0 : index
      %24 = vector.load %arg7[%c0_22, %c0_23] : memref<1x128xf32, #tpu.memory_space<vmem>>, vector<1x128xf32>
      %c0_24 = arith.constant 0 : index
      %c0_25 = arith.constant 0 : index
      %25 = vector.load %arg5[%c0_24, %c0_25] : memref<1x128xf32, #tpu.memory_space<vmem>>, vector<1x128xf32>
      tpu.vector_store %arg5[%c0_24, %c0_25], %24 {strides = array<i32>} : memref<1x128xf32, #tpu.memory_space<vmem>>, vector<1x128xf32>,
    } else {
    }
    return
  }
  func.func @transform_0(%arg0: i32) -> (i32, i32) {
    %c0_i32 = arith.constant 0 : i32
    %c0_i32_0 = arith.constant 0 : i32
    return %arg0, %c0_i32 : i32, i32
  }
  func.func @transform_1(%arg0: i32) -> (i32, i32) {
    %c0_i32 = arith.constant 0 : i32
    %c0_i32_0 = arith.constant 0 : i32
    %c0_i32_1 = arith.constant 0 : i32
    return %c0_i32, %c0_i32_0 : i32, i32
  }
  func.func @transform_2(%arg0: i32) -> (i32, i32) {
    %c0_i32 = arith.constant 0 : i32
    %c0_i32_0 = arith.constant 0 : i32
    return %arg0, %c0_i32 : i32, i32
  }
  func.func @transform_3(%arg0: i32) -> (i32, i32) {
    %c0_i32 = arith.constant 0 : i32
    %c0_i32_0 = arith.constant 0 : i32
    %c0_i32_1 = arith.constant 0 : i32
    return %c0_i32, %c0_i32_0 : i32, i32
  }
  func.func @transform_4(%arg0: i32) -> (i32, i32) {
    %c0_i32 = arith.constant 0 : i32
    %c0_i32_0 = arith.constant 0 : i32
    %c0_i32_1 = arith.constant 0 : i32
    return %c0_i32, %c0_i32_0 : i32, i32
  }
}

module attributes {stable_mosaic.version = 11 : i64} {
  func.func @_bn_apply_kernel(%arg0: i32, %arg1: memref<128x128xbf16, #tpu.memory_space<vmem>>, %arg2: memref<1x128xf32, #tpu.memory_space<vmem>>, %arg3: memref<1x128xf32, #tpu.memory_space<vmem>>, %arg4: memref<1x128xf32, #tpu.memory_space<vmem>>, %arg5: memref<1x128xf32, #tpu.memory_space<vmem>>, %arg6: memref<128x128xbf16, #tpu.memory_space<vmem>>) attributes {dimension_semantics = [#tpu.dimension_semantics<parallel>], iteration_bounds = array<i64: 1>, scalar_prefetch = 0 : i64, scratch_operands = 0 : i64, tpu.core_type = #tpu.core_type<tc>, window_params = [{transform_indices = @transform_0, window_bounds = array<i64: 128, 128>}, {pipeline_mode = #tpu.pipeline_mode<synchronous>, transform_indices = @transform_1, window_bounds = array<i64: 1, 128>}, {pipeline_mode = #tpu.pipeline_mode<synchronous>, transform_indices = @transform_2, window_bounds = array<i64: 1, 128>}, {pipeline_mode = #tpu.pipeline_mode<synchronous>, transform_indices = @transform_3, window_bounds = array<i64: 1, 128>}, {pipeline_mode = #tpu.pipeline_mode<synchronous>, transform_indices = @transform_4, window_bounds = array<i64: 1, 128>}, {transform_indices = @transform_5, window_bounds = array<i64: 128, 128>}]} {
    %c0 = arith.constant 0 : index
    %c0_0 = arith.constant 0 : index
    %0 = vector.load %arg2[%c0, %c0_0] : memref<1x128xf32, #tpu.memory_space<vmem>>, vector<1x128xf32>
    %cst = arith.constant 7.812500e-03 : f32
    %1 = vector.broadcast %cst : f32 to vector<1x128xf32>
    %2 = arith.mulf %0, %1 : vector<1x128xf32>
    %c0_1 = arith.constant 0 : index
    %c0_2 = arith.constant 0 : index
    %3 = vector.load %arg3[%c0_1, %c0_2] : memref<1x128xf32, #tpu.memory_space<vmem>>, vector<1x128xf32>
    %cst_3 = arith.constant 7.812500e-03 : f32
    %4 = vector.broadcast %cst_3 : f32 to vector<1x128xf32>
    %5 = arith.mulf %3, %4 : vector<1x128xf32>
    %6 = arith.mulf %2, %2 : vector<1x128xf32>
    %7 = arith.subf %5, %6 : vector<1x128xf32>
    %cst_4 = arith.constant 0.000000e+00 : f32
    %8 = vector.broadcast %cst_4 : f32 to vector<1x128xf32>
    %9 = arith.maximumf %7, %8 : vector<1x128xf32>
    %cst_5 = arith.constant 9.99999974E-6 : f32
    %10 = vector.broadcast %cst_5 : f32 to vector<1x128xf32>
    %11 = arith.addf %9, %10 : vector<1x128xf32>
    %12 = math.rsqrt %11 : vector<1x128xf32>
    %c0_6 = arith.constant 0 : index
    %c0_7 = arith.constant 0 : index
    %13 = vector.load %arg4[%c0_6, %c0_7] : memref<1x128xf32, #tpu.memory_space<vmem>>, vector<1x128xf32>
    %14 = arith.mulf %12, %13 : vector<1x128xf32>
    %c0_8 = arith.constant 0 : index
    %c0_9 = arith.constant 0 : index
    %15 = vector.load %arg5[%c0_8, %c0_9] : memref<1x128xf32, #tpu.memory_space<vmem>>, vector<1x128xf32>
    %16 = arith.mulf %2, %14 : vector<1x128xf32>
    %17 = arith.subf %15, %16 : vector<1x128xf32>
    %c0_10 = arith.constant 0 : index
    %c0_11 = arith.constant 0 : index
    %18 = vector.load %arg1[%c0_10, %c0_11] : memref<128x128xbf16, #tpu.memory_space<vmem>>, vector<128x128xbf16>
    %19 = arith.extf %18 : vector<128x128xbf16> to vector<128x128xf32>
    %20 = vector.broadcast %14 : vector<1x128xf32> to vector<128x128xf32>
    %21 = arith.mulf %19, %20 : vector<128x128xf32>
    %22 = vector.broadcast %17 : vector<1x128xf32> to vector<128x128xf32>
    %23 = arith.addf %21, %22 : vector<128x128xf32>
    %cst_12 = arith.constant 0.000000e+00 : f32
    %24 = vector.broadcast %cst_12 : f32 to vector<128x128xf32>
    %25 = arith.maximumf %23, %24 : vector<128x128xf32>
    %26 = arith.truncf %25 : vector<128x128xf32> to vector<128x128xbf16>
    %c0_13 = arith.constant 0 : index
    %c0_14 = arith.constant 0 : index
    %27 = vector.load %arg6[%c0_13, %c0_14] : memref<128x128xbf16, #tpu.memory_space<vmem>>, vector<128x128xbf16>
    tpu.vector_store %arg6[%c0_13, %c0_14], %26 {strides = array<i32>} : memref<128x128xbf16, #tpu.memory_space<vmem>>, vector<128x128xbf16>,
    return
  }
  func.func @transform_0(%arg0: i32) -> (i32, i32) {
    %c0_i32 = arith.constant 0 : i32
    %c0_i32_0 = arith.constant 0 : i32
    return %arg0, %c0_i32 : i32, i32
  }
  func.func @transform_1(%arg0: i32) -> (i32, i32) {
    %c0_i32 = arith.constant 0 : i32
    %c0_i32_0 = arith.constant 0 : i32
    %c0_i32_1 = arith.constant 0 : i32
    return %c0_i32, %c0_i32_0 : i32, i32
  }
  func.func @transform_2(%arg0: i32) -> (i32, i32) {
    %c0_i32 = arith.constant 0 : i32
    %c0_i32_0 = arith.constant 0 : i32
    %c0_i32_1 = arith.constant 0 : i32
    return %c0_i32, %c0_i32_0 : i32, i32
  }
  func.func @transform_3(%arg0: i32) -> (i32, i32) {
    %c0_i32 = arith.constant 0 : i32
    %c0_i32_0 = arith.constant 0 : i32
    %c0_i32_1 = arith.constant 0 : i32
    return %c0_i32, %c0_i32_0 : i32, i32
  }
  func.func @transform_4(%arg0: i32) -> (i32, i32) {
    %c0_i32 = arith.constant 0 : i32
    %c0_i32_0 = arith.constant 0 : i32
    %c0_i32_1 = arith.constant 0 : i32
    return %c0_i32, %c0_i32_0 : i32, i32
  }
  func.func @transform_5(%arg0: i32) -> (i32, i32) {
    %c0_i32 = arith.constant 0 : i32
    %c0_i32_0 = arith.constant 0 : i32
    return %arg0, %c0_i32 : i32, i32
  }
}

module attributes {stable_mosaic.version = 11 : i64} {
  func.func @_matmul_stats_kernel(%arg0: i32, %arg1: memref<128x144xbf16, #tpu.memory_space<vmem>>, %arg2: memref<144x128xbf16, #tpu.memory_space<vmem>>, %arg3: memref<128x128xbf16, #tpu.memory_space<vmem>>, %arg4: memref<1x128xf32, #tpu.memory_space<vmem>>, %arg5: memref<1x128xf32, #tpu.memory_space<vmem>>, %arg6: memref<1x128xf32, #tpu.memory_space<vmem>>, %arg7: memref<1x128xf32, #tpu.memory_space<vmem>>) attributes {dimension_semantics = [#tpu.dimension_semantics<arbitrary>], iteration_bounds = array<i64: 1>, scalar_prefetch = 0 : i64, scratch_operands = 2 : i64, tpu.core_type = #tpu.core_type<tc>, window_params = [{transform_indices = @transform_0, window_bounds = array<i64: 128, 144>}, {pipeline_mode = #tpu.pipeline_mode<synchronous>, transform_indices = @transform_1, window_bounds = array<i64: 144, 128>}, {transform_indices = @transform_2, window_bounds = array<i64: 128, 128>}, {pipeline_mode = #tpu.pipeline_mode<synchronous>, transform_indices = @transform_3, window_bounds = array<i64: 1, 128>}, {pipeline_mode = #tpu.pipeline_mode<synchronous>, transform_indices = @transform_4, window_bounds = array<i64: 1, 128>}]} {
    %c0_i32 = arith.constant 0 : i32
    %0 = arith.cmpi eq, %arg0, %c0_i32 : i32
    %1 = arith.extui %0 : i1 to i32
    %c0_i32_0 = arith.constant 0 : i32
    %2 = arith.cmpi ne, %1, %c0_i32_0 : i32
    scf.if %2 {
      %cst_18 = arith.constant 0.000000e+00 : f32
      %22 = vector.broadcast %cst_18 : f32 to vector<1x128xf32>
      %c0_19 = arith.constant 0 : index
      %c0_20 = arith.constant 0 : index
      %23 = vector.load %arg6[%c0_19, %c0_20] : memref<1x128xf32, #tpu.memory_space<vmem>>, vector<1x128xf32>
      tpu.vector_store %arg6[%c0_19, %c0_20], %22 {strides = array<i32>} : memref<1x128xf32, #tpu.memory_space<vmem>>, vector<1x128xf32>,
      %cst_21 = arith.constant 0.000000e+00 : f32
      %24 = vector.broadcast %cst_21 : f32 to vector<1x128xf32>
      %c0_22 = arith.constant 0 : index
      %c0_23 = arith.constant 0 : index
      %25 = vector.load %arg7[%c0_22, %c0_23] : memref<1x128xf32, #tpu.memory_space<vmem>>, vector<1x128xf32>
      tpu.vector_store %arg7[%c0_22, %c0_23], %24 {strides = array<i32>} : memref<1x128xf32, #tpu.memory_space<vmem>>, vector<1x128xf32>,
    } else {
    }
    %c0 = arith.constant 0 : index
    %c0_1 = arith.constant 0 : index
    %3 = vector.load %arg1[%c0, %c0_1] : memref<128x144xbf16, #tpu.memory_space<vmem>>, vector<128x144xbf16>
    %c0_2 = arith.constant 0 : index
    %c0_3 = arith.constant 0 : index
    %4 = vector.load %arg2[%c0_2, %c0_3] : memref<144x128xbf16, #tpu.memory_space<vmem>>, vector<144x128xbf16>
    %cst = arith.constant dense<0.000000e+00> : vector<128x128xf32>
    %5 = tpu.matmul %3, %4, %cst {dimension_numbers = #tpu.dot_dimension_numbers<[1], [0], [0], [1], [0, 0, 1, 1], [], []>} : vector<128x144xbf16>, vector<144x128xbf16>, vector<128x128xf32> -> vector<128x128xf32>
    %6 = arith.truncf %5 : vector<128x128xf32> to vector<128x128xbf16>
    %c0_4 = arith.constant 0 : index
    %c0_5 = arith.constant 0 : index
    %7 = vector.load %arg3[%c0_4, %c0_5] : memref<128x128xbf16, #tpu.memory_space<vmem>>, vector<128x128xbf16>
    tpu.vector_store %arg3[%c0_4, %c0_5], %6 {strides = array<i32>} : memref<128x128xbf16, #tpu.memory_space<vmem>>, vector<128x128xbf16>,
    %c0_6 = arith.constant 0 : index
    %c0_7 = arith.constant 0 : index
    %8 = vector.load %arg6[%c0_6, %c0_7] : memref<1x128xf32, #tpu.memory_space<vmem>>, vector<1x128xf32>
    %cst_8 = arith.constant dense<0.000000e+00> : vector<128xf32>
    %9 = vector.multi_reduction <add>, %5, %cst_8 [0] : vector<128x128xf32> to vector<128xf32>
    %10 = vector.shape_cast %9 : vector<128xf32> to vector<1x128xf32>
    %11 = arith.addf %8, %10 : vector<1x128xf32>
    %c0_9 = arith.constant 0 : index
    %c0_10 = arith.constant 0 : index
    %12 = vector.load %arg6[%c0_9, %c0_10] : memref<1x128xf32, #tpu.memory_space<vmem>>, vector<1x128xf32>
    tpu.vector_store %arg6[%c0_9, %c0_10], %11 {strides = array<i32>} : memref<1x128xf32, #tpu.memory_space<vmem>>, vector<1x128xf32>,
    %c0_11 = arith.constant 0 : index
    %c0_12 = arith.constant 0 : index
    %13 = vector.load %arg7[%c0_11, %c0_12] : memref<1x128xf32, #tpu.memory_space<vmem>>, vector<1x128xf32>
    %14 = arith.mulf %5, %5 : vector<128x128xf32>
    %cst_13 = arith.constant dense<0.000000e+00> : vector<128xf32>
    %15 = vector.multi_reduction <add>, %14, %cst_13 [0] : vector<128x128xf32> to vector<128xf32>
    %16 = vector.shape_cast %15 : vector<128xf32> to vector<1x128xf32>
    %17 = arith.addf %13, %16 : vector<1x128xf32>
    %c0_14 = arith.constant 0 : index
    %c0_15 = arith.constant 0 : index
    %18 = vector.load %arg7[%c0_14, %c0_15] : memref<1x128xf32, #tpu.memory_space<vmem>>, vector<1x128xf32>
    tpu.vector_store %arg7[%c0_14, %c0_15], %17 {strides = array<i32>} : memref<1x128xf32, #tpu.memory_space<vmem>>, vector<1x128xf32>,
    %c0_i32_16 = arith.constant 0 : i32
    %19 = arith.cmpi eq, %arg0, %c0_i32_16 : i32
    %20 = arith.extui %19 : i1 to i32
    %c0_i32_17 = arith.constant 0 : i32
    %21 = arith.cmpi ne, %20, %c0_i32_17 : i32
    scf.if %21 {
      %c0_18 = arith.constant 0 : index
      %c0_19 = arith.constant 0 : index
      %22 = vector.load %arg6[%c0_18, %c0_19] : memref<1x128xf32, #tpu.memory_space<vmem>>, vector<1x128xf32>
      %c0_20 = arith.constant 0 : index
      %c0_21 = arith.constant 0 : index
      %23 = vector.load %arg4[%c0_20, %c0_21] : memref<1x128xf32, #tpu.memory_space<vmem>>, vector<1x128xf32>
      tpu.vector_store %arg4[%c0_20, %c0_21], %22 {strides = array<i32>} : memref<1x128xf32, #tpu.memory_space<vmem>>, vector<1x128xf32>,
      %c0_22 = arith.constant 0 : index
      %c0_23 = arith.constant 0 : index
      %24 = vector.load %arg7[%c0_22, %c0_23] : memref<1x128xf32, #tpu.memory_space<vmem>>, vector<1x128xf32>
      %c0_24 = arith.constant 0 : index
      %c0_25 = arith.constant 0 : index
      %25 = vector.load %arg5[%c0_24, %c0_25] : memref<1x128xf32, #tpu.memory_space<vmem>>, vector<1x128xf32>
      tpu.vector_store %arg5[%c0_24, %c0_25], %24 {strides = array<i32>} : memref<1x128xf32, #tpu.memory_space<vmem>>, vector<1x128xf32>,
    } else {
    }
    return
  }
  func.func @transform_0(%arg0: i32) -> (i32, i32) {
    %c0_i32 = arith.constant 0 : i32
    %c0_i32_0 = arith.constant 0 : i32
    return %arg0, %c0_i32 : i32, i32
  }
  func.func @transform_1(%arg0: i32) -> (i32, i32) {
    %c0_i32 = arith.constant 0 : i32
    %c0_i32_0 = arith.constant 0 : i32
    %c0_i32_1 = arith.constant 0 : i32
    return %c0_i32, %c0_i32_0 : i32, i32
  }
  func.func @transform_2(%arg0: i32) -> (i32, i32) {
    %c0_i32 = arith.constant 0 : i32
    %c0_i32_0 = arith.constant 0 : i32
    return %arg0, %c0_i32 : i32, i32
  }
  func.func @transform_3(%arg0: i32) -> (i32, i32) {
    %c0_i32 = arith.constant 0 : i32
    %c0_i32_0 = arith.constant 0 : i32
    %c0_i32_1 = arith.constant 0 : i32
    return %c0_i32, %c0_i32_0 : i32, i32
  }
  func.func @transform_4(%arg0: i32) -> (i32, i32) {
    %c0_i32 = arith.constant 0 : i32
    %c0_i32_0 = arith.constant 0 : i32
    %c0_i32_1 = arith.constant 0 : i32
    return %c0_i32, %c0_i32_0 : i32, i32
  }
}

module attributes {stable_mosaic.version = 11 : i64} {
  func.func @_bn_apply_kernel(%arg0: i32, %arg1: memref<128x128xbf16, #tpu.memory_space<vmem>>, %arg2: memref<1x128xf32, #tpu.memory_space<vmem>>, %arg3: memref<1x128xf32, #tpu.memory_space<vmem>>, %arg4: memref<1x128xf32, #tpu.memory_space<vmem>>, %arg5: memref<1x128xf32, #tpu.memory_space<vmem>>, %arg6: memref<128x128xbf16, #tpu.memory_space<vmem>>, %arg7: memref<1x128xf32, #tpu.memory_space<vmem>>, %arg8: memref<1x128xf32, #tpu.memory_space<vmem>>, %arg9: memref<1x128xf32, #tpu.memory_space<vmem>>, %arg10: memref<1x128xf32, #tpu.memory_space<vmem>>, %arg11: memref<128x128xbf16, #tpu.memory_space<vmem>>) attributes {dimension_semantics = [#tpu.dimension_semantics<parallel>], iteration_bounds = array<i64: 1>, scalar_prefetch = 0 : i64, scratch_operands = 0 : i64, tpu.core_type = #tpu.core_type<tc>, window_params = [{transform_indices = @transform_0, window_bounds = array<i64: 128, 128>}, {pipeline_mode = #tpu.pipeline_mode<synchronous>, transform_indices = @transform_1, window_bounds = array<i64: 1, 128>}, {pipeline_mode = #tpu.pipeline_mode<synchronous>, transform_indices = @transform_2, window_bounds = array<i64: 1, 128>}, {pipeline_mode = #tpu.pipeline_mode<synchronous>, transform_indices = @transform_3, window_bounds = array<i64: 1, 128>}, {pipeline_mode = #tpu.pipeline_mode<synchronous>, transform_indices = @transform_4, window_bounds = array<i64: 1, 128>}, {transform_indices = @transform_5, window_bounds = array<i64: 128, 128>}, {pipeline_mode = #tpu.pipeline_mode<synchronous>, transform_indices = @transform_6, window_bounds = array<i64: 1, 128>}, {pipeline_mode = #tpu.pipeline_mode<synchronous>, transform_indices = @transform_7, window_bounds = array<i64: 1, 128>}, {pipeline_mode = #tpu.pipeline_mode<synchronous>, transform_indices = @transform_8, window_bounds = array<i64: 1, 128>}, {pipeline_mode = #tpu.pipeline_mode<synchronous>, transform_indices = @transform_9, window_bounds = array<i64: 1, 128>}, {transform_indices = @transform_10, window_bounds = array<i64: 128, 128>}]} {
    %c0 = arith.constant 0 : index
    %c0_0 = arith.constant 0 : index
    %0 = vector.load %arg2[%c0, %c0_0] : memref<1x128xf32, #tpu.memory_space<vmem>>, vector<1x128xf32>
    %cst = arith.constant 7.812500e-03 : f32
    %1 = vector.broadcast %cst : f32 to vector<1x128xf32>
    %2 = arith.mulf %0, %1 : vector<1x128xf32>
    %c0_1 = arith.constant 0 : index
    %c0_2 = arith.constant 0 : index
    %3 = vector.load %arg3[%c0_1, %c0_2] : memref<1x128xf32, #tpu.memory_space<vmem>>, vector<1x128xf32>
    %cst_3 = arith.constant 7.812500e-03 : f32
    %4 = vector.broadcast %cst_3 : f32 to vector<1x128xf32>
    %5 = arith.mulf %3, %4 : vector<1x128xf32>
    %6 = arith.mulf %2, %2 : vector<1x128xf32>
    %7 = arith.subf %5, %6 : vector<1x128xf32>
    %cst_4 = arith.constant 0.000000e+00 : f32
    %8 = vector.broadcast %cst_4 : f32 to vector<1x128xf32>
    %9 = arith.maximumf %7, %8 : vector<1x128xf32>
    %cst_5 = arith.constant 9.99999974E-6 : f32
    %10 = vector.broadcast %cst_5 : f32 to vector<1x128xf32>
    %11 = arith.addf %9, %10 : vector<1x128xf32>
    %12 = math.rsqrt %11 : vector<1x128xf32>
    %c0_6 = arith.constant 0 : index
    %c0_7 = arith.constant 0 : index
    %13 = vector.load %arg4[%c0_6, %c0_7] : memref<1x128xf32, #tpu.memory_space<vmem>>, vector<1x128xf32>
    %14 = arith.mulf %12, %13 : vector<1x128xf32>
    %c0_8 = arith.constant 0 : index
    %c0_9 = arith.constant 0 : index
    %15 = vector.load %arg5[%c0_8, %c0_9] : memref<1x128xf32, #tpu.memory_space<vmem>>, vector<1x128xf32>
    %16 = arith.mulf %2, %14 : vector<1x128xf32>
    %17 = arith.subf %15, %16 : vector<1x128xf32>
    %c0_10 = arith.constant 0 : index
    %c0_11 = arith.constant 0 : index
    %18 = vector.load %arg1[%c0_10, %c0_11] : memref<128x128xbf16, #tpu.memory_space<vmem>>, vector<128x128xbf16>
    %19 = arith.extf %18 : vector<128x128xbf16> to vector<128x128xf32>
    %20 = vector.broadcast %14 : vector<1x128xf32> to vector<128x128xf32>
    %21 = arith.mulf %19, %20 : vector<128x128xf32>
    %22 = vector.broadcast %17 : vector<1x128xf32> to vector<128x128xf32>
    %23 = arith.addf %21, %22 : vector<128x128xf32>
    %c0_12 = arith.constant 0 : index
    %c0_13 = arith.constant 0 : index
    %24 = vector.load %arg7[%c0_12, %c0_13] : memref<1x128xf32, #tpu.memory_space<vmem>>, vector<1x128xf32>
    %cst_14 = arith.constant 7.812500e-03 : f32
    %25 = vector.broadcast %cst_14 : f32 to vector<1x128xf32>
    %26 = arith.mulf %24, %25 : vector<1x128xf32>
    %c0_15 = arith.constant 0 : index
    %c0_16 = arith.constant 0 : index
    %27 = vector.load %arg8[%c0_15, %c0_16] : memref<1x128xf32, #tpu.memory_space<vmem>>, vector<1x128xf32>
    %cst_17 = arith.constant 7.812500e-03 : f32
    %28 = vector.broadcast %cst_17 : f32 to vector<1x128xf32>
    %29 = arith.mulf %27, %28 : vector<1x128xf32>
    %30 = arith.mulf %26, %26 : vector<1x128xf32>
    %31 = arith.subf %29, %30 : vector<1x128xf32>
    %cst_18 = arith.constant 0.000000e+00 : f32
    %32 = vector.broadcast %cst_18 : f32 to vector<1x128xf32>
    %33 = arith.maximumf %31, %32 : vector<1x128xf32>
    %cst_19 = arith.constant 9.99999974E-6 : f32
    %34 = vector.broadcast %cst_19 : f32 to vector<1x128xf32>
    %35 = arith.addf %33, %34 : vector<1x128xf32>
    %36 = math.rsqrt %35 : vector<1x128xf32>
    %c0_20 = arith.constant 0 : index
    %c0_21 = arith.constant 0 : index
    %37 = vector.load %arg9[%c0_20, %c0_21] : memref<1x128xf32, #tpu.memory_space<vmem>>, vector<1x128xf32>
    %38 = arith.mulf %36, %37 : vector<1x128xf32>
    %c0_22 = arith.constant 0 : index
    %c0_23 = arith.constant 0 : index
    %39 = vector.load %arg10[%c0_22, %c0_23] : memref<1x128xf32, #tpu.memory_space<vmem>>, vector<1x128xf32>
    %40 = arith.mulf %26, %38 : vector<1x128xf32>
    %41 = arith.subf %39, %40 : vector<1x128xf32>
    %c0_24 = arith.constant 0 : index
    %c0_25 = arith.constant 0 : index
    %42 = vector.load %arg6[%c0_24, %c0_25] : memref<128x128xbf16, #tpu.memory_space<vmem>>, vector<128x128xbf16>
    %43 = arith.extf %42 : vector<128x128xbf16> to vector<128x128xf32>
    %44 = vector.broadcast %38 : vector<1x128xf32> to vector<128x128xf32>
    %45 = arith.mulf %43, %44 : vector<128x128xf32>
    %46 = vector.broadcast %41 : vector<1x128xf32> to vector<128x128xf32>
    %47 = arith.addf %45, %46 : vector<128x128xf32>
    %48 = arith.addf %23, %47 : vector<128x128xf32>
    %cst_26 = arith.constant 0.000000e+00 : f32
    %49 = vector.broadcast %cst_26 : f32 to vector<128x128xf32>
    %50 = arith.maximumf %48, %49 : vector<128x128xf32>
    %51 = arith.truncf %50 : vector<128x128xf32> to vector<128x128xbf16>
    %c0_27 = arith.constant 0 : index
    %c0_28 = arith.constant 0 : index
    %52 = vector.load %arg11[%c0_27, %c0_28] : memref<128x128xbf16, #tpu.memory_space<vmem>>, vector<128x128xbf16>
    tpu.vector_store %arg11[%c0_27, %c0_28], %51 {strides = array<i32>} : memref<128x128xbf16, #tpu.memory_space<vmem>>, vector<128x128xbf16>,
    return
  }
  func.func @transform_0(%arg0: i32) -> (i32, i32) {
    %c0_i32 = arith.constant 0 : i32
    %c0_i32_0 = arith.constant 0 : i32
    return %arg0, %c0_i32 : i32, i32
  }
  func.func @transform_1(%arg0: i32) -> (i32, i32) {
    %c0_i32 = arith.constant 0 : i32
    %c0_i32_0 = arith.constant 0 : i32
    %c0_i32_1 = arith.constant 0 : i32
    return %c0_i32, %c0_i32_0 : i32, i32
  }
  func.func @transform_2(%arg0: i32) -> (i32, i32) {
    %c0_i32 = arith.constant 0 : i32
    %c0_i32_0 = arith.constant 0 : i32
    %c0_i32_1 = arith.constant 0 : i32
    return %c0_i32, %c0_i32_0 : i32, i32
  }
  func.func @transform_3(%arg0: i32) -> (i32, i32) {
    %c0_i32 = arith.constant 0 : i32
    %c0_i32_0 = arith.constant 0 : i32
    %c0_i32_1 = arith.constant 0 : i32
    return %c0_i32, %c0_i32_0 : i32, i32
  }
  func.func @transform_4(%arg0: i32) -> (i32, i32) {
    %c0_i32 = arith.constant 0 : i32
    %c0_i32_0 = arith.constant 0 : i32
    %c0_i32_1 = arith.constant 0 : i32
    return %c0_i32, %c0_i32_0 : i32, i32
  }
  func.func @transform_5(%arg0: i32) -> (i32, i32) {
    %c0_i32 = arith.constant 0 : i32
    %c0_i32_0 = arith.constant 0 : i32
    return %arg0, %c0_i32 : i32, i32
  }
  func.func @transform_6(%arg0: i32) -> (i32, i32) {
    %c0_i32 = arith.constant 0 : i32
    %c0_i32_0 = arith.constant 0 : i32
    %c0_i32_1 = arith.constant 0 : i32
    return %c0_i32, %c0_i32_0 : i32, i32
  }
  func.func @transform_7(%arg0: i32) -> (i32, i32) {
    %c0_i32 = arith.constant 0 : i32
    %c0_i32_0 = arith.constant 0 : i32
    %c0_i32_1 = arith.constant 0 : i32
    return %c0_i32, %c0_i32_0 : i32, i32
  }
  func.func @transform_8(%arg0: i32) -> (i32, i32) {
    %c0_i32 = arith.constant 0 : i32
    %c0_i32_0 = arith.constant 0 : i32
    %c0_i32_1 = arith.constant 0 : i32
    return %c0_i32, %c0_i32_0 : i32, i32
  }
  func.func @transform_9(%arg0: i32) -> (i32, i32) {
    %c0_i32 = arith.constant 0 : i32
    %c0_i32_0 = arith.constant 0 : i32
    %c0_i32_1 = arith.constant 0 : i32
    return %c0_i32, %c0_i32_0 : i32, i32
  }
  func.func @transform_10(%arg0: i32) -> (i32, i32) {
    %c0_i32 = arith.constant 0 : i32
    %c0_i32_0 = arith.constant 0 : i32
    return %arg0, %c0_i32 : i32, i32
  }
}

module attributes {stable_mosaic.version = 11 : i64} {
  func.func @_matmul_stats_kernel(%arg0: i32, %arg1: memref<128x144xbf16, #tpu.memory_space<vmem>>, %arg2: memref<144x128xbf16, #tpu.memory_space<vmem>>, %arg3: memref<128x8xbf16, #tpu.memory_space<vmem>>, %arg4: memref<8x128xbf16, #tpu.memory_space<vmem>>, %arg5: memref<128x128xbf16, #tpu.memory_space<vmem>>, %arg6: memref<1x128xf32, #tpu.memory_space<vmem>>, %arg7: memref<1x128xf32, #tpu.memory_space<vmem>>, %arg8: memref<128x128xbf16, #tpu.memory_space<vmem>>, %arg9: memref<1x128xf32, #tpu.memory_space<vmem>>, %arg10: memref<1x128xf32, #tpu.memory_space<vmem>>, %arg11: memref<1x128xf32, #tpu.memory_space<vmem>>, %arg12: memref<1x128xf32, #tpu.memory_space<vmem>>, %arg13: memref<1x128xf32, #tpu.memory_space<vmem>>, %arg14: memref<1x128xf32, #tpu.memory_space<vmem>>) attributes {dimension_semantics = [#tpu.dimension_semantics<arbitrary>], iteration_bounds = array<i64: 1>, scalar_prefetch = 0 : i64, scratch_operands = 4 : i64, tpu.core_type = #tpu.core_type<tc>, window_params = [{transform_indices = @transform_0, window_bounds = array<i64: 128, 144>}, {pipeline_mode = #tpu.pipeline_mode<synchronous>, transform_indices = @transform_1, window_bounds = array<i64: 144, 128>}, {transform_indices = @transform_2, window_bounds = array<i64: 128, 8>}, {pipeline_mode = #tpu.pipeline_mode<synchronous>, transform_indices = @transform_3, window_bounds = array<i64: 8, 128>}, {transform_indices = @transform_4, window_bounds = array<i64: 128, 128>}, {pipeline_mode = #tpu.pipeline_mode<synchronous>, transform_indices = @transform_5, window_bounds = array<i64: 1, 128>}, {pipeline_mode = #tpu.pipeline_mode<synchronous>, transform_indices = @transform_6, window_bounds = array<i64: 1, 128>}, {transform_indices = @transform_7, window_bounds = array<i64: 128, 128>}, {pipeline_mode = #tpu.pipeline_mode<synchronous>, transform_indices = @transform_8, window_bounds = array<i64: 1, 128>}, {pipeline_mode = #tpu.pipeline_mode<synchronous>, transform_indices = @transform_9, window_bounds = array<i64: 1, 128>}]} {
    %c0_i32 = arith.constant 0 : i32
    %0 = arith.cmpi eq, %arg0, %c0_i32 : i32
    %1 = arith.extui %0 : i1 to i32
    %c0_i32_0 = arith.constant 0 : i32
    %2 = arith.cmpi ne, %1, %c0_i32_0 : i32
    scf.if %2 {
      %cst_35 = arith.constant 0.000000e+00 : f32
      %38 = vector.broadcast %cst_35 : f32 to vector<1x128xf32>
      %c0_36 = arith.constant 0 : index
      %c0_37 = arith.constant 0 : index
      %39 = vector.load %arg11[%c0_36, %c0_37] : memref<1x128xf32, #tpu.memory_space<vmem>>, vector<1x128xf32>
      tpu.vector_store %arg11[%c0_36, %c0_37], %38 {strides = array<i32>} : memref<1x128xf32, #tpu.memory_space<vmem>>, vector<1x128xf32>,
      %cst_38 = arith.constant 0.000000e+00 : f32
      %40 = vector.broadcast %cst_38 : f32 to vector<1x128xf32>
      %c0_39 = arith.constant 0 : index
      %c0_40 = arith.constant 0 : index
      %41 = vector.load %arg12[%c0_39, %c0_40] : memref<1x128xf32, #tpu.memory_space<vmem>>, vector<1x128xf32>
      tpu.vector_store %arg12[%c0_39, %c0_40], %40 {strides = array<i32>} : memref<1x128xf32, #tpu.memory_space<vmem>>, vector<1x128xf32>,
      %cst_41 = arith.constant 0.000000e+00 : f32
      %42 = vector.broadcast %cst_41 : f32 to vector<1x128xf32>
      %c0_42 = arith.constant 0 : index
      %c0_43 = arith.constant 0 : index
      %43 = vector.load %arg13[%c0_42, %c0_43] : memref<1x128xf32, #tpu.memory_space<vmem>>, vector<1x128xf32>
      tpu.vector_store %arg13[%c0_42, %c0_43], %42 {strides = array<i32>} : memref<1x128xf32, #tpu.memory_space<vmem>>, vector<1x128xf32>,
      %cst_44 = arith.constant 0.000000e+00 : f32
      %44 = vector.broadcast %cst_44 : f32 to vector<1x128xf32>
      %c0_45 = arith.constant 0 : index
      %c0_46 = arith.constant 0 : index
      %45 = vector.load %arg14[%c0_45, %c0_46] : memref<1x128xf32, #tpu.memory_space<vmem>>, vector<1x128xf32>
      tpu.vector_store %arg14[%c0_45, %c0_46], %44 {strides = array<i32>} : memref<1x128xf32, #tpu.memory_space<vmem>>, vector<1x128xf32>,
    } else {
    }
    %c0 = arith.constant 0 : index
    %c0_1 = arith.constant 0 : index
    %3 = vector.load %arg1[%c0, %c0_1] : memref<128x144xbf16, #tpu.memory_space<vmem>>, vector<128x144xbf16>
    %c0_2 = arith.constant 0 : index
    %c0_3 = arith.constant 0 : index
    %4 = vector.load %arg2[%c0_2, %c0_3] : memref<144x128xbf16, #tpu.memory_space<vmem>>, vector<144x128xbf16>
    %cst = arith.constant dense<0.000000e+00> : vector<128x128xf32>
    %5 = tpu.matmul %3, %4, %cst {dimension_numbers = #tpu.dot_dimension_numbers<[1], [0], [0], [1], [0, 0, 1, 1], [], []>} : vector<128x144xbf16>, vector<144x128xbf16>, vector<128x128xf32> -> vector<128x128xf32>
    %6 = arith.truncf %5 : vector<128x128xf32> to vector<128x128xbf16>
    %c0_4 = arith.constant 0 : index
    %c0_5 = arith.constant 0 : index
    %7 = vector.load %arg5[%c0_4, %c0_5] : memref<128x128xbf16, #tpu.memory_space<vmem>>, vector<128x128xbf16>
    tpu.vector_store %arg5[%c0_4, %c0_5], %6 {strides = array<i32>} : memref<128x128xbf16, #tpu.memory_space<vmem>>, vector<128x128xbf16>,
    %c0_6 = arith.constant 0 : index
    %c0_7 = arith.constant 0 : index
    %8 = vector.load %arg11[%c0_6, %c0_7] : memref<1x128xf32, #tpu.memory_space<vmem>>, vector<1x128xf32>
    %cst_8 = arith.constant dense<0.000000e+00> : vector<128xf32>
    %9 = vector.multi_reduction <add>, %5, %cst_8 [0] : vector<128x128xf32> to vector<128xf32>
    %10 = vector.shape_cast %9 : vector<128xf32> to vector<1x128xf32>
    %11 = arith.addf %8, %10 : vector<1x128xf32>
    %c0_9 = arith.constant 0 : index
    %c0_10 = arith.constant 0 : index
    %12 = vector.load %arg11[%c0_9, %c0_10] : memref<1x128xf32, #tpu.memory_space<vmem>>, vector<1x128xf32>
    tpu.vector_store %arg11[%c0_9, %c0_10], %11 {strides = array<i32>} : memref<1x128xf32, #tpu.memory_space<vmem>>, vector<1x128xf32>,
    %c0_11 = arith.constant 0 : index
    %c0_12 = arith.constant 0 : index
    %13 = vector.load %arg12[%c0_11, %c0_12] : memref<1x128xf32, #tpu.memory_space<vmem>>, vector<1x128xf32>
    %14 = arith.mulf %5, %5 : vector<128x128xf32>
    %cst_13 = arith.constant dense<0.000000e+00> : vector<128xf32>
    %15 = vector.multi_reduction <add>, %14, %cst_13 [0] : vector<128x128xf32> to vector<128xf32>
    %16 = vector.shape_cast %15 : vector<128xf32> to vector<1x128xf32>
    %17 = arith.addf %13, %16 : vector<1x128xf32>
    %c0_14 = arith.constant 0 : index
    %c0_15 = arith.constant 0 : index
    %18 = vector.load %arg12[%c0_14, %c0_15] : memref<1x128xf32, #tpu.memory_space<vmem>>, vector<1x128xf32>
    tpu.vector_store %arg12[%c0_14, %c0_15], %17 {strides = array<i32>} : memref<1x128xf32, #tpu.memory_space<vmem>>, vector<1x128xf32>,
    %c0_16 = arith.constant 0 : index
    %c0_17 = arith.constant 0 : index
    %19 = vector.load %arg3[%c0_16, %c0_17] : memref<128x8xbf16, #tpu.memory_space<vmem>>, vector<128x8xbf16>
    %c0_18 = arith.constant 0 : index
    %c0_19 = arith.constant 0 : index
    %20 = vector.load %arg4[%c0_18, %c0_19] : memref<8x128xbf16, #tpu.memory_space<vmem>>, vector<8x128xbf16>
    %cst_20 = arith.constant dense<0.000000e+00> : vector<128x128xf32>
    %21 = tpu.matmul %19, %20, %cst_20 {dimension_numbers = #tpu.dot_dimension_numbers<[1], [0], [0], [1], [0, 0, 1, 1], [], []>} : vector<128x8xbf16>, vector<8x128xbf16>, vector<128x128xf32> -> vector<128x128xf32>
    %22 = arith.truncf %21 : vector<128x128xf32> to vector<128x128xbf16>
    %c0_21 = arith.constant 0 : index
    %c0_22 = arith.constant 0 : index
    %23 = vector.load %arg8[%c0_21, %c0_22] : memref<128x128xbf16, #tpu.memory_space<vmem>>, vector<128x128xbf16>
    tpu.vector_store %arg8[%c0_21, %c0_22], %22 {strides = array<i32>} : memref<128x128xbf16, #tpu.memory_space<vmem>>, vector<128x128xbf16>,
    %c0_23 = arith.constant 0 : index
    %c0_24 = arith.constant 0 : index
    %24 = vector.load %arg13[%c0_23, %c0_24] : memref<1x128xf32, #tpu.memory_space<vmem>>, vector<1x128xf32>
    %cst_25 = arith.constant dense<0.000000e+00> : vector<128xf32>
    %25 = vector.multi_reduction <add>, %21, %cst_25 [0] : vector<128x128xf32> to vector<128xf32>
    %26 = vector.shape_cast %25 : vector<128xf32> to vector<1x128xf32>
    %27 = arith.addf %24, %26 : vector<1x128xf32>
    %c0_26 = arith.constant 0 : index
    %c0_27 = arith.constant 0 : index
    %28 = vector.load %arg13[%c0_26, %c0_27] : memref<1x128xf32, #tpu.memory_space<vmem>>, vector<1x128xf32>
    tpu.vector_store %arg13[%c0_26, %c0_27], %27 {strides = array<i32>} : memref<1x128xf32, #tpu.memory_space<vmem>>, vector<1x128xf32>,
    %c0_28 = arith.constant 0 : index
    %c0_29 = arith.constant 0 : index
    %29 = vector.load %arg14[%c0_28, %c0_29] : memref<1x128xf32, #tpu.memory_space<vmem>>, vector<1x128xf32>
    %30 = arith.mulf %21, %21 : vector<128x128xf32>
    %cst_30 = arith.constant dense<0.000000e+00> : vector<128xf32>
    %31 = vector.multi_reduction <add>, %30, %cst_30 [0] : vector<128x128xf32> to vector<128xf32>
    %32 = vector.shape_cast %31 : vector<128xf32> to vector<1x128xf32>
    %33 = arith.addf %29, %32 : vector<1x128xf32>
    %c0_31 = arith.constant 0 : index
    %c0_32 = arith.constant 0 : index
    %34 = vector.load %arg14[%c0_31, %c0_32] : memref<1x128xf32, #tpu.memory_space<vmem>>, vector<1x128xf32>
    tpu.vector_store %arg14[%c0_31, %c0_32], %33 {strides = array<i32>} : memref<1x128xf32, #tpu.memory_space<vmem>>, vector<1x128xf32>,
    %c0_i32_33 = arith.constant 0 : i32
    %35 = arith.cmpi eq, %arg0, %c0_i32_33 : i32
    %36 = arith.extui %35 : i1 to i32
    %c0_i32_34 = arith.constant 0 : i32
    %37 = arith.cmpi ne, %36, %c0_i32_34 : i32
    scf.if %37 {
      %c0_35 = arith.constant 0 : index
      %c0_36 = arith.constant 0 : index
      %38 = vector.load %arg11[%c0_35, %c0_36] : memref<1x128xf32, #tpu.memory_space<vmem>>, vector<1x128xf32>
      %c0_37 = arith.constant 0 : index
      %c0_38 = arith.constant 0 : index
      %39 = vector.load %arg6[%c0_37, %c0_38] : memref<1x128xf32, #tpu.memory_space<vmem>>, vector<1x128xf32>
      tpu.vector_store %arg6[%c0_37, %c0_38], %38 {strides = array<i32>} : memref<1x128xf32, #tpu.memory_space<vmem>>, vector<1x128xf32>,
      %c0_39 = arith.constant 0 : index
      %c0_40 = arith.constant 0 : index
      %40 = vector.load %arg12[%c0_39, %c0_40] : memref<1x128xf32, #tpu.memory_space<vmem>>, vector<1x128xf32>
      %c0_41 = arith.constant 0 : index
      %c0_42 = arith.constant 0 : index
      %41 = vector.load %arg7[%c0_41, %c0_42] : memref<1x128xf32, #tpu.memory_space<vmem>>, vector<1x128xf32>
      tpu.vector_store %arg7[%c0_41, %c0_42], %40 {strides = array<i32>} : memref<1x128xf32, #tpu.memory_space<vmem>>, vector<1x128xf32>,
      %c0_43 = arith.constant 0 : index
      %c0_44 = arith.constant 0 : index
      %42 = vector.load %arg13[%c0_43, %c0_44] : memref<1x128xf32, #tpu.memory_space<vmem>>, vector<1x128xf32>
      %c0_45 = arith.constant 0 : index
      %c0_46 = arith.constant 0 : index
      %43 = vector.load %arg9[%c0_45, %c0_46] : memref<1x128xf32, #tpu.memory_space<vmem>>, vector<1x128xf32>
      tpu.vector_store %arg9[%c0_45, %c0_46], %42 {strides = array<i32>} : memref<1x128xf32, #tpu.memory_space<vmem>>, vector<1x128xf32>,
      %c0_47 = arith.constant 0 : index
      %c0_48 = arith.constant 0 : index
      %44 = vector.load %arg14[%c0_47, %c0_48] : memref<1x128xf32, #tpu.memory_space<vmem>>, vector<1x128xf32>
      %c0_49 = arith.constant 0 : index
      %c0_50 = arith.constant 0 : index
      %45 = vector.load %arg10[%c0_49, %c0_50] : memref<1x128xf32, #tpu.memory_space<vmem>>, vector<1x128xf32>
      tpu.vector_store %arg10[%c0_49, %c0_50], %44 {strides = array<i32>} : memref<1x128xf32, #tpu.memory_space<vmem>>, vector<1x128xf32>,
    } else {
    }
    return
  }
  func.func @transform_0(%arg0: i32) -> (i32, i32) {
    %c0_i32 = arith.constant 0 : i32
    %c0_i32_0 = arith.constant 0 : i32
    return %arg0, %c0_i32 : i32, i32
  }
  func.func @transform_1(%arg0: i32) -> (i32, i32) {
    %c0_i32 = arith.constant 0 : i32
    %c0_i32_0 = arith.constant 0 : i32
    %c0_i32_1 = arith.constant 0 : i32
    return %c0_i32, %c0_i32_0 : i32, i32
  }
  func.func @transform_2(%arg0: i32) -> (i32, i32) {
    %c0_i32 = arith.constant 0 : i32
    %c0_i32_0 = arith.constant 0 : i32
    return %arg0, %c0_i32 : i32, i32
  }
  func.func @transform_3(%arg0: i32) -> (i32, i32) {
    %c0_i32 = arith.constant 0 : i32
    %c0_i32_0 = arith.constant 0 : i32
    %c0_i32_1 = arith.constant 0 : i32
    return %c0_i32, %c0_i32_0 : i32, i32
  }
  func.func @transform_4(%arg0: i32) -> (i32, i32) {
    %c0_i32 = arith.constant 0 : i32
    %c0_i32_0 = arith.constant 0 : i32
    return %arg0, %c0_i32 : i32, i32
  }
  func.func @transform_5(%arg0: i32) -> (i32, i32) {
    %c0_i32 = arith.constant 0 : i32
    %c0_i32_0 = arith.constant 0 : i32
    %c0_i32_1 = arith.constant 0 : i32
    return %c0_i32, %c0_i32_0 : i32, i32
  }
  func.func @transform_6(%arg0: i32) -> (i32, i32) {
    %c0_i32 = arith.constant 0 : i32
    %c0_i32_0 = arith.constant 0 : i32
    %c0_i32_1 = arith.constant 0 : i32
    return %c0_i32, %c0_i32_0 : i32, i32
  }
  func.func @transform_7(%arg0: i32) -> (i32, i32) {
    %c0_i32 = arith.constant 0 : i32
    %c0_i32_0 = arith.constant 0 : i32
    return %arg0, %c0_i32 : i32, i32
  }
  func.func @transform_8(%arg0: i32) -> (i32, i32) {
    %c0_i32 = arith.constant 0 : i32
    %c0_i32_0 = arith.constant 0 : i32
    %c0_i32_1 = arith.constant 0 : i32
    return %c0_i32, %c0_i32_0 : i32, i32
  }
  func.func @transform_9(%arg0: i32) -> (i32, i32) {
    %c0_i32 = arith.constant 0 : i32
    %c0_i32_0 = arith.constant 0 : i32
    %c0_i32_1 = arith.constant 0 : i32
    return %c0_i32, %c0_i32_0 : i32, i32
  }
}

module attributes {stable_mosaic.version = 11 : i64} {
  func.func @_bn_apply_kernel(%arg0: i32, %arg1: memref<128x128xbf16, #tpu.memory_space<vmem>>, %arg2: memref<1x128xf32, #tpu.memory_space<vmem>>, %arg3: memref<1x128xf32, #tpu.memory_space<vmem>>, %arg4: memref<1x128xf32, #tpu.memory_space<vmem>>, %arg5: memref<1x128xf32, #tpu.memory_space<vmem>>, %arg6: memref<128x128xbf16, #tpu.memory_space<vmem>>, %arg7: memref<128x128xbf16, #tpu.memory_space<vmem>>) attributes {dimension_semantics = [#tpu.dimension_semantics<parallel>], iteration_bounds = array<i64: 1>, scalar_prefetch = 0 : i64, scratch_operands = 0 : i64, tpu.core_type = #tpu.core_type<tc>, window_params = [{transform_indices = @transform_0, window_bounds = array<i64: 128, 128>}, {pipeline_mode = #tpu.pipeline_mode<synchronous>, transform_indices = @transform_1, window_bounds = array<i64: 1, 128>}, {pipeline_mode = #tpu.pipeline_mode<synchronous>, transform_indices = @transform_2, window_bounds = array<i64: 1, 128>}, {pipeline_mode = #tpu.pipeline_mode<synchronous>, transform_indices = @transform_3, window_bounds = array<i64: 1, 128>}, {pipeline_mode = #tpu.pipeline_mode<synchronous>, transform_indices = @transform_4, window_bounds = array<i64: 1, 128>}, {transform_indices = @transform_5, window_bounds = array<i64: 128, 128>}, {transform_indices = @transform_6, window_bounds = array<i64: 128, 128>}]} {
    %c0 = arith.constant 0 : index
    %c0_0 = arith.constant 0 : index
    %0 = vector.load %arg2[%c0, %c0_0] : memref<1x128xf32, #tpu.memory_space<vmem>>, vector<1x128xf32>
    %cst = arith.constant 7.812500e-03 : f32
    %1 = vector.broadcast %cst : f32 to vector<1x128xf32>
    %2 = arith.mulf %0, %1 : vector<1x128xf32>
    %c0_1 = arith.constant 0 : index
    %c0_2 = arith.constant 0 : index
    %3 = vector.load %arg3[%c0_1, %c0_2] : memref<1x128xf32, #tpu.memory_space<vmem>>, vector<1x128xf32>
    %cst_3 = arith.constant 7.812500e-03 : f32
    %4 = vector.broadcast %cst_3 : f32 to vector<1x128xf32>
    %5 = arith.mulf %3, %4 : vector<1x128xf32>
    %6 = arith.mulf %2, %2 : vector<1x128xf32>
    %7 = arith.subf %5, %6 : vector<1x128xf32>
    %cst_4 = arith.constant 0.000000e+00 : f32
    %8 = vector.broadcast %cst_4 : f32 to vector<1x128xf32>
    %9 = arith.maximumf %7, %8 : vector<1x128xf32>
    %cst_5 = arith.constant 9.99999974E-6 : f32
    %10 = vector.broadcast %cst_5 : f32 to vector<1x128xf32>
    %11 = arith.addf %9, %10 : vector<1x128xf32>
    %12 = math.rsqrt %11 : vector<1x128xf32>
    %c0_6 = arith.constant 0 : index
    %c0_7 = arith.constant 0 : index
    %13 = vector.load %arg4[%c0_6, %c0_7] : memref<1x128xf32, #tpu.memory_space<vmem>>, vector<1x128xf32>
    %14 = arith.mulf %12, %13 : vector<1x128xf32>
    %c0_8 = arith.constant 0 : index
    %c0_9 = arith.constant 0 : index
    %15 = vector.load %arg5[%c0_8, %c0_9] : memref<1x128xf32, #tpu.memory_space<vmem>>, vector<1x128xf32>
    %16 = arith.mulf %2, %14 : vector<1x128xf32>
    %17 = arith.subf %15, %16 : vector<1x128xf32>
    %c0_10 = arith.constant 0 : index
    %c0_11 = arith.constant 0 : index
    %18 = vector.load %arg1[%c0_10, %c0_11] : memref<128x128xbf16, #tpu.memory_space<vmem>>, vector<128x128xbf16>
    %19 = arith.extf %18 : vector<128x128xbf16> to vector<128x128xf32>
    %20 = vector.broadcast %14 : vector<1x128xf32> to vector<128x128xf32>
    %21 = arith.mulf %19, %20 : vector<128x128xf32>
    %22 = vector.broadcast %17 : vector<1x128xf32> to vector<128x128xf32>
    %23 = arith.addf %21, %22 : vector<128x128xf32>
    %c0_12 = arith.constant 0 : index
    %c0_13 = arith.constant 0 : index
    %24 = vector.load %arg6[%c0_12, %c0_13] : memref<128x128xbf16, #tpu.memory_space<vmem>>, vector<128x128xbf16>
    %25 = arith.extf %24 : vector<128x128xbf16> to vector<128x128xf32>
    %26 = arith.addf %23, %25 : vector<128x128xf32>
    %cst_14 = arith.constant 0.000000e+00 : f32
    %27 = vector.broadcast %cst_14 : f32 to vector<128x128xf32>
    %28 = arith.maximumf %26, %27 : vector<128x128xf32>
    %29 = arith.truncf %28 : vector<128x128xf32> to vector<128x128xbf16>
    %c0_15 = arith.constant 0 : index
    %c0_16 = arith.constant 0 : index
    %30 = vector.load %arg7[%c0_15, %c0_16] : memref<128x128xbf16, #tpu.memory_space<vmem>>, vector<128x128xbf16>
    tpu.vector_store %arg7[%c0_15, %c0_16], %29 {strides = array<i32>} : memref<128x128xbf16, #tpu.memory_space<vmem>>, vector<128x128xbf16>,
    return
  }
  func.func @transform_0(%arg0: i32) -> (i32, i32) {
    %c0_i32 = arith.constant 0 : i32
    %c0_i32_0 = arith.constant 0 : i32
    return %arg0, %c0_i32 : i32, i32
  }
  func.func @transform_1(%arg0: i32) -> (i32, i32) {
    %c0_i32 = arith.constant 0 : i32
    %c0_i32_0 = arith.constant 0 : i32
    %c0_i32_1 = arith.constant 0 : i32
    return %c0_i32, %c0_i32_0 : i32, i32
  }
  func.func @transform_2(%arg0: i32) -> (i32, i32) {
    %c0_i32 = arith.constant 0 : i32
    %c0_i32_0 = arith.constant 0 : i32
    %c0_i32_1 = arith.constant 0 : i32
    return %c0_i32, %c0_i32_0 : i32, i32
  }
  func.func @transform_3(%arg0: i32) -> (i32, i32) {
    %c0_i32 = arith.constant 0 : i32
    %c0_i32_0 = arith.constant 0 : i32
    %c0_i32_1 = arith.constant 0 : i32
    return %c0_i32, %c0_i32_0 : i32, i32
  }
  func.func @transform_4(%arg0: i32) -> (i32, i32) {
    %c0_i32 = arith.constant 0 : i32
    %c0_i32_0 = arith.constant 0 : i32
    %c0_i32_1 = arith.constant 0 : i32
    return %c0_i32, %c0_i32_0 : i32, i32
  }
  func.func @transform_5(%arg0: i32) -> (i32, i32) {
    %c0_i32 = arith.constant 0 : i32
    %c0_i32_0 = arith.constant 0 : i32
    return %arg0, %c0_i32 : i32, i32
  }
  func.func @transform_6(%arg0: i32) -> (i32, i32) {
    %c0_i32 = arith.constant 0 : i32
    %c0_i32_0 = arith.constant 0 : i32
    return %arg0, %c0_i32 : i32, i32
  }
}

module attributes {stable_mosaic.version = 11 : i64} {
  func.func @_bn_apply_kernel(%arg0: i32, %arg1: memref<32x128xbf16, #tpu.memory_space<vmem>>, %arg2: memref<1x128xf32, #tpu.memory_space<vmem>>, %arg3: memref<1x128xf32, #tpu.memory_space<vmem>>, %arg4: memref<1x128xf32, #tpu.memory_space<vmem>>, %arg5: memref<1x128xf32, #tpu.memory_space<vmem>>, %arg6: memref<32x128xbf16, #tpu.memory_space<vmem>>) attributes {dimension_semantics = [#tpu.dimension_semantics<parallel>], iteration_bounds = array<i64: 1>, scalar_prefetch = 0 : i64, scratch_operands = 0 : i64, tpu.core_type = #tpu.core_type<tc>, window_params = [{transform_indices = @transform_0, window_bounds = array<i64: 32, 128>}, {pipeline_mode = #tpu.pipeline_mode<synchronous>, transform_indices = @transform_1, window_bounds = array<i64: 1, 128>}, {pipeline_mode = #tpu.pipeline_mode<synchronous>, transform_indices = @transform_2, window_bounds = array<i64: 1, 128>}, {pipeline_mode = #tpu.pipeline_mode<synchronous>, transform_indices = @transform_3, window_bounds = array<i64: 1, 128>}, {pipeline_mode = #tpu.pipeline_mode<synchronous>, transform_indices = @transform_4, window_bounds = array<i64: 1, 128>}, {transform_indices = @transform_5, window_bounds = array<i64: 32, 128>}]} {
    %c0 = arith.constant 0 : index
    %c0_0 = arith.constant 0 : index
    %0 = vector.load %arg2[%c0, %c0_0] : memref<1x128xf32, #tpu.memory_space<vmem>>, vector<1x128xf32>
    %cst = arith.constant 3.125000e-02 : f32
    %1 = vector.broadcast %cst : f32 to vector<1x128xf32>
    %2 = arith.mulf %0, %1 : vector<1x128xf32>
    %c0_1 = arith.constant 0 : index
    %c0_2 = arith.constant 0 : index
    %3 = vector.load %arg3[%c0_1, %c0_2] : memref<1x128xf32, #tpu.memory_space<vmem>>, vector<1x128xf32>
    %cst_3 = arith.constant 3.125000e-02 : f32
    %4 = vector.broadcast %cst_3 : f32 to vector<1x128xf32>
    %5 = arith.mulf %3, %4 : vector<1x128xf32>
    %6 = arith.mulf %2, %2 : vector<1x128xf32>
    %7 = arith.subf %5, %6 : vector<1x128xf32>
    %cst_4 = arith.constant 0.000000e+00 : f32
    %8 = vector.broadcast %cst_4 : f32 to vector<1x128xf32>
    %9 = arith.maximumf %7, %8 : vector<1x128xf32>
    %cst_5 = arith.constant 9.99999974E-6 : f32
    %10 = vector.broadcast %cst_5 : f32 to vector<1x128xf32>
    %11 = arith.addf %9, %10 : vector<1x128xf32>
    %12 = math.rsqrt %11 : vector<1x128xf32>
    %c0_6 = arith.constant 0 : index
    %c0_7 = arith.constant 0 : index
    %13 = vector.load %arg4[%c0_6, %c0_7] : memref<1x128xf32, #tpu.memory_space<vmem>>, vector<1x128xf32>
    %14 = arith.mulf %12, %13 : vector<1x128xf32>
    %c0_8 = arith.constant 0 : index
    %c0_9 = arith.constant 0 : index
    %15 = vector.load %arg5[%c0_8, %c0_9] : memref<1x128xf32, #tpu.memory_space<vmem>>, vector<1x128xf32>
    %16 = arith.mulf %2, %14 : vector<1x128xf32>
    %17 = arith.subf %15, %16 : vector<1x128xf32>
    %c0_10 = arith.constant 0 : index
    %c0_11 = arith.constant 0 : index
    %18 = vector.load %arg1[%c0_10, %c0_11] : memref<32x128xbf16, #tpu.memory_space<vmem>>, vector<32x128xbf16>
    %19 = arith.extf %18 : vector<32x128xbf16> to vector<32x128xf32>
    %20 = vector.broadcast %14 : vector<1x128xf32> to vector<32x128xf32>
    %21 = arith.mulf %19, %20 : vector<32x128xf32>
    %22 = vector.broadcast %17 : vector<1x128xf32> to vector<32x128xf32>
    %23 = arith.addf %21, %22 : vector<32x128xf32>
    %cst_12 = arith.constant 0.000000e+00 : f32
    %24 = vector.broadcast %cst_12 : f32 to vector<32x128xf32>
    %25 = arith.maximumf %23, %24 : vector<32x128xf32>
    %26 = arith.truncf %25 : vector<32x128xf32> to vector<32x128xbf16>
    %c0_13 = arith.constant 0 : index
    %c0_14 = arith.constant 0 : index
    %27 = vector.load %arg6[%c0_13, %c0_14] : memref<32x128xbf16, #tpu.memory_space<vmem>>, vector<32x128xbf16>
    tpu.vector_store %arg6[%c0_13, %c0_14], %26 {strides = array<i32>} : memref<32x128xbf16, #tpu.memory_space<vmem>>, vector<32x128xbf16>,
    return
  }
  func.func @transform_0(%arg0: i32) -> (i32, i32) {
    %c0_i32 = arith.constant 0 : i32
    %c0_i32_0 = arith.constant 0 : i32
    return %arg0, %c0_i32 : i32, i32
  }
  func.func @transform_1(%arg0: i32) -> (i32, i32) {
    %c0_i32 = arith.constant 0 : i32
    %c0_i32_0 = arith.constant 0 : i32
    %c0_i32_1 = arith.constant 0 : i32
    return %c0_i32, %c0_i32_0 : i32, i32
  }
  func.func @transform_2(%arg0: i32) -> (i32, i32) {
    %c0_i32 = arith.constant 0 : i32
    %c0_i32_0 = arith.constant 0 : i32
    %c0_i32_1 = arith.constant 0 : i32
    return %c0_i32, %c0_i32_0 : i32, i32
  }
  func.func @transform_3(%arg0: i32) -> (i32, i32) {
    %c0_i32 = arith.constant 0 : i32
    %c0_i32_0 = arith.constant 0 : i32
    %c0_i32_1 = arith.constant 0 : i32
    return %c0_i32, %c0_i32_0 : i32, i32
  }
  func.func @transform_4(%arg0: i32) -> (i32, i32) {
    %c0_i32 = arith.constant 0 : i32
    %c0_i32_0 = arith.constant 0 : i32
    %c0_i32_1 = arith.constant 0 : i32
    return %c0_i32, %c0_i32_0 : i32, i32
  }
  func.func @transform_5(%arg0: i32) -> (i32, i32) {
    %c0_i32 = arith.constant 0 : i32
    %c0_i32_0 = arith.constant 0 : i32
    return %arg0, %c0_i32 : i32, i32
  }
}

module attributes {stable_mosaic.version = 11 : i64} {
  func.func @_matmul_stats_kernel(%arg0: i32, %arg1: memref<32x144xbf16, #tpu.memory_space<vmem>>, %arg2: memref<144x128xbf16, #tpu.memory_space<vmem>>, %arg3: memref<32x128xbf16, #tpu.memory_space<vmem>>, %arg4: memref<1x128xf32, #tpu.memory_space<vmem>>, %arg5: memref<1x128xf32, #tpu.memory_space<vmem>>, %arg6: memref<1x128xf32, #tpu.memory_space<vmem>>, %arg7: memref<1x128xf32, #tpu.memory_space<vmem>>) attributes {dimension_semantics = [#tpu.dimension_semantics<arbitrary>], iteration_bounds = array<i64: 1>, scalar_prefetch = 0 : i64, scratch_operands = 2 : i64, tpu.core_type = #tpu.core_type<tc>, window_params = [{transform_indices = @transform_0, window_bounds = array<i64: 32, 144>}, {pipeline_mode = #tpu.pipeline_mode<synchronous>, transform_indices = @transform_1, window_bounds = array<i64: 144, 128>}, {transform_indices = @transform_2, window_bounds = array<i64: 32, 128>}, {pipeline_mode = #tpu.pipeline_mode<synchronous>, transform_indices = @transform_3, window_bounds = array<i64: 1, 128>}, {pipeline_mode = #tpu.pipeline_mode<synchronous>, transform_indices = @transform_4, window_bounds = array<i64: 1, 128>}]} {
    %c0_i32 = arith.constant 0 : i32
    %0 = arith.cmpi eq, %arg0, %c0_i32 : i32
    %1 = arith.extui %0 : i1 to i32
    %c0_i32_0 = arith.constant 0 : i32
    %2 = arith.cmpi ne, %1, %c0_i32_0 : i32
    scf.if %2 {
      %cst_18 = arith.constant 0.000000e+00 : f32
      %22 = vector.broadcast %cst_18 : f32 to vector<1x128xf32>
      %c0_19 = arith.constant 0 : index
      %c0_20 = arith.constant 0 : index
      %23 = vector.load %arg6[%c0_19, %c0_20] : memref<1x128xf32, #tpu.memory_space<vmem>>, vector<1x128xf32>
      tpu.vector_store %arg6[%c0_19, %c0_20], %22 {strides = array<i32>} : memref<1x128xf32, #tpu.memory_space<vmem>>, vector<1x128xf32>,
      %cst_21 = arith.constant 0.000000e+00 : f32
      %24 = vector.broadcast %cst_21 : f32 to vector<1x128xf32>
      %c0_22 = arith.constant 0 : index
      %c0_23 = arith.constant 0 : index
      %25 = vector.load %arg7[%c0_22, %c0_23] : memref<1x128xf32, #tpu.memory_space<vmem>>, vector<1x128xf32>
      tpu.vector_store %arg7[%c0_22, %c0_23], %24 {strides = array<i32>} : memref<1x128xf32, #tpu.memory_space<vmem>>, vector<1x128xf32>,
    } else {
    }
    %c0 = arith.constant 0 : index
    %c0_1 = arith.constant 0 : index
    %3 = vector.load %arg1[%c0, %c0_1] : memref<32x144xbf16, #tpu.memory_space<vmem>>, vector<32x144xbf16>
    %c0_2 = arith.constant 0 : index
    %c0_3 = arith.constant 0 : index
    %4 = vector.load %arg2[%c0_2, %c0_3] : memref<144x128xbf16, #tpu.memory_space<vmem>>, vector<144x128xbf16>
    %cst = arith.constant dense<0.000000e+00> : vector<32x128xf32>
    %5 = tpu.matmul %3, %4, %cst {dimension_numbers = #tpu.dot_dimension_numbers<[1], [0], [0], [1], [0, 0, 1, 1], [], []>} : vector<32x144xbf16>, vector<144x128xbf16>, vector<32x128xf32> -> vector<32x128xf32>
    %6 = arith.truncf %5 : vector<32x128xf32> to vector<32x128xbf16>
    %c0_4 = arith.constant 0 : index
    %c0_5 = arith.constant 0 : index
    %7 = vector.load %arg3[%c0_4, %c0_5] : memref<32x128xbf16, #tpu.memory_space<vmem>>, vector<32x128xbf16>
    tpu.vector_store %arg3[%c0_4, %c0_5], %6 {strides = array<i32>} : memref<32x128xbf16, #tpu.memory_space<vmem>>, vector<32x128xbf16>,
    %c0_6 = arith.constant 0 : index
    %c0_7 = arith.constant 0 : index
    %8 = vector.load %arg6[%c0_6, %c0_7] : memref<1x128xf32, #tpu.memory_space<vmem>>, vector<1x128xf32>
    %cst_8 = arith.constant dense<0.000000e+00> : vector<128xf32>
    %9 = vector.multi_reduction <add>, %5, %cst_8 [0] : vector<32x128xf32> to vector<128xf32>
    %10 = vector.shape_cast %9 : vector<128xf32> to vector<1x128xf32>
    %11 = arith.addf %8, %10 : vector<1x128xf32>
    %c0_9 = arith.constant 0 : index
    %c0_10 = arith.constant 0 : index
    %12 = vector.load %arg6[%c0_9, %c0_10] : memref<1x128xf32, #tpu.memory_space<vmem>>, vector<1x128xf32>
    tpu.vector_store %arg6[%c0_9, %c0_10], %11 {strides = array<i32>} : memref<1x128xf32, #tpu.memory_space<vmem>>, vector<1x128xf32>,
    %c0_11 = arith.constant 0 : index
    %c0_12 = arith.constant 0 : index
    %13 = vector.load %arg7[%c0_11, %c0_12] : memref<1x128xf32, #tpu.memory_space<vmem>>, vector<1x128xf32>
    %14 = arith.mulf %5, %5 : vector<32x128xf32>
    %cst_13 = arith.constant dense<0.000000e+00> : vector<128xf32>
    %15 = vector.multi_reduction <add>, %14, %cst_13 [0] : vector<32x128xf32> to vector<128xf32>
    %16 = vector.shape_cast %15 : vector<128xf32> to vector<1x128xf32>
    %17 = arith.addf %13, %16 : vector<1x128xf32>
    %c0_14 = arith.constant 0 : index
    %c0_15 = arith.constant 0 : index
    %18 = vector.load %arg7[%c0_14, %c0_15] : memref<1x128xf32, #tpu.memory_space<vmem>>, vector<1x128xf32>
    tpu.vector_store %arg7[%c0_14, %c0_15], %17 {strides = array<i32>} : memref<1x128xf32, #tpu.memory_space<vmem>>, vector<1x128xf32>,
    %c0_i32_16 = arith.constant 0 : i32
    %19 = arith.cmpi eq, %arg0, %c0_i32_16 : i32
    %20 = arith.extui %19 : i1 to i32
    %c0_i32_17 = arith.constant 0 : i32
    %21 = arith.cmpi ne, %20, %c0_i32_17 : i32
    scf.if %21 {
      %c0_18 = arith.constant 0 : index
      %c0_19 = arith.constant 0 : index
      %22 = vector.load %arg6[%c0_18, %c0_19] : memref<1x128xf32, #tpu.memory_space<vmem>>, vector<1x128xf32>
      %c0_20 = arith.constant 0 : index
      %c0_21 = arith.constant 0 : index
      %23 = vector.load %arg4[%c0_20, %c0_21] : memref<1x128xf32, #tpu.memory_space<vmem>>, vector<1x128xf32>
      tpu.vector_store %arg4[%c0_20, %c0_21], %22 {strides = array<i32>} : memref<1x128xf32, #tpu.memory_space<vmem>>, vector<1x128xf32>,
      %c0_22 = arith.constant 0 : index
      %c0_23 = arith.constant 0 : index
      %24 = vector.load %arg7[%c0_22, %c0_23] : memref<1x128xf32, #tpu.memory_space<vmem>>, vector<1x128xf32>
      %c0_24 = arith.constant 0 : index
      %c0_25 = arith.constant 0 : index
      %25 = vector.load %arg5[%c0_24, %c0_25] : memref<1x128xf32, #tpu.memory_space<vmem>>, vector<1x128xf32>
      tpu.vector_store %arg5[%c0_24, %c0_25], %24 {strides = array<i32>} : memref<1x128xf32, #tpu.memory_space<vmem>>, vector<1x128xf32>,
    } else {
    }
    return
  }
  func.func @transform_0(%arg0: i32) -> (i32, i32) {
    %c0_i32 = arith.constant 0 : i32
    %c0_i32_0 = arith.constant 0 : i32
    return %arg0, %c0_i32 : i32, i32
  }
  func.func @transform_1(%arg0: i32) -> (i32, i32) {
    %c0_i32 = arith.constant 0 : i32
    %c0_i32_0 = arith.constant 0 : i32
    %c0_i32_1 = arith.constant 0 : i32
    return %c0_i32, %c0_i32_0 : i32, i32
  }
  func.func @transform_2(%arg0: i32) -> (i32, i32) {
    %c0_i32 = arith.constant 0 : i32
    %c0_i32_0 = arith.constant 0 : i32
    return %arg0, %c0_i32 : i32, i32
  }
  func.func @transform_3(%arg0: i32) -> (i32, i32) {
    %c0_i32 = arith.constant 0 : i32
    %c0_i32_0 = arith.constant 0 : i32
    %c0_i32_1 = arith.constant 0 : i32
    return %c0_i32, %c0_i32_0 : i32, i32
  }
  func.func @transform_4(%arg0: i32) -> (i32, i32) {
    %c0_i32 = arith.constant 0 : i32
    %c0_i32_0 = arith.constant 0 : i32
    %c0_i32_1 = arith.constant 0 : i32
    return %c0_i32, %c0_i32_0 : i32, i32
  }
}

module attributes {stable_mosaic.version = 11 : i64} {
  func.func @_bn_apply_kernel(%arg0: i32, %arg1: memref<32x128xbf16, #tpu.memory_space<vmem>>, %arg2: memref<1x128xf32, #tpu.memory_space<vmem>>, %arg3: memref<1x128xf32, #tpu.memory_space<vmem>>, %arg4: memref<1x128xf32, #tpu.memory_space<vmem>>, %arg5: memref<1x128xf32, #tpu.memory_space<vmem>>, %arg6: memref<32x128xbf16, #tpu.memory_space<vmem>>, %arg7: memref<1x128xf32, #tpu.memory_space<vmem>>, %arg8: memref<1x128xf32, #tpu.memory_space<vmem>>, %arg9: memref<1x128xf32, #tpu.memory_space<vmem>>, %arg10: memref<1x128xf32, #tpu.memory_space<vmem>>, %arg11: memref<32x128xbf16, #tpu.memory_space<vmem>>) attributes {dimension_semantics = [#tpu.dimension_semantics<parallel>], iteration_bounds = array<i64: 1>, scalar_prefetch = 0 : i64, scratch_operands = 0 : i64, tpu.core_type = #tpu.core_type<tc>, window_params = [{transform_indices = @transform_0, window_bounds = array<i64: 32, 128>}, {pipeline_mode = #tpu.pipeline_mode<synchronous>, transform_indices = @transform_1, window_bounds = array<i64: 1, 128>}, {pipeline_mode = #tpu.pipeline_mode<synchronous>, transform_indices = @transform_2, window_bounds = array<i64: 1, 128>}, {pipeline_mode = #tpu.pipeline_mode<synchronous>, transform_indices = @transform_3, window_bounds = array<i64: 1, 128>}, {pipeline_mode = #tpu.pipeline_mode<synchronous>, transform_indices = @transform_4, window_bounds = array<i64: 1, 128>}, {transform_indices = @transform_5, window_bounds = array<i64: 32, 128>}, {pipeline_mode = #tpu.pipeline_mode<synchronous>, transform_indices = @transform_6, window_bounds = array<i64: 1, 128>}, {pipeline_mode = #tpu.pipeline_mode<synchronous>, transform_indices = @transform_7, window_bounds = array<i64: 1, 128>}, {pipeline_mode = #tpu.pipeline_mode<synchronous>, transform_indices = @transform_8, window_bounds = array<i64: 1, 128>}, {pipeline_mode = #tpu.pipeline_mode<synchronous>, transform_indices = @transform_9, window_bounds = array<i64: 1, 128>}, {transform_indices = @transform_10, window_bounds = array<i64: 32, 128>}]} {
    %c0 = arith.constant 0 : index
    %c0_0 = arith.constant 0 : index
    %0 = vector.load %arg2[%c0, %c0_0] : memref<1x128xf32, #tpu.memory_space<vmem>>, vector<1x128xf32>
    %cst = arith.constant 3.125000e-02 : f32
    %1 = vector.broadcast %cst : f32 to vector<1x128xf32>
    %2 = arith.mulf %0, %1 : vector<1x128xf32>
    %c0_1 = arith.constant 0 : index
    %c0_2 = arith.constant 0 : index
    %3 = vector.load %arg3[%c0_1, %c0_2] : memref<1x128xf32, #tpu.memory_space<vmem>>, vector<1x128xf32>
    %cst_3 = arith.constant 3.125000e-02 : f32
    %4 = vector.broadcast %cst_3 : f32 to vector<1x128xf32>
    %5 = arith.mulf %3, %4 : vector<1x128xf32>
    %6 = arith.mulf %2, %2 : vector<1x128xf32>
    %7 = arith.subf %5, %6 : vector<1x128xf32>
    %cst_4 = arith.constant 0.000000e+00 : f32
    %8 = vector.broadcast %cst_4 : f32 to vector<1x128xf32>
    %9 = arith.maximumf %7, %8 : vector<1x128xf32>
    %cst_5 = arith.constant 9.99999974E-6 : f32
    %10 = vector.broadcast %cst_5 : f32 to vector<1x128xf32>
    %11 = arith.addf %9, %10 : vector<1x128xf32>
    %12 = math.rsqrt %11 : vector<1x128xf32>
    %c0_6 = arith.constant 0 : index
    %c0_7 = arith.constant 0 : index
    %13 = vector.load %arg4[%c0_6, %c0_7] : memref<1x128xf32, #tpu.memory_space<vmem>>, vector<1x128xf32>
    %14 = arith.mulf %12, %13 : vector<1x128xf32>
    %c0_8 = arith.constant 0 : index
    %c0_9 = arith.constant 0 : index
    %15 = vector.load %arg5[%c0_8, %c0_9] : memref<1x128xf32, #tpu.memory_space<vmem>>, vector<1x128xf32>
    %16 = arith.mulf %2, %14 : vector<1x128xf32>
    %17 = arith.subf %15, %16 : vector<1x128xf32>
    %c0_10 = arith.constant 0 : index
    %c0_11 = arith.constant 0 : index
    %18 = vector.load %arg1[%c0_10, %c0_11] : memref<32x128xbf16, #tpu.memory_space<vmem>>, vector<32x128xbf16>
    %19 = arith.extf %18 : vector<32x128xbf16> to vector<32x128xf32>
    %20 = vector.broadcast %14 : vector<1x128xf32> to vector<32x128xf32>
    %21 = arith.mulf %19, %20 : vector<32x128xf32>
    %22 = vector.broadcast %17 : vector<1x128xf32> to vector<32x128xf32>
    %23 = arith.addf %21, %22 : vector<32x128xf32>
    %c0_12 = arith.constant 0 : index
    %c0_13 = arith.constant 0 : index
    %24 = vector.load %arg7[%c0_12, %c0_13] : memref<1x128xf32, #tpu.memory_space<vmem>>, vector<1x128xf32>
    %cst_14 = arith.constant 3.125000e-02 : f32
    %25 = vector.broadcast %cst_14 : f32 to vector<1x128xf32>
    %26 = arith.mulf %24, %25 : vector<1x128xf32>
    %c0_15 = arith.constant 0 : index
    %c0_16 = arith.constant 0 : index
    %27 = vector.load %arg8[%c0_15, %c0_16] : memref<1x128xf32, #tpu.memory_space<vmem>>, vector<1x128xf32>
    %cst_17 = arith.constant 3.125000e-02 : f32
    %28 = vector.broadcast %cst_17 : f32 to vector<1x128xf32>
    %29 = arith.mulf %27, %28 : vector<1x128xf32>
    %30 = arith.mulf %26, %26 : vector<1x128xf32>
    %31 = arith.subf %29, %30 : vector<1x128xf32>
    %cst_18 = arith.constant 0.000000e+00 : f32
    %32 = vector.broadcast %cst_18 : f32 to vector<1x128xf32>
    %33 = arith.maximumf %31, %32 : vector<1x128xf32>
    %cst_19 = arith.constant 9.99999974E-6 : f32
    %34 = vector.broadcast %cst_19 : f32 to vector<1x128xf32>
    %35 = arith.addf %33, %34 : vector<1x128xf32>
    %36 = math.rsqrt %35 : vector<1x128xf32>
    %c0_20 = arith.constant 0 : index
    %c0_21 = arith.constant 0 : index
    %37 = vector.load %arg9[%c0_20, %c0_21] : memref<1x128xf32, #tpu.memory_space<vmem>>, vector<1x128xf32>
    %38 = arith.mulf %36, %37 : vector<1x128xf32>
    %c0_22 = arith.constant 0 : index
    %c0_23 = arith.constant 0 : index
    %39 = vector.load %arg10[%c0_22, %c0_23] : memref<1x128xf32, #tpu.memory_space<vmem>>, vector<1x128xf32>
    %40 = arith.mulf %26, %38 : vector<1x128xf32>
    %41 = arith.subf %39, %40 : vector<1x128xf32>
    %c0_24 = arith.constant 0 : index
    %c0_25 = arith.constant 0 : index
    %42 = vector.load %arg6[%c0_24, %c0_25] : memref<32x128xbf16, #tpu.memory_space<vmem>>, vector<32x128xbf16>
    %43 = arith.extf %42 : vector<32x128xbf16> to vector<32x128xf32>
    %44 = vector.broadcast %38 : vector<1x128xf32> to vector<32x128xf32>
    %45 = arith.mulf %43, %44 : vector<32x128xf32>
    %46 = vector.broadcast %41 : vector<1x128xf32> to vector<32x128xf32>
    %47 = arith.addf %45, %46 : vector<32x128xf32>
    %48 = arith.addf %23, %47 : vector<32x128xf32>
    %cst_26 = arith.constant 0.000000e+00 : f32
    %49 = vector.broadcast %cst_26 : f32 to vector<32x128xf32>
    %50 = arith.maximumf %48, %49 : vector<32x128xf32>
    %51 = arith.truncf %50 : vector<32x128xf32> to vector<32x128xbf16>
    %c0_27 = arith.constant 0 : index
    %c0_28 = arith.constant 0 : index
    %52 = vector.load %arg11[%c0_27, %c0_28] : memref<32x128xbf16, #tpu.memory_space<vmem>>, vector<32x128xbf16>
    tpu.vector_store %arg11[%c0_27, %c0_28], %51 {strides = array<i32>} : memref<32x128xbf16, #tpu.memory_space<vmem>>, vector<32x128xbf16>,
    return
  }
  func.func @transform_0(%arg0: i32) -> (i32, i32) {
    %c0_i32 = arith.constant 0 : i32
    %c0_i32_0 = arith.constant 0 : i32
    return %arg0, %c0_i32 : i32, i32
  }
  func.func @transform_1(%arg0: i32) -> (i32, i32) {
    %c0_i32 = arith.constant 0 : i32
    %c0_i32_0 = arith.constant 0 : i32
    %c0_i32_1 = arith.constant 0 : i32
    return %c0_i32, %c0_i32_0 : i32, i32
  }
  func.func @transform_2(%arg0: i32) -> (i32, i32) {
    %c0_i32 = arith.constant 0 : i32
    %c0_i32_0 = arith.constant 0 : i32
    %c0_i32_1 = arith.constant 0 : i32
    return %c0_i32, %c0_i32_0 : i32, i32
  }
  func.func @transform_3(%arg0: i32) -> (i32, i32) {
    %c0_i32 = arith.constant 0 : i32
    %c0_i32_0 = arith.constant 0 : i32
    %c0_i32_1 = arith.constant 0 : i32
    return %c0_i32, %c0_i32_0 : i32, i32
  }
  func.func @transform_4(%arg0: i32) -> (i32, i32) {
    %c0_i32 = arith.constant 0 : i32
    %c0_i32_0 = arith.constant 0 : i32
    %c0_i32_1 = arith.constant 0 : i32
    return %c0_i32, %c0_i32_0 : i32, i32
  }
  func.func @transform_5(%arg0: i32) -> (i32, i32) {
    %c0_i32 = arith.constant 0 : i32
    %c0_i32_0 = arith.constant 0 : i32
    return %arg0, %c0_i32 : i32, i32
  }
  func.func @transform_6(%arg0: i32) -> (i32, i32) {
    %c0_i32 = arith.constant 0 : i32
    %c0_i32_0 = arith.constant 0 : i32
    %c0_i32_1 = arith.constant 0 : i32
    return %c0_i32, %c0_i32_0 : i32, i32
  }
  func.func @transform_7(%arg0: i32) -> (i32, i32) {
    %c0_i32 = arith.constant 0 : i32
    %c0_i32_0 = arith.constant 0 : i32
    %c0_i32_1 = arith.constant 0 : i32
    return %c0_i32, %c0_i32_0 : i32, i32
  }
  func.func @transform_8(%arg0: i32) -> (i32, i32) {
    %c0_i32 = arith.constant 0 : i32
    %c0_i32_0 = arith.constant 0 : i32
    %c0_i32_1 = arith.constant 0 : i32
    return %c0_i32, %c0_i32_0 : i32, i32
  }
  func.func @transform_9(%arg0: i32) -> (i32, i32) {
    %c0_i32 = arith.constant 0 : i32
    %c0_i32_0 = arith.constant 0 : i32
    %c0_i32_1 = arith.constant 0 : i32
    return %c0_i32, %c0_i32_0 : i32, i32
  }
  func.func @transform_10(%arg0: i32) -> (i32, i32) {
    %c0_i32 = arith.constant 0 : i32
    %c0_i32_0 = arith.constant 0 : i32
    return %arg0, %c0_i32 : i32, i32
  }
}

module attributes {stable_mosaic.version = 11 : i64} {
  func.func @_matmul_stats_kernel(%arg0: i32, %arg1: memref<32x288xbf16, #tpu.memory_space<vmem>>, %arg2: memref<288x128xbf16, #tpu.memory_space<vmem>>, %arg3: memref<32x16xbf16, #tpu.memory_space<vmem>>, %arg4: memref<16x128xbf16, #tpu.memory_space<vmem>>, %arg5: memref<32x128xbf16, #tpu.memory_space<vmem>>, %arg6: memref<1x128xf32, #tpu.memory_space<vmem>>, %arg7: memref<1x128xf32, #tpu.memory_space<vmem>>, %arg8: memref<32x128xbf16, #tpu.memory_space<vmem>>, %arg9: memref<1x128xf32, #tpu.memory_space<vmem>>, %arg10: memref<1x128xf32, #tpu.memory_space<vmem>>, %arg11: memref<1x128xf32, #tpu.memory_space<vmem>>, %arg12: memref<1x128xf32, #tpu.memory_space<vmem>>, %arg13: memref<1x128xf32, #tpu.memory_space<vmem>>, %arg14: memref<1x128xf32, #tpu.memory_space<vmem>>) attributes {dimension_semantics = [#tpu.dimension_semantics<arbitrary>], iteration_bounds = array<i64: 1>, scalar_prefetch = 0 : i64, scratch_operands = 4 : i64, tpu.core_type = #tpu.core_type<tc>, window_params = [{transform_indices = @transform_0, window_bounds = array<i64: 32, 288>}, {pipeline_mode = #tpu.pipeline_mode<synchronous>, transform_indices = @transform_1, window_bounds = array<i64: 288, 128>}, {transform_indices = @transform_2, window_bounds = array<i64: 32, 16>}, {pipeline_mode = #tpu.pipeline_mode<synchronous>, transform_indices = @transform_3, window_bounds = array<i64: 16, 128>}, {transform_indices = @transform_4, window_bounds = array<i64: 32, 128>}, {pipeline_mode = #tpu.pipeline_mode<synchronous>, transform_indices = @transform_5, window_bounds = array<i64: 1, 128>}, {pipeline_mode = #tpu.pipeline_mode<synchronous>, transform_indices = @transform_6, window_bounds = array<i64: 1, 128>}, {transform_indices = @transform_7, window_bounds = array<i64: 32, 128>}, {pipeline_mode = #tpu.pipeline_mode<synchronous>, transform_indices = @transform_8, window_bounds = array<i64: 1, 128>}, {pipeline_mode = #tpu.pipeline_mode<synchronous>, transform_indices = @transform_9, window_bounds = array<i64: 1, 128>}]} {
    %c0_i32 = arith.constant 0 : i32
    %0 = arith.cmpi eq, %arg0, %c0_i32 : i32
    %1 = arith.extui %0 : i1 to i32
    %c0_i32_0 = arith.constant 0 : i32
    %2 = arith.cmpi ne, %1, %c0_i32_0 : i32
    scf.if %2 {
      %cst_35 = arith.constant 0.000000e+00 : f32
      %38 = vector.broadcast %cst_35 : f32 to vector<1x128xf32>
      %c0_36 = arith.constant 0 : index
      %c0_37 = arith.constant 0 : index
      %39 = vector.load %arg11[%c0_36, %c0_37] : memref<1x128xf32, #tpu.memory_space<vmem>>, vector<1x128xf32>
      tpu.vector_store %arg11[%c0_36, %c0_37], %38 {strides = array<i32>} : memref<1x128xf32, #tpu.memory_space<vmem>>, vector<1x128xf32>,
      %cst_38 = arith.constant 0.000000e+00 : f32
      %40 = vector.broadcast %cst_38 : f32 to vector<1x128xf32>
      %c0_39 = arith.constant 0 : index
      %c0_40 = arith.constant 0 : index
      %41 = vector.load %arg12[%c0_39, %c0_40] : memref<1x128xf32, #tpu.memory_space<vmem>>, vector<1x128xf32>
      tpu.vector_store %arg12[%c0_39, %c0_40], %40 {strides = array<i32>} : memref<1x128xf32, #tpu.memory_space<vmem>>, vector<1x128xf32>,
      %cst_41 = arith.constant 0.000000e+00 : f32
      %42 = vector.broadcast %cst_41 : f32 to vector<1x128xf32>
      %c0_42 = arith.constant 0 : index
      %c0_43 = arith.constant 0 : index
      %43 = vector.load %arg13[%c0_42, %c0_43] : memref<1x128xf32, #tpu.memory_space<vmem>>, vector<1x128xf32>
      tpu.vector_store %arg13[%c0_42, %c0_43], %42 {strides = array<i32>} : memref<1x128xf32, #tpu.memory_space<vmem>>, vector<1x128xf32>,
      %cst_44 = arith.constant 0.000000e+00 : f32
      %44 = vector.broadcast %cst_44 : f32 to vector<1x128xf32>
      %c0_45 = arith.constant 0 : index
      %c0_46 = arith.constant 0 : index
      %45 = vector.load %arg14[%c0_45, %c0_46] : memref<1x128xf32, #tpu.memory_space<vmem>>, vector<1x128xf32>
      tpu.vector_store %arg14[%c0_45, %c0_46], %44 {strides = array<i32>} : memref<1x128xf32, #tpu.memory_space<vmem>>, vector<1x128xf32>,
    } else {
    }
    %c0 = arith.constant 0 : index
    %c0_1 = arith.constant 0 : index
    %3 = vector.load %arg1[%c0, %c0_1] : memref<32x288xbf16, #tpu.memory_space<vmem>>, vector<32x288xbf16>
    %c0_2 = arith.constant 0 : index
    %c0_3 = arith.constant 0 : index
    %4 = vector.load %arg2[%c0_2, %c0_3] : memref<288x128xbf16, #tpu.memory_space<vmem>>, vector<288x128xbf16>
    %cst = arith.constant dense<0.000000e+00> : vector<32x128xf32>
    %5 = tpu.matmul %3, %4, %cst {dimension_numbers = #tpu.dot_dimension_numbers<[1], [0], [0], [1], [0, 0, 1, 1], [], []>} : vector<32x288xbf16>, vector<288x128xbf16>, vector<32x128xf32> -> vector<32x128xf32>
    %6 = arith.truncf %5 : vector<32x128xf32> to vector<32x128xbf16>
    %c0_4 = arith.constant 0 : index
    %c0_5 = arith.constant 0 : index
    %7 = vector.load %arg5[%c0_4, %c0_5] : memref<32x128xbf16, #tpu.memory_space<vmem>>, vector<32x128xbf16>
    tpu.vector_store %arg5[%c0_4, %c0_5], %6 {strides = array<i32>} : memref<32x128xbf16, #tpu.memory_space<vmem>>, vector<32x128xbf16>,
    %c0_6 = arith.constant 0 : index
    %c0_7 = arith.constant 0 : index
    %8 = vector.load %arg11[%c0_6, %c0_7] : memref<1x128xf32, #tpu.memory_space<vmem>>, vector<1x128xf32>
    %cst_8 = arith.constant dense<0.000000e+00> : vector<128xf32>
    %9 = vector.multi_reduction <add>, %5, %cst_8 [0] : vector<32x128xf32> to vector<128xf32>
    %10 = vector.shape_cast %9 : vector<128xf32> to vector<1x128xf32>
    %11 = arith.addf %8, %10 : vector<1x128xf32>
    %c0_9 = arith.constant 0 : index
    %c0_10 = arith.constant 0 : index
    %12 = vector.load %arg11[%c0_9, %c0_10] : memref<1x128xf32, #tpu.memory_space<vmem>>, vector<1x128xf32>
    tpu.vector_store %arg11[%c0_9, %c0_10], %11 {strides = array<i32>} : memref<1x128xf32, #tpu.memory_space<vmem>>, vector<1x128xf32>,
    %c0_11 = arith.constant 0 : index
    %c0_12 = arith.constant 0 : index
    %13 = vector.load %arg12[%c0_11, %c0_12] : memref<1x128xf32, #tpu.memory_space<vmem>>, vector<1x128xf32>
    %14 = arith.mulf %5, %5 : vector<32x128xf32>
    %cst_13 = arith.constant dense<0.000000e+00> : vector<128xf32>
    %15 = vector.multi_reduction <add>, %14, %cst_13 [0] : vector<32x128xf32> to vector<128xf32>
    %16 = vector.shape_cast %15 : vector<128xf32> to vector<1x128xf32>
    %17 = arith.addf %13, %16 : vector<1x128xf32>
    %c0_14 = arith.constant 0 : index
    %c0_15 = arith.constant 0 : index
    %18 = vector.load %arg12[%c0_14, %c0_15] : memref<1x128xf32, #tpu.memory_space<vmem>>, vector<1x128xf32>
    tpu.vector_store %arg12[%c0_14, %c0_15], %17 {strides = array<i32>} : memref<1x128xf32, #tpu.memory_space<vmem>>, vector<1x128xf32>,
    %c0_16 = arith.constant 0 : index
    %c0_17 = arith.constant 0 : index
    %19 = vector.load %arg3[%c0_16, %c0_17] : memref<32x16xbf16, #tpu.memory_space<vmem>>, vector<32x16xbf16>
    %c0_18 = arith.constant 0 : index
    %c0_19 = arith.constant 0 : index
    %20 = vector.load %arg4[%c0_18, %c0_19] : memref<16x128xbf16, #tpu.memory_space<vmem>>, vector<16x128xbf16>
    %cst_20 = arith.constant dense<0.000000e+00> : vector<32x128xf32>
    %21 = tpu.matmul %19, %20, %cst_20 {dimension_numbers = #tpu.dot_dimension_numbers<[1], [0], [0], [1], [0, 0, 1, 1], [], []>} : vector<32x16xbf16>, vector<16x128xbf16>, vector<32x128xf32> -> vector<32x128xf32>
    %22 = arith.truncf %21 : vector<32x128xf32> to vector<32x128xbf16>
    %c0_21 = arith.constant 0 : index
    %c0_22 = arith.constant 0 : index
    %23 = vector.load %arg8[%c0_21, %c0_22] : memref<32x128xbf16, #tpu.memory_space<vmem>>, vector<32x128xbf16>
    tpu.vector_store %arg8[%c0_21, %c0_22], %22 {strides = array<i32>} : memref<32x128xbf16, #tpu.memory_space<vmem>>, vector<32x128xbf16>,
    %c0_23 = arith.constant 0 : index
    %c0_24 = arith.constant 0 : index
    %24 = vector.load %arg13[%c0_23, %c0_24] : memref<1x128xf32, #tpu.memory_space<vmem>>, vector<1x128xf32>
    %cst_25 = arith.constant dense<0.000000e+00> : vector<128xf32>
    %25 = vector.multi_reduction <add>, %21, %cst_25 [0] : vector<32x128xf32> to vector<128xf32>
    %26 = vector.shape_cast %25 : vector<128xf32> to vector<1x128xf32>
    %27 = arith.addf %24, %26 : vector<1x128xf32>
    %c0_26 = arith.constant 0 : index
    %c0_27 = arith.constant 0 : index
    %28 = vector.load %arg13[%c0_26, %c0_27] : memref<1x128xf32, #tpu.memory_space<vmem>>, vector<1x128xf32>
    tpu.vector_store %arg13[%c0_26, %c0_27], %27 {strides = array<i32>} : memref<1x128xf32, #tpu.memory_space<vmem>>, vector<1x128xf32>,
    %c0_28 = arith.constant 0 : index
    %c0_29 = arith.constant 0 : index
    %29 = vector.load %arg14[%c0_28, %c0_29] : memref<1x128xf32, #tpu.memory_space<vmem>>, vector<1x128xf32>
    %30 = arith.mulf %21, %21 : vector<32x128xf32>
    %cst_30 = arith.constant dense<0.000000e+00> : vector<128xf32>
    %31 = vector.multi_reduction <add>, %30, %cst_30 [0] : vector<32x128xf32> to vector<128xf32>
    %32 = vector.shape_cast %31 : vector<128xf32> to vector<1x128xf32>
    %33 = arith.addf %29, %32 : vector<1x128xf32>
    %c0_31 = arith.constant 0 : index
    %c0_32 = arith.constant 0 : index
    %34 = vector.load %arg14[%c0_31, %c0_32] : memref<1x128xf32, #tpu.memory_space<vmem>>, vector<1x128xf32>
    tpu.vector_store %arg14[%c0_31, %c0_32], %33 {strides = array<i32>} : memref<1x128xf32, #tpu.memory_space<vmem>>, vector<1x128xf32>,
    %c0_i32_33 = arith.constant 0 : i32
    %35 = arith.cmpi eq, %arg0, %c0_i32_33 : i32
    %36 = arith.extui %35 : i1 to i32
    %c0_i32_34 = arith.constant 0 : i32
    %37 = arith.cmpi ne, %36, %c0_i32_34 : i32
    scf.if %37 {
      %c0_35 = arith.constant 0 : index
      %c0_36 = arith.constant 0 : index
      %38 = vector.load %arg11[%c0_35, %c0_36] : memref<1x128xf32, #tpu.memory_space<vmem>>, vector<1x128xf32>
      %c0_37 = arith.constant 0 : index
      %c0_38 = arith.constant 0 : index
      %39 = vector.load %arg6[%c0_37, %c0_38] : memref<1x128xf32, #tpu.memory_space<vmem>>, vector<1x128xf32>
      tpu.vector_store %arg6[%c0_37, %c0_38], %38 {strides = array<i32>} : memref<1x128xf32, #tpu.memory_space<vmem>>, vector<1x128xf32>,
      %c0_39 = arith.constant 0 : index
      %c0_40 = arith.constant 0 : index
      %40 = vector.load %arg12[%c0_39, %c0_40] : memref<1x128xf32, #tpu.memory_space<vmem>>, vector<1x128xf32>
      %c0_41 = arith.constant 0 : index
      %c0_42 = arith.constant 0 : index
      %41 = vector.load %arg7[%c0_41, %c0_42] : memref<1x128xf32, #tpu.memory_space<vmem>>, vector<1x128xf32>
      tpu.vector_store %arg7[%c0_41, %c0_42], %40 {strides = array<i32>} : memref<1x128xf32, #tpu.memory_space<vmem>>, vector<1x128xf32>,
      %c0_43 = arith.constant 0 : index
      %c0_44 = arith.constant 0 : index
      %42 = vector.load %arg13[%c0_43, %c0_44] : memref<1x128xf32, #tpu.memory_space<vmem>>, vector<1x128xf32>
      %c0_45 = arith.constant 0 : index
      %c0_46 = arith.constant 0 : index
      %43 = vector.load %arg9[%c0_45, %c0_46] : memref<1x128xf32, #tpu.memory_space<vmem>>, vector<1x128xf32>
      tpu.vector_store %arg9[%c0_45, %c0_46], %42 {strides = array<i32>} : memref<1x128xf32, #tpu.memory_space<vmem>>, vector<1x128xf32>,
      %c0_47 = arith.constant 0 : index
      %c0_48 = arith.constant 0 : index
      %44 = vector.load %arg14[%c0_47, %c0_48] : memref<1x128xf32, #tpu.memory_space<vmem>>, vector<1x128xf32>
      %c0_49 = arith.constant 0 : index
      %c0_50 = arith.constant 0 : index
      %45 = vector.load %arg10[%c0_49, %c0_50] : memref<1x128xf32, #tpu.memory_space<vmem>>, vector<1x128xf32>
      tpu.vector_store %arg10[%c0_49, %c0_50], %44 {strides = array<i32>} : memref<1x128xf32, #tpu.memory_space<vmem>>, vector<1x128xf32>,
    } else {
    }
    return
  }
  func.func @transform_0(%arg0: i32) -> (i32, i32) {
    %c0_i32 = arith.constant 0 : i32
    %c0_i32_0 = arith.constant 0 : i32
    return %arg0, %c0_i32 : i32, i32
  }
  func.func @transform_1(%arg0: i32) -> (i32, i32) {
    %c0_i32 = arith.constant 0 : i32
    %c0_i32_0 = arith.constant 0 : i32
    %c0_i32_1 = arith.constant 0 : i32
    return %c0_i32, %c0_i32_0 : i32, i32
  }
  func.func @transform_2(%arg0: i32) -> (i32, i32) {
    %c0_i32 = arith.constant 0 : i32
    %c0_i32_0 = arith.constant 0 : i32
    return %arg0, %c0_i32 : i32, i32
  }
  func.func @transform_3(%arg0: i32) -> (i32, i32) {
    %c0_i32 = arith.constant 0 : i32
    %c0_i32_0 = arith.constant 0 : i32
    %c0_i32_1 = arith.constant 0 : i32
    return %c0_i32, %c0_i32_0 : i32, i32
  }
  func.func @transform_4(%arg0: i32) -> (i32, i32) {
    %c0_i32 = arith.constant 0 : i32
    %c0_i32_0 = arith.constant 0 : i32
    return %arg0, %c0_i32 : i32, i32
  }
  func.func @transform_5(%arg0: i32) -> (i32, i32) {
    %c0_i32 = arith.constant 0 : i32
    %c0_i32_0 = arith.constant 0 : i32
    %c0_i32_1 = arith.constant 0 : i32
    return %c0_i32, %c0_i32_0 : i32, i32
  }
  func.func @transform_6(%arg0: i32) -> (i32, i32) {
    %c0_i32 = arith.constant 0 : i32
    %c0_i32_0 = arith.constant 0 : i32
    %c0_i32_1 = arith.constant 0 : i32
    return %c0_i32, %c0_i32_0 : i32, i32
  }
  func.func @transform_7(%arg0: i32) -> (i32, i32) {
    %c0_i32 = arith.constant 0 : i32
    %c0_i32_0 = arith.constant 0 : i32
    return %arg0, %c0_i32 : i32, i32
  }
  func.func @transform_8(%arg0: i32) -> (i32, i32) {
    %c0_i32 = arith.constant 0 : i32
    %c0_i32_0 = arith.constant 0 : i32
    %c0_i32_1 = arith.constant 0 : i32
    return %c0_i32, %c0_i32_0 : i32, i32
  }
  func.func @transform_9(%arg0: i32) -> (i32, i32) {
    %c0_i32 = arith.constant 0 : i32
    %c0_i32_0 = arith.constant 0 : i32
    %c0_i32_1 = arith.constant 0 : i32
    return %c0_i32, %c0_i32_0 : i32, i32
  }
}

module attributes {stable_mosaic.version = 11 : i64} {
  func.func @_bn_apply_kernel(%arg0: i32, %arg1: memref<32x128xbf16, #tpu.memory_space<vmem>>, %arg2: memref<1x128xf32, #tpu.memory_space<vmem>>, %arg3: memref<1x128xf32, #tpu.memory_space<vmem>>, %arg4: memref<1x128xf32, #tpu.memory_space<vmem>>, %arg5: memref<1x128xf32, #tpu.memory_space<vmem>>, %arg6: memref<32x128xbf16, #tpu.memory_space<vmem>>, %arg7: memref<32x128xbf16, #tpu.memory_space<vmem>>) attributes {dimension_semantics = [#tpu.dimension_semantics<parallel>], iteration_bounds = array<i64: 1>, scalar_prefetch = 0 : i64, scratch_operands = 0 : i64, tpu.core_type = #tpu.core_type<tc>, window_params = [{transform_indices = @transform_0, window_bounds = array<i64: 32, 128>}, {pipeline_mode = #tpu.pipeline_mode<synchronous>, transform_indices = @transform_1, window_bounds = array<i64: 1, 128>}, {pipeline_mode = #tpu.pipeline_mode<synchronous>, transform_indices = @transform_2, window_bounds = array<i64: 1, 128>}, {pipeline_mode = #tpu.pipeline_mode<synchronous>, transform_indices = @transform_3, window_bounds = array<i64: 1, 128>}, {pipeline_mode = #tpu.pipeline_mode<synchronous>, transform_indices = @transform_4, window_bounds = array<i64: 1, 128>}, {transform_indices = @transform_5, window_bounds = array<i64: 32, 128>}, {transform_indices = @transform_6, window_bounds = array<i64: 32, 128>}]} {
    %c0 = arith.constant 0 : index
    %c0_0 = arith.constant 0 : index
    %0 = vector.load %arg2[%c0, %c0_0] : memref<1x128xf32, #tpu.memory_space<vmem>>, vector<1x128xf32>
    %cst = arith.constant 3.125000e-02 : f32
    %1 = vector.broadcast %cst : f32 to vector<1x128xf32>
    %2 = arith.mulf %0, %1 : vector<1x128xf32>
    %c0_1 = arith.constant 0 : index
    %c0_2 = arith.constant 0 : index
    %3 = vector.load %arg3[%c0_1, %c0_2] : memref<1x128xf32, #tpu.memory_space<vmem>>, vector<1x128xf32>
    %cst_3 = arith.constant 3.125000e-02 : f32
    %4 = vector.broadcast %cst_3 : f32 to vector<1x128xf32>
    %5 = arith.mulf %3, %4 : vector<1x128xf32>
    %6 = arith.mulf %2, %2 : vector<1x128xf32>
    %7 = arith.subf %5, %6 : vector<1x128xf32>
    %cst_4 = arith.constant 0.000000e+00 : f32
    %8 = vector.broadcast %cst_4 : f32 to vector<1x128xf32>
    %9 = arith.maximumf %7, %8 : vector<1x128xf32>
    %cst_5 = arith.constant 9.99999974E-6 : f32
    %10 = vector.broadcast %cst_5 : f32 to vector<1x128xf32>
    %11 = arith.addf %9, %10 : vector<1x128xf32>
    %12 = math.rsqrt %11 : vector<1x128xf32>
    %c0_6 = arith.constant 0 : index
    %c0_7 = arith.constant 0 : index
    %13 = vector.load %arg4[%c0_6, %c0_7] : memref<1x128xf32, #tpu.memory_space<vmem>>, vector<1x128xf32>
    %14 = arith.mulf %12, %13 : vector<1x128xf32>
    %c0_8 = arith.constant 0 : index
    %c0_9 = arith.constant 0 : index
    %15 = vector.load %arg5[%c0_8, %c0_9] : memref<1x128xf32, #tpu.memory_space<vmem>>, vector<1x128xf32>
    %16 = arith.mulf %2, %14 : vector<1x128xf32>
    %17 = arith.subf %15, %16 : vector<1x128xf32>
    %c0_10 = arith.constant 0 : index
    %c0_11 = arith.constant 0 : index
    %18 = vector.load %arg1[%c0_10, %c0_11] : memref<32x128xbf16, #tpu.memory_space<vmem>>, vector<32x128xbf16>
    %19 = arith.extf %18 : vector<32x128xbf16> to vector<32x128xf32>
    %20 = vector.broadcast %14 : vector<1x128xf32> to vector<32x128xf32>
    %21 = arith.mulf %19, %20 : vector<32x128xf32>
    %22 = vector.broadcast %17 : vector<1x128xf32> to vector<32x128xf32>
    %23 = arith.addf %21, %22 : vector<32x128xf32>
    %c0_12 = arith.constant 0 : index
    %c0_13 = arith.constant 0 : index
    %24 = vector.load %arg6[%c0_12, %c0_13] : memref<32x128xbf16, #tpu.memory_space<vmem>>, vector<32x128xbf16>
    %25 = arith.extf %24 : vector<32x128xbf16> to vector<32x128xf32>
    %26 = arith.addf %23, %25 : vector<32x128xf32>
    %cst_14 = arith.constant 0.000000e+00 : f32
    %27 = vector.broadcast %cst_14 : f32 to vector<32x128xf32>
    %28 = arith.maximumf %26, %27 : vector<32x128xf32>
    %29 = arith.truncf %28 : vector<32x128xf32> to vector<32x128xbf16>
    %c0_15 = arith.constant 0 : index
    %c0_16 = arith.constant 0 : index
    %30 = vector.load %arg7[%c0_15, %c0_16] : memref<32x128xbf16, #tpu.memory_space<vmem>>, vector<32x128xbf16>
    tpu.vector_store %arg7[%c0_15, %c0_16], %29 {strides = array<i32>} : memref<32x128xbf16, #tpu.memory_space<vmem>>, vector<32x128xbf16>,
    return
  }
  func.func @transform_0(%arg0: i32) -> (i32, i32) {
    %c0_i32 = arith.constant 0 : i32
    %c0_i32_0 = arith.constant 0 : i32
    return %arg0, %c0_i32 : i32, i32
  }
  func.func @transform_1(%arg0: i32) -> (i32, i32) {
    %c0_i32 = arith.constant 0 : i32
    %c0_i32_0 = arith.constant 0 : i32
    %c0_i32_1 = arith.constant 0 : i32
    return %c0_i32, %c0_i32_0 : i32, i32
  }
  func.func @transform_2(%arg0: i32) -> (i32, i32) {
    %c0_i32 = arith.constant 0 : i32
    %c0_i32_0 = arith.constant 0 : i32
    %c0_i32_1 = arith.constant 0 : i32
    return %c0_i32, %c0_i32_0 : i32, i32
  }
  func.func @transform_3(%arg0: i32) -> (i32, i32) {
    %c0_i32 = arith.constant 0 : i32
    %c0_i32_0 = arith.constant 0 : i32
    %c0_i32_1 = arith.constant 0 : i32
    return %c0_i32, %c0_i32_0 : i32, i32
  }
  func.func @transform_4(%arg0: i32) -> (i32, i32) {
    %c0_i32 = arith.constant 0 : i32
    %c0_i32_0 = arith.constant 0 : i32
    %c0_i32_1 = arith.constant 0 : i32
    return %c0_i32, %c0_i32_0 : i32, i32
  }
  func.func @transform_5(%arg0: i32) -> (i32, i32) {
    %c0_i32 = arith.constant 0 : i32
    %c0_i32_0 = arith.constant 0 : i32
    return %arg0, %c0_i32 : i32, i32
  }
  func.func @transform_6(%arg0: i32) -> (i32, i32) {
    %c0_i32 = arith.constant 0 : i32
    %c0_i32_0 = arith.constant 0 : i32
    return %arg0, %c0_i32 : i32, i32
  }
}

module attributes {stable_mosaic.version = 11 : i64} {
  func.func @_matmul_stats_kernel(%arg0: i32, %arg1: memref<32x288xbf16, #tpu.memory_space<vmem>>, %arg2: memref<288x128xbf16, #tpu.memory_space<vmem>>, %arg3: memref<32x128xbf16, #tpu.memory_space<vmem>>, %arg4: memref<1x128xf32, #tpu.memory_space<vmem>>, %arg5: memref<1x128xf32, #tpu.memory_space<vmem>>, %arg6: memref<1x128xf32, #tpu.memory_space<vmem>>, %arg7: memref<1x128xf32, #tpu.memory_space<vmem>>) attributes {dimension_semantics = [#tpu.dimension_semantics<arbitrary>], iteration_bounds = array<i64: 1>, scalar_prefetch = 0 : i64, scratch_operands = 2 : i64, tpu.core_type = #tpu.core_type<tc>, window_params = [{transform_indices = @transform_0, window_bounds = array<i64: 32, 288>}, {pipeline_mode = #tpu.pipeline_mode<synchronous>, transform_indices = @transform_1, window_bounds = array<i64: 288, 128>}, {transform_indices = @transform_2, window_bounds = array<i64: 32, 128>}, {pipeline_mode = #tpu.pipeline_mode<synchronous>, transform_indices = @transform_3, window_bounds = array<i64: 1, 128>}, {pipeline_mode = #tpu.pipeline_mode<synchronous>, transform_indices = @transform_4, window_bounds = array<i64: 1, 128>}]} {
    %c0_i32 = arith.constant 0 : i32
    %0 = arith.cmpi eq, %arg0, %c0_i32 : i32
    %1 = arith.extui %0 : i1 to i32
    %c0_i32_0 = arith.constant 0 : i32
    %2 = arith.cmpi ne, %1, %c0_i32_0 : i32
    scf.if %2 {
      %cst_18 = arith.constant 0.000000e+00 : f32
      %22 = vector.broadcast %cst_18 : f32 to vector<1x128xf32>
      %c0_19 = arith.constant 0 : index
      %c0_20 = arith.constant 0 : index
      %23 = vector.load %arg6[%c0_19, %c0_20] : memref<1x128xf32, #tpu.memory_space<vmem>>, vector<1x128xf32>
      tpu.vector_store %arg6[%c0_19, %c0_20], %22 {strides = array<i32>} : memref<1x128xf32, #tpu.memory_space<vmem>>, vector<1x128xf32>,
      %cst_21 = arith.constant 0.000000e+00 : f32
      %24 = vector.broadcast %cst_21 : f32 to vector<1x128xf32>
      %c0_22 = arith.constant 0 : index
      %c0_23 = arith.constant 0 : index
      %25 = vector.load %arg7[%c0_22, %c0_23] : memref<1x128xf32, #tpu.memory_space<vmem>>, vector<1x128xf32>
      tpu.vector_store %arg7[%c0_22, %c0_23], %24 {strides = array<i32>} : memref<1x128xf32, #tpu.memory_space<vmem>>, vector<1x128xf32>,
    } else {
    }
    %c0 = arith.constant 0 : index
    %c0_1 = arith.constant 0 : index
    %3 = vector.load %arg1[%c0, %c0_1] : memref<32x288xbf16, #tpu.memory_space<vmem>>, vector<32x288xbf16>
    %c0_2 = arith.constant 0 : index
    %c0_3 = arith.constant 0 : index
    %4 = vector.load %arg2[%c0_2, %c0_3] : memref<288x128xbf16, #tpu.memory_space<vmem>>, vector<288x128xbf16>
    %cst = arith.constant dense<0.000000e+00> : vector<32x128xf32>
    %5 = tpu.matmul %3, %4, %cst {dimension_numbers = #tpu.dot_dimension_numbers<[1], [0], [0], [1], [0, 0, 1, 1], [], []>} : vector<32x288xbf16>, vector<288x128xbf16>, vector<32x128xf32> -> vector<32x128xf32>
    %6 = arith.truncf %5 : vector<32x128xf32> to vector<32x128xbf16>
    %c0_4 = arith.constant 0 : index
    %c0_5 = arith.constant 0 : index
    %7 = vector.load %arg3[%c0_4, %c0_5] : memref<32x128xbf16, #tpu.memory_space<vmem>>, vector<32x128xbf16>
    tpu.vector_store %arg3[%c0_4, %c0_5], %6 {strides = array<i32>} : memref<32x128xbf16, #tpu.memory_space<vmem>>, vector<32x128xbf16>,
    %c0_6 = arith.constant 0 : index
    %c0_7 = arith.constant 0 : index
    %8 = vector.load %arg6[%c0_6, %c0_7] : memref<1x128xf32, #tpu.memory_space<vmem>>, vector<1x128xf32>
    %cst_8 = arith.constant dense<0.000000e+00> : vector<128xf32>
    %9 = vector.multi_reduction <add>, %5, %cst_8 [0] : vector<32x128xf32> to vector<128xf32>
    %10 = vector.shape_cast %9 : vector<128xf32> to vector<1x128xf32>
    %11 = arith.addf %8, %10 : vector<1x128xf32>
    %c0_9 = arith.constant 0 : index
    %c0_10 = arith.constant 0 : index
    %12 = vector.load %arg6[%c0_9, %c0_10] : memref<1x128xf32, #tpu.memory_space<vmem>>, vector<1x128xf32>
    tpu.vector_store %arg6[%c0_9, %c0_10], %11 {strides = array<i32>} : memref<1x128xf32, #tpu.memory_space<vmem>>, vector<1x128xf32>,
    %c0_11 = arith.constant 0 : index
    %c0_12 = arith.constant 0 : index
    %13 = vector.load %arg7[%c0_11, %c0_12] : memref<1x128xf32, #tpu.memory_space<vmem>>, vector<1x128xf32>
    %14 = arith.mulf %5, %5 : vector<32x128xf32>
    %cst_13 = arith.constant dense<0.000000e+00> : vector<128xf32>
    %15 = vector.multi_reduction <add>, %14, %cst_13 [0] : vector<32x128xf32> to vector<128xf32>
    %16 = vector.shape_cast %15 : vector<128xf32> to vector<1x128xf32>
    %17 = arith.addf %13, %16 : vector<1x128xf32>
    %c0_14 = arith.constant 0 : index
    %c0_15 = arith.constant 0 : index
    %18 = vector.load %arg7[%c0_14, %c0_15] : memref<1x128xf32, #tpu.memory_space<vmem>>, vector<1x128xf32>
    tpu.vector_store %arg7[%c0_14, %c0_15], %17 {strides = array<i32>} : memref<1x128xf32, #tpu.memory_space<vmem>>, vector<1x128xf32>,
    %c0_i32_16 = arith.constant 0 : i32
    %19 = arith.cmpi eq, %arg0, %c0_i32_16 : i32
    %20 = arith.extui %19 : i1 to i32
    %c0_i32_17 = arith.constant 0 : i32
    %21 = arith.cmpi ne, %20, %c0_i32_17 : i32
    scf.if %21 {
      %c0_18 = arith.constant 0 : index
      %c0_19 = arith.constant 0 : index
      %22 = vector.load %arg6[%c0_18, %c0_19] : memref<1x128xf32, #tpu.memory_space<vmem>>, vector<1x128xf32>
      %c0_20 = arith.constant 0 : index
      %c0_21 = arith.constant 0 : index
      %23 = vector.load %arg4[%c0_20, %c0_21] : memref<1x128xf32, #tpu.memory_space<vmem>>, vector<1x128xf32>
      tpu.vector_store %arg4[%c0_20, %c0_21], %22 {strides = array<i32>} : memref<1x128xf32, #tpu.memory_space<vmem>>, vector<1x128xf32>,
      %c0_22 = arith.constant 0 : index
      %c0_23 = arith.constant 0 : index
      %24 = vector.load %arg7[%c0_22, %c0_23] : memref<1x128xf32, #tpu.memory_space<vmem>>, vector<1x128xf32>
      %c0_24 = arith.constant 0 : index
      %c0_25 = arith.constant 0 : index
      %25 = vector.load %arg5[%c0_24, %c0_25] : memref<1x128xf32, #tpu.memory_space<vmem>>, vector<1x128xf32>
      tpu.vector_store %arg5[%c0_24, %c0_25], %24 {strides = array<i32>} : memref<1x128xf32, #tpu.memory_space<vmem>>, vector<1x128xf32>,
    } else {
    }
    return
  }
  func.func @transform_0(%arg0: i32) -> (i32, i32) {
    %c0_i32 = arith.constant 0 : i32
    %c0_i32_0 = arith.constant 0 : i32
    return %arg0, %c0_i32 : i32, i32
  }
  func.func @transform_1(%arg0: i32) -> (i32, i32) {
    %c0_i32 = arith.constant 0 : i32
    %c0_i32_0 = arith.constant 0 : i32
    %c0_i32_1 = arith.constant 0 : i32
    return %c0_i32, %c0_i32_0 : i32, i32
  }
  func.func @transform_2(%arg0: i32) -> (i32, i32) {
    %c0_i32 = arith.constant 0 : i32
    %c0_i32_0 = arith.constant 0 : i32
    return %arg0, %c0_i32 : i32, i32
  }
  func.func @transform_3(%arg0: i32) -> (i32, i32) {
    %c0_i32 = arith.constant 0 : i32
    %c0_i32_0 = arith.constant 0 : i32
    %c0_i32_1 = arith.constant 0 : i32
    return %c0_i32, %c0_i32_0 : i32, i32
  }
  func.func @transform_4(%arg0: i32) -> (i32, i32) {
    %c0_i32 = arith.constant 0 : i32
    %c0_i32_0 = arith.constant 0 : i32
    %c0_i32_1 = arith.constant 0 : i32
    return %c0_i32, %c0_i32_0 : i32, i32
  }
}

module attributes {stable_mosaic.version = 11 : i64} {
  func.func @_matmul_stats_kernel(%arg0: i32, %arg1: memref<8x288xbf16, #tpu.memory_space<vmem>>, %arg2: memref<288x128xbf16, #tpu.memory_space<vmem>>, %arg3: memref<8x128xbf16, #tpu.memory_space<vmem>>, %arg4: memref<1x128xf32, #tpu.memory_space<vmem>>, %arg5: memref<1x128xf32, #tpu.memory_space<vmem>>, %arg6: memref<1x128xf32, #tpu.memory_space<vmem>>, %arg7: memref<1x128xf32, #tpu.memory_space<vmem>>) attributes {dimension_semantics = [#tpu.dimension_semantics<arbitrary>], iteration_bounds = array<i64: 1>, scalar_prefetch = 0 : i64, scratch_operands = 2 : i64, tpu.core_type = #tpu.core_type<tc>, window_params = [{transform_indices = @transform_0, window_bounds = array<i64: 8, 288>}, {pipeline_mode = #tpu.pipeline_mode<synchronous>, transform_indices = @transform_1, window_bounds = array<i64: 288, 128>}, {transform_indices = @transform_2, window_bounds = array<i64: 8, 128>}, {pipeline_mode = #tpu.pipeline_mode<synchronous>, transform_indices = @transform_3, window_bounds = array<i64: 1, 128>}, {pipeline_mode = #tpu.pipeline_mode<synchronous>, transform_indices = @transform_4, window_bounds = array<i64: 1, 128>}]} {
    %c0_i32 = arith.constant 0 : i32
    %0 = arith.cmpi eq, %arg0, %c0_i32 : i32
    %1 = arith.extui %0 : i1 to i32
    %c0_i32_0 = arith.constant 0 : i32
    %2 = arith.cmpi ne, %1, %c0_i32_0 : i32
    scf.if %2 {
      %cst_18 = arith.constant 0.000000e+00 : f32
      %22 = vector.broadcast %cst_18 : f32 to vector<1x128xf32>
      %c0_19 = arith.constant 0 : index
      %c0_20 = arith.constant 0 : index
      %23 = vector.load %arg6[%c0_19, %c0_20] : memref<1x128xf32, #tpu.memory_space<vmem>>, vector<1x128xf32>
      tpu.vector_store %arg6[%c0_19, %c0_20], %22 {strides = array<i32>} : memref<1x128xf32, #tpu.memory_space<vmem>>, vector<1x128xf32>,
      %cst_21 = arith.constant 0.000000e+00 : f32
      %24 = vector.broadcast %cst_21 : f32 to vector<1x128xf32>
      %c0_22 = arith.constant 0 : index
      %c0_23 = arith.constant 0 : index
      %25 = vector.load %arg7[%c0_22, %c0_23] : memref<1x128xf32, #tpu.memory_space<vmem>>, vector<1x128xf32>
      tpu.vector_store %arg7[%c0_22, %c0_23], %24 {strides = array<i32>} : memref<1x128xf32, #tpu.memory_space<vmem>>, vector<1x128xf32>,
    } else {
    }
    %c0 = arith.constant 0 : index
    %c0_1 = arith.constant 0 : index
    %3 = vector.load %arg1[%c0, %c0_1] : memref<8x288xbf16, #tpu.memory_space<vmem>>, vector<8x288xbf16>
    %c0_2 = arith.constant 0 : index
    %c0_3 = arith.constant 0 : index
    %4 = vector.load %arg2[%c0_2, %c0_3] : memref<288x128xbf16, #tpu.memory_space<vmem>>, vector<288x128xbf16>
    %cst = arith.constant dense<0.000000e+00> : vector<8x128xf32>
    %5 = tpu.matmul %3, %4, %cst {dimension_numbers = #tpu.dot_dimension_numbers<[1], [0], [0], [1], [0, 0, 1, 1], [], []>} : vector<8x288xbf16>, vector<288x128xbf16>, vector<8x128xf32> -> vector<8x128xf32>
    %6 = arith.truncf %5 : vector<8x128xf32> to vector<8x128xbf16>
    %c0_4 = arith.constant 0 : index
    %c0_5 = arith.constant 0 : index
    %7 = vector.load %arg3[%c0_4, %c0_5] : memref<8x128xbf16, #tpu.memory_space<vmem>>, vector<8x128xbf16>
    tpu.vector_store %arg3[%c0_4, %c0_5], %6 {strides = array<i32>} : memref<8x128xbf16, #tpu.memory_space<vmem>>, vector<8x128xbf16>,
    %c0_6 = arith.constant 0 : index
    %c0_7 = arith.constant 0 : index
    %8 = vector.load %arg6[%c0_6, %c0_7] : memref<1x128xf32, #tpu.memory_space<vmem>>, vector<1x128xf32>
    %cst_8 = arith.constant dense<0.000000e+00> : vector<128xf32>
    %9 = vector.multi_reduction <add>, %5, %cst_8 [0] : vector<8x128xf32> to vector<128xf32>
    %10 = vector.shape_cast %9 : vector<128xf32> to vector<1x128xf32>
    %11 = arith.addf %8, %10 : vector<1x128xf32>
    %c0_9 = arith.constant 0 : index
    %c0_10 = arith.constant 0 : index
    %12 = vector.load %arg6[%c0_9, %c0_10] : memref<1x128xf32, #tpu.memory_space<vmem>>, vector<1x128xf32>
    tpu.vector_store %arg6[%c0_9, %c0_10], %11 {strides = array<i32>} : memref<1x128xf32, #tpu.memory_space<vmem>>, vector<1x128xf32>,
    %c0_11 = arith.constant 0 : index
    %c0_12 = arith.constant 0 : index
    %13 = vector.load %arg7[%c0_11, %c0_12] : memref<1x128xf32, #tpu.memory_space<vmem>>, vector<1x128xf32>
    %14 = arith.mulf %5, %5 : vector<8x128xf32>
    %cst_13 = arith.constant dense<0.000000e+00> : vector<128xf32>
    %15 = vector.multi_reduction <add>, %14, %cst_13 [0] : vector<8x128xf32> to vector<128xf32>
    %16 = vector.shape_cast %15 : vector<128xf32> to vector<1x128xf32>
    %17 = arith.addf %13, %16 : vector<1x128xf32>
    %c0_14 = arith.constant 0 : index
    %c0_15 = arith.constant 0 : index
    %18 = vector.load %arg7[%c0_14, %c0_15] : memref<1x128xf32, #tpu.memory_space<vmem>>, vector<1x128xf32>
    tpu.vector_store %arg7[%c0_14, %c0_15], %17 {strides = array<i32>} : memref<1x128xf32, #tpu.memory_space<vmem>>, vector<1x128xf32>,
    %c0_i32_16 = arith.constant 0 : i32
    %19 = arith.cmpi eq, %arg0, %c0_i32_16 : i32
    %20 = arith.extui %19 : i1 to i32
    %c0_i32_17 = arith.constant 0 : i32
    %21 = arith.cmpi ne, %20, %c0_i32_17 : i32
    scf.if %21 {
      %c0_18 = arith.constant 0 : index
      %c0_19 = arith.constant 0 : index
      %22 = vector.load %arg6[%c0_18, %c0_19] : memref<1x128xf32, #tpu.memory_space<vmem>>, vector<1x128xf32>
      %c0_20 = arith.constant 0 : index
      %c0_21 = arith.constant 0 : index
      %23 = vector.load %arg4[%c0_20, %c0_21] : memref<1x128xf32, #tpu.memory_space<vmem>>, vector<1x128xf32>
      tpu.vector_store %arg4[%c0_20, %c0_21], %22 {strides = array<i32>} : memref<1x128xf32, #tpu.memory_space<vmem>>, vector<1x128xf32>,
      %c0_22 = arith.constant 0 : index
      %c0_23 = arith.constant 0 : index
      %24 = vector.load %arg7[%c0_22, %c0_23] : memref<1x128xf32, #tpu.memory_space<vmem>>, vector<1x128xf32>
      %c0_24 = arith.constant 0 : index
      %c0_25 = arith.constant 0 : index
      %25 = vector.load %arg5[%c0_24, %c0_25] : memref<1x128xf32, #tpu.memory_space<vmem>>, vector<1x128xf32>
      tpu.vector_store %arg5[%c0_24, %c0_25], %24 {strides = array<i32>} : memref<1x128xf32, #tpu.memory_space<vmem>>, vector<1x128xf32>,
    } else {
    }
    return
  }
  func.func @transform_0(%arg0: i32) -> (i32, i32) {
    %c0_i32 = arith.constant 0 : i32
    %c0_i32_0 = arith.constant 0 : i32
    return %arg0, %c0_i32 : i32, i32
  }
  func.func @transform_1(%arg0: i32) -> (i32, i32) {
    %c0_i32 = arith.constant 0 : i32
    %c0_i32_0 = arith.constant 0 : i32
    %c0_i32_1 = arith.constant 0 : i32
    return %c0_i32, %c0_i32_0 : i32, i32
  }
  func.func @transform_2(%arg0: i32) -> (i32, i32) {
    %c0_i32 = arith.constant 0 : i32
    %c0_i32_0 = arith.constant 0 : i32
    return %arg0, %c0_i32 : i32, i32
  }
  func.func @transform_3(%arg0: i32) -> (i32, i32) {
    %c0_i32 = arith.constant 0 : i32
    %c0_i32_0 = arith.constant 0 : i32
    %c0_i32_1 = arith.constant 0 : i32
    return %c0_i32, %c0_i32_0 : i32, i32
  }
  func.func @transform_4(%arg0: i32) -> (i32, i32) {
    %c0_i32 = arith.constant 0 : i32
    %c0_i32_0 = arith.constant 0 : i32
    %c0_i32_1 = arith.constant 0 : i32
    return %c0_i32, %c0_i32_0 : i32, i32
  }
}

module attributes {stable_mosaic.version = 11 : i64} {
  func.func @_bn_apply_kernel(%arg0: i32, %arg1: memref<8x128xbf16, #tpu.memory_space<vmem>>, %arg2: memref<1x128xf32, #tpu.memory_space<vmem>>, %arg3: memref<1x128xf32, #tpu.memory_space<vmem>>, %arg4: memref<1x128xf32, #tpu.memory_space<vmem>>, %arg5: memref<1x128xf32, #tpu.memory_space<vmem>>, %arg6: memref<8x128xbf16, #tpu.memory_space<vmem>>) attributes {dimension_semantics = [#tpu.dimension_semantics<parallel>], iteration_bounds = array<i64: 1>, scalar_prefetch = 0 : i64, scratch_operands = 0 : i64, tpu.core_type = #tpu.core_type<tc>, window_params = [{transform_indices = @transform_0, window_bounds = array<i64: 8, 128>}, {pipeline_mode = #tpu.pipeline_mode<synchronous>, transform_indices = @transform_1, window_bounds = array<i64: 1, 128>}, {pipeline_mode = #tpu.pipeline_mode<synchronous>, transform_indices = @transform_2, window_bounds = array<i64: 1, 128>}, {pipeline_mode = #tpu.pipeline_mode<synchronous>, transform_indices = @transform_3, window_bounds = array<i64: 1, 128>}, {pipeline_mode = #tpu.pipeline_mode<synchronous>, transform_indices = @transform_4, window_bounds = array<i64: 1, 128>}, {transform_indices = @transform_5, window_bounds = array<i64: 8, 128>}]} {
    %c0 = arith.constant 0 : index
    %c0_0 = arith.constant 0 : index
    %0 = vector.load %arg2[%c0, %c0_0] : memref<1x128xf32, #tpu.memory_space<vmem>>, vector<1x128xf32>
    %cst = arith.constant 1.250000e-01 : f32
    %1 = vector.broadcast %cst : f32 to vector<1x128xf32>
    %2 = arith.mulf %0, %1 : vector<1x128xf32>
    %c0_1 = arith.constant 0 : index
    %c0_2 = arith.constant 0 : index
    %3 = vector.load %arg3[%c0_1, %c0_2] : memref<1x128xf32, #tpu.memory_space<vmem>>, vector<1x128xf32>
    %cst_3 = arith.constant 1.250000e-01 : f32
    %4 = vector.broadcast %cst_3 : f32 to vector<1x128xf32>
    %5 = arith.mulf %3, %4 : vector<1x128xf32>
    %6 = arith.mulf %2, %2 : vector<1x128xf32>
    %7 = arith.subf %5, %6 : vector<1x128xf32>
    %cst_4 = arith.constant 0.000000e+00 : f32
    %8 = vector.broadcast %cst_4 : f32 to vector<1x128xf32>
    %9 = arith.maximumf %7, %8 : vector<1x128xf32>
    %cst_5 = arith.constant 9.99999974E-6 : f32
    %10 = vector.broadcast %cst_5 : f32 to vector<1x128xf32>
    %11 = arith.addf %9, %10 : vector<1x128xf32>
    %12 = math.rsqrt %11 : vector<1x128xf32>
    %c0_6 = arith.constant 0 : index
    %c0_7 = arith.constant 0 : index
    %13 = vector.load %arg4[%c0_6, %c0_7] : memref<1x128xf32, #tpu.memory_space<vmem>>, vector<1x128xf32>
    %14 = arith.mulf %12, %13 : vector<1x128xf32>
    %c0_8 = arith.constant 0 : index
    %c0_9 = arith.constant 0 : index
    %15 = vector.load %arg5[%c0_8, %c0_9] : memref<1x128xf32, #tpu.memory_space<vmem>>, vector<1x128xf32>
    %16 = arith.mulf %2, %14 : vector<1x128xf32>
    %17 = arith.subf %15, %16 : vector<1x128xf32>
    %c0_10 = arith.constant 0 : index
    %c0_11 = arith.constant 0 : index
    %18 = vector.load %arg1[%c0_10, %c0_11] : memref<8x128xbf16, #tpu.memory_space<vmem>>, vector<8x128xbf16>
    %19 = arith.extf %18 : vector<8x128xbf16> to vector<8x128xf32>
    %20 = vector.broadcast %14 : vector<1x128xf32> to vector<8x128xf32>
    %21 = arith.mulf %19, %20 : vector<8x128xf32>
    %22 = vector.broadcast %17 : vector<1x128xf32> to vector<8x128xf32>
    %23 = arith.addf %21, %22 : vector<8x128xf32>
    %cst_12 = arith.constant 0.000000e+00 : f32
    %24 = vector.broadcast %cst_12 : f32 to vector<8x128xf32>
    %25 = arith.maximumf %23, %24 : vector<8x128xf32>
    %26 = arith.truncf %25 : vector<8x128xf32> to vector<8x128xbf16>
    %c0_13 = arith.constant 0 : index
    %c0_14 = arith.constant 0 : index
    %27 = vector.load %arg6[%c0_13, %c0_14] : memref<8x128xbf16, #tpu.memory_space<vmem>>, vector<8x128xbf16>
    tpu.vector_store %arg6[%c0_13, %c0_14], %26 {strides = array<i32>} : memref<8x128xbf16, #tpu.memory_space<vmem>>, vector<8x128xbf16>,
    return
  }
  func.func @transform_0(%arg0: i32) -> (i32, i32) {
    %c0_i32 = arith.constant 0 : i32
    %c0_i32_0 = arith.constant 0 : i32
    return %arg0, %c0_i32 : i32, i32
  }
  func.func @transform_1(%arg0: i32) -> (i32, i32) {
    %c0_i32 = arith.constant 0 : i32
    %c0_i32_0 = arith.constant 0 : i32
    %c0_i32_1 = arith.constant 0 : i32
    return %c0_i32, %c0_i32_0 : i32, i32
  }
  func.func @transform_2(%arg0: i32) -> (i32, i32) {
    %c0_i32 = arith.constant 0 : i32
    %c0_i32_0 = arith.constant 0 : i32
    %c0_i32_1 = arith.constant 0 : i32
    return %c0_i32, %c0_i32_0 : i32, i32
  }
  func.func @transform_3(%arg0: i32) -> (i32, i32) {
    %c0_i32 = arith.constant 0 : i32
    %c0_i32_0 = arith.constant 0 : i32
    %c0_i32_1 = arith.constant 0 : i32
    return %c0_i32, %c0_i32_0 : i32, i32
  }
  func.func @transform_4(%arg0: i32) -> (i32, i32) {
    %c0_i32 = arith.constant 0 : i32
    %c0_i32_0 = arith.constant 0 : i32
    %c0_i32_1 = arith.constant 0 : i32
    return %c0_i32, %c0_i32_0 : i32, i32
  }
  func.func @transform_5(%arg0: i32) -> (i32, i32) {
    %c0_i32 = arith.constant 0 : i32
    %c0_i32_0 = arith.constant 0 : i32
    return %arg0, %c0_i32 : i32, i32
  }
}

module attributes {stable_mosaic.version = 11 : i64} {
  func.func @_matmul_stats_kernel(%arg0: i32, %arg1: memref<8x576xbf16, #tpu.memory_space<vmem>>, %arg2: memref<576x128xbf16, #tpu.memory_space<vmem>>, %arg3: memref<8x128xbf16, #tpu.memory_space<vmem>>, %arg4: memref<1x128xf32, #tpu.memory_space<vmem>>, %arg5: memref<1x128xf32, #tpu.memory_space<vmem>>, %arg6: memref<1x128xf32, #tpu.memory_space<vmem>>, %arg7: memref<1x128xf32, #tpu.memory_space<vmem>>) attributes {dimension_semantics = [#tpu.dimension_semantics<arbitrary>], iteration_bounds = array<i64: 1>, scalar_prefetch = 0 : i64, scratch_operands = 2 : i64, tpu.core_type = #tpu.core_type<tc>, window_params = [{transform_indices = @transform_0, window_bounds = array<i64: 8, 576>}, {pipeline_mode = #tpu.pipeline_mode<synchronous>, transform_indices = @transform_1, window_bounds = array<i64: 576, 128>}, {transform_indices = @transform_2, window_bounds = array<i64: 8, 128>}, {pipeline_mode = #tpu.pipeline_mode<synchronous>, transform_indices = @transform_3, window_bounds = array<i64: 1, 128>}, {pipeline_mode = #tpu.pipeline_mode<synchronous>, transform_indices = @transform_4, window_bounds = array<i64: 1, 128>}]} {
    %c0_i32 = arith.constant 0 : i32
    %0 = arith.cmpi eq, %arg0, %c0_i32 : i32
    %1 = arith.extui %0 : i1 to i32
    %c0_i32_0 = arith.constant 0 : i32
    %2 = arith.cmpi ne, %1, %c0_i32_0 : i32
    scf.if %2 {
      %cst_18 = arith.constant 0.000000e+00 : f32
      %22 = vector.broadcast %cst_18 : f32 to vector<1x128xf32>
      %c0_19 = arith.constant 0 : index
      %c0_20 = arith.constant 0 : index
      %23 = vector.load %arg6[%c0_19, %c0_20] : memref<1x128xf32, #tpu.memory_space<vmem>>, vector<1x128xf32>
      tpu.vector_store %arg6[%c0_19, %c0_20], %22 {strides = array<i32>} : memref<1x128xf32, #tpu.memory_space<vmem>>, vector<1x128xf32>,
      %cst_21 = arith.constant 0.000000e+00 : f32
      %24 = vector.broadcast %cst_21 : f32 to vector<1x128xf32>
      %c0_22 = arith.constant 0 : index
      %c0_23 = arith.constant 0 : index
      %25 = vector.load %arg7[%c0_22, %c0_23] : memref<1x128xf32, #tpu.memory_space<vmem>>, vector<1x128xf32>
      tpu.vector_store %arg7[%c0_22, %c0_23], %24 {strides = array<i32>} : memref<1x128xf32, #tpu.memory_space<vmem>>, vector<1x128xf32>,
    } else {
    }
    %c0 = arith.constant 0 : index
    %c0_1 = arith.constant 0 : index
    %3 = vector.load %arg1[%c0, %c0_1] : memref<8x576xbf16, #tpu.memory_space<vmem>>, vector<8x576xbf16>
    %c0_2 = arith.constant 0 : index
    %c0_3 = arith.constant 0 : index
    %4 = vector.load %arg2[%c0_2, %c0_3] : memref<576x128xbf16, #tpu.memory_space<vmem>>, vector<576x128xbf16>
    %cst = arith.constant dense<0.000000e+00> : vector<8x128xf32>
    %5 = tpu.matmul %3, %4, %cst {dimension_numbers = #tpu.dot_dimension_numbers<[1], [0], [0], [1], [0, 0, 1, 1], [], []>} : vector<8x576xbf16>, vector<576x128xbf16>, vector<8x128xf32> -> vector<8x128xf32>
    %6 = arith.truncf %5 : vector<8x128xf32> to vector<8x128xbf16>
    %c0_4 = arith.constant 0 : index
    %c0_5 = arith.constant 0 : index
    %7 = vector.load %arg3[%c0_4, %c0_5] : memref<8x128xbf16, #tpu.memory_space<vmem>>, vector<8x128xbf16>
    tpu.vector_store %arg3[%c0_4, %c0_5], %6 {strides = array<i32>} : memref<8x128xbf16, #tpu.memory_space<vmem>>, vector<8x128xbf16>,
    %c0_6 = arith.constant 0 : index
    %c0_7 = arith.constant 0 : index
    %8 = vector.load %arg6[%c0_6, %c0_7] : memref<1x128xf32, #tpu.memory_space<vmem>>, vector<1x128xf32>
    %cst_8 = arith.constant dense<0.000000e+00> : vector<128xf32>
    %9 = vector.multi_reduction <add>, %5, %cst_8 [0] : vector<8x128xf32> to vector<128xf32>
    %10 = vector.shape_cast %9 : vector<128xf32> to vector<1x128xf32>
    %11 = arith.addf %8, %10 : vector<1x128xf32>
    %c0_9 = arith.constant 0 : index
    %c0_10 = arith.constant 0 : index
    %12 = vector.load %arg6[%c0_9, %c0_10] : memref<1x128xf32, #tpu.memory_space<vmem>>, vector<1x128xf32>
    tpu.vector_store %arg6[%c0_9, %c0_10], %11 {strides = array<i32>} : memref<1x128xf32, #tpu.memory_space<vmem>>, vector<1x128xf32>,
    %c0_11 = arith.constant 0 : index
    %c0_12 = arith.constant 0 : index
    %13 = vector.load %arg7[%c0_11, %c0_12] : memref<1x128xf32, #tpu.memory_space<vmem>>, vector<1x128xf32>
    %14 = arith.mulf %5, %5 : vector<8x128xf32>
    %cst_13 = arith.constant dense<0.000000e+00> : vector<128xf32>
    %15 = vector.multi_reduction <add>, %14, %cst_13 [0] : vector<8x128xf32> to vector<128xf32>
    %16 = vector.shape_cast %15 : vector<128xf32> to vector<1x128xf32>
    %17 = arith.addf %13, %16 : vector<1x128xf32>
    %c0_14 = arith.constant 0 : index
    %c0_15 = arith.constant 0 : index
    %18 = vector.load %arg7[%c0_14, %c0_15] : memref<1x128xf32, #tpu.memory_space<vmem>>, vector<1x128xf32>
    tpu.vector_store %arg7[%c0_14, %c0_15], %17 {strides = array<i32>} : memref<1x128xf32, #tpu.memory_space<vmem>>, vector<1x128xf32>,
    %c0_i32_16 = arith.constant 0 : i32
    %19 = arith.cmpi eq, %arg0, %c0_i32_16 : i32
    %20 = arith.extui %19 : i1 to i32
    %c0_i32_17 = arith.constant 0 : i32
    %21 = arith.cmpi ne, %20, %c0_i32_17 : i32
    scf.if %21 {
      %c0_18 = arith.constant 0 : index
      %c0_19 = arith.constant 0 : index
      %22 = vector.load %arg6[%c0_18, %c0_19] : memref<1x128xf32, #tpu.memory_space<vmem>>, vector<1x128xf32>
      %c0_20 = arith.constant 0 : index
      %c0_21 = arith.constant 0 : index
      %23 = vector.load %arg4[%c0_20, %c0_21] : memref<1x128xf32, #tpu.memory_space<vmem>>, vector<1x128xf32>
      tpu.vector_store %arg4[%c0_20, %c0_21], %22 {strides = array<i32>} : memref<1x128xf32, #tpu.memory_space<vmem>>, vector<1x128xf32>,
      %c0_22 = arith.constant 0 : index
      %c0_23 = arith.constant 0 : index
      %24 = vector.load %arg7[%c0_22, %c0_23] : memref<1x128xf32, #tpu.memory_space<vmem>>, vector<1x128xf32>
      %c0_24 = arith.constant 0 : index
      %c0_25 = arith.constant 0 : index
      %25 = vector.load %arg5[%c0_24, %c0_25] : memref<1x128xf32, #tpu.memory_space<vmem>>, vector<1x128xf32>
      tpu.vector_store %arg5[%c0_24, %c0_25], %24 {strides = array<i32>} : memref<1x128xf32, #tpu.memory_space<vmem>>, vector<1x128xf32>,
    } else {
    }
    return
  }
  func.func @transform_0(%arg0: i32) -> (i32, i32) {
    %c0_i32 = arith.constant 0 : i32
    %c0_i32_0 = arith.constant 0 : i32
    return %arg0, %c0_i32 : i32, i32
  }
  func.func @transform_1(%arg0: i32) -> (i32, i32) {
    %c0_i32 = arith.constant 0 : i32
    %c0_i32_0 = arith.constant 0 : i32
    %c0_i32_1 = arith.constant 0 : i32
    return %c0_i32, %c0_i32_0 : i32, i32
  }
  func.func @transform_2(%arg0: i32) -> (i32, i32) {
    %c0_i32 = arith.constant 0 : i32
    %c0_i32_0 = arith.constant 0 : i32
    return %arg0, %c0_i32 : i32, i32
  }
  func.func @transform_3(%arg0: i32) -> (i32, i32) {
    %c0_i32 = arith.constant 0 : i32
    %c0_i32_0 = arith.constant 0 : i32
    %c0_i32_1 = arith.constant 0 : i32
    return %c0_i32, %c0_i32_0 : i32, i32
  }
  func.func @transform_4(%arg0: i32) -> (i32, i32) {
    %c0_i32 = arith.constant 0 : i32
    %c0_i32_0 = arith.constant 0 : i32
    %c0_i32_1 = arith.constant 0 : i32
    return %c0_i32, %c0_i32_0 : i32, i32
  }
}

module attributes {stable_mosaic.version = 11 : i64} {
  func.func @_matmul_stats_kernel(%arg0: i32, %arg1: memref<8x576xbf16, #tpu.memory_space<vmem>>, %arg2: memref<576x128xbf16, #tpu.memory_space<vmem>>, %arg3: memref<8x32xbf16, #tpu.memory_space<vmem>>, %arg4: memref<32x128xbf16, #tpu.memory_space<vmem>>, %arg5: memref<8x128xbf16, #tpu.memory_space<vmem>>, %arg6: memref<1x128xf32, #tpu.memory_space<vmem>>, %arg7: memref<1x128xf32, #tpu.memory_space<vmem>>, %arg8: memref<8x128xbf16, #tpu.memory_space<vmem>>, %arg9: memref<1x128xf32, #tpu.memory_space<vmem>>, %arg10: memref<1x128xf32, #tpu.memory_space<vmem>>, %arg11: memref<1x128xf32, #tpu.memory_space<vmem>>, %arg12: memref<1x128xf32, #tpu.memory_space<vmem>>, %arg13: memref<1x128xf32, #tpu.memory_space<vmem>>, %arg14: memref<1x128xf32, #tpu.memory_space<vmem>>) attributes {dimension_semantics = [#tpu.dimension_semantics<arbitrary>], iteration_bounds = array<i64: 1>, scalar_prefetch = 0 : i64, scratch_operands = 4 : i64, tpu.core_type = #tpu.core_type<tc>, window_params = [{transform_indices = @transform_0, window_bounds = array<i64: 8, 576>}, {pipeline_mode = #tpu.pipeline_mode<synchronous>, transform_indices = @transform_1, window_bounds = array<i64: 576, 128>}, {transform_indices = @transform_2, window_bounds = array<i64: 8, 32>}, {pipeline_mode = #tpu.pipeline_mode<synchronous>, transform_indices = @transform_3, window_bounds = array<i64: 32, 128>}, {transform_indices = @transform_4, window_bounds = array<i64: 8, 128>}, {pipeline_mode = #tpu.pipeline_mode<synchronous>, transform_indices = @transform_5, window_bounds = array<i64: 1, 128>}, {pipeline_mode = #tpu.pipeline_mode<synchronous>, transform_indices = @transform_6, window_bounds = array<i64: 1, 128>}, {transform_indices = @transform_7, window_bounds = array<i64: 8, 128>}, {pipeline_mode = #tpu.pipeline_mode<synchronous>, transform_indices = @transform_8, window_bounds = array<i64: 1, 128>}, {pipeline_mode = #tpu.pipeline_mode<synchronous>, transform_indices = @transform_9, window_bounds = array<i64: 1, 128>}]} {
    %c0_i32 = arith.constant 0 : i32
    %0 = arith.cmpi eq, %arg0, %c0_i32 : i32
    %1 = arith.extui %0 : i1 to i32
    %c0_i32_0 = arith.constant 0 : i32
    %2 = arith.cmpi ne, %1, %c0_i32_0 : i32
    scf.if %2 {
      %cst_35 = arith.constant 0.000000e+00 : f32
      %38 = vector.broadcast %cst_35 : f32 to vector<1x128xf32>
      %c0_36 = arith.constant 0 : index
      %c0_37 = arith.constant 0 : index
      %39 = vector.load %arg11[%c0_36, %c0_37] : memref<1x128xf32, #tpu.memory_space<vmem>>, vector<1x128xf32>
      tpu.vector_store %arg11[%c0_36, %c0_37], %38 {strides = array<i32>} : memref<1x128xf32, #tpu.memory_space<vmem>>, vector<1x128xf32>,
      %cst_38 = arith.constant 0.000000e+00 : f32
      %40 = vector.broadcast %cst_38 : f32 to vector<1x128xf32>
      %c0_39 = arith.constant 0 : index
      %c0_40 = arith.constant 0 : index
      %41 = vector.load %arg12[%c0_39, %c0_40] : memref<1x128xf32, #tpu.memory_space<vmem>>, vector<1x128xf32>
      tpu.vector_store %arg12[%c0_39, %c0_40], %40 {strides = array<i32>} : memref<1x128xf32, #tpu.memory_space<vmem>>, vector<1x128xf32>,
      %cst_41 = arith.constant 0.000000e+00 : f32
      %42 = vector.broadcast %cst_41 : f32 to vector<1x128xf32>
      %c0_42 = arith.constant 0 : index
      %c0_43 = arith.constant 0 : index
      %43 = vector.load %arg13[%c0_42, %c0_43] : memref<1x128xf32, #tpu.memory_space<vmem>>, vector<1x128xf32>
      tpu.vector_store %arg13[%c0_42, %c0_43], %42 {strides = array<i32>} : memref<1x128xf32, #tpu.memory_space<vmem>>, vector<1x128xf32>,
      %cst_44 = arith.constant 0.000000e+00 : f32
      %44 = vector.broadcast %cst_44 : f32 to vector<1x128xf32>
      %c0_45 = arith.constant 0 : index
      %c0_46 = arith.constant 0 : index
      %45 = vector.load %arg14[%c0_45, %c0_46] : memref<1x128xf32, #tpu.memory_space<vmem>>, vector<1x128xf32>
      tpu.vector_store %arg14[%c0_45, %c0_46], %44 {strides = array<i32>} : memref<1x128xf32, #tpu.memory_space<vmem>>, vector<1x128xf32>,
    } else {
    }
    %c0 = arith.constant 0 : index
    %c0_1 = arith.constant 0 : index
    %3 = vector.load %arg1[%c0, %c0_1] : memref<8x576xbf16, #tpu.memory_space<vmem>>, vector<8x576xbf16>
    %c0_2 = arith.constant 0 : index
    %c0_3 = arith.constant 0 : index
    %4 = vector.load %arg2[%c0_2, %c0_3] : memref<576x128xbf16, #tpu.memory_space<vmem>>, vector<576x128xbf16>
    %cst = arith.constant dense<0.000000e+00> : vector<8x128xf32>
    %5 = tpu.matmul %3, %4, %cst {dimension_numbers = #tpu.dot_dimension_numbers<[1], [0], [0], [1], [0, 0, 1, 1], [], []>} : vector<8x576xbf16>, vector<576x128xbf16>, vector<8x128xf32> -> vector<8x128xf32>
    %6 = arith.truncf %5 : vector<8x128xf32> to vector<8x128xbf16>
    %c0_4 = arith.constant 0 : index
    %c0_5 = arith.constant 0 : index
    %7 = vector.load %arg5[%c0_4, %c0_5] : memref<8x128xbf16, #tpu.memory_space<vmem>>, vector<8x128xbf16>
    tpu.vector_store %arg5[%c0_4, %c0_5], %6 {strides = array<i32>} : memref<8x128xbf16, #tpu.memory_space<vmem>>, vector<8x128xbf16>,
    %c0_6 = arith.constant 0 : index
    %c0_7 = arith.constant 0 : index
    %8 = vector.load %arg11[%c0_6, %c0_7] : memref<1x128xf32, #tpu.memory_space<vmem>>, vector<1x128xf32>
    %cst_8 = arith.constant dense<0.000000e+00> : vector<128xf32>
    %9 = vector.multi_reduction <add>, %5, %cst_8 [0] : vector<8x128xf32> to vector<128xf32>
    %10 = vector.shape_cast %9 : vector<128xf32> to vector<1x128xf32>
    %11 = arith.addf %8, %10 : vector<1x128xf32>
    %c0_9 = arith.constant 0 : index
    %c0_10 = arith.constant 0 : index
    %12 = vector.load %arg11[%c0_9, %c0_10] : memref<1x128xf32, #tpu.memory_space<vmem>>, vector<1x128xf32>
    tpu.vector_store %arg11[%c0_9, %c0_10], %11 {strides = array<i32>} : memref<1x128xf32, #tpu.memory_space<vmem>>, vector<1x128xf32>,
    %c0_11 = arith.constant 0 : index
    %c0_12 = arith.constant 0 : index
    %13 = vector.load %arg12[%c0_11, %c0_12] : memref<1x128xf32, #tpu.memory_space<vmem>>, vector<1x128xf32>
    %14 = arith.mulf %5, %5 : vector<8x128xf32>
    %cst_13 = arith.constant dense<0.000000e+00> : vector<128xf32>
    %15 = vector.multi_reduction <add>, %14, %cst_13 [0] : vector<8x128xf32> to vector<128xf32>
    %16 = vector.shape_cast %15 : vector<128xf32> to vector<1x128xf32>
    %17 = arith.addf %13, %16 : vector<1x128xf32>
    %c0_14 = arith.constant 0 : index
    %c0_15 = arith.constant 0 : index
    %18 = vector.load %arg12[%c0_14, %c0_15] : memref<1x128xf32, #tpu.memory_space<vmem>>, vector<1x128xf32>
    tpu.vector_store %arg12[%c0_14, %c0_15], %17 {strides = array<i32>} : memref<1x128xf32, #tpu.memory_space<vmem>>, vector<1x128xf32>,
    %c0_16 = arith.constant 0 : index
    %c0_17 = arith.constant 0 : index
    %19 = vector.load %arg3[%c0_16, %c0_17] : memref<8x32xbf16, #tpu.memory_space<vmem>>, vector<8x32xbf16>
    %c0_18 = arith.constant 0 : index
    %c0_19 = arith.constant 0 : index
    %20 = vector.load %arg4[%c0_18, %c0_19] : memref<32x128xbf16, #tpu.memory_space<vmem>>, vector<32x128xbf16>
    %cst_20 = arith.constant dense<0.000000e+00> : vector<8x128xf32>
    %21 = tpu.matmul %19, %20, %cst_20 {dimension_numbers = #tpu.dot_dimension_numbers<[1], [0], [0], [1], [0, 0, 1, 1], [], []>} : vector<8x32xbf16>, vector<32x128xbf16>, vector<8x128xf32> -> vector<8x128xf32>
    %22 = arith.truncf %21 : vector<8x128xf32> to vector<8x128xbf16>
    %c0_21 = arith.constant 0 : index
    %c0_22 = arith.constant 0 : index
    %23 = vector.load %arg8[%c0_21, %c0_22] : memref<8x128xbf16, #tpu.memory_space<vmem>>, vector<8x128xbf16>
    tpu.vector_store %arg8[%c0_21, %c0_22], %22 {strides = array<i32>} : memref<8x128xbf16, #tpu.memory_space<vmem>>, vector<8x128xbf16>,
    %c0_23 = arith.constant 0 : index
    %c0_24 = arith.constant 0 : index
    %24 = vector.load %arg13[%c0_23, %c0_24] : memref<1x128xf32, #tpu.memory_space<vmem>>, vector<1x128xf32>
    %cst_25 = arith.constant dense<0.000000e+00> : vector<128xf32>
    %25 = vector.multi_reduction <add>, %21, %cst_25 [0] : vector<8x128xf32> to vector<128xf32>
    %26 = vector.shape_cast %25 : vector<128xf32> to vector<1x128xf32>
    %27 = arith.addf %24, %26 : vector<1x128xf32>
    %c0_26 = arith.constant 0 : index
    %c0_27 = arith.constant 0 : index
    %28 = vector.load %arg13[%c0_26, %c0_27] : memref<1x128xf32, #tpu.memory_space<vmem>>, vector<1x128xf32>
    tpu.vector_store %arg13[%c0_26, %c0_27], %27 {strides = array<i32>} : memref<1x128xf32, #tpu.memory_space<vmem>>, vector<1x128xf32>,
    %c0_28 = arith.constant 0 : index
    %c0_29 = arith.constant 0 : index
    %29 = vector.load %arg14[%c0_28, %c0_29] : memref<1x128xf32, #tpu.memory_space<vmem>>, vector<1x128xf32>
    %30 = arith.mulf %21, %21 : vector<8x128xf32>
    %cst_30 = arith.constant dense<0.000000e+00> : vector<128xf32>
    %31 = vector.multi_reduction <add>, %30, %cst_30 [0] : vector<8x128xf32> to vector<128xf32>
    %32 = vector.shape_cast %31 : vector<128xf32> to vector<1x128xf32>
    %33 = arith.addf %29, %32 : vector<1x128xf32>
    %c0_31 = arith.constant 0 : index
    %c0_32 = arith.constant 0 : index
    %34 = vector.load %arg14[%c0_31, %c0_32] : memref<1x128xf32, #tpu.memory_space<vmem>>, vector<1x128xf32>
    tpu.vector_store %arg14[%c0_31, %c0_32], %33 {strides = array<i32>} : memref<1x128xf32, #tpu.memory_space<vmem>>, vector<1x128xf32>,
    %c0_i32_33 = arith.constant 0 : i32
    %35 = arith.cmpi eq, %arg0, %c0_i32_33 : i32
    %36 = arith.extui %35 : i1 to i32
    %c0_i32_34 = arith.constant 0 : i32
    %37 = arith.cmpi ne, %36, %c0_i32_34 : i32
    scf.if %37 {
      %c0_35 = arith.constant 0 : index
      %c0_36 = arith.constant 0 : index
      %38 = vector.load %arg11[%c0_35, %c0_36] : memref<1x128xf32, #tpu.memory_space<vmem>>, vector<1x128xf32>
      %c0_37 = arith.constant 0 : index
      %c0_38 = arith.constant 0 : index
      %39 = vector.load %arg6[%c0_37, %c0_38] : memref<1x128xf32, #tpu.memory_space<vmem>>, vector<1x128xf32>
      tpu.vector_store %arg6[%c0_37, %c0_38], %38 {strides = array<i32>} : memref<1x128xf32, #tpu.memory_space<vmem>>, vector<1x128xf32>,
      %c0_39 = arith.constant 0 : index
      %c0_40 = arith.constant 0 : index
      %40 = vector.load %arg12[%c0_39, %c0_40] : memref<1x128xf32, #tpu.memory_space<vmem>>, vector<1x128xf32>
      %c0_41 = arith.constant 0 : index
      %c0_42 = arith.constant 0 : index
      %41 = vector.load %arg7[%c0_41, %c0_42] : memref<1x128xf32, #tpu.memory_space<vmem>>, vector<1x128xf32>
      tpu.vector_store %arg7[%c0_41, %c0_42], %40 {strides = array<i32>} : memref<1x128xf32, #tpu.memory_space<vmem>>, vector<1x128xf32>,
      %c0_43 = arith.constant 0 : index
      %c0_44 = arith.constant 0 : index
      %42 = vector.load %arg13[%c0_43, %c0_44] : memref<1x128xf32, #tpu.memory_space<vmem>>, vector<1x128xf32>
      %c0_45 = arith.constant 0 : index
      %c0_46 = arith.constant 0 : index
      %43 = vector.load %arg9[%c0_45, %c0_46] : memref<1x128xf32, #tpu.memory_space<vmem>>, vector<1x128xf32>
      tpu.vector_store %arg9[%c0_45, %c0_46], %42 {strides = array<i32>} : memref<1x128xf32, #tpu.memory_space<vmem>>, vector<1x128xf32>,
      %c0_47 = arith.constant 0 : index
      %c0_48 = arith.constant 0 : index
      %44 = vector.load %arg14[%c0_47, %c0_48] : memref<1x128xf32, #tpu.memory_space<vmem>>, vector<1x128xf32>
      %c0_49 = arith.constant 0 : index
      %c0_50 = arith.constant 0 : index
      %45 = vector.load %arg10[%c0_49, %c0_50] : memref<1x128xf32, #tpu.memory_space<vmem>>, vector<1x128xf32>
      tpu.vector_store %arg10[%c0_49, %c0_50], %44 {strides = array<i32>} : memref<1x128xf32, #tpu.memory_space<vmem>>, vector<1x128xf32>,
    } else {
    }
    return
  }
  func.func @transform_0(%arg0: i32) -> (i32, i32) {
    %c0_i32 = arith.constant 0 : i32
    %c0_i32_0 = arith.constant 0 : i32
    return %arg0, %c0_i32 : i32, i32
  }
  func.func @transform_1(%arg0: i32) -> (i32, i32) {
    %c0_i32 = arith.constant 0 : i32
    %c0_i32_0 = arith.constant 0 : i32
    %c0_i32_1 = arith.constant 0 : i32
    return %c0_i32, %c0_i32_0 : i32, i32
  }
  func.func @transform_2(%arg0: i32) -> (i32, i32) {
    %c0_i32 = arith.constant 0 : i32
    %c0_i32_0 = arith.constant 0 : i32
    return %arg0, %c0_i32 : i32, i32
  }
  func.func @transform_3(%arg0: i32) -> (i32, i32) {
    %c0_i32 = arith.constant 0 : i32
    %c0_i32_0 = arith.constant 0 : i32
    %c0_i32_1 = arith.constant 0 : i32
    return %c0_i32, %c0_i32_0 : i32, i32
  }
  func.func @transform_4(%arg0: i32) -> (i32, i32) {
    %c0_i32 = arith.constant 0 : i32
    %c0_i32_0 = arith.constant 0 : i32
    return %arg0, %c0_i32 : i32, i32
  }
  func.func @transform_5(%arg0: i32) -> (i32, i32) {
    %c0_i32 = arith.constant 0 : i32
    %c0_i32_0 = arith.constant 0 : i32
    %c0_i32_1 = arith.constant 0 : i32
    return %c0_i32, %c0_i32_0 : i32, i32
  }
  func.func @transform_6(%arg0: i32) -> (i32, i32) {
    %c0_i32 = arith.constant 0 : i32
    %c0_i32_0 = arith.constant 0 : i32
    %c0_i32_1 = arith.constant 0 : i32
    return %c0_i32, %c0_i32_0 : i32, i32
  }
  func.func @transform_7(%arg0: i32) -> (i32, i32) {
    %c0_i32 = arith.constant 0 : i32
    %c0_i32_0 = arith.constant 0 : i32
    return %arg0, %c0_i32 : i32, i32
  }
  func.func @transform_8(%arg0: i32) -> (i32, i32) {
    %c0_i32 = arith.constant 0 : i32
    %c0_i32_0 = arith.constant 0 : i32
    %c0_i32_1 = arith.constant 0 : i32
    return %c0_i32, %c0_i32_0 : i32, i32
  }
  func.func @transform_9(%arg0: i32) -> (i32, i32) {
    %c0_i32 = arith.constant 0 : i32
    %c0_i32_0 = arith.constant 0 : i32
    %c0_i32_1 = arith.constant 0 : i32
    return %c0_i32, %c0_i32_0 : i32, i32
  }
}

module attributes {stable_mosaic.version = 11 : i64} {
  func.func @_bn_apply_kernel(%arg0: i32, %arg1: memref<8x128xbf16, #tpu.memory_space<vmem>>, %arg2: memref<1x128xf32, #tpu.memory_space<vmem>>, %arg3: memref<1x128xf32, #tpu.memory_space<vmem>>, %arg4: memref<1x128xf32, #tpu.memory_space<vmem>>, %arg5: memref<1x128xf32, #tpu.memory_space<vmem>>, %arg6: memref<8x128xbf16, #tpu.memory_space<vmem>>, %arg7: memref<1x128xf32, #tpu.memory_space<vmem>>, %arg8: memref<1x128xf32, #tpu.memory_space<vmem>>, %arg9: memref<1x128xf32, #tpu.memory_space<vmem>>, %arg10: memref<1x128xf32, #tpu.memory_space<vmem>>, %arg11: memref<8x128xbf16, #tpu.memory_space<vmem>>) attributes {dimension_semantics = [#tpu.dimension_semantics<parallel>], iteration_bounds = array<i64: 1>, scalar_prefetch = 0 : i64, scratch_operands = 0 : i64, tpu.core_type = #tpu.core_type<tc>, window_params = [{transform_indices = @transform_0, window_bounds = array<i64: 8, 128>}, {pipeline_mode = #tpu.pipeline_mode<synchronous>, transform_indices = @transform_1, window_bounds = array<i64: 1, 128>}, {pipeline_mode = #tpu.pipeline_mode<synchronous>, transform_indices = @transform_2, window_bounds = array<i64: 1, 128>}, {pipeline_mode = #tpu.pipeline_mode<synchronous>, transform_indices = @transform_3, window_bounds = array<i64: 1, 128>}, {pipeline_mode = #tpu.pipeline_mode<synchronous>, transform_indices = @transform_4, window_bounds = array<i64: 1, 128>}, {transform_indices = @transform_5, window_bounds = array<i64: 8, 128>}, {pipeline_mode = #tpu.pipeline_mode<synchronous>, transform_indices = @transform_6, window_bounds = array<i64: 1, 128>}, {pipeline_mode = #tpu.pipeline_mode<synchronous>, transform_indices = @transform_7, window_bounds = array<i64: 1, 128>}, {pipeline_mode = #tpu.pipeline_mode<synchronous>, transform_indices = @transform_8, window_bounds = array<i64: 1, 128>}, {pipeline_mode = #tpu.pipeline_mode<synchronous>, transform_indices = @transform_9, window_bounds = array<i64: 1, 128>}, {transform_indices = @transform_10, window_bounds = array<i64: 8, 128>}]} {
    %c0 = arith.constant 0 : index
    %c0_0 = arith.constant 0 : index
    %0 = vector.load %arg2[%c0, %c0_0] : memref<1x128xf32, #tpu.memory_space<vmem>>, vector<1x128xf32>
    %cst = arith.constant 1.250000e-01 : f32
    %1 = vector.broadcast %cst : f32 to vector<1x128xf32>
    %2 = arith.mulf %0, %1 : vector<1x128xf32>
    %c0_1 = arith.constant 0 : index
    %c0_2 = arith.constant 0 : index
    %3 = vector.load %arg3[%c0_1, %c0_2] : memref<1x128xf32, #tpu.memory_space<vmem>>, vector<1x128xf32>
    %cst_3 = arith.constant 1.250000e-01 : f32
    %4 = vector.broadcast %cst_3 : f32 to vector<1x128xf32>
    %5 = arith.mulf %3, %4 : vector<1x128xf32>
    %6 = arith.mulf %2, %2 : vector<1x128xf32>
    %7 = arith.subf %5, %6 : vector<1x128xf32>
    %cst_4 = arith.constant 0.000000e+00 : f32
    %8 = vector.broadcast %cst_4 : f32 to vector<1x128xf32>
    %9 = arith.maximumf %7, %8 : vector<1x128xf32>
    %cst_5 = arith.constant 9.99999974E-6 : f32
    %10 = vector.broadcast %cst_5 : f32 to vector<1x128xf32>
    %11 = arith.addf %9, %10 : vector<1x128xf32>
    %12 = math.rsqrt %11 : vector<1x128xf32>
    %c0_6 = arith.constant 0 : index
    %c0_7 = arith.constant 0 : index
    %13 = vector.load %arg4[%c0_6, %c0_7] : memref<1x128xf32, #tpu.memory_space<vmem>>, vector<1x128xf32>
    %14 = arith.mulf %12, %13 : vector<1x128xf32>
    %c0_8 = arith.constant 0 : index
    %c0_9 = arith.constant 0 : index
    %15 = vector.load %arg5[%c0_8, %c0_9] : memref<1x128xf32, #tpu.memory_space<vmem>>, vector<1x128xf32>
    %16 = arith.mulf %2, %14 : vector<1x128xf32>
    %17 = arith.subf %15, %16 : vector<1x128xf32>
    %c0_10 = arith.constant 0 : index
    %c0_11 = arith.constant 0 : index
    %18 = vector.load %arg1[%c0_10, %c0_11] : memref<8x128xbf16, #tpu.memory_space<vmem>>, vector<8x128xbf16>
    %19 = arith.extf %18 : vector<8x128xbf16> to vector<8x128xf32>
    %20 = vector.broadcast %14 : vector<1x128xf32> to vector<8x128xf32>
    %21 = arith.mulf %19, %20 : vector<8x128xf32>
    %22 = vector.broadcast %17 : vector<1x128xf32> to vector<8x128xf32>
    %23 = arith.addf %21, %22 : vector<8x128xf32>
    %c0_12 = arith.constant 0 : index
    %c0_13 = arith.constant 0 : index
    %24 = vector.load %arg7[%c0_12, %c0_13] : memref<1x128xf32, #tpu.memory_space<vmem>>, vector<1x128xf32>
    %cst_14 = arith.constant 1.250000e-01 : f32
    %25 = vector.broadcast %cst_14 : f32 to vector<1x128xf32>
    %26 = arith.mulf %24, %25 : vector<1x128xf32>
    %c0_15 = arith.constant 0 : index
    %c0_16 = arith.constant 0 : index
    %27 = vector.load %arg8[%c0_15, %c0_16] : memref<1x128xf32, #tpu.memory_space<vmem>>, vector<1x128xf32>
    %cst_17 = arith.constant 1.250000e-01 : f32
    %28 = vector.broadcast %cst_17 : f32 to vector<1x128xf32>
    %29 = arith.mulf %27, %28 : vector<1x128xf32>
    %30 = arith.mulf %26, %26 : vector<1x128xf32>
    %31 = arith.subf %29, %30 : vector<1x128xf32>
    %cst_18 = arith.constant 0.000000e+00 : f32
    %32 = vector.broadcast %cst_18 : f32 to vector<1x128xf32>
    %33 = arith.maximumf %31, %32 : vector<1x128xf32>
    %cst_19 = arith.constant 9.99999974E-6 : f32
    %34 = vector.broadcast %cst_19 : f32 to vector<1x128xf32>
    %35 = arith.addf %33, %34 : vector<1x128xf32>
    %36 = math.rsqrt %35 : vector<1x128xf32>
    %c0_20 = arith.constant 0 : index
    %c0_21 = arith.constant 0 : index
    %37 = vector.load %arg9[%c0_20, %c0_21] : memref<1x128xf32, #tpu.memory_space<vmem>>, vector<1x128xf32>
    %38 = arith.mulf %36, %37 : vector<1x128xf32>
    %c0_22 = arith.constant 0 : index
    %c0_23 = arith.constant 0 : index
    %39 = vector.load %arg10[%c0_22, %c0_23] : memref<1x128xf32, #tpu.memory_space<vmem>>, vector<1x128xf32>
    %40 = arith.mulf %26, %38 : vector<1x128xf32>
    %41 = arith.subf %39, %40 : vector<1x128xf32>
    %c0_24 = arith.constant 0 : index
    %c0_25 = arith.constant 0 : index
    %42 = vector.load %arg6[%c0_24, %c0_25] : memref<8x128xbf16, #tpu.memory_space<vmem>>, vector<8x128xbf16>
    %43 = arith.extf %42 : vector<8x128xbf16> to vector<8x128xf32>
    %44 = vector.broadcast %38 : vector<1x128xf32> to vector<8x128xf32>
    %45 = arith.mulf %43, %44 : vector<8x128xf32>
    %46 = vector.broadcast %41 : vector<1x128xf32> to vector<8x128xf32>
    %47 = arith.addf %45, %46 : vector<8x128xf32>
    %48 = arith.addf %23, %47 : vector<8x128xf32>
    %cst_26 = arith.constant 0.000000e+00 : f32
    %49 = vector.broadcast %cst_26 : f32 to vector<8x128xf32>
    %50 = arith.maximumf %48, %49 : vector<8x128xf32>
    %51 = arith.truncf %50 : vector<8x128xf32> to vector<8x128xbf16>
    %c0_27 = arith.constant 0 : index
    %c0_28 = arith.constant 0 : index
    %52 = vector.load %arg11[%c0_27, %c0_28] : memref<8x128xbf16, #tpu.memory_space<vmem>>, vector<8x128xbf16>
    tpu.vector_store %arg11[%c0_27, %c0_28], %51 {strides = array<i32>} : memref<8x128xbf16, #tpu.memory_space<vmem>>, vector<8x128xbf16>,
    return
  }
  func.func @transform_0(%arg0: i32) -> (i32, i32) {
    %c0_i32 = arith.constant 0 : i32
    %c0_i32_0 = arith.constant 0 : i32
    return %arg0, %c0_i32 : i32, i32
  }
  func.func @transform_1(%arg0: i32) -> (i32, i32) {
    %c0_i32 = arith.constant 0 : i32
    %c0_i32_0 = arith.constant 0 : i32
    %c0_i32_1 = arith.constant 0 : i32
    return %c0_i32, %c0_i32_0 : i32, i32
  }
  func.func @transform_2(%arg0: i32) -> (i32, i32) {
    %c0_i32 = arith.constant 0 : i32
    %c0_i32_0 = arith.constant 0 : i32
    %c0_i32_1 = arith.constant 0 : i32
    return %c0_i32, %c0_i32_0 : i32, i32
  }
  func.func @transform_3(%arg0: i32) -> (i32, i32) {
    %c0_i32 = arith.constant 0 : i32
    %c0_i32_0 = arith.constant 0 : i32
    %c0_i32_1 = arith.constant 0 : i32
    return %c0_i32, %c0_i32_0 : i32, i32
  }
  func.func @transform_4(%arg0: i32) -> (i32, i32) {
    %c0_i32 = arith.constant 0 : i32
    %c0_i32_0 = arith.constant 0 : i32
    %c0_i32_1 = arith.constant 0 : i32
    return %c0_i32, %c0_i32_0 : i32, i32
  }
  func.func @transform_5(%arg0: i32) -> (i32, i32) {
    %c0_i32 = arith.constant 0 : i32
    %c0_i32_0 = arith.constant 0 : i32
    return %arg0, %c0_i32 : i32, i32
  }
  func.func @transform_6(%arg0: i32) -> (i32, i32) {
    %c0_i32 = arith.constant 0 : i32
    %c0_i32_0 = arith.constant 0 : i32
    %c0_i32_1 = arith.constant 0 : i32
    return %c0_i32, %c0_i32_0 : i32, i32
  }
  func.func @transform_7(%arg0: i32) -> (i32, i32) {
    %c0_i32 = arith.constant 0 : i32
    %c0_i32_0 = arith.constant 0 : i32
    %c0_i32_1 = arith.constant 0 : i32
    return %c0_i32, %c0_i32_0 : i32, i32
  }
  func.func @transform_8(%arg0: i32) -> (i32, i32) {
    %c0_i32 = arith.constant 0 : i32
    %c0_i32_0 = arith.constant 0 : i32
    %c0_i32_1 = arith.constant 0 : i32
    return %c0_i32, %c0_i32_0 : i32, i32
  }
  func.func @transform_9(%arg0: i32) -> (i32, i32) {
    %c0_i32 = arith.constant 0 : i32
    %c0_i32_0 = arith.constant 0 : i32
    %c0_i32_1 = arith.constant 0 : i32
    return %c0_i32, %c0_i32_0 : i32, i32
  }
  func.func @transform_10(%arg0: i32) -> (i32, i32) {
    %c0_i32 = arith.constant 0 : i32
    %c0_i32_0 = arith.constant 0 : i32
    return %arg0, %c0_i32 : i32, i32
  }
}

module attributes {stable_mosaic.version = 11 : i64} {
  func.func @_bn_apply_kernel(%arg0: i32, %arg1: memref<8x128xbf16, #tpu.memory_space<vmem>>, %arg2: memref<1x128xf32, #tpu.memory_space<vmem>>, %arg3: memref<1x128xf32, #tpu.memory_space<vmem>>, %arg4: memref<1x128xf32, #tpu.memory_space<vmem>>, %arg5: memref<1x128xf32, #tpu.memory_space<vmem>>, %arg6: memref<8x128xbf16, #tpu.memory_space<vmem>>, %arg7: memref<8x128xbf16, #tpu.memory_space<vmem>>) attributes {dimension_semantics = [#tpu.dimension_semantics<parallel>], iteration_bounds = array<i64: 1>, scalar_prefetch = 0 : i64, scratch_operands = 0 : i64, tpu.core_type = #tpu.core_type<tc>, window_params = [{transform_indices = @transform_0, window_bounds = array<i64: 8, 128>}, {pipeline_mode = #tpu.pipeline_mode<synchronous>, transform_indices = @transform_1, window_bounds = array<i64: 1, 128>}, {pipeline_mode = #tpu.pipeline_mode<synchronous>, transform_indices = @transform_2, window_bounds = array<i64: 1, 128>}, {pipeline_mode = #tpu.pipeline_mode<synchronous>, transform_indices = @transform_3, window_bounds = array<i64: 1, 128>}, {pipeline_mode = #tpu.pipeline_mode<synchronous>, transform_indices = @transform_4, window_bounds = array<i64: 1, 128>}, {transform_indices = @transform_5, window_bounds = array<i64: 8, 128>}, {transform_indices = @transform_6, window_bounds = array<i64: 8, 128>}]} {
    %c0 = arith.constant 0 : index
    %c0_0 = arith.constant 0 : index
    %0 = vector.load %arg2[%c0, %c0_0] : memref<1x128xf32, #tpu.memory_space<vmem>>, vector<1x128xf32>
    %cst = arith.constant 1.250000e-01 : f32
    %1 = vector.broadcast %cst : f32 to vector<1x128xf32>
    %2 = arith.mulf %0, %1 : vector<1x128xf32>
    %c0_1 = arith.constant 0 : index
    %c0_2 = arith.constant 0 : index
    %3 = vector.load %arg3[%c0_1, %c0_2] : memref<1x128xf32, #tpu.memory_space<vmem>>, vector<1x128xf32>
    %cst_3 = arith.constant 1.250000e-01 : f32
    %4 = vector.broadcast %cst_3 : f32 to vector<1x128xf32>
    %5 = arith.mulf %3, %4 : vector<1x128xf32>
    %6 = arith.mulf %2, %2 : vector<1x128xf32>
    %7 = arith.subf %5, %6 : vector<1x128xf32>
    %cst_4 = arith.constant 0.000000e+00 : f32
    %8 = vector.broadcast %cst_4 : f32 to vector<1x128xf32>
    %9 = arith.maximumf %7, %8 : vector<1x128xf32>
    %cst_5 = arith.constant 9.99999974E-6 : f32
    %10 = vector.broadcast %cst_5 : f32 to vector<1x128xf32>
    %11 = arith.addf %9, %10 : vector<1x128xf32>
    %12 = math.rsqrt %11 : vector<1x128xf32>
    %c0_6 = arith.constant 0 : index
    %c0_7 = arith.constant 0 : index
    %13 = vector.load %arg4[%c0_6, %c0_7] : memref<1x128xf32, #tpu.memory_space<vmem>>, vector<1x128xf32>
    %14 = arith.mulf %12, %13 : vector<1x128xf32>
    %c0_8 = arith.constant 0 : index
    %c0_9 = arith.constant 0 : index
    %15 = vector.load %arg5[%c0_8, %c0_9] : memref<1x128xf32, #tpu.memory_space<vmem>>, vector<1x128xf32>
    %16 = arith.mulf %2, %14 : vector<1x128xf32>
    %17 = arith.subf %15, %16 : vector<1x128xf32>
    %c0_10 = arith.constant 0 : index
    %c0_11 = arith.constant 0 : index
    %18 = vector.load %arg1[%c0_10, %c0_11] : memref<8x128xbf16, #tpu.memory_space<vmem>>, vector<8x128xbf16>
    %19 = arith.extf %18 : vector<8x128xbf16> to vector<8x128xf32>
    %20 = vector.broadcast %14 : vector<1x128xf32> to vector<8x128xf32>
    %21 = arith.mulf %19, %20 : vector<8x128xf32>
    %22 = vector.broadcast %17 : vector<1x128xf32> to vector<8x128xf32>
    %23 = arith.addf %21, %22 : vector<8x128xf32>
    %c0_12 = arith.constant 0 : index
    %c0_13 = arith.constant 0 : index
    %24 = vector.load %arg6[%c0_12, %c0_13] : memref<8x128xbf16, #tpu.memory_space<vmem>>, vector<8x128xbf16>
    %25 = arith.extf %24 : vector<8x128xbf16> to vector<8x128xf32>
    %26 = arith.addf %23, %25 : vector<8x128xf32>
    %cst_14 = arith.constant 0.000000e+00 : f32
    %27 = vector.broadcast %cst_14 : f32 to vector<8x128xf32>
    %28 = arith.maximumf %26, %27 : vector<8x128xf32>
    %29 = arith.truncf %28 : vector<8x128xf32> to vector<8x128xbf16>
    %c0_15 = arith.constant 0 : index
    %c0_16 = arith.constant 0 : index
    %30 = vector.load %arg7[%c0_15, %c0_16] : memref<8x128xbf16, #tpu.memory_space<vmem>>, vector<8x128xbf16>
    tpu.vector_store %arg7[%c0_15, %c0_16], %29 {strides = array<i32>} : memref<8x128xbf16, #tpu.memory_space<vmem>>, vector<8x128xbf16>,
    return
  }
  func.func @transform_0(%arg0: i32) -> (i32, i32) {
    %c0_i32 = arith.constant 0 : i32
    %c0_i32_0 = arith.constant 0 : i32
    return %arg0, %c0_i32 : i32, i32
  }
  func.func @transform_1(%arg0: i32) -> (i32, i32) {
    %c0_i32 = arith.constant 0 : i32
    %c0_i32_0 = arith.constant 0 : i32
    %c0_i32_1 = arith.constant 0 : i32
    return %c0_i32, %c0_i32_0 : i32, i32
  }
  func.func @transform_2(%arg0: i32) -> (i32, i32) {
    %c0_i32 = arith.constant 0 : i32
    %c0_i32_0 = arith.constant 0 : i32
    %c0_i32_1 = arith.constant 0 : i32
    return %c0_i32, %c0_i32_0 : i32, i32
  }
  func.func @transform_3(%arg0: i32) -> (i32, i32) {
    %c0_i32 = arith.constant 0 : i32
    %c0_i32_0 = arith.constant 0 : i32
    %c0_i32_1 = arith.constant 0 : i32
    return %c0_i32, %c0_i32_0 : i32, i32
  }
  func.func @transform_4(%arg0: i32) -> (i32, i32) {
    %c0_i32 = arith.constant 0 : i32
    %c0_i32_0 = arith.constant 0 : i32
    %c0_i32_1 = arith.constant 0 : i32
    return %c0_i32, %c0_i32_0 : i32, i32
  }
  func.func @transform_5(%arg0: i32) -> (i32, i32) {
    %c0_i32 = arith.constant 0 : i32
    %c0_i32_0 = arith.constant 0 : i32
    return %arg0, %c0_i32 : i32, i32
  }
  func.func @transform_6(%arg0: i32) -> (i32, i32) {
    %c0_i32 = arith.constant 0 : i32
    %c0_i32_0 = arith.constant 0 : i32
    return %arg0, %c0_i32 : i32, i32
  }
}

module attributes {stable_mosaic.version = 11 : i64} {
  func.func @_pool_linear_kernel(%arg0: memref<8x4x64xbf16, #tpu.memory_space<vmem>>, %arg1: memref<64x128xf32, #tpu.memory_space<vmem>>, %arg2: memref<1x128xf32, #tpu.memory_space<vmem>>, %arg3: memref<8x128xf32, #tpu.memory_space<vmem>>) attributes {dimension_semantics = [], scalar_prefetch = 0 : i64, scratch_operands = 0 : i64, tpu.core_type = #tpu.core_type<tc>} {
    %c0 = arith.constant 0 : index
    %c0_0 = arith.constant 0 : index
    %c0_1 = arith.constant 0 : index
    %0 = vector.load %arg0[%c0, %c0_0, %c0_1] : memref<8x4x64xbf16, #tpu.memory_space<vmem>>, vector<8x4x64xbf16>
    %1 = arith.extf %0 : vector<8x4x64xbf16> to vector<8x4x64xf32>
    %cst = arith.constant dense<0.000000e+00> : vector<8x64xf32>
    %2 = vector.multi_reduction <add>, %1, %cst [1] : vector<8x4x64xf32> to vector<8x64xf32>
    %cst_2 = arith.constant 2.500000e-01 : f32
    %3 = vector.broadcast %cst_2 : f32 to vector<8x64xf32>
    %4 = arith.mulf %2, %3 : vector<8x64xf32>
    %c0_3 = arith.constant 0 : index
    %c0_4 = arith.constant 0 : index
    %5 = vector.load %arg1[%c0_3, %c0_4] : memref<64x128xf32, #tpu.memory_space<vmem>>, vector<64x128xf32>
    %cst_5 = arith.constant dense<0.000000e+00> : vector<8x128xf32>
    %6 = tpu.matmul %4, %5, %cst_5 {dimension_numbers = #tpu.dot_dimension_numbers<[1], [0], [0], [1], [0, 0, 1, 1], [], []>} : vector<8x64xf32>, vector<64x128xf32>, vector<8x128xf32> -> vector<8x128xf32>
    %c0_6 = arith.constant 0 : index
    %c0_7 = arith.constant 0 : index
    %7 = vector.load %arg2[%c0_6, %c0_7] : memref<1x128xf32, #tpu.memory_space<vmem>>, vector<1x128xf32>
    %8 = vector.broadcast %7 : vector<1x128xf32> to vector<8x128xf32>
    %9 = arith.addf %6, %8 : vector<8x128xf32>
    %c0_8 = arith.constant 0 : index
    %c0_9 = arith.constant 0 : index
    %10 = vector.load %arg3[%c0_8, %c0_9] : memref<8x128xf32, #tpu.memory_space<vmem>>, vector<8x128xf32>
    tpu.vector_store %arg3[%c0_8, %c0_9], %9 {strides = array<i32>} : memref<8x128xf32, #tpu.memory_space<vmem>>, vector<8x128xf32>,
    return
  }
}

</mosaic_0001>

<bundles_post_ra>
// kernel: resnet_forward.36
= control target key start
LH: loop header
LB: loop body
LE: loop exit
PB: predicated region body
PF: predicated region fallthrough
CT: control target
= control target key end

     0   :  { %s1400_s1 = inlined_call_operand.vmem [shape: f32[1,128], index: 1, kind: input, shape index: {}]   ;;  %s1401_s2 = inlined_call_operand.vmem [shape: f32[1,128], index: 2, kind: input, shape index: {}]   ;;  %s1402_s0 = inlined_call_operand.vmem [shape: bf16[512,128], index: 0, kind: input, shape index: {}]   ;;  %s1403_s3 = inlined_call_operand.vmem [shape: f32[1,128], index: 3, kind: input, shape index: {}]   ;;  %s1404_s4 = inlined_call_operand.vmem [shape: f32[1,128], index: 4, kind: input, shape index: {}]   ;;  %s1405_s5 = inlined_call_operand.vmem [shape: bf16[512,128], index: 5, kind: output, shape index: {}]  }
   0x1   :  { %v20_v0 = vld [vmem:[%s1400_s1] sm:$0x1]  ;;  %v901_v10 = vld [vmem:[%s1402_s0 + $0x8] sm:$0xff]   ;;  %v906_v12 = vld [vmem:[%s1402_s0 + $0x10] sm:$0xff]  }
   0x2   :  { %v22_v1 = vld [vmem:[%s1401_s2] sm:$0x1]  ;;  %v889_v2 = vmul.f32 0.001953125, %v20_v0  ;;  %v911_v13 = vld [vmem:[%s1402_s0 + $0x18] sm:$0xff]   ;;  %v507_v17 = vunpack.c.l.bf16 %v901_v10  ;;  %v924_v19 = vld [vmem:[%s1402_s0 + $0x28] sm:$0xff]   ;;  %v508_v20 = vunpack.c.h.bf16 %v901_v10  ;;  %v511_v21 = vunpack.c.l.bf16 %v906_v12 }
   0x3   :  { %v23_v3 = vmul.f32 0.001953125, %v22_v1  ;;  %v896_v9 = vld [vmem:[%s1402_s0] sm:$0xff]   ;;  %v512_v22 = vunpack.c.h.bf16 %v906_v12  ;;  %v515_v23 = vunpack.c.l.bf16 %v911_v13  ;;  %v933_v24 = vld [vmem:[%s1402_s0 + $0x30] sm:$0xff]   ;;  %v938_v25 = vld [vmem:[%s1402_s0 + $0x38] sm:$0xff]   ;;  %v516_v27 = vunpack.c.h.bf16 %v911_v13 }
   0x4   :  { %v24_v4 = vmul.f32 %v889_v2, %v889_v2  ;;  %v503_v15 = vunpack.c.l.bf16 %v896_v9  ;;  %v504_v16 = vunpack.c.h.bf16 %v896_v9  ;;  %v919_v18 = vld [vmem:[%s1402_s0 + $0x20] sm:$0xff]   ;;  %v949_v29 = vld [vmem:[%s1402_s0 + $0x48] sm:$0xff]   ;;  %v523_v32 = vunpack.c.l.bf16 %v924_v19  ;;  %v958_v34 = vld [vmem:[%s1402_s0 + $0x50] sm:$0xff]  }
   0x5   :  { %v944_v28 = vld [vmem:[%s1402_s0 + $0x40] sm:$0xff]   ;;  %v519_v30 = vunpack.c.l.bf16 %v919_v18  ;;  %v520_v31 = vunpack.c.h.bf16 %v919_v18  ;;  %v524_v33 = vunpack.c.h.bf16 %v924_v19  ;;  %v527_v36 = vunpack.c.l.bf16 %v933_v24  ;;  %v966_v39 = vld [vmem:[%s1402_s0 + $0x58] sm:$0xff]   ;;  %v986_v46 = vld [vmem:[%s1402_s0 + $0x68] sm:$0xff]  }
   0x6   :  { %v25_v5 = vsub.f32 %v23_v3, %v24_v4  ;;  %v528_v37 = vunpack.c.h.bf16 %v933_v24  ;;  %v531_v38 = vunpack.c.l.bf16 %v938_v25  ;;  %v971_v40 = vld [vmem:[%s1402_s0 + $0x60] sm:$0xff]   ;;  %v532_v42 = vunpack.c.h.bf16 %v938_v25  ;;  %v991_v47 = vld [vmem:[%s1402_s0 + $0x70] sm:$0xff]   ;;  %v1002_v53 = vld [vmem:[%s1402_s0 + $0x78] sm:$0xff]  }
   0x7   :  { %v535_v43 = vunpack.c.l.bf16 %v944_v28  ;;  %v536_v44 = vunpack.c.h.bf16 %v944_v28  ;;  %v539_v45 = vunpack.c.l.bf16 %v949_v29  ;;  %v38_v49 = vld [vmem:[%s1403_s3] sm:$0x1]  ;;  %v540_v50 = vunpack.c.h.bf16 %v949_v29  ;;  %v1016_v59 = vld [vmem:[%s1402_s0 + $0x88] sm:$0xff]   ;;  %v1026_v0 = vld [vmem:[%s1402_s0 + $0x90] sm:$0xff]  }
   0x8   :  { %v26_v6 = vmax.f32 %v25_v5, 0.0  ;;  %v543_v51 = vunpack.c.l.bf16 %v958_v34  ;;  %v544_v52 = vunpack.c.h.bf16 %v958_v34  ;;  %v547_v54 = vunpack.c.l.bf16 %v966_v39  ;;  %v1011_v58 = vld [vmem:[%s1402_s0 + $0x80] sm:$0xff]  }
   0x9   :  { %v548_v55 = vunpack.c.h.bf16 %v966_v39  ;;  %v551_v56 = vunpack.c.l.bf16 %v971_v40  ;;  %v552_v57 = vunpack.c.h.bf16 %v971_v40  ;;  %v555_v61 = vunpack.c.l.bf16 %v986_v46 }
   0xa   :  { %v27_v7 = vadd.f32 1e-05, %v26_v6  ;;  %v556_v62 = vunpack.c.h.bf16 %v986_v46  ;;  %v559_v63 = vunpack.c.l.bf16 %v991_v47  ;;  %v560_v3 = vunpack.c.h.bf16 %v991_v47  ;;  %v1034_v6 = vld [vmem:[%s1402_s0 + $0x98] sm:$0xff]  }
   0xb   :  { %v1409_v47 = vunpack.c.h.bf16 %v1002_v53 }
   0xc   :  { %851 = vrsqrt.f32 %v27_v7  ;;  %vm34_vm0 = vweird.f32 %v27_v7 }
  0x12   :  { %v852_v8 = vpop.eup %851 }
  0x13   :  { %v29_v11 = vmul.f32 %v852_v8, %v27_v7  ;;  %vm35_vm1 = vweird.f32 %v852_v8  ;;  %v40_v7 = vld [vmem:[%s1404_s4] sm:$0x1] }
  0x14   :  { %vm975_vm2 = vmor %vm34_vm0, %vm35_vm1 }
  0x15   :  { %v30_v14 = vmul.f32 %v852_v8, %v29_v11 }
  0x17   :  { %v31_v26 = vmul.f32 0.5, %v30_v14 }
  0x19   :  { %v32_v35 = vsub.f32 1.5, %v31_v26 }
  0x1b   :  { %v33_v48 = vmul.f32 %v852_v8, %v32_v35  ;;  %v1046_v35 = vld [vmem:[%s1402_s0 + $0xa0] sm:$0xff]  }
  0x1d   :  { %v37_v60 = vsel %vm975_vm2, %v852_v8, %v33_v48 }
  0x1e   :  { %v39_v1 = vmul.f32 %v38_v49, %v37_v60  ;;  %v575_v49 = vunpack.c.l.bf16 %v1026_v0  ;;  %v576_v60 = vunpack.c.h.bf16 %v1026_v0  ;;  %v1415_v0 = vunpack.c.h.bf16 %v1034_v6 }
  0x20   :  { %v41_v41 = vmul.f32 %v39_v1, %v889_v2  ;;  %v1049_v48 = vperm.slane %v39_v1, 0 }
  0x22   :  { %v42_v5 = vsub.f32 %v40_v7, %v41_v41  ;;  %v174_v4 = vmul.f32 %v503_v15, %v1049_v48  ;;  %v175_v2 = vmul.f32 %v504_v16, %v1049_v48  ;;  %v176_v1 = vmul.f32 %v507_v17, %v1049_v48 }
  0x23   :  { %v177_v11 = vmul.f32 %v508_v20, %v1049_v48  ;;  %v178_v7 = vmul.f32 %v511_v21, %v1049_v48  ;;  %v179_v15 = vmul.f32 %v512_v22, %v1049_v48  ;;  %v180_v9 = vmul.f32 %v515_v23, %v1049_v48 }
  0x24   :  { %v1078_v16 = vperm.slane %v42_v5, 0  ;;  %v181_v17 = vmul.f32 %v516_v27, %v1049_v48  ;;  %v182_v10 = vmul.f32 %v519_v30, %v1049_v48  ;;  %v183_v20 = vmul.f32 %v520_v31, %v1049_v48 }
  0x25   :  { %v184_v12 = vmul.f32 %v523_v32, %v1049_v48  ;;  %v185_v21 = vmul.f32 %v524_v33, %v1049_v48  ;;  %v186_v13 = vmul.f32 %v527_v36, %v1049_v48  ;;  %v187_v22 = vmul.f32 %v528_v37, %v1049_v48 }
  0x26   :  { %v241_v23 = vadd.f32 %v1078_v16, %v174_v4  ;;  %v242_v18 = vadd.f32 %v1078_v16, %v175_v2  ;;  %v243_v27 = vadd.f32 %v1078_v16, %v176_v1  ;;  %v244_v30 = vadd.f32 %v1078_v16, %v177_v11 }
  0x27   :  { %v245_v31 = vadd.f32 %v1078_v16, %v178_v7  ;;  %v246_v19 = vadd.f32 %v1078_v16, %v179_v15  ;;  %v247_v32 = vadd.f32 %v1078_v16, %v180_v9  ;;  %v248_v33 = vadd.f32 %v1078_v16, %v181_v17 }
  0x28   :  { %v305_v36 = vmax.f32 %v241_v23, 0.0  ;;  %v306_v5 = vmax.f32 %v242_v18, 0.0  ;;  %v307_v24 = vmax.f32 %v243_v27, 0.0  ;;  %v308_v37 = vmax.f32 %v244_v30, 0.0 }
  0x29   :  { %v309_v41 = vmax.f32 %v245_v31, 0.0  ;;  %v310_v4 = vmax.f32 %v246_v19, 0.0  ;;  %v311_v26 = vmax.f32 %v247_v32, 0.0  ;;  %v312_v2 = vmax.f32 %v248_v33, 0.0 }
  0x2a   :  { %v632_v14 = vpack.c.bf16 %v306_v5, %v305_v36  ;;  %v637_v1 = vpack.c.bf16 %v308_v37, %v307_v24  ;;  %v249_v11 = vadd.f32 %v1078_v16, %v182_v10  ;;  %v250_v7 = vadd.f32 %v1078_v16, %v183_v20 }
  0x2b   :  { %v642_v8 = vpack.c.bf16 %v310_v4, %v309_v41  ;;  %v647_v15 = vpack.c.bf16 %v312_v2, %v311_v26  ;;  %v251_v9 = vadd.f32 %v1078_v16, %v184_v12  ;;  %v252_v17 = vadd.f32 %v1078_v16, %v185_v21 }
  0x2c   :  { %633 = vst [vmem:[%s1405_s5] sm:$0xff] %v632_v14   ;;  %v313_v23 = vmax.f32 %v249_v11, 0.0  ;;  %v314_v18 = vmax.f32 %v250_v7, 0.0  ;;  %v253_v27 = vadd.f32 %v1078_v16, %v186_v13  ;;  %v254_v30 = vadd.f32 %v1078_v16, %v187_v22 }
  0x2d   :  { %820 = vst [vmem:[%s1405_s5 + $0x8] sm:$0xff] %v637_v1   ;;  %v315_v10 = vmax.f32 %v251_v9, 0.0  ;;  %v316_v26 = vmax.f32 %v252_v17, 0.0  ;;  %v188_v20 = vmul.f32 %v531_v38, %v1049_v48  ;;  %v189_v14 = vmul.f32 %v532_v42, %v1049_v48 }
  0x2e   :  { %821 = vst [vmem:[%s1405_s5 + $0x10] sm:$0xff] %v642_v8   ;;  %v652_v12 = vpack.c.bf16 %v314_v18, %v313_v23  ;;  %v317_v21 = vmax.f32 %v253_v27, 0.0  ;;  %v318_v13 = vmax.f32 %v254_v30, 0.0  ;;  %v190_v22 = vmul.f32 %v535_v43, %v1049_v48 }
  0x2f   :  { %822 = vst [vmem:[%s1405_s5 + $0x18] sm:$0xff] %v647_v15   ;;  %v657_v38 = vpack.c.bf16 %v316_v26, %v315_v10  ;;  %v255_v31 = vadd.f32 %v1078_v16, %v188_v20  ;;  %v256_v25 = vadd.f32 %v1078_v16, %v189_v14  ;;  %v191_v42 = vmul.f32 %v536_v44, %v1049_v48 }
  0x30   :  { %823 = vst [vmem:[%s1405_s5 + $0x20] sm:$0xff] %v652_v12   ;;  %v662_v8 = vpack.c.bf16 %v318_v13, %v317_v21  ;;  %v257_v43 = vadd.f32 %v1078_v16, %v190_v22  ;;  %v192_v19 = vmul.f32 %v539_v45, %v1049_v48  ;;  %v193_v32 = vmul.f32 %v540_v50, %v1049_v48 }
  0x31   :  { %824 = vst [vmem:[%s1405_s5 + $0x28] sm:$0xff] %v657_v38   ;;  %v319_v28 = vmax.f32 %v255_v31, 0.0  ;;  %v320_v44 = vmax.f32 %v256_v25, 0.0  ;;  %v258_v33 = vadd.f32 %v1078_v16, %v191_v42  ;;  %v194_v36 = vmul.f32 %v543_v51, %v1049_v48 }
  0x32   :  { %825 = vst [vmem:[%s1405_s5 + $0x30] sm:$0xff] %v662_v8   ;;  %v321_v45 = vmax.f32 %v257_v43, 0.0  ;;  %v259_v29 = vadd.f32 %v1078_v16, %v192_v19  ;;  %v260_v50 = vadd.f32 %v1078_v16, %v193_v32  ;;  %v195_v5 = vmul.f32 %v544_v52, %v1049_v48 }
  0x33   :  { %v667_v24 = vpack.c.bf16 %v320_v44, %v319_v28  ;;  %v322_v37 = vmax.f32 %v258_v33, 0.0  ;;  %v261_v41 = vadd.f32 %v1078_v16, %v194_v36  ;;  %v196_v51 = vmul.f32 %v547_v54, %v1049_v48 }
  0x34   :  { %v323_v4 = vmax.f32 %v259_v29, 0.0  ;;  %v324_v2 = vmax.f32 %v260_v50, 0.0  ;;  %v262_v1 = vadd.f32 %v1078_v16, %v195_v5  ;;  %v197_v11 = vmul.f32 %v548_v55, %v1049_v48 }
  0x35   :  { %826 = vst [vmem:[%s1405_s5 + $0x38] sm:$0xff] %v667_v24   ;;  %v672_v34 = vpack.c.bf16 %v322_v37, %v321_v45  ;;  %v325_v52 = vmax.f32 %v261_v41, 0.0  ;;  %v263_v7 = vadd.f32 %v1078_v16, %v196_v51  ;;  %v198_v54 = vmul.f32 %v551_v56, %v1049_v48 }
  0x36   :  { %v677_v15 = vpack.c.bf16 %v324_v2, %v323_v4  ;;  %v326_v9 = vmax.f32 %v262_v1, 0.0  ;;  %v264_v17 = vadd.f32 %v1078_v16, %v197_v11  ;;  %v199_v39 = vmul.f32 %v552_v57, %v1049_v48 }
  0x37   :  { %827 = vst [vmem:[%s1405_s5 + $0x40] sm:$0xff] %v672_v34   ;;  %v327_v55 = vmax.f32 %v263_v7, 0.0  ;;  %v265_v23 = vadd.f32 %v1078_v16, %v198_v54  ;;  %v200_v18 = vmul.f32 %v555_v61, %v1049_v48  ;;  %v201_v56 = vmul.f32 %v556_v62, %v1049_v48 }
  0x38   :  { %828 = vst [vmem:[%s1405_s5 + $0x48] sm:$0xff] %v677_v15   ;;  %v682_v40 = vpack.c.bf16 %v326_v9, %v325_v52  ;;  %v328_v57 = vmax.f32 %v264_v17, 0.0  ;;  %v266_v27 = vadd.f32 %v1078_v16, %v199_v39  ;;  %v202_v30 = vmul.f32 %v559_v63, %v1049_v48  ;;  %v809_v15 = vld [vmem:[%s1402_s0 + $0xa8] sm:$0xff]  }
  0x39   :  { %v329_v10 = vmax.f32 %v265_v23, 0.0  ;;  %v267_v26 = vadd.f32 %v1078_v16, %v200_v18  ;;  %v268_v61 = vadd.f32 %v1078_v16, %v201_v56  ;;  %v203_v46 = vmul.f32 %v560_v3, %v1049_v48 }
  0x3a   :  { %829 = vst [vmem:[%s1405_s5 + $0x50] sm:$0xff] %v682_v40   ;;  %v687_v62 = vpack.c.bf16 %v328_v57, %v327_v55  ;;  %v330_v20 = vmax.f32 %v266_v27, 0.0  ;;  %v269_v14 = vadd.f32 %v1078_v16, %v202_v30  ;;  %v1408_v63 = vunpack.c.l.bf16 %v1002_v53 }
  0x3b   :  { %v331_v21 = vmax.f32 %v267_v26, 0.0  ;;  %v332_v13 = vmax.f32 %v268_v61, 0.0  ;;  %v270_v22 = vadd.f32 %v1078_v16, %v203_v46  ;;  %v205_v3 = vmul.f32 %v1409_v47, %v1049_v48  ;;  %v811_v46 = vld [vmem:[%s1402_s0 + $0xb8] sm:$0xff]  }
  0x3c   :  { %v204_v12 = vmul.f32 %v1408_v63, %v1049_v48  ;;  %830 = vst [vmem:[%s1405_s5 + $0x58] sm:$0xff] %v687_v62   ;;  %v692_v38 = vpack.c.bf16 %v330_v20, %v329_v10  ;;  %v333_v31 = vmax.f32 %v269_v14, 0.0  ;;  %v1410_v42 = vunpack.c.l.bf16 %v1011_v58 }
  0x3d   :  { %v697_v43 = vpack.c.bf16 %v332_v13, %v331_v21  ;;  %v334_v19 = vmax.f32 %v270_v22, 0.0  ;;  %v272_v32 = vadd.f32 %v1078_v16, %v205_v3  ;;  %v1411_v53 = vunpack.c.h.bf16 %v1011_v58  ;;  %v812_v22 = vld [vmem:[%s1402_s0 + $0xc0] sm:$0xff]  }
  0x3e   :  { %v271_v25 = vadd.f32 %v1078_v16, %v204_v12  ;;  %v206_v8 = vmul.f32 %v1410_v42, %v1049_v48  ;;  %831 = vst [vmem:[%s1405_s5 + $0x60] sm:$0xff] %v692_v38   ;;  %v1412_v36 = vunpack.c.l.bf16 %v1016_v59  ;;  %v1413_v29 = vunpack.c.h.bf16 %v1016_v59 }
  0x3f   :  { %v207_v28 = vmul.f32 %v1411_v53, %v1049_v48  ;;  %832 = vst [vmem:[%s1405_s5 + $0x68] sm:$0xff] %v697_v43   ;;  %v702_v58 = vpack.c.bf16 %v334_v19, %v333_v31  ;;  %v336_v5 = vmax.f32 %v272_v32, 0.0  ;;  %v210_v37 = vmul.f32 %v575_v49, %v1049_v48 }
  0x40   :  { %v335_v44 = vmax.f32 %v271_v25, 0.0  ;;  %v273_v33 = vadd.f32 %v1078_v16, %v206_v8  ;;  %v208_v45 = vmul.f32 %v1412_v36, %v1049_v48  ;;  %v209_v50 = vmul.f32 %v1413_v29, %v1049_v48 }
  0x41   :  { %v274_v24 = vadd.f32 %v1078_v16, %v207_v28  ;;  %v211_v59 = vmul.f32 %v576_v60, %v1049_v48  ;;  %833 = vst [vmem:[%s1405_s5 + $0x70] sm:$0xff] %v702_v58   ;;  %v277_v11 = vadd.f32 %v1078_v16, %v210_v37  ;;  %v1414_v49 = vunpack.c.l.bf16 %v1034_v6  ;;  %v810_v6 = vld [vmem:[%s1402_s0 + $0xb0] sm:$0xff]  }
  0x42   :  { %v337_v41 = vmax.f32 %v273_v33, 0.0  ;;  %v275_v51 = vadd.f32 %v1078_v16, %v208_v45  ;;  %v276_v4 = vadd.f32 %v1078_v16, %v209_v50  ;;  %v707_v2 = vpack.c.bf16 %v336_v5, %v335_v44  ;;  %v813_v44 = vld [vmem:[%s1402_s0 + $0xc8] sm:$0xff]   ;;  %v814_v37 = vld [vmem:[%s1402_s0 + $0xd0] sm:$0xff]  }
  0x43   :  { %v338_v1 = vmax.f32 %v274_v24, 0.0  ;;  %v212_v34 = vmul.f32 %v1414_v49, %v1049_v48  ;;  %v278_v54 = vadd.f32 %v1078_v16, %v211_v59  ;;  %v213_v60 = vmul.f32 %v1415_v0, %v1049_v48 }
  0x44   :  { %v339_v52 = vmax.f32 %v275_v51, 0.0  ;;  %v340_v7 = vmax.f32 %v276_v4, 0.0  ;;  %834 = vst [vmem:[%s1405_s5 + $0x78] sm:$0xff] %v707_v2   ;;  %v341_v17 = vmax.f32 %v277_v11, 0.0  ;;  %v1416_v55 = vunpack.c.l.bf16 %v1046_v35 }
  0x45   :  { %v712_v9 = vpack.c.bf16 %v338_v1, %v337_v41  ;;  %v279_v39 = vadd.f32 %v1078_v16, %v212_v34  ;;  %v342_v56 = vmax.f32 %v278_v54, 0.0  ;;  %v280_v40 = vadd.f32 %v1078_v16, %v213_v60  ;;  %v815_v34 = vld [vmem:[%s1402_s0 + $0xd8] sm:$0xff]  }
  0x46   :  { %v214_v23 = vmul.f32 %v1416_v55, %v1049_v48  ;;  %v717_v18 = vpack.c.bf16 %v340_v7, %v339_v52  ;;  %v1417_v57 = vunpack.c.h.bf16 %v1046_v35  ;;  %v587_v26 = vunpack.c.l.bf16 %v809_v15 }
  0x47   :  { %835 = vst [vmem:[%s1405_s5 + $0x80] sm:$0xff] %v712_v9   ;;  %v343_v30 = vmax.f32 %v279_v39, 0.0  ;;  %v588_v61 = vunpack.c.h.bf16 %v809_v15  ;;  %v722_v62 = vpack.c.bf16 %v342_v56, %v341_v17  ;;  %v344_v35 = vmax.f32 %v280_v40, 0.0  ;;  %v816_v39 = vld [vmem:[%s1402_s0 + $0xe0] sm:$0xff]  }
  0x48   :  { %v215_v27 = vmul.f32 %v1417_v57, %v1049_v48  ;;  %v281_v10 = vadd.f32 %v1078_v16, %v214_v23  ;;  %836 = vst [vmem:[%s1405_s5 + $0x88] sm:$0xff] %v717_v18   ;;  %v591_v14 = vunpack.c.l.bf16 %v810_v6  ;;  %v216_v12 = vmul.f32 %v587_v26, %v1049_v48 }
  0x49   :  { %v217_v21 = vmul.f32 %v588_v61, %v1049_v48  ;;  %v592_v13 = vunpack.c.h.bf16 %v810_v6  ;;  %837 = vst [vmem:[%s1405_s5 + $0x90] sm:$0xff] %v722_v62   ;;  %v727_v47 = vpack.c.bf16 %v344_v35, %v343_v30  ;;  %v595_v31 = vunpack.c.l.bf16 %v811_v46 }
  0x4a   :  { %v282_v20 = vadd.f32 %v1078_v16, %v215_v27  ;;  %v345_v63 = vmax.f32 %v281_v10, 0.0  ;;  %v218_v38 = vmul.f32 %v591_v14, %v1049_v48  ;;  %v283_v25 = vadd.f32 %v1078_v16, %v216_v12 }
  0x4b   :  { %v284_v42 = vadd.f32 %v1078_v16, %v217_v21  ;;  %v219_v8 = vmul.f32 %v592_v13, %v1049_v48  ;;  %v596_v43 = vunpack.c.h.bf16 %v811_v46  ;;  %838 = vst [vmem:[%s1405_s5 + $0x98] sm:$0xff] %v727_v47   ;;  %v220_v53 = vmul.f32 %v595_v31, %v1049_v48  ;;  %v817_v46 = vld [vmem:[%s1402_s0 + $0xe8] sm:$0xff]  }
  0x4c   :  { %v346_v3 = vmax.f32 %v282_v20, 0.0  ;;  %v285_v32 = vadd.f32 %v1078_v16, %v218_v38  ;;  %v599_v28 = vunpack.c.l.bf16 %v812_v22  ;;  %v347_v33 = vmax.f32 %v283_v25, 0.0 }
  0x4d   :  { %v348_v36 = vmax.f32 %v284_v42, 0.0  ;;  %v286_v45 = vadd.f32 %v1078_v16, %v219_v8  ;;  %v221_v29 = vmul.f32 %v596_v43, %v1049_v48  ;;  %v287_v58 = vadd.f32 %v1078_v16, %v220_v53 }
  0x4e   :  { %v732_v19 = vpack.c.bf16 %v346_v3, %v345_v63  ;;  %v349_v50 = vmax.f32 %v285_v32, 0.0  ;;  %v600_v5 = vunpack.c.h.bf16 %v812_v22  ;;  %v222_v24 = vmul.f32 %v599_v28, %v1049_v48  ;;  %v818_v22 = vld [vmem:[%s1402_s0 + $0xf0] sm:$0xff]  }
  0x4f   :  { %v737_v41 = vpack.c.bf16 %v348_v36, %v347_v33  ;;  %v350_v51 = vmax.f32 %v286_v45, 0.0  ;;  %v288_v4 = vadd.f32 %v1078_v16, %v221_v29  ;;  %v603_v59 = vunpack.c.l.bf16 %v813_v44 }
  0x50   :  { %839 = vst [vmem:[%s1405_s5 + $0xa0] sm:$0xff] %v732_v19   ;;  %v351_v2 = vmax.f32 %v287_v58, 0.0  ;;  %v223_v1 = vmul.f32 %v600_v5, %v1049_v48  ;;  %v289_v11 = vadd.f32 %v1078_v16, %v222_v24  ;;  %v604_v49 = vunpack.c.h.bf16 %v813_v44  ;;  %v819_v19 = vld [vmem:[%s1402_s0 + $0xf8] sm:$0xff]  }
  0x51   :  { %840 = vst [vmem:[%s1405_s5 + $0xa8] sm:$0xff] %v737_v41   ;;  %v742_v52 = vpack.c.bf16 %v350_v51, %v349_v50  ;;  %v352_v7 = vmax.f32 %v288_v4, 0.0  ;;  %v224_v54 = vmul.f32 %v603_v59, %v1049_v48  ;;  %v607_v0 = vunpack.c.l.bf16 %v814_v37 }
  0x52   :  { %v290_v60 = vadd.f32 %v1078_v16, %v223_v1  ;;  %v353_v15 = vmax.f32 %v289_v11, 0.0  ;;  %v225_v9 = vmul.f32 %v604_v49, %v1049_v48  ;;  %v608_v17 = vunpack.c.h.bf16 %v814_v37 }
  0x53   :  { %841 = vst [vmem:[%s1405_s5 + $0xb0] sm:$0xff] %v742_v52   ;;  %v747_v55 = vpack.c.bf16 %v352_v7, %v351_v2  ;;  %v291_v23 = vadd.f32 %v1078_v16, %v224_v54  ;;  %v226_v6 = vmul.f32 %v607_v0, %v1049_v48  ;;  %v611_v18 = vunpack.c.l.bf16 %v815_v34 }
  0x54   :  { %v354_v56 = vmax.f32 %v290_v60, 0.0  ;;  %v292_v40 = vadd.f32 %v1078_v16, %v225_v9  ;;  %v227_v57 = vmul.f32 %v608_v17, %v1049_v48  ;;  %v612_v27 = vunpack.c.h.bf16 %v815_v34 }
  0x55   :  { %842 = vst [vmem:[%s1405_s5 + $0xb8] sm:$0xff] %v747_v55   ;;  %v355_v30 = vmax.f32 %v291_v23, 0.0  ;;  %v293_v10 = vadd.f32 %v1078_v16, %v226_v6  ;;  %v228_v26 = vmul.f32 %v611_v18, %v1049_v48  ;;  %v615_v61 = vunpack.c.l.bf16 %v816_v39 }
  0x56   :  { %v752_v62 = vpack.c.bf16 %v354_v56, %v353_v15  ;;  %v356_v35 = vmax.f32 %v292_v40, 0.0  ;;  %v294_v20 = vadd.f32 %v1078_v16, %v227_v57  ;;  %v229_v14 = vmul.f32 %v612_v27, %v1049_v48 }
  0x57   :  { %v357_v63 = vmax.f32 %v293_v10, 0.0  ;;  %v295_v12 = vadd.f32 %v1078_v16, %v228_v26  ;;  %v616_v21 = vunpack.c.h.bf16 %v816_v39  ;;  %v230_v13 = vmul.f32 %v615_v61, %v1049_v48 }
  0x58   :  { %843 = vst [vmem:[%s1405_s5 + $0xc0] sm:$0xff] %v752_v62   ;;  %v757_v47 = vpack.c.bf16 %v356_v35, %v355_v30  ;;  %v358_v3 = vmax.f32 %v294_v20, 0.0  ;;  %v296_v38 = vadd.f32 %v1078_v16, %v229_v14  ;;  %v619_v31 = vunpack.c.l.bf16 %v817_v46 }
  0x59   :  { %v359_v25 = vmax.f32 %v295_v12, 0.0  ;;  %v231_v42 = vmul.f32 %v616_v21, %v1049_v48  ;;  %v297_v8 = vadd.f32 %v1078_v16, %v230_v13  ;;  %v620_v43 = vunpack.c.h.bf16 %v817_v46 }
  0x5a   :  { %844 = vst [vmem:[%s1405_s5 + $0xc8] sm:$0xff] %v757_v47   ;;  %v762_v32 = vpack.c.bf16 %v358_v3, %v357_v63  ;;  %v360_v53 = vmax.f32 %v296_v38, 0.0  ;;  %v232_v28 = vmul.f32 %v619_v31, %v1049_v48  ;;  %v623_v44 = vunpack.c.l.bf16 %v818_v22 }
  0x5b   :  { %v298_v33 = vadd.f32 %v1078_v16, %v231_v42  ;;  %v361_v36 = vmax.f32 %v297_v8, 0.0  ;;  %v233_v45 = vmul.f32 %v620_v43, %v1049_v48  ;;  %v624_v29 = vunpack.c.h.bf16 %v818_v22 }
  0x5c   :  { %845 = vst [vmem:[%s1405_s5 + $0xd0] sm:$0xff] %v762_v32   ;;  %v767_v50 = vpack.c.bf16 %v360_v53, %v359_v25  ;;  %v299_v58 = vadd.f32 %v1078_v16, %v232_v28  ;;  %v234_v5 = vmul.f32 %v623_v44, %v1049_v48  ;;  %v627_v24 = vunpack.c.l.bf16 %v819_v19 }
  0x5d   :  { %v362_v37 = vmax.f32 %v298_v33, 0.0  ;;  %v300_v41 = vadd.f32 %v1078_v16, %v233_v45  ;;  %v235_v51 = vmul.f32 %v624_v29, %v1049_v48  ;;  %v628_v4 = vunpack.c.h.bf16 %v819_v19 }
  0x5e   :  { %846 = vst [vmem:[%s1405_s5 + $0xd8] sm:$0xff] %v767_v50   ;;  %v363_v59 = vmax.f32 %v299_v58, 0.0  ;;  %v301_v2 = vadd.f32 %v1078_v16, %v234_v5  ;;  %v236_v1 = vmul.f32 %v627_v24, %v1049_v48 }
  0x5f   :  { %v772_v11 = vpack.c.bf16 %v362_v37, %v361_v36  ;;  %v364_v49 = vmax.f32 %v300_v41, 0.0  ;;  %v302_v34 = vadd.f32 %v1078_v16, %v235_v51  ;;  %v237_v52 = vmul.f32 %v628_v4, %v1049_v48 }
  0x60   :  { %v365_v7 = vmax.f32 %v301_v2, 0.0  ;;  %v303_v54 = vadd.f32 %v1078_v16, %v236_v1 }
  0x61   :  { %847 = vst [vmem:[%s1405_s5 + $0xe0] sm:$0xff] %v772_v11   ;;  %v777_v0 = vpack.c.bf16 %v364_v49, %v363_v59  ;;  %v366_v60 = vmax.f32 %v302_v34, 0.0  ;;  %v304_v15 = vadd.f32 %v1078_v16, %v237_v52 }
  0x62   :  { %v367_v9 = vmax.f32 %v303_v54, 0.0 }
  0x63   :  { %848 = vst [vmem:[%s1405_s5 + $0xe8] sm:$0xff] %v777_v0   ;;  %v782_v17 = vpack.c.bf16 %v366_v60, %v365_v7  ;;  %v368_v39 = vmax.f32 %v304_v15, 0.0 }
  0x65   :  { %849 = vst [vmem:[%s1405_s5 + $0xf0] sm:$0xff] %v782_v17   ;;  %v787_v48 = vpack.c.bf16 %v368_v39, %v367_v9 }
  0x67   :  { %850 = vst [vmem:[%s1405_s5 + $0xf8] sm:$0xff] %v787_v48  }

// kernel: resnet_forward.35
= control target key start
LH: loop header
LB: loop body
LE: loop exit
PB: predicated region body
PF: predicated region fallthrough
CT: control target
= control target key end

     0   :  { %vm357_vm0 = vcmask 1044480   ;;  %vm358_vm1 = vcmask 1045504   ;;  %v1289_v2 = vmov 65535   ;;  %vm260_vm2 = vcmask 220160   ;;  %s1849_s1 = inlined_call_operand.vmem [shape: bf16[27,128], index: 1, kind: input, shape index: {}]   ;;  %s1850_s0 = inlined_call_operand.vmem [shape: bf16[512,27], index: 0, kind: input, shape index: {}]   ;;  %s1851_s2 = inlined_call_operand.vmem [shape: bf16[512,128], index: 2, kind: output, shape index: {0}]   ;;  %s1852_s3 = inlined_call_operand.vmem [shape: f32[1,128], index: 3, kind: output, shape index: {1}]   ;;  %s1853_s4 = inlined_call_operand.vmem [shape: f32[1,128], index: 4, kind: output, shape index: {2}]  }
   0x1   :  { %v1022_v0 = vld [vmem:[%s1849_s1 + $0x8] sm:$0xf]  ;;  %v1089_v1 = vld [vmem:[%s1849_s1 + $0x8] sm:$0x30]  ;;  %v359_v3 = vsel %vm357_vm0, 4294967295, %v1289_v2  ;;  %v1088_v7 = vld [vmem:[%s1849_s1] sm:$0xff] }
   0x2   :  { %v1023_v4 = vor.u32 %v1089_v1, %v1022_v0  ;;  %v360_v5 = vsel %vm358_vm1, %v359_v3, 0  ;;  %v1056_v8 = vld [vmem:[%s1850_s0] sm:$0xff]  ;;  %v1057_v10 = vld [vmem:[%s1850_s0 + $0x8] sm:$0xff]  ;;  %v1058_v13 = vld [vmem:[%s1850_s0 + $0x10] sm:$0xff] }
   0x3   :  { %v1064_v9 = vld [vmem:[%s1850_s0 + $0x40] sm:$0xff]  ;;  %v1065_v11 = vld [vmem:[%s1850_s0 + $0x48] sm:$0xff]  ;;  %v1066_v14 = vld [vmem:[%s1850_s0 + $0x50] sm:$0xff] }
   0x4   :  { %v362_v6 = vand.u32 %v1023_v4, %v360_v5  ;;  %v1072_v12 = vld [vmem:[%s1850_s0 + $0x80] sm:$0xff]  ;;  %v1073_v15 = vld [vmem:[%s1850_s0 + $0x88] sm:$0xff]  ;;  %v1059_v16 = vld [vmem:[%s1850_s0 + $0x18] sm:$0xff] }
   0x5   :  { %v1067_v17 = vld [vmem:[%s1850_s0 + $0x58] sm:$0xff]  ;;  %v1074_v18 = vld [vmem:[%s1850_s0 + $0x90] sm:$0xff]  ;;  %v1080_v19 = vld [vmem:[%s1850_s0 + $0xc0] sm:$0xff] }
   0x6   :  { %370 = vmatpush.bf16.msra.mxu0 %v362_v6  ;;  %1281 = vmatpush.bf16.msra.mxu1 %v362_v6  ;;  %v1060_v20 = vld [vmem:[%s1850_s0 + $0x20] sm:$0xff]  ;;  %v1075_v22 = vld [vmem:[%s1850_s0 + $0x98] sm:$0xff]  ;;  %v1081_v23 = vld [vmem:[%s1850_s0 + $0xc8] sm:$0xff] }
   0x7   :  { %1282 = vmatpush.bf16.msra.mxu2 %v362_v6  ;;  %1283 = vmatpush.bf16.msra.mxu3 %v362_v6  ;;  %v1068_v21 = vld [vmem:[%s1850_s0 + $0x60] sm:$0xff]  ;;  %v1061_v24 = vld [vmem:[%s1850_s0 + $0x28] sm:$0xff]  ;;  %v1082_v27 = vld [vmem:[%s1850_s0 + $0xd0] sm:$0xff] }
   0x8   :  { %v1069_v25 = vld [vmem:[%s1850_s0 + $0x68] sm:$0xff]  ;;  %v1076_v26 = vld [vmem:[%s1850_s0 + $0xa0] sm:$0xff]  ;;  %v1062_v28 = vld [vmem:[%s1850_s0 + $0x30] sm:$0xff] }
   0x9   :  { %v1070_v29 = vld [vmem:[%s1850_s0 + $0x70] sm:$0xff]  ;;  %v1077_v30 = vld [vmem:[%s1850_s0 + $0xa8] sm:$0xff]  ;;  %v1083_v31 = vld [vmem:[%s1850_s0 + $0xd8] sm:$0xff] }
   0xa   :  { %371 = vmatpush.bf16.msra.mxu0 %v1088_v7  ;;  %1284 = vmatpush.bf16.msra.mxu1 %v1088_v7  ;;  %v1063_v32 = vld [vmem:[%s1850_s0 + $0x38] sm:$0xff]  ;;  %v1078_v34 = vld [vmem:[%s1850_s0 + $0xb0] sm:$0xff]  ;;  %v1084_v35 = vld [vmem:[%s1850_s0 + $0xe0] sm:$0xff] }
   0xb   :  { %1285 = vmatpush.bf16.msra.mxu2 %v1088_v7  ;;  %1286 = vmatpush.bf16.msra.mxu3 %v1088_v7  ;;  %v1071_v33 = vld [vmem:[%s1850_s0 + $0x78] sm:$0xff]  ;;  %v1085_v39 = vld [vmem:[%s1850_s0 + $0xe8] sm:$0xff]  ;;  %v1086_v53 = vld [vmem:[%s1850_s0 + $0xf0] sm:$0xff] }
   0xc   :  { %v1079_v38 = vld [vmem:[%s1850_s0 + $0xb8] sm:$0xff] }
   0xd   :  { %1024 = vmatmul.msk.bf16.vlgmr.msra.gmra.mxu0 %vm260_vm2, %v1056_v8  ;;  %1032 = vmatmul.msk.bf16.vlgmr.msra.gmra.mxu1 %vm260_vm2, %v1064_v9  ;;  %v1087_v5 = vld [vmem:[%s1850_s0 + $0xf8] sm:$0xff] }
   0xe   :  { %1040 = vmatmul.msk.bf16.vlgmr.msra.gmra.mxu2 %vm260_vm2, %v1072_v12  ;;  %1048 = vmatmul.msk.bf16.vlgmr.msra.gmra.mxu3 %vm260_vm2, %v1080_v19 }
  0x1d   :  { %1025 = vmatmul.msk.bf16.gmra.mxu0 %vm260_vm2, %v1057_v10  ;;  %1033 = vmatmul.msk.bf16.gmra.mxu1 %vm260_vm2, %v1065_v11 }
  0x1e   :  { %1041 = vmatmul.msk.bf16.gmra.mxu2 %vm260_vm2, %v1073_v15  ;;  %1049 = vmatmul.msk.bf16.gmra.mxu3 %vm260_vm2, %v1081_v23 }
  0x2d   :  { %1026 = vmatmul.msk.bf16.gmra.mxu0 %vm260_vm2, %v1058_v13  ;;  %1034 = vmatmul.msk.bf16.gmra.mxu1 %vm260_vm2, %v1066_v14 }
  0x2e   :  { %1042 = vmatmul.msk.bf16.gmra.mxu2 %vm260_vm2, %v1074_v18  ;;  %1050 = vmatmul.msk.bf16.gmra.mxu3 %vm260_vm2, %v1082_v27 }
  0x3d   :  { %1027 = vmatmul.msk.bf16.gmra.mxu0 %vm260_vm2, %v1059_v16  ;;  %1035 = vmatmul.msk.bf16.gmra.mxu1 %vm260_vm2, %v1067_v17 }
  0x3e   :  { %1043 = vmatmul.msk.bf16.gmra.mxu2 %vm260_vm2, %v1075_v22  ;;  %1051 = vmatmul.msk.bf16.gmra.mxu3 %vm260_vm2, %v1083_v31 }
  0x4d   :  { %1028 = vmatmul.msk.bf16.gmra.mxu0 %vm260_vm2, %v1060_v20  ;;  %1036 = vmatmul.msk.bf16.gmra.mxu1 %vm260_vm2, %v1068_v21 }
  0x4e   :  { %1044 = vmatmul.msk.bf16.gmra.mxu2 %vm260_vm2, %v1076_v26  ;;  %1052 = vmatmul.msk.bf16.gmra.mxu3 %vm260_vm2, %v1084_v35 }
  0x5d   :  { %1029 = vmatmul.msk.bf16.gmra.mxu0 %vm260_vm2, %v1061_v24  ;;  %1037 = vmatmul.msk.bf16.gmra.mxu1 %vm260_vm2, %v1069_v25 }
  0x5e   :  { %1045 = vmatmul.msk.bf16.gmra.mxu2 %vm260_vm2, %v1077_v30  ;;  %1053 = vmatmul.msk.bf16.gmra.mxu3 %vm260_vm2, %v1085_v39 }
  0x6d   :  { %1030 = vmatmul.msk.bf16.gmra.mxu0 %vm260_vm2, %v1062_v28  ;;  %1038 = vmatmul.msk.bf16.gmra.mxu1 %vm260_vm2, %v1070_v29 }
  0x6e   :  { %1046 = vmatmul.msk.bf16.gmra.mxu2 %vm260_vm2, %v1078_v34  ;;  %1054 = vmatmul.msk.bf16.gmra.mxu3 %vm260_vm2, %v1086_v53 }
  0x7d   :  { %1031 = vmatmul.msk.bf16.gmra.mxu0 %vm260_vm2, %v1063_v32  ;;  %1039 = vmatmul.msk.bf16.gmra.mxu1 %vm260_vm2, %v1071_v33 }
  0x7e   :  { %1047 = vmatmul.msk.bf16.gmra.mxu2 %vm260_vm2, %v1079_v38  ;;  %1055 = vmatmul.msk.bf16.gmra.mxu3 %vm260_vm2, %v1087_v5 }
  0x8a   :  { %v373_v36 = vpop.f32.mrf.mxu0  ;;  %v1437_v37 = vpop.f32.mrf.mxu1 }
  0x8b   :  { %v734_v40 = vmul.f32 %v373_v36, %v373_v36 }
  0x91   :  { %v1467_v60 = vpop.f32.mrf.mxu2  ;;  %v1519_v20 = vpop.f32.mrf.mxu3 }
  0x92   :  { %v375_v41 = vpop.f32.mrf.mxu0  ;;  %v1447_v42 = vpop.f32.mrf.mxu1 }
  0x93   :  { %v1093_v43 = vpack.c.bf16 %v375_v41, %v373_v36  ;;  %v662_v44 = vadd.f32 %v375_v41, %v373_v36  ;;  %v735_v45 = vmul.f32 %v375_v41, %v375_v41  ;;  %v1133_v46 = vpack.c.bf16 %v1447_v42, %v1437_v37 }
  0x95   :  { %1094 = vst [vmem:[%s1851_s2] sm:$0xff] %v1093_v43   ;;  %v798_v47 = vadd.f32 %v735_v45, %v734_v40 }
  0x96   :  { %1257 = vst [vmem:[%s1851_s2 + $0x40] sm:$0xff] %v1133_v46  }
  0x99   :  { %v1479_v2 = vpop.f32.mrf.mxu2  ;;  %v1531_v24 = vpop.f32.mrf.mxu3 }
  0x9a   :  { %v378_v48 = vpop.f32.mrf.mxu0  ;;  %v1457_v49 = vpop.f32.mrf.mxu1  ;;  %v1173_v3 = vpack.c.bf16 %v1479_v2, %v1467_v60  ;;  %v1213_v26 = vpack.c.bf16 %v1531_v24, %v1519_v20 }
  0x9b   :  { %v663_v50 = vadd.f32 %v662_v44, %v378_v48  ;;  %v736_v51 = vmul.f32 %v378_v48, %v378_v48 }
  0x9c   :  { %1265 = vst [vmem:[%s1851_s2 + $0x80] sm:$0xff] %v1173_v3  }
  0x9d   :  { %v799_v52 = vadd.f32 %v798_v47, %v736_v51  ;;  %1273 = vst [vmem:[%s1851_s2 + $0xc0] sm:$0xff] %v1213_v26  }
  0xa1   :  { %v1496_v10 = vpop.f32.mrf.mxu2  ;;  %v1549_v32 = vpop.f32.mrf.mxu3 }
  0xa2   :  { %v380_v54 = vpop.f32.mrf.mxu0  ;;  %v1463_v55 = vpop.f32.mrf.mxu1 }
  0xa3   :  { %v1098_v56 = vpack.c.bf16 %v380_v54, %v378_v48  ;;  %v664_v57 = vadd.f32 %v663_v50, %v380_v54  ;;  %v737_v58 = vmul.f32 %v380_v54, %v380_v54  ;;  %v1138_v59 = vpack.c.bf16 %v1463_v55, %v1457_v49 }
  0xa5   :  { %1250 = vst [vmem:[%s1851_s2 + $0x8] sm:$0xff] %v1098_v56   ;;  %v800_v61 = vadd.f32 %v799_v52, %v737_v58 }
  0xa6   :  { %1258 = vst [vmem:[%s1851_s2 + $0x48] sm:$0xff] %v1138_v59  }
  0xa9   :  { %v1506_v13 = vpop.f32.mrf.mxu2  ;;  %v1561_v36 = vpop.f32.mrf.mxu3 }
  0xaa   :  { %v383_v62 = vpop.f32.mrf.mxu0  ;;  %v1475_v63 = vpop.f32.mrf.mxu1  ;;  %v1178_v14 = vpack.c.bf16 %v1506_v13, %v1496_v10  ;;  %v1218_v39 = vpack.c.bf16 %v1561_v36, %v1549_v32 }
  0xab   :  { %v1477_v0 = vadd.f32 %v664_v57, %v383_v62  ;;  %v738_v1 = vmul.f32 %v383_v62, %v383_v62 }
  0xac   :  { %1266 = vst [vmem:[%s1851_s2 + $0x88] sm:$0xff] %v1178_v14  }
  0xad   :  { %v1483_v4 = vadd.f32 %v800_v61, %v738_v1  ;;  %1274 = vst [vmem:[%s1851_s2 + $0xc8] sm:$0xff] %v1218_v39  }
  0xb1   :  { %v1517_v19 = vpop.f32.mrf.mxu2  ;;  %v1579_v46 = vpop.f32.mrf.mxu3 }
  0xb2   :  { %v385_v6 = vpop.f32.mrf.mxu0  ;;  %v1492_v7 = vpop.f32.mrf.mxu1 }
  0xb3   :  { %v1103_v8 = vpack.c.bf16 %v385_v6, %v383_v62  ;;  %v1143_v9 = vpack.c.bf16 %v1492_v7, %v1475_v63  ;;  %v739_v52 = vmul.f32 %v385_v6, %v385_v6  ;;  %v666_v57 = vadd.f32 %v1477_v0, %v385_v6 }
  0xb5   :  { %1251 = vst [vmem:[%s1851_s2 + $0x10] sm:$0xff] %v1103_v8   ;;  %v802_v58 = vadd.f32 %v1483_v4, %v739_v52 }
  0xb6   :  { %1259 = vst [vmem:[%s1851_s2 + $0x50] sm:$0xff] %v1143_v9  }
  0xb9   :  { %v1529_v23 = vpop.f32.mrf.mxu2  ;;  %v1591_v51 = vpop.f32.mrf.mxu3 }
  0xba   :  { %v388_v11 = vpop.f32.mrf.mxu0  ;;  %v1504_v12 = vpop.f32.mrf.mxu1  ;;  %v1183_v25 = vpack.c.bf16 %v1529_v23, %v1517_v19  ;;  %v1223_v54 = vpack.c.bf16 %v1591_v51, %v1579_v46 }
  0xbb   :  { %v740_v56 = vmul.f32 %v388_v11, %v388_v11  ;;  %v667_v61 = vadd.f32 %v666_v57, %v388_v11 }
  0xbc   :  { %1267 = vst [vmem:[%s1851_s2 + $0x90] sm:$0xff] %v1183_v25  }
  0xbd   :  { %1275 = vst [vmem:[%s1851_s2 + $0xd0] sm:$0xff] %v1223_v54   ;;  %v803_v62 = vadd.f32 %v802_v58, %v740_v56 }
  0xc1   :  { %v1547_v31 = vpop.f32.mrf.mxu2  ;;  %v1611_v0 = vpop.f32.mrf.mxu3 }
  0xc2   :  { %v390_v15 = vpop.f32.mrf.mxu0  ;;  %v1513_v16 = vpop.f32.mrf.mxu1 }
  0xc3   :  { %v1108_v17 = vpack.c.bf16 %v390_v15, %v388_v11  ;;  %v1148_v18 = vpack.c.bf16 %v1513_v16, %v1504_v12  ;;  %v741_v59 = vmul.f32 %v390_v15, %v390_v15  ;;  %v668_v8 = vadd.f32 %v667_v61, %v390_v15 }
  0xc5   :  { %1252 = vst [vmem:[%s1851_s2 + $0x18] sm:$0xff] %v1108_v17   ;;  %v804_v6 = vadd.f32 %v803_v62, %v741_v59 }
  0xc6   :  { %1260 = vst [vmem:[%s1851_s2 + $0x58] sm:$0xff] %v1148_v18  }
  0xc9   :  { %v1559_v35 = vpop.f32.mrf.mxu2 }
  0xca   :  { %v393_v21 = vpop.f32.mrf.mxu0  ;;  %v1527_v22 = vpop.f32.mrf.mxu1  ;;  %v1188_v38 = vpack.c.bf16 %v1559_v35, %v1547_v31 }
  0xcb   :  { %v742_v1 = vmul.f32 %v393_v21, %v393_v21  ;;  %v669_v25 = vadd.f32 %v668_v8, %v393_v21 }
  0xcc   :  { %1268 = vst [vmem:[%s1851_s2 + $0x98] sm:$0xff] %v1188_v38  }
  0xcd   :  { %v805_v4 = vadd.f32 %v804_v6, %v742_v1 }
  0xd1   :  { %v1577_v45 = vpop.f32.mrf.mxu2 }
  0xd2   :  { %v395_v27 = vpop.f32.mrf.mxu0  ;;  %v1543_v28 = vpop.f32.mrf.mxu1 }
  0xd3   :  { %v1113_v29 = vpack.c.bf16 %v395_v27, %v393_v21  ;;  %v1153_v30 = vpack.c.bf16 %v1543_v28, %v1527_v22  ;;  %v743_v18 = vmul.f32 %v395_v27, %v395_v27  ;;  %v670_v15 = vadd.f32 %v669_v25, %v395_v27 }
  0xd5   :  { %1253 = vst [vmem:[%s1851_s2 + $0x20] sm:$0xff] %v1113_v29   ;;  %v806_v26 = vadd.f32 %v805_v4, %v743_v18 }
  0xd6   :  { %1261 = vst [vmem:[%s1851_s2 + $0x60] sm:$0xff] %v1153_v30  }
  0xd9   :  { %v1589_v50 = vpop.f32.mrf.mxu2 }
  0xda   :  { %v398_v33 = vpop.f32.mrf.mxu0  ;;  %v1557_v34 = vpop.f32.mrf.mxu1  ;;  %v1193_v53 = vpack.c.bf16 %v1589_v50, %v1577_v45 }
  0xdb   :  { %v744_v11 = vmul.f32 %v398_v33, %v398_v33  ;;  %v671_v30 = vadd.f32 %v670_v15, %v398_v33 }
  0xdc   :  { %1269 = vst [vmem:[%s1851_s2 + $0xa0] sm:$0xff] %v1193_v53   ;;  %v1623_v53 = vpop.f32.mrf.mxu3 }
  0xdd   :  { %v807_v38 = vadd.f32 %v806_v26, %v744_v11  ;;  %v1228_v27 = vpack.c.bf16 %v1623_v53, %v1611_v0  ;;  %v751_v26 = vmul.f32 %v1447_v42, %v1447_v42 }
  0xdf   :  { %1276 = vst [vmem:[%s1851_s2 + $0xd8] sm:$0xff] %v1228_v27  }
  0xe1   :  { %v1609_v17 = vpop.f32.mrf.mxu2 }
  0xe2   :  { %v400_v40 = vpop.f32.mrf.mxu0  ;;  %v1573_v41 = vpop.f32.mrf.mxu1 }
  0xe3   :  { %v1118_v43 = vpack.c.bf16 %v400_v40, %v398_v33  ;;  %v1158_v44 = vpack.c.bf16 %v1573_v41, %v1557_v34  ;;  %v745_v29 = vmul.f32 %v400_v40, %v400_v40  ;;  %v672_v21 = vadd.f32 %v671_v30, %v400_v40 }
  0xe4   :  { %v1641_v4 = vpop.f32.mrf.mxu3 }
  0xe5   :  { %1254 = vst [vmem:[%s1851_s2 + $0x28] sm:$0xff] %v1118_v43   ;;  %v808_v54 = vadd.f32 %v807_v38, %v745_v29  ;;  %v752_v38 = vmul.f32 %v1457_v49, %v1457_v49 }
  0xe6   :  { %1262 = vst [vmem:[%s1851_s2 + $0x68] sm:$0xff] %v1158_v44  }
  0xe9   :  { %v1621_v52 = vpop.f32.mrf.mxu2 }
  0xea   :  { %v403_v47 = vpop.f32.mrf.mxu0  ;;  %v1587_v48 = vpop.f32.mrf.mxu1  ;;  %v1198_v57 = vpack.c.bf16 %v1621_v52, %v1609_v17 }
  0xeb   :  { %v746_v39 = vmul.f32 %v403_v47, %v403_v47  ;;  %v673_v58 = vadd.f32 %v672_v21, %v403_v47 }
  0xec   :  { %1270 = vst [vmem:[%s1851_s2 + $0xa8] sm:$0xff] %v1198_v57   ;;  %v1663_v57 = vpop.f32.mrf.mxu3 }
  0xed   :  { %v809_v33 = vadd.f32 %v808_v54, %v746_v39  ;;  %v1233_v27 = vpack.c.bf16 %v1663_v57, %v1641_v4 }
  0xef   :  { %1277 = vst [vmem:[%s1851_s2 + $0xe0] sm:$0xff] %v1233_v27  }
  0xf1   :  { %v1639_v25 = vpop.f32.mrf.mxu2 }
  0xf2   :  { %v405_v3 = vpop.f32.mrf.mxu0  ;;  %v1605_v5 = vpop.f32.mrf.mxu1 }
  0xf3   :  { %v1123_v9 = vpack.c.bf16 %v405_v3, %v403_v47  ;;  %v1163_v14 = vpack.c.bf16 %v1605_v5, %v1587_v48  ;;  %v747_v56 = vmul.f32 %v405_v3, %v405_v3  ;;  %v674_v40 = vadd.f32 %v673_v58, %v405_v3 }
  0xf4   :  { %v750_v3 = vmul.f32 %v1437_v37, %v1437_v37  ;;  %v763_v27 = vmul.f32 %v1605_v5, %v1605_v5 }
  0xf5   :  { %1255 = vst [vmem:[%s1851_s2 + $0x30] sm:$0xff] %v1123_v9   ;;  %v810_v61 = vadd.f32 %v809_v33, %v747_v56 }
  0xf6   :  { %1263 = vst [vmem:[%s1851_s2 + $0x70] sm:$0xff] %v1163_v14  }
  0xf9   :  { %v1661_v56 = vpop.f32.mrf.mxu2 }
  0xfa   :  { %v408_v43 = vpop.f32.mrf.mxu0  ;;  %v1619_v44 = vpop.f32.mrf.mxu1 }
  0xfb   :  { %v748_v59 = vmul.f32 %v408_v43, %v408_v43  ;;  %v675_v62 = vadd.f32 %v674_v40, %v408_v43 }
  0xfd   :  { %v811_v1 = vadd.f32 %v810_v61, %v748_v59  ;;  %v756_v61 = vmul.f32 %v1504_v12, %v1504_v12 }
 0x102   :  { %v410_v8 = vpop.f32.mrf.mxu0  ;;  %v1635_v9 = vpop.f32.mrf.mxu1 }
 0x103   :  { %v1128_v14 = vpack.c.bf16 %v410_v8, %v408_v43  ;;  %v676_v6 = vadd.f32 %v675_v62, %v410_v8  ;;  %v749_v47 = vmul.f32 %v410_v8, %v410_v8  ;;  %v1168_v18 = vpack.c.bf16 %v1635_v9, %v1619_v44 }
 0x105   :  { %1256 = vst [vmem:[%s1851_s2 + $0x38] sm:$0xff] %v1128_v14   ;;  %v677_v11 = vadd.f32 %v676_v6, %v1437_v37  ;;  %v812_v15 = vadd.f32 %v811_v1, %v749_v47  ;;  %v753_v37 = vmul.f32 %v1463_v55, %v1463_v55  ;;  %v757_v1 = vmul.f32 %v1513_v16, %v1513_v16  ;;  %v1687_v6 = vpop.f32.mrf.mxu2 }
 0x106   :  { %1264 = vst [vmem:[%s1851_s2 + $0x78] sm:$0xff] %v1168_v18   ;;  %v758_v47 = vmul.f32 %v1527_v22, %v1527_v22 }
 0x107   :  { %v678_v29 = vadd.f32 %v677_v11, %v1447_v42  ;;  %v813_v30 = vadd.f32 %v812_v15, %v750_v3  ;;  %v1203_v42 = vpack.c.bf16 %v1661_v56, %v1639_v25  ;;  %v759_v11 = vmul.f32 %v1543_v28, %v1543_v28 }
 0x109   :  { %v679_v39 = vadd.f32 %v678_v29, %v1457_v49  ;;  %v814_v43 = vadd.f32 %v813_v30, %v751_v26  ;;  %v754_v49 = vmul.f32 %v1475_v63, %v1475_v63  ;;  %1271 = vst [vmem:[%s1851_s2 + $0xb0] sm:$0xff] %v1203_v42   ;;  %v761_v30 = vmul.f32 %v1573_v41, %v1573_v41 }
 0x10b   :  { %v680_v21 = vadd.f32 %v679_v39, %v1463_v55  ;;  %v815_v54 = vadd.f32 %v814_v43, %v752_v38  ;;  %v755_v55 = vmul.f32 %v1492_v7, %v1492_v7 }
 0x10d   :  { %v681_v58 = vadd.f32 %v680_v21, %v1475_v63  ;;  %v816_v33 = vadd.f32 %v815_v54, %v753_v37 }
 0x10f   :  { %v682_v59 = vadd.f32 %v681_v58, %v1492_v7  ;;  %v817_v40 = vadd.f32 %v816_v33, %v754_v49  ;;  %v1689_v7 = vpop.f32.mrf.mxu3 }
 0x111   :  { %v818_v62 = vadd.f32 %v817_v40, %v755_v55  ;;  %v683_v63 = vadd.f32 %v682_v59, %v1504_v12  ;;  %v765_v59 = vmul.f32 %v1635_v9, %v1635_v9 }
 0x113   :  { %v684_v8 = vadd.f32 %v683_v63, %v1513_v16  ;;  %v819_v14 = vadd.f32 %v818_v62, %v756_v61  ;;  %v760_v16 = vmul.f32 %v1557_v34, %v1557_v34  ;;  %v767_v63 = vmul.f32 %v1479_v2, %v1479_v2 }
 0x115   :  { %v685_v18 = vadd.f32 %v684_v8, %v1527_v22  ;;  %v820_v3 = vadd.f32 %v819_v14, %v757_v1  ;;  %v1703_v22 = vpop.f32.mrf.mxu2  ;;  %v768_v8 = vmul.f32 %v1496_v10, %v1496_v10 }
 0x117   :  { %v686_v12 = vadd.f32 %v685_v18, %v1543_v28  ;;  %v821_v15 = vadd.f32 %v820_v3, %v758_v47  ;;  %v1705_v43 = vpop.f32.mrf.mxu3  ;;  %v1208_v28 = vpack.c.bf16 %v1703_v22, %v1687_v6  ;;  %v769_v47 = vmul.f32 %v1506_v13, %v1506_v13 }
 0x118   :  { %v1238_v37 = vpack.c.bf16 %v1705_v43, %v1689_v7 }
 0x119   :  { %v687_v26 = vadd.f32 %v686_v12, %v1557_v34  ;;  %v822_v29 = vadd.f32 %v821_v15, %v759_v11  ;;  %v762_v34 = vmul.f32 %v1587_v48, %v1587_v48  ;;  %1272 = vst [vmem:[%s1851_s2 + $0xb8] sm:$0xff] %v1208_v28  }
 0x11a   :  { %1278 = vst [vmem:[%s1851_s2 + $0xe8] sm:$0xff] %v1238_v37   ;;  %v774_v37 = vmul.f32 %v1577_v45, %v1577_v45 }
 0x11b   :  { %v688_v38 = vadd.f32 %v687_v26, %v1573_v41  ;;  %v823_v39 = vadd.f32 %v822_v29, %v760_v16  ;;  %v772_v26 = vmul.f32 %v1547_v31, %v1547_v31 }
 0x11d   :  { %v689_v21 = vadd.f32 %v688_v38, %v1587_v48  ;;  %v824_v54 = vadd.f32 %v823_v39, %v761_v30  ;;  %v764_v48 = vmul.f32 %v1619_v44, %v1619_v44 }
 0x11f   :  { %v825_v41 = vadd.f32 %v824_v54, %v762_v34  ;;  %v690_v42 = vadd.f32 %v689_v21, %v1605_v5  ;;  %v1729_v40 = vpop.f32.mrf.mxu3  ;;  %v766_v5 = vmul.f32 %v1467_v60, %v1467_v60  ;;  %v775_v34 = vmul.f32 %v1589_v50, %v1589_v50 }
 0x121   :  { %v826_v49 = vadd.f32 %v825_v41, %v763_v27  ;;  %v691_v58 = vadd.f32 %v690_v42, %v1619_v44  ;;  %v776_v41 = vmul.f32 %v1609_v17, %v1609_v17 }
 0x123   :  { %v827_v33 = vadd.f32 %v826_v49, %v764_v48  ;;  %v692_v55 = vadd.f32 %v691_v58, %v1635_v9  ;;  %v777_v49 = vmul.f32 %v1621_v52, %v1621_v52 }
 0x125   :  { %v693_v61 = vadd.f32 %v692_v55, %v1467_v60  ;;  %v828_v62 = vadd.f32 %v827_v33, %v765_v59  ;;  %v778_v55 = vmul.f32 %v1639_v25, %v1639_v25 }
 0x127   :  { %v694_v1 = vadd.f32 %v693_v61, %v1479_v2  ;;  %v829_v44 = vadd.f32 %v828_v62, %v766_v5  ;;  %v1743_v60 = vpop.f32.mrf.mxu3  ;;  %v770_v2 = vmul.f32 %v1517_v19, %v1517_v19  ;;  %v780_v62 = vmul.f32 %v1687_v6, %v1687_v6 }
 0x128   :  { %v1243_v11 = vpack.c.bf16 %v1743_v60, %v1729_v40 }
 0x129   :  { %v695_v14 = vadd.f32 %v694_v1, %v1496_v10  ;;  %v830_v9 = vadd.f32 %v829_v44, %v767_v63  ;;  %v771_v10 = vmul.f32 %v1529_v23, %v1529_v23  ;;  %v1290_v44 = vmov 0.0  }
 0x12a   :  { %1279 = vst [vmem:[%s1851_s2 + $0xf0] sm:$0xff] %v1243_v11   ;;  %v785_v11 = vmul.f32 %v1561_v36, %v1561_v36 }
 0x12b   :  { %v696_v18 = vadd.f32 %v695_v14, %v1506_v13  ;;  %v831_v3 = vadd.f32 %v830_v9, %v768_v8  ;;  %19 = vst [vmem:[#allocation2] sm:$0x1] %v1290_v44  ;;  %v782_v8 = vmul.f32 %v1519_v20, %v1519_v20  ;;  %v783_v9 = vmul.f32 %v1531_v24, %v1531_v24 }
 0x12c   :  { %20 = vst [vmem:[#allocation3] sm:$0x1] %v1290_v44 }
 0x12d   :  { %v697_v12 = vadd.f32 %v696_v18, %v1517_v19  ;;  %v832_v15 = vadd.f32 %v831_v3, %v769_v47  ;;  %v773_v19 = vmul.f32 %v1559_v35, %v1559_v35  ;;  %v784_v18 = vmul.f32 %v1549_v32, %v1549_v32 }
 0x12f   :  { %v698_v13 = vadd.f32 %v697_v12, %v1529_v23  ;;  %v833_v16 = vadd.f32 %v832_v15, %v770_v2  ;;  %v1762_v28 = vpop.f32.mrf.mxu3  ;;  %v786_v12 = vmul.f32 %v1579_v46, %v1579_v46 }
 0x131   :  { %v834_v29 = vadd.f32 %v833_v16, %v771_v10  ;;  %v699_v30 = vadd.f32 %v698_v13, %v1547_v31 }
 0x133   :  { %v700_v38 = vadd.f32 %v699_v30, %v1559_v35  ;;  %v835_v39 = vadd.f32 %v834_v29, %v772_v26 }
 0x135   :  { %v701_v23 = vadd.f32 %v700_v38, %v1577_v45  ;;  %v836_v21 = vadd.f32 %v835_v39, %v773_v19 }
 0x137   :  { %v702_v54 = vadd.f32 %v701_v23, %v1589_v50  ;;  %v837_v31 = vadd.f32 %v836_v21, %v774_v37  ;;  %v1776_v45 = vpop.f32.mrf.mxu3 }
 0x138   :  { %v1248_v48 = vpack.c.bf16 %v1776_v45, %v1762_v28 }
 0x139   :  { %v703_v35 = vadd.f32 %v702_v54, %v1609_v17  ;;  %v838_v42 = vadd.f32 %v837_v31, %v775_v34  ;;  %v793_v54 = vmul.f32 %v1705_v43, %v1705_v43 }
 0x13a   :  { %1280 = vst [vmem:[%s1851_s2 + $0xf8] sm:$0xff] %v1248_v48  }
 0x13b   :  { %v704_v27 = vadd.f32 %v703_v35, %v1621_v52  ;;  %v839_v58 = vadd.f32 %v838_v42, %v776_v41  ;;  %v779_v52 = vmul.f32 %v1661_v56, %v1661_v56  ;;  %v794_v35 = vmul.f32 %v1729_v40, %v1729_v40 }
 0x13d   :  { %v840_v33 = vadd.f32 %v839_v58, %v777_v49  ;;  %v705_v50 = vadd.f32 %v704_v27, %v1639_v25  ;;  %v781_v25 = vmul.f32 %v1703_v22, %v1703_v22  ;;  %v795_v27 = vmul.f32 %v1743_v60, %v1743_v60 }
 0x13e   :  { %v796_v58 = vmul.f32 %v1762_v28, %v1762_v28 }
 0x13f   :  { %v841_v17 = vadd.f32 %v840_v33, %v778_v55  ;;  %v706_v59 = vadd.f32 %v705_v50, %v1661_v56  ;;  %v797_v33 = vmul.f32 %v1776_v45, %v1776_v45 }
 0x141   :  { %v842_v5 = vadd.f32 %v841_v17, %v779_v52  ;;  %v707_v61 = vadd.f32 %v706_v59, %v1687_v6 }
 0x143   :  { %v843_v63 = vadd.f32 %v842_v5, %v780_v62  ;;  %v708_v1 = vadd.f32 %v707_v61, %v1703_v22 }
 0x145   :  { %v709_v14 = vadd.f32 %v708_v1, %v1519_v20  ;;  %v844_v56 = vadd.f32 %v843_v63, %v781_v25  ;;  %v661_v63 = vld [vmem:[#allocation2] sm:$0x1] }
 0x147   :  { %v710_v6 = vadd.f32 %v709_v14, %v1531_v24  ;;  %v845_v47 = vadd.f32 %v844_v56, %v782_v8  ;;  %v787_v24 = vmul.f32 %v1591_v51, %v1591_v51 }
 0x149   :  { %v711_v22 = vadd.f32 %v710_v6, %v1549_v32  ;;  %v846_v3 = vadd.f32 %v845_v47, %v783_v9  ;;  %v788_v32 = vmul.f32 %v1611_v0, %v1611_v0 }
 0x14b   :  { %v712_v2 = vadd.f32 %v711_v22, %v1561_v36  ;;  %v847_v20 = vadd.f32 %v846_v3, %v784_v18  ;;  %v789_v36 = vmul.f32 %v1623_v53, %v1623_v53 }
 0x14d   :  { %v713_v15 = vadd.f32 %v712_v2, %v1579_v46  ;;  %v848_v10 = vadd.f32 %v847_v20, %v785_v11  ;;  %v790_v46 = vmul.f32 %v1641_v4, %v1641_v4 }
 0x14f   :  { %v714_v13 = vadd.f32 %v713_v15, %v1591_v51  ;;  %v849_v16 = vadd.f32 %v848_v10, %v786_v12  ;;  %v791_v51 = vmul.f32 %v1663_v57, %v1663_v57 }
 0x151   :  { %v850_v26 = vadd.f32 %v849_v16, %v787_v24  ;;  %v715_v29 = vadd.f32 %v714_v13, %v1611_v0  ;;  %v792_v0 = vmul.f32 %v1689_v7, %v1689_v7 }
 0x153   :  { %v716_v30 = vadd.f32 %v715_v29, %v1623_v53  ;;  %v851_v19 = vadd.f32 %v850_v26, %v788_v32 }
 0x155   :  { %v717_v38 = vadd.f32 %v716_v30, %v1641_v4  ;;  %v852_v39 = vadd.f32 %v851_v19, %v789_v36 }
 0x157   :  { %v718_v37 = vadd.f32 %v717_v38, %v1663_v57  ;;  %v853_v23 = vadd.f32 %v852_v39, %v790_v46 }
 0x159   :  { %v719_v21 = vadd.f32 %v718_v37, %v1689_v7  ;;  %v854_v34 = vadd.f32 %v853_v23, %v791_v51 }
 0x15b   :  { %v720_v53 = vadd.f32 %v719_v21, %v1705_v43  ;;  %v855_v31 = vadd.f32 %v854_v34, %v792_v0 }
 0x15d   :  { %v856_v4 = vadd.f32 %v855_v31, %v793_v54  ;;  %v721_v41 = vadd.f32 %v720_v53, %v1729_v40 }
 0x15f   :  { %v857_v57 = vadd.f32 %v856_v4, %v794_v35  ;;  %v722_v42 = vadd.f32 %v721_v41, %v1743_v60 }
 0x161   :  { %v858_v7 = vadd.f32 %v857_v57, %v795_v27  ;;  %v723_v49 = vadd.f32 %v722_v42, %v1762_v28  ;;  %v733_v28 = vld [vmem:[#allocation3] sm:$0x1] }
 0x163   :  { %v859_v43 = vadd.f32 %v858_v7, %v796_v58  ;;  %v724_v48 = vadd.f32 %v723_v49, %v1776_v45 }
 0x165   :  { %v725_v50 = vrot.slane %v724_v48, 4  ;;  %v860_v40 = vadd.f32 %v859_v43, %v797_v33 }
 0x167   :  { %v726_v55 = vadd.f32 %v725_v50, %v724_v48  ;;  %v861_v17 = vrot.slane %v860_v40, 4 }
 0x169   :  { %v727_v59 = vrot.slane %v726_v55, 2  ;;  %v862_v52 = vadd.f32 %v861_v17, %v860_v40 }
 0x16b   :  { %v728_v5 = vadd.f32 %v727_v59, %v726_v55  ;;  %v863_v60 = vrot.slane %v862_v52, 2 }
 0x16d   :  { %v729_v61 = vrot.slane %v728_v5, 1  ;;  %v864_v62 = vadd.f32 %v863_v60, %v862_v52 }
 0x16f   :  { %v730_v1 = vadd.f32 %v729_v61, %v728_v5  ;;  %v865_v25 = vrot.slane %v864_v62, 1 }
 0x171   :  { %v731_v44 = vadd.f32 %v730_v1, %v661_v63  ;;  %v866_v8 = vadd.f32 %v865_v25, %v864_v62 }
 0x173   :  { %732 = vst [vmem:[#allocation2] sm:$0x1] %v731_v44  ;;  %v867_v14 = vadd.f32 %v866_v8, %v733_v28 }
 0x175   :  { %868 = vst [vmem:[#allocation3] sm:$0x1] %v867_v14 }
 0x17a   :  { %v872_v45 = vld [vmem:[#allocation2] sm:$0x1] }
 0x17b   :  { %873 = vst [vmem:[%s1852_s3] sm:$0x1] %v872_v45 }
 0x17c   :  { %v874_v56 = vld [vmem:[#allocation3] sm:$0x1] }
 0x17d   :  { %875 = vst [vmem:[%s1853_s4] sm:$0x1] %v874_v56 }

// kernel: resnet_forward.37
= control target key start
LH: loop header
LB: loop body
LE: loop exit
PB: predicated region body
PF: predicated region fallthrough
CT: control target
= control target key end

     0   :  { %vm378_vm0 = vcmask 1043456   ;;  %vm281_vm1 = vcmask 588800   ;;  %s1890_s1 = inlined_call_operand.vmem [shape: bf16[72,128], index: 1, kind: input, shape index: {}]   ;;  %s1891_s0 = inlined_call_operand.vmem [shape: bf16[512,72], index: 0, kind: input, shape index: {}]   ;;  %s1892_s2 = inlined_call_operand.vmem [shape: bf16[512,128], index: 2, kind: output, shape index: {0}]   ;;  %s1893_s3 = inlined_call_operand.vmem [shape: f32[1,128], index: 3, kind: output, shape index: {1}]   ;;  %s1894_s4 = inlined_call_operand.vmem [shape: f32[1,128], index: 4, kind: output, shape index: {2}]  }
   0x1   :  { %v93_v0 = vld [vmem:[%s1890_s1 + $0x20] sm:$0xf]  ;;  %v1117_v4 = vld [vmem:[%s1890_s1 + $0x18] sm:$0xff]  ;;  %v1116_v5 = vld [vmem:[%s1890_s1 + $0x10] sm:$0xff] }
   0x2   :  { %v271_v1 = vunpack.c.l.b16 %v93_v0  ;;  %v1115_v6 = vld [vmem:[%s1890_s1 + $0x8] sm:$0xff]  ;;  %v1114_v7 = vld [vmem:[%s1890_s1] sm:$0xff]  ;;  %v1084_v13 = vld [vmem:[%s1891_s0 + $0x10] sm:$0xff] }
   0x3   :  { %v1082_v8 = vld [vmem:[%s1891_s0] sm:$0xff]  ;;  %v1083_v10 = vld [vmem:[%s1891_s0 + $0x8] sm:$0xff]  ;;  %v1092_v14 = vld [vmem:[%s1891_s0 + $0x50] sm:$0xff] }
   0x4   :  { %v276_v2 = vpack.c.b16 %v271_v1, %v271_v1  ;;  %v1090_v9 = vld [vmem:[%s1891_s0 + $0x40] sm:$0xff]  ;;  %v1091_v11 = vld [vmem:[%s1891_s0 + $0x48] sm:$0xff]  ;;  %v1085_v16 = vld [vmem:[%s1891_s0 + $0x18] sm:$0xff] }
   0x5   :  { %v1098_v12 = vld [vmem:[%s1891_s0 + $0x80] sm:$0xff]  ;;  %v1099_v15 = vld [vmem:[%s1891_s0 + $0x88] sm:$0xff]  ;;  %v1093_v17 = vld [vmem:[%s1891_s0 + $0x58] sm:$0xff] }
   0x6   :  { %v380_v3 = vsel %vm378_vm0, %v276_v2, 0  ;;  %v1100_v18 = vld [vmem:[%s1891_s0 + $0x90] sm:$0xff]  ;;  %v1106_v19 = vld [vmem:[%s1891_s0 + $0xc0] sm:$0xff]  ;;  %v1101_v22 = vld [vmem:[%s1891_s0 + $0x98] sm:$0xff] }
   0x7   :  { %385 = vmatpush.bf16.msra.mxu0 %v380_v3  ;;  %1309 = vmatpush.bf16.msra.mxu1 %v380_v3  ;;  %v1086_v20 = vld [vmem:[%s1891_s0 + $0x20] sm:$0xff]  ;;  %v1107_v23 = vld [vmem:[%s1891_s0 + $0xc8] sm:$0xff]  ;;  %v1108_v27 = vld [vmem:[%s1891_s0 + $0xd0] sm:$0xff] }
   0x8   :  { %1310 = vmatpush.bf16.msra.mxu2 %v380_v3  ;;  %1311 = vmatpush.bf16.msra.mxu3 %v380_v3  ;;  %v1094_v21 = vld [vmem:[%s1891_s0 + $0x60] sm:$0xff]  ;;  %v1087_v24 = vld [vmem:[%s1891_s0 + $0x28] sm:$0xff]  ;;  %v1088_v28 = vld [vmem:[%s1891_s0 + $0x30] sm:$0xff] }
   0x9   :  { %v1095_v25 = vld [vmem:[%s1891_s0 + $0x68] sm:$0xff]  ;;  %v1102_v26 = vld [vmem:[%s1891_s0 + $0xa0] sm:$0xff]  ;;  %v1096_v29 = vld [vmem:[%s1891_s0 + $0x70] sm:$0xff] }
   0xa   :  { %v1103_v30 = vld [vmem:[%s1891_s0 + $0xa8] sm:$0xff]  ;;  %v1109_v31 = vld [vmem:[%s1891_s0 + $0xd8] sm:$0xff]  ;;  %v1104_v34 = vld [vmem:[%s1891_s0 + $0xb0] sm:$0xff] }
   0xb   :  { %386 = vmatpush.bf16.msra.mxu0 %v1117_v4  ;;  %1312 = vmatpush.bf16.msra.mxu1 %v1117_v4  ;;  %v1089_v32 = vld [vmem:[%s1891_s0 + $0x38] sm:$0xff]  ;;  %v1110_v35 = vld [vmem:[%s1891_s0 + $0xe0] sm:$0xff]  ;;  %v1111_v39 = vld [vmem:[%s1891_s0 + $0xe8] sm:$0xff] }
   0xc   :  { %1313 = vmatpush.bf16.msra.mxu2 %v1117_v4  ;;  %1314 = vmatpush.bf16.msra.mxu3 %v1117_v4  ;;  %v1097_v33 = vld [vmem:[%s1891_s0 + $0x78] sm:$0xff]  ;;  %v1112_v53 = vld [vmem:[%s1891_s0 + $0xf0] sm:$0xff] }
   0xd   :  { %v1105_v38 = vld [vmem:[%s1891_s0 + $0xb8] sm:$0xff] }
   0xf   :  { %387 = vmatpush.bf16.msra.mxu0 %v1116_v5  ;;  %1315 = vmatpush.bf16.msra.mxu1 %v1116_v5 }
  0x10   :  { %1316 = vmatpush.bf16.msra.mxu2 %v1116_v5  ;;  %1317 = vmatpush.bf16.msra.mxu3 %v1116_v5  ;;  %v1113_v5 = vld [vmem:[%s1891_s0 + $0xf8] sm:$0xff] }
  0x13   :  { %388 = vmatpush.bf16.msra.mxu0 %v1115_v6  ;;  %1318 = vmatpush.bf16.msra.mxu1 %v1115_v6 }
  0x14   :  { %1319 = vmatpush.bf16.msra.mxu2 %v1115_v6  ;;  %1320 = vmatpush.bf16.msra.mxu3 %v1115_v6 }
  0x17   :  { %389 = vmatpush.bf16.msra.mxu0 %v1114_v7  ;;  %1321 = vmatpush.bf16.msra.mxu1 %v1114_v7 }
  0x18   :  { %1322 = vmatpush.bf16.msra.mxu2 %v1114_v7  ;;  %1323 = vmatpush.bf16.msra.mxu3 %v1114_v7 }
  0x1a   :  { %1050 = vmatmul.msk.bf16.vlgmr.msra.gmra.mxu0 %vm281_vm1, %v1082_v8  ;;  %1058 = vmatmul.msk.bf16.vlgmr.msra.gmra.mxu1 %vm281_vm1, %v1090_v9 }
  0x1b   :  { %1066 = vmatmul.msk.bf16.vlgmr.msra.gmra.mxu2 %vm281_vm1, %v1098_v12  ;;  %1074 = vmatmul.msk.bf16.vlgmr.msra.gmra.mxu3 %vm281_vm1, %v1106_v19 }
  0x2a   :  { %1051 = vmatmul.msk.bf16.gmra.mxu0 %vm281_vm1, %v1083_v10  ;;  %1059 = vmatmul.msk.bf16.gmra.mxu1 %vm281_vm1, %v1091_v11 }
  0x2b   :  { %1067 = vmatmul.msk.bf16.gmra.mxu2 %vm281_vm1, %v1099_v15  ;;  %1075 = vmatmul.msk.bf16.gmra.mxu3 %vm281_vm1, %v1107_v23 }
  0x3a   :  { %1052 = vmatmul.msk.bf16.gmra.mxu0 %vm281_vm1, %v1084_v13  ;;  %1060 = vmatmul.msk.bf16.gmra.mxu1 %vm281_vm1, %v1092_v14 }
  0x3b   :  { %1068 = vmatmul.msk.bf16.gmra.mxu2 %vm281_vm1, %v1100_v18  ;;  %1076 = vmatmul.msk.bf16.gmra.mxu3 %vm281_vm1, %v1108_v27 }
  0x4a   :  { %1053 = vmatmul.msk.bf16.gmra.mxu0 %vm281_vm1, %v1085_v16  ;;  %1061 = vmatmul.msk.bf16.gmra.mxu1 %vm281_vm1, %v1093_v17 }
  0x4b   :  { %1069 = vmatmul.msk.bf16.gmra.mxu2 %vm281_vm1, %v1101_v22  ;;  %1077 = vmatmul.msk.bf16.gmra.mxu3 %vm281_vm1, %v1109_v31 }
  0x5a   :  { %1054 = vmatmul.msk.bf16.gmra.mxu0 %vm281_vm1, %v1086_v20  ;;  %1062 = vmatmul.msk.bf16.gmra.mxu1 %vm281_vm1, %v1094_v21 }
  0x5b   :  { %1070 = vmatmul.msk.bf16.gmra.mxu2 %vm281_vm1, %v1102_v26  ;;  %1078 = vmatmul.msk.bf16.gmra.mxu3 %vm281_vm1, %v1110_v35 }
  0x6a   :  { %1055 = vmatmul.msk.bf16.gmra.mxu0 %vm281_vm1, %v1087_v24  ;;  %1063 = vmatmul.msk.bf16.gmra.mxu1 %vm281_vm1, %v1095_v25 }
  0x6b   :  { %1071 = vmatmul.msk.bf16.gmra.mxu2 %vm281_vm1, %v1103_v30  ;;  %1079 = vmatmul.msk.bf16.gmra.mxu3 %vm281_vm1, %v1111_v39 }
  0x7a   :  { %1056 = vmatmul.msk.bf16.gmra.mxu0 %vm281_vm1, %v1088_v28  ;;  %1064 = vmatmul.msk.bf16.gmra.mxu1 %vm281_vm1, %v1096_v29 }
  0x7b   :  { %1072 = vmatmul.msk.bf16.gmra.mxu2 %vm281_vm1, %v1104_v34  ;;  %1080 = vmatmul.msk.bf16.gmra.mxu3 %vm281_vm1, %v1112_v53 }
  0x8a   :  { %1057 = vmatmul.msk.bf16.gmra.mxu0 %vm281_vm1, %v1089_v32  ;;  %1065 = vmatmul.msk.bf16.gmra.mxu1 %vm281_vm1, %v1097_v33 }
  0x8b   :  { %1073 = vmatmul.msk.bf16.gmra.mxu2 %vm281_vm1, %v1105_v38  ;;  %1081 = vmatmul.msk.bf16.gmra.mxu3 %vm281_vm1, %v1113_v5 }
  0x97   :  { %v391_v36 = vpop.f32.mrf.mxu0  ;;  %v1478_v37 = vpop.f32.mrf.mxu1 }
  0x98   :  { %v752_v40 = vmul.f32 %v391_v36, %v391_v36 }
  0x9e   :  { %v1508_v60 = vpop.f32.mrf.mxu2  ;;  %v1560_v20 = vpop.f32.mrf.mxu3 }
  0x9f   :  { %v393_v41 = vpop.f32.mrf.mxu0  ;;  %v1488_v42 = vpop.f32.mrf.mxu1 }
  0xa0   :  { %v1121_v43 = vpack.c.bf16 %v393_v41, %v391_v36  ;;  %v680_v44 = vadd.f32 %v393_v41, %v391_v36  ;;  %v753_v45 = vmul.f32 %v393_v41, %v393_v41  ;;  %v1161_v46 = vpack.c.bf16 %v1488_v42, %v1478_v37 }
  0xa2   :  { %1122 = vst [vmem:[%s1892_s2] sm:$0xff] %v1121_v43   ;;  %v816_v47 = vadd.f32 %v753_v45, %v752_v40 }
  0xa3   :  { %1285 = vst [vmem:[%s1892_s2 + $0x40] sm:$0xff] %v1161_v46  }
  0xa6   :  { %v1520_v2 = vpop.f32.mrf.mxu2  ;;  %v1572_v24 = vpop.f32.mrf.mxu3 }
  0xa7   :  { %v396_v48 = vpop.f32.mrf.mxu0  ;;  %v1498_v49 = vpop.f32.mrf.mxu1  ;;  %v1201_v3 = vpack.c.bf16 %v1520_v2, %v1508_v60  ;;  %v1241_v26 = vpack.c.bf16 %v1572_v24, %v1560_v20 }
  0xa8   :  { %v681_v50 = vadd.f32 %v680_v44, %v396_v48  ;;  %v754_v51 = vmul.f32 %v396_v48, %v396_v48 }
  0xa9   :  { %1293 = vst [vmem:[%s1892_s2 + $0x80] sm:$0xff] %v1201_v3  }
  0xaa   :  { %v817_v52 = vadd.f32 %v816_v47, %v754_v51  ;;  %1301 = vst [vmem:[%s1892_s2 + $0xc0] sm:$0xff] %v1241_v26  }
  0xae   :  { %v1537_v10 = vpop.f32.mrf.mxu2  ;;  %v1590_v32 = vpop.f32.mrf.mxu3 }
  0xaf   :  { %v398_v54 = vpop.f32.mrf.mxu0  ;;  %v1504_v55 = vpop.f32.mrf.mxu1 }
  0xb0   :  { %v1126_v56 = vpack.c.bf16 %v398_v54, %v396_v48  ;;  %v682_v57 = vadd.f32 %v681_v50, %v398_v54  ;;  %v755_v58 = vmul.f32 %v398_v54, %v398_v54  ;;  %v1166_v59 = vpack.c.bf16 %v1504_v55, %v1498_v49 }
  0xb2   :  { %1278 = vst [vmem:[%s1892_s2 + $0x8] sm:$0xff] %v1126_v56   ;;  %v818_v61 = vadd.f32 %v817_v52, %v755_v58 }
  0xb3   :  { %1286 = vst [vmem:[%s1892_s2 + $0x48] sm:$0xff] %v1166_v59  }
  0xb6   :  { %v1547_v13 = vpop.f32.mrf.mxu2  ;;  %v1602_v36 = vpop.f32.mrf.mxu3 }
  0xb7   :  { %v401_v62 = vpop.f32.mrf.mxu0  ;;  %v1516_v63 = vpop.f32.mrf.mxu1  ;;  %v1206_v14 = vpack.c.bf16 %v1547_v13, %v1537_v10  ;;  %v1246_v39 = vpack.c.bf16 %v1602_v36, %v1590_v32 }
  0xb8   :  { %v1518_v0 = vadd.f32 %v682_v57, %v401_v62  ;;  %v756_v1 = vmul.f32 %v401_v62, %v401_v62 }
  0xb9   :  { %1294 = vst [vmem:[%s1892_s2 + $0x88] sm:$0xff] %v1206_v14  }
  0xba   :  { %v1524_v4 = vadd.f32 %v818_v61, %v756_v1  ;;  %1302 = vst [vmem:[%s1892_s2 + $0xc8] sm:$0xff] %v1246_v39  }
  0xbe   :  { %v1558_v19 = vpop.f32.mrf.mxu2  ;;  %v1620_v46 = vpop.f32.mrf.mxu3 }
  0xbf   :  { %v403_v6 = vpop.f32.mrf.mxu0  ;;  %v1533_v7 = vpop.f32.mrf.mxu1 }
  0xc0   :  { %v1131_v8 = vpack.c.bf16 %v403_v6, %v401_v62  ;;  %v1171_v9 = vpack.c.bf16 %v1533_v7, %v1516_v63  ;;  %v757_v52 = vmul.f32 %v403_v6, %v403_v6  ;;  %v684_v57 = vadd.f32 %v1518_v0, %v403_v6 }
  0xc2   :  { %1279 = vst [vmem:[%s1892_s2 + $0x10] sm:$0xff] %v1131_v8   ;;  %v820_v58 = vadd.f32 %v1524_v4, %v757_v52 }
  0xc3   :  { %1287 = vst [vmem:[%s1892_s2 + $0x50] sm:$0xff] %v1171_v9  }
  0xc6   :  { %v1570_v23 = vpop.f32.mrf.mxu2  ;;  %v1632_v51 = vpop.f32.mrf.mxu3 }
  0xc7   :  { %v406_v11 = vpop.f32.mrf.mxu0  ;;  %v1545_v12 = vpop.f32.mrf.mxu1  ;;  %v1211_v25 = vpack.c.bf16 %v1570_v23, %v1558_v19  ;;  %v1251_v54 = vpack.c.bf16 %v1632_v51, %v1620_v46 }
  0xc8   :  { %v758_v56 = vmul.f32 %v406_v11, %v406_v11  ;;  %v685_v61 = vadd.f32 %v684_v57, %v406_v11 }
  0xc9   :  { %1295 = vst [vmem:[%s1892_s2 + $0x90] sm:$0xff] %v1211_v25  }
  0xca   :  { %1303 = vst [vmem:[%s1892_s2 + $0xd0] sm:$0xff] %v1251_v54   ;;  %v821_v62 = vadd.f32 %v820_v58, %v758_v56 }
  0xce   :  { %v1588_v31 = vpop.f32.mrf.mxu2  ;;  %v1652_v0 = vpop.f32.mrf.mxu3 }
  0xcf   :  { %v408_v15 = vpop.f32.mrf.mxu0  ;;  %v1554_v16 = vpop.f32.mrf.mxu1 }
  0xd0   :  { %v1136_v17 = vpack.c.bf16 %v408_v15, %v406_v11  ;;  %v1176_v18 = vpack.c.bf16 %v1554_v16, %v1545_v12  ;;  %v759_v59 = vmul.f32 %v408_v15, %v408_v15  ;;  %v686_v8 = vadd.f32 %v685_v61, %v408_v15 }
  0xd2   :  { %1280 = vst [vmem:[%s1892_s2 + $0x18] sm:$0xff] %v1136_v17   ;;  %v822_v6 = vadd.f32 %v821_v62, %v759_v59 }
  0xd3   :  { %1288 = vst [vmem:[%s1892_s2 + $0x58] sm:$0xff] %v1176_v18  }
  0xd6   :  { %v1600_v35 = vpop.f32.mrf.mxu2 }
  0xd7   :  { %v411_v21 = vpop.f32.mrf.mxu0  ;;  %v1568_v22 = vpop.f32.mrf.mxu1  ;;  %v1216_v38 = vpack.c.bf16 %v1600_v35, %v1588_v31 }
  0xd8   :  { %v760_v1 = vmul.f32 %v411_v21, %v411_v21  ;;  %v687_v25 = vadd.f32 %v686_v8, %v411_v21 }
  0xd9   :  { %1296 = vst [vmem:[%s1892_s2 + $0x98] sm:$0xff] %v1216_v38  }
  0xda   :  { %v823_v4 = vadd.f32 %v822_v6, %v760_v1 }
  0xde   :  { %v1618_v45 = vpop.f32.mrf.mxu2 }
  0xdf   :  { %v413_v27 = vpop.f32.mrf.mxu0  ;;  %v1584_v28 = vpop.f32.mrf.mxu1 }
  0xe0   :  { %v1141_v29 = vpack.c.bf16 %v413_v27, %v411_v21  ;;  %v1181_v30 = vpack.c.bf16 %v1584_v28, %v1568_v22  ;;  %v761_v18 = vmul.f32 %v413_v27, %v413_v27  ;;  %v688_v15 = vadd.f32 %v687_v25, %v413_v27 }
  0xe2   :  { %1281 = vst [vmem:[%s1892_s2 + $0x20] sm:$0xff] %v1141_v29   ;;  %v824_v26 = vadd.f32 %v823_v4, %v761_v18 }
  0xe3   :  { %1289 = vst [vmem:[%s1892_s2 + $0x60] sm:$0xff] %v1181_v30  }
  0xe6   :  { %v1630_v50 = vpop.f32.mrf.mxu2 }
  0xe7   :  { %v416_v33 = vpop.f32.mrf.mxu0  ;;  %v1598_v34 = vpop.f32.mrf.mxu1  ;;  %v1221_v53 = vpack.c.bf16 %v1630_v50, %v1618_v45 }
  0xe8   :  { %v762_v11 = vmul.f32 %v416_v33, %v416_v33  ;;  %v689_v30 = vadd.f32 %v688_v15, %v416_v33 }
  0xe9   :  { %1297 = vst [vmem:[%s1892_s2 + $0xa0] sm:$0xff] %v1221_v53   ;;  %v1664_v53 = vpop.f32.mrf.mxu3 }
  0xea   :  { %v825_v38 = vadd.f32 %v824_v26, %v762_v11  ;;  %v1256_v27 = vpack.c.bf16 %v1664_v53, %v1652_v0  ;;  %v769_v26 = vmul.f32 %v1488_v42, %v1488_v42 }
  0xec   :  { %1304 = vst [vmem:[%s1892_s2 + $0xd8] sm:$0xff] %v1256_v27  }
  0xee   :  { %v1650_v17 = vpop.f32.mrf.mxu2 }
  0xef   :  { %v418_v40 = vpop.f32.mrf.mxu0  ;;  %v1614_v41 = vpop.f32.mrf.mxu1 }
  0xf0   :  { %v1146_v43 = vpack.c.bf16 %v418_v40, %v416_v33  ;;  %v1186_v44 = vpack.c.bf16 %v1614_v41, %v1598_v34  ;;  %v763_v29 = vmul.f32 %v418_v40, %v418_v40  ;;  %v690_v21 = vadd.f32 %v689_v30, %v418_v40 }
  0xf1   :  { %v1682_v4 = vpop.f32.mrf.mxu3 }
  0xf2   :  { %1282 = vst [vmem:[%s1892_s2 + $0x28] sm:$0xff] %v1146_v43   ;;  %v826_v54 = vadd.f32 %v825_v38, %v763_v29  ;;  %v770_v38 = vmul.f32 %v1498_v49, %v1498_v49 }
  0xf3   :  { %1290 = vst [vmem:[%s1892_s2 + $0x68] sm:$0xff] %v1186_v44  }
  0xf6   :  { %v1662_v52 = vpop.f32.mrf.mxu2 }
  0xf7   :  { %v421_v47 = vpop.f32.mrf.mxu0  ;;  %v1628_v48 = vpop.f32.mrf.mxu1  ;;  %v1226_v57 = vpack.c.bf16 %v1662_v52, %v1650_v17 }
  0xf8   :  { %v764_v39 = vmul.f32 %v421_v47, %v421_v47  ;;  %v691_v58 = vadd.f32 %v690_v21, %v421_v47 }
  0xf9   :  { %1298 = vst [vmem:[%s1892_s2 + $0xa8] sm:$0xff] %v1226_v57   ;;  %v1704_v57 = vpop.f32.mrf.mxu3 }
  0xfa   :  { %v827_v33 = vadd.f32 %v826_v54, %v764_v39  ;;  %v1261_v27 = vpack.c.bf16 %v1704_v57, %v1682_v4 }
  0xfc   :  { %1305 = vst [vmem:[%s1892_s2 + $0xe0] sm:$0xff] %v1261_v27  }
  0xfe   :  { %v1680_v25 = vpop.f32.mrf.mxu2 }
  0xff   :  { %v423_v3 = vpop.f32.mrf.mxu0  ;;  %v1646_v5 = vpop.f32.mrf.mxu1 }
 0x100   :  { %v1151_v9 = vpack.c.bf16 %v423_v3, %v421_v47  ;;  %v1191_v14 = vpack.c.bf16 %v1646_v5, %v1628_v48  ;;  %v765_v56 = vmul.f32 %v423_v3, %v423_v3  ;;  %v692_v40 = vadd.f32 %v691_v58, %v423_v3 }
 0x101   :  { %v768_v3 = vmul.f32 %v1478_v37, %v1478_v37  ;;  %v781_v27 = vmul.f32 %v1646_v5, %v1646_v5 }
 0x102   :  { %1283 = vst [vmem:[%s1892_s2 + $0x30] sm:$0xff] %v1151_v9   ;;  %v828_v61 = vadd.f32 %v827_v33, %v765_v56 }
 0x103   :  { %1291 = vst [vmem:[%s1892_s2 + $0x70] sm:$0xff] %v1191_v14  }
 0x106   :  { %v1702_v56 = vpop.f32.mrf.mxu2 }
 0x107   :  { %v426_v43 = vpop.f32.mrf.mxu0  ;;  %v1660_v44 = vpop.f32.mrf.mxu1 }
 0x108   :  { %v766_v59 = vmul.f32 %v426_v43, %v426_v43  ;;  %v693_v62 = vadd.f32 %v692_v40, %v426_v43 }
 0x10a   :  { %v829_v1 = vadd.f32 %v828_v61, %v766_v59  ;;  %v774_v61 = vmul.f32 %v1545_v12, %v1545_v12 }
 0x10f   :  { %v428_v8 = vpop.f32.mrf.mxu0  ;;  %v1676_v9 = vpop.f32.mrf.mxu1 }
 0x110   :  { %v1156_v14 = vpack.c.bf16 %v428_v8, %v426_v43  ;;  %v694_v6 = vadd.f32 %v693_v62, %v428_v8  ;;  %v767_v47 = vmul.f32 %v428_v8, %v428_v8  ;;  %v1196_v18 = vpack.c.bf16 %v1676_v9, %v1660_v44 }
 0x112   :  { %1284 = vst [vmem:[%s1892_s2 + $0x38] sm:$0xff] %v1156_v14   ;;  %v695_v11 = vadd.f32 %v694_v6, %v1478_v37  ;;  %v830_v15 = vadd.f32 %v829_v1, %v767_v47  ;;  %v771_v37 = vmul.f32 %v1504_v55, %v1504_v55  ;;  %v775_v1 = vmul.f32 %v1554_v16, %v1554_v16  ;;  %v1728_v6 = vpop.f32.mrf.mxu2 }
 0x113   :  { %1292 = vst [vmem:[%s1892_s2 + $0x78] sm:$0xff] %v1196_v18   ;;  %v776_v47 = vmul.f32 %v1568_v22, %v1568_v22 }
 0x114   :  { %v696_v29 = vadd.f32 %v695_v11, %v1488_v42  ;;  %v831_v30 = vadd.f32 %v830_v15, %v768_v3  ;;  %v1231_v42 = vpack.c.bf16 %v1702_v56, %v1680_v25  ;;  %v777_v11 = vmul.f32 %v1584_v28, %v1584_v28 }
 0x116   :  { %v697_v39 = vadd.f32 %v696_v29, %v1498_v49  ;;  %v832_v43 = vadd.f32 %v831_v30, %v769_v26  ;;  %v772_v49 = vmul.f32 %v1516_v63, %v1516_v63  ;;  %1299 = vst [vmem:[%s1892_s2 + $0xb0] sm:$0xff] %v1231_v42   ;;  %v779_v30 = vmul.f32 %v1614_v41, %v1614_v41 }
 0x118   :  { %v698_v21 = vadd.f32 %v697_v39, %v1504_v55  ;;  %v833_v54 = vadd.f32 %v832_v43, %v770_v38  ;;  %v773_v55 = vmul.f32 %v1533_v7, %v1533_v7 }
 0x11a   :  { %v699_v58 = vadd.f32 %v698_v21, %v1516_v63  ;;  %v834_v33 = vadd.f32 %v833_v54, %v771_v37 }
 0x11c   :  { %v700_v59 = vadd.f32 %v699_v58, %v1533_v7  ;;  %v835_v40 = vadd.f32 %v834_v33, %v772_v49  ;;  %v1730_v7 = vpop.f32.mrf.mxu3 }
 0x11e   :  { %v836_v62 = vadd.f32 %v835_v40, %v773_v55  ;;  %v701_v63 = vadd.f32 %v700_v59, %v1545_v12  ;;  %v783_v59 = vmul.f32 %v1676_v9, %v1676_v9 }
 0x120   :  { %v702_v8 = vadd.f32 %v701_v63, %v1554_v16  ;;  %v837_v14 = vadd.f32 %v836_v62, %v774_v61  ;;  %v778_v16 = vmul.f32 %v1598_v34, %v1598_v34  ;;  %v785_v63 = vmul.f32 %v1520_v2, %v1520_v2 }
 0x122   :  { %v703_v18 = vadd.f32 %v702_v8, %v1568_v22  ;;  %v838_v3 = vadd.f32 %v837_v14, %v775_v1  ;;  %v1744_v22 = vpop.f32.mrf.mxu2  ;;  %v786_v8 = vmul.f32 %v1537_v10, %v1537_v10 }
 0x124   :  { %v704_v12 = vadd.f32 %v703_v18, %v1584_v28  ;;  %v839_v15 = vadd.f32 %v838_v3, %v776_v47  ;;  %v1746_v43 = vpop.f32.mrf.mxu3  ;;  %v1236_v28 = vpack.c.bf16 %v1744_v22, %v1728_v6  ;;  %v787_v47 = vmul.f32 %v1547_v13, %v1547_v13 }
 0x125   :  { %v1266_v37 = vpack.c.bf16 %v1746_v43, %v1730_v7 }
 0x126   :  { %v705_v26 = vadd.f32 %v704_v12, %v1598_v34  ;;  %v840_v29 = vadd.f32 %v839_v15, %v777_v11  ;;  %v780_v34 = vmul.f32 %v1628_v48, %v1628_v48  ;;  %1300 = vst [vmem:[%s1892_s2 + $0xb8] sm:$0xff] %v1236_v28  }
 0x127   :  { %1306 = vst [vmem:[%s1892_s2 + $0xe8] sm:$0xff] %v1266_v37   ;;  %v792_v37 = vmul.f32 %v1618_v45, %v1618_v45 }
 0x128   :  { %v706_v38 = vadd.f32 %v705_v26, %v1614_v41  ;;  %v841_v39 = vadd.f32 %v840_v29, %v778_v16  ;;  %v790_v26 = vmul.f32 %v1588_v31, %v1588_v31 }
 0x12a   :  { %v707_v21 = vadd.f32 %v706_v38, %v1628_v48  ;;  %v842_v54 = vadd.f32 %v841_v39, %v779_v30  ;;  %v782_v48 = vmul.f32 %v1660_v44, %v1660_v44 }
 0x12c   :  { %v843_v41 = vadd.f32 %v842_v54, %v780_v34  ;;  %v708_v42 = vadd.f32 %v707_v21, %v1646_v5  ;;  %v1770_v40 = vpop.f32.mrf.mxu3  ;;  %v784_v5 = vmul.f32 %v1508_v60, %v1508_v60  ;;  %v793_v34 = vmul.f32 %v1630_v50, %v1630_v50 }
 0x12e   :  { %v844_v49 = vadd.f32 %v843_v41, %v781_v27  ;;  %v709_v58 = vadd.f32 %v708_v42, %v1660_v44  ;;  %v794_v41 = vmul.f32 %v1650_v17, %v1650_v17 }
 0x130   :  { %v845_v33 = vadd.f32 %v844_v49, %v782_v48  ;;  %v710_v55 = vadd.f32 %v709_v58, %v1676_v9  ;;  %v795_v49 = vmul.f32 %v1662_v52, %v1662_v52 }
 0x132   :  { %v711_v61 = vadd.f32 %v710_v55, %v1508_v60  ;;  %v846_v62 = vadd.f32 %v845_v33, %v783_v59  ;;  %v796_v55 = vmul.f32 %v1680_v25, %v1680_v25 }
 0x134   :  { %v712_v1 = vadd.f32 %v711_v61, %v1520_v2  ;;  %v847_v44 = vadd.f32 %v846_v62, %v784_v5  ;;  %v1784_v60 = vpop.f32.mrf.mxu3  ;;  %v788_v2 = vmul.f32 %v1558_v19, %v1558_v19  ;;  %v798_v62 = vmul.f32 %v1728_v6, %v1728_v6 }
 0x135   :  { %v1271_v11 = vpack.c.bf16 %v1784_v60, %v1770_v40 }
 0x136   :  { %v713_v14 = vadd.f32 %v712_v1, %v1537_v10  ;;  %v848_v9 = vadd.f32 %v847_v44, %v785_v63  ;;  %v789_v10 = vmul.f32 %v1570_v23, %v1570_v23  ;;  %v1325_v44 = vmov 0.0  }
 0x137   :  { %1307 = vst [vmem:[%s1892_s2 + $0xf0] sm:$0xff] %v1271_v11   ;;  %v803_v11 = vmul.f32 %v1602_v36, %v1602_v36 }
 0x138   :  { %v714_v18 = vadd.f32 %v713_v14, %v1547_v13  ;;  %v849_v3 = vadd.f32 %v848_v9, %v786_v8  ;;  %19 = vst [vmem:[#allocation2] sm:$0x1] %v1325_v44  ;;  %v800_v8 = vmul.f32 %v1560_v20, %v1560_v20  ;;  %v801_v9 = vmul.f32 %v1572_v24, %v1572_v24 }
 0x139   :  { %20 = vst [vmem:[#allocation3] sm:$0x1] %v1325_v44 }
 0x13a   :  { %v715_v12 = vadd.f32 %v714_v18, %v1558_v19  ;;  %v850_v15 = vadd.f32 %v849_v3, %v787_v47  ;;  %v791_v19 = vmul.f32 %v1600_v35, %v1600_v35  ;;  %v802_v18 = vmul.f32 %v1590_v32, %v1590_v32 }
 0x13c   :  { %v716_v13 = vadd.f32 %v715_v12, %v1570_v23  ;;  %v851_v16 = vadd.f32 %v850_v15, %v788_v2  ;;  %v1803_v28 = vpop.f32.mrf.mxu3  ;;  %v804_v12 = vmul.f32 %v1620_v46, %v1620_v46 }
 0x13e   :  { %v852_v29 = vadd.f32 %v851_v16, %v789_v10  ;;  %v717_v30 = vadd.f32 %v716_v13, %v1588_v31 }
 0x140   :  { %v718_v38 = vadd.f32 %v717_v30, %v1600_v35  ;;  %v853_v39 = vadd.f32 %v852_v29, %v790_v26 }
 0x142   :  { %v719_v23 = vadd.f32 %v718_v38, %v1618_v45  ;;  %v854_v21 = vadd.f32 %v853_v39, %v791_v19 }
 0x144   :  { %v720_v54 = vadd.f32 %v719_v23, %v1630_v50  ;;  %v855_v31 = vadd.f32 %v854_v21, %v792_v37  ;;  %v1817_v45 = vpop.f32.mrf.mxu3 }
 0x145   :  { %v1276_v48 = vpack.c.bf16 %v1817_v45, %v1803_v28 }
 0x146   :  { %v721_v35 = vadd.f32 %v720_v54, %v1650_v17  ;;  %v856_v42 = vadd.f32 %v855_v31, %v793_v34  ;;  %v811_v54 = vmul.f32 %v1746_v43, %v1746_v43 }
 0x147   :  { %1308 = vst [vmem:[%s1892_s2 + $0xf8] sm:$0xff] %v1276_v48  }
 0x148   :  { %v722_v27 = vadd.f32 %v721_v35, %v1662_v52  ;;  %v857_v58 = vadd.f32 %v856_v42, %v794_v41  ;;  %v797_v52 = vmul.f32 %v1702_v56, %v1702_v56  ;;  %v812_v35 = vmul.f32 %v1770_v40, %v1770_v40 }
 0x14a   :  { %v858_v33 = vadd.f32 %v857_v58, %v795_v49  ;;  %v723_v50 = vadd.f32 %v722_v27, %v1680_v25  ;;  %v799_v25 = vmul.f32 %v1744_v22, %v1744_v22  ;;  %v813_v27 = vmul.f32 %v1784_v60, %v1784_v60 }
 0x14b   :  { %v814_v58 = vmul.f32 %v1803_v28, %v1803_v28 }
 0x14c   :  { %v859_v17 = vadd.f32 %v858_v33, %v796_v55  ;;  %v724_v59 = vadd.f32 %v723_v50, %v1702_v56  ;;  %v815_v33 = vmul.f32 %v1817_v45, %v1817_v45 }
 0x14e   :  { %v860_v5 = vadd.f32 %v859_v17, %v797_v52  ;;  %v725_v61 = vadd.f32 %v724_v59, %v1728_v6 }
 0x150   :  { %v861_v63 = vadd.f32 %v860_v5, %v798_v62  ;;  %v726_v1 = vadd.f32 %v725_v61, %v1744_v22 }
 0x152   :  { %v727_v14 = vadd.f32 %v726_v1, %v1560_v20  ;;  %v862_v56 = vadd.f32 %v861_v63, %v799_v25  ;;  %v679_v63 = vld [vmem:[#allocation2] sm:$0x1] }
 0x154   :  { %v728_v6 = vadd.f32 %v727_v14, %v1572_v24  ;;  %v863_v47 = vadd.f32 %v862_v56, %v800_v8  ;;  %v805_v24 = vmul.f32 %v1632_v51, %v1632_v51 }
 0x156   :  { %v729_v22 = vadd.f32 %v728_v6, %v1590_v32  ;;  %v864_v3 = vadd.f32 %v863_v47, %v801_v9  ;;  %v806_v32 = vmul.f32 %v1652_v0, %v1652_v0 }
 0x158   :  { %v730_v2 = vadd.f32 %v729_v22, %v1602_v36  ;;  %v865_v20 = vadd.f32 %v864_v3, %v802_v18  ;;  %v807_v36 = vmul.f32 %v1664_v53, %v1664_v53 }
 0x15a   :  { %v731_v15 = vadd.f32 %v730_v2, %v1620_v46  ;;  %v866_v10 = vadd.f32 %v865_v20, %v803_v11  ;;  %v808_v46 = vmul.f32 %v1682_v4, %v1682_v4 }
 0x15c   :  { %v732_v13 = vadd.f32 %v731_v15, %v1632_v51  ;;  %v867_v16 = vadd.f32 %v866_v10, %v804_v12  ;;  %v809_v51 = vmul.f32 %v1704_v57, %v1704_v57 }
 0x15e   :  { %v868_v26 = vadd.f32 %v867_v16, %v805_v24  ;;  %v733_v29 = vadd.f32 %v732_v13, %v1652_v0  ;;  %v810_v0 = vmul.f32 %v1730_v7, %v1730_v7 }
 0x160   :  { %v734_v30 = vadd.f32 %v733_v29, %v1664_v53  ;;  %v869_v19 = vadd.f32 %v868_v26, %v806_v32 }
 0x162   :  { %v735_v38 = vadd.f32 %v734_v30, %v1682_v4  ;;  %v870_v39 = vadd.f32 %v869_v19, %v807_v36 }
 0x164   :  { %v736_v37 = vadd.f32 %v735_v38, %v1704_v57  ;;  %v871_v23 = vadd.f32 %v870_v39, %v808_v46 }
 0x166   :  { %v737_v21 = vadd.f32 %v736_v37, %v1730_v7  ;;  %v872_v34 = vadd.f32 %v871_v23, %v809_v51 }
 0x168   :  { %v738_v53 = vadd.f32 %v737_v21, %v1746_v43  ;;  %v873_v31 = vadd.f32 %v872_v34, %v810_v0 }
 0x16a   :  { %v874_v4 = vadd.f32 %v873_v31, %v811_v54  ;;  %v739_v41 = vadd.f32 %v738_v53, %v1770_v40 }
 0x16c   :  { %v875_v57 = vadd.f32 %v874_v4, %v812_v35  ;;  %v740_v42 = vadd.f32 %v739_v41, %v1784_v60 }
 0x16e   :  { %v876_v7 = vadd.f32 %v875_v57, %v813_v27  ;;  %v741_v49 = vadd.f32 %v740_v42, %v1803_v28  ;;  %v751_v28 = vld [vmem:[#allocation3] sm:$0x1] }
 0x170   :  { %v877_v43 = vadd.f32 %v876_v7, %v814_v58  ;;  %v742_v48 = vadd.f32 %v741_v49, %v1817_v45 }
 0x172   :  { %v743_v50 = vrot.slane %v742_v48, 4  ;;  %v878_v40 = vadd.f32 %v877_v43, %v815_v33 }
 0x174   :  { %v744_v55 = vadd.f32 %v743_v50, %v742_v48  ;;  %v879_v17 = vrot.slane %v878_v40, 4 }
 0x176   :  { %v745_v59 = vrot.slane %v744_v55, 2  ;;  %v880_v52 = vadd.f32 %v879_v17, %v878_v40 }
 0x178   :  { %v746_v5 = vadd.f32 %v745_v59, %v744_v55  ;;  %v881_v60 = vrot.slane %v880_v52, 2 }
 0x17a   :  { %v747_v61 = vrot.slane %v746_v5, 1  ;;  %v882_v62 = vadd.f32 %v881_v60, %v880_v52 }
 0x17c   :  { %v748_v1 = vadd.f32 %v747_v61, %v746_v5  ;;  %v883_v25 = vrot.slane %v882_v62, 1 }
 0x17e   :  { %v749_v44 = vadd.f32 %v748_v1, %v679_v63  ;;  %v884_v8 = vadd.f32 %v883_v25, %v882_v62 }
 0x180   :  { %750 = vst [vmem:[#allocation2] sm:$0x1] %v749_v44  ;;  %v885_v14 = vadd.f32 %v884_v8, %v751_v28 }
 0x182   :  { %886 = vst [vmem:[#allocation3] sm:$0x1] %v885_v14 }
 0x187   :  { %v890_v45 = vld [vmem:[#allocation2] sm:$0x1] }
 0x188   :  { %891 = vst [vmem:[%s1893_s3] sm:$0x1] %v890_v45 }
 0x189   :  { %v892_v56 = vld [vmem:[#allocation3] sm:$0x1] }
 0x18a   :  { %893 = vst [vmem:[%s1894_s4] sm:$0x1] %v892_v56 }

// kernel: resnet_forward.40
= control target key start
LH: loop header
LB: loop body
LE: loop exit
PB: predicated region body
PF: predicated region fallthrough
CT: control target
= control target key end

     0   :  { %s1957_s1 = inlined_call_operand.vmem [shape: f32[1,128], index: 1, kind: input, shape index: {}]   ;;  %s1958_s2 = inlined_call_operand.vmem [shape: f32[1,128], index: 2, kind: input, shape index: {}]   ;;  %s1959_s0 = inlined_call_operand.vmem [shape: bf16[512,128], index: 0, kind: input, shape index: {}]   ;;  %s1960_s5 = inlined_call_operand.vmem [shape: bf16[512,128], index: 5, kind: input, shape index: {}]   ;;  %s1961_s3 = inlined_call_operand.vmem [shape: f32[1,128], index: 3, kind: input, shape index: {}]   ;;  %s1962_s4 = inlined_call_operand.vmem [shape: f32[1,128], index: 4, kind: input, shape index: {}]   ;;  %s1963_s6 = inlined_call_operand.vmem [shape: bf16[512,128], index: 6, kind: output, shape index: {}]  }
   0x1   :  { %v23_v0 = vld [vmem:[%s1957_s1] sm:$0x1]  ;;  %v1263_v9 = vld [vmem:[%s1959_s0 + $0x8] sm:$0xff]   ;;  %v1268_v10 = vld [vmem:[%s1959_s0 + $0x10] sm:$0xff]  }
   0x2   :  { %v25_v1 = vld [vmem:[%s1958_s2] sm:$0x1]  ;;  %v1248_v2 = vmul.f32 0.001953125, %v23_v0  ;;  %v1273_v11 = vld [vmem:[%s1959_s0 + $0x18] sm:$0xff]   ;;  %v702_v16 = vunpack.c.l.bf16 %v1263_v9  ;;  %v1291_v17 = vld [vmem:[%s1960_s5 + $0x8] sm:$0xff]   ;;  %v703_v19 = vunpack.c.h.bf16 %v1263_v9  ;;  %v706_v20 = vunpack.c.l.bf16 %v1268_v10 }
   0x3   :  { %v26_v3 = vmul.f32 0.001953125, %v25_v1  ;;  %v1258_v8 = vld [vmem:[%s1959_s0] sm:$0xff]   ;;  %v1296_v18 = vld [vmem:[%s1960_s5 + $0x10] sm:$0xff]   ;;  %v707_v21 = vunpack.c.h.bf16 %v1268_v10  ;;  %v710_v22 = vunpack.c.l.bf16 %v1273_v11  ;;  %v1305_v23 = vld [vmem:[%s1960_s5 + $0x18] sm:$0xff]   ;;  %v711_v25 = vunpack.c.h.bf16 %v1273_v11 }
   0x4   :  { %v27_v4 = vmul.f32 %v1248_v2, %v1248_v2  ;;  %v1278_v12 = vld [vmem:[%s1960_s5] sm:$0xff]   ;;  %v698_v14 = vunpack.c.l.bf16 %v1258_v8  ;;  %v699_v15 = vunpack.c.h.bf16 %v1258_v8  ;;  %v1314_v28 = vld [vmem:[%s1959_s0 + $0x28] sm:$0xff]   ;;  %v1319_v29 = vld [vmem:[%s1959_s0 + $0x30] sm:$0xff]   ;;  %v830_v32 = vunpack.c.l.bf16 %v1291_v17 }
   0x5   :  { %v1283_v13 = vld [vmem:[%s1959_s0 + $0x20] sm:$0xff]   ;;  %v826_v24 = vunpack.c.l.bf16 %v1278_v12  ;;  %v827_v31 = vunpack.c.h.bf16 %v1278_v12  ;;  %v831_v33 = vunpack.c.h.bf16 %v1291_v17  ;;  %v834_v34 = vunpack.c.l.bf16 %v1296_v18  ;;  %v1330_v35 = vld [vmem:[%s1959_s0 + $0x38] sm:$0xff]   ;;  %v1345_v41 = vld [vmem:[%s1960_s5 + $0x28] sm:$0xff]  }
   0x6   :  { %v28_v5 = vsub.f32 %v26_v3, %v27_v4  ;;  %v714_v26 = vunpack.c.l.bf16 %v1283_v13  ;;  %v715_v27 = vunpack.c.h.bf16 %v1283_v13  ;;  %v835_v37 = vunpack.c.h.bf16 %v1296_v18  ;;  %v1340_v40 = vld [vmem:[%s1960_s5 + $0x20] sm:$0xff]   ;;  %v1361_v48 = vld [vmem:[%s1960_s5 + $0x30] sm:$0xff]   ;;  %v1368_v51 = vld [vmem:[%s1960_s5 + $0x38] sm:$0xff]  }
   0x7   :  { %v838_v38 = vunpack.c.l.bf16 %v1305_v23  ;;  %v718_v42 = vunpack.c.l.bf16 %v1314_v28  ;;  %v719_v43 = vunpack.c.h.bf16 %v1314_v28  ;;  %v722_v44 = vunpack.c.l.bf16 %v1319_v29  ;;  %v1354_v46 = vld [vmem:[%s1959_s0 + $0x40] sm:$0xff]   ;;  %v1377_v56 = vld [vmem:[%s1959_s0 + $0x48] sm:$0xff]   ;;  %v1382_v57 = vld [vmem:[%s1959_s0 + $0x50] sm:$0xff]  }
   0x8   :  { %v29_v6 = vmax.f32 %v28_v5, 0.0  ;;  %v723_v45 = vunpack.c.h.bf16 %v1319_v29  ;;  %v1390_v61 = vld [vmem:[%s1960_s5 + $0x40] sm:$0xff]   ;;  %v1395_v62 = vld [vmem:[%s1959_s0 + $0x58] sm:$0xff]   ;;  %v1404_v4 = vld [vmem:[%s1960_s5 + $0x48] sm:$0xff]  }
   0x9   :  { %v1412_v60 = vld [vmem:[%s1960_s5 + $0x50] sm:$0xff]   ;;  %v1417_v3 = vld [vmem:[%s1959_s0 + $0x60] sm:$0xff]   ;;  %v1434_v59 = vld [vmem:[%s1960_s5 + $0x58] sm:$0xff]  }
   0xa   :  { %v1252_v7 = vadd.f32 1e-05, %v29_v6  ;;  %v1451_v63 = vld [vmem:[%s1959_s0 + $0x70] sm:$0xff]   ;;  %v1460_v6 = vld [vmem:[%s1959_s0 + $0x78] sm:$0xff]   ;;  %v1469_v50 = vld [vmem:[%s1960_s5 + $0x60] sm:$0xff]  }
   0xb   :  { %v1477_v53 = vld [vmem:[%s1960_s5 + $0x68] sm:$0xff]   ;;  %v1491_v54 = vld [vmem:[%s1959_s0 + $0x80] sm:$0xff]   ;;  %v1501_v55 = vld [vmem:[%s1960_s5 + $0x70] sm:$0xff]  }
   0xc   :  { %1205 = vrsqrt.f32 %v1252_v7  ;;  %vm37_vm0 = vweird.f32 %v1252_v7  ;;  %v763_v39 = vunpack.c.h.bf16 %v1491_v54 }
  0x12   :  { %v1321_v30 = vpop.eup %1205 }
  0x13   :  { %v32_v36 = vmul.f32 %v1321_v30, %v1252_v7  ;;  %vm38_vm1 = vweird.f32 %v1321_v30  ;;  %v1439_v7 = vld [vmem:[%s1959_s0 + $0x68] sm:$0xff]  }
  0x14   :  { %vm1423_vm2 = vmor %vm37_vm0, %vm38_vm1 }
  0x15   :  { %v33_v47 = vmul.f32 %v1321_v30, %v32_v36  ;;  %v41_v36 = vld [vmem:[%s1961_s3] sm:$0x1] }
  0x17   :  { %v34_v58 = vmul.f32 0.5, %v33_v47 }
  0x19   :  { %v35_v5 = vsub.f32 1.5, %v34_v58  ;;  %v43_v58 = vld [vmem:[%s1962_s4] sm:$0x1] }
  0x1b   :  { %v36_v0 = vmul.f32 %v1321_v30, %v35_v5  ;;  %v762_v5 = vunpack.c.l.bf16 %v1491_v54 }
  0x1d   :  { %v40_v47 = vsel %vm1423_vm2, %v1321_v30, %v36_v0 }
  0x1e   :  { %v42_v49 = vmul.f32 %v41_v36, %v40_v47  ;;  %v882_v47 = vunpack.c.l.bf16 %v1501_v55 }
  0x20   :  { %v44_v30 = vmul.f32 %v42_v49, %v1248_v2  ;;  %v1494_v0 = vperm.slane %v42_v49, 0 }
  0x22   :  { %v45_v2 = vsub.f32 %v43_v58, %v44_v30  ;;  %v177_v49 = vmul.f32 %v698_v14, %v1494_v0  ;;  %v178_v52 = vmul.f32 %v699_v15, %v1494_v0  ;;  %v179_v1 = vmul.f32 %v702_v16, %v1494_v0 }
  0x23   :  { %v180_v36 = vmul.f32 %v703_v19, %v1494_v0  ;;  %v181_v30 = vmul.f32 %v706_v20, %v1494_v0  ;;  %v182_v14 = vmul.f32 %v707_v21, %v1494_v0  ;;  %v183_v8 = vmul.f32 %v710_v22, %v1494_v0 }
  0x24   :  { %v1528_v15 = vperm.slane %v45_v2, 0  ;;  %v184_v16 = vmul.f32 %v711_v25, %v1494_v0  ;;  %v185_v9 = vmul.f32 %v714_v26, %v1494_v0  ;;  %v186_v19 = vmul.f32 %v715_v27, %v1494_v0 }
  0x25   :  { %v187_v10 = vmul.f32 %v718_v42, %v1494_v0  ;;  %v188_v20 = vmul.f32 %v719_v43, %v1494_v0  ;;  %v189_v11 = vmul.f32 %v722_v44, %v1494_v0  ;;  %v190_v21 = vmul.f32 %v723_v45, %v1494_v0 }
  0x26   :  { %v244_v22 = vadd.f32 %v1528_v15, %v177_v49  ;;  %v245_v13 = vadd.f32 %v1528_v15, %v178_v52  ;;  %v246_v25 = vadd.f32 %v1528_v15, %v179_v1  ;;  %v247_v26 = vadd.f32 %v1528_v15, %v180_v36 }
  0x27   :  { %v248_v27 = vadd.f32 %v1528_v15, %v181_v30  ;;  %v249_v28 = vadd.f32 %v1528_v15, %v182_v14  ;;  %v250_v42 = vadd.f32 %v1528_v15, %v183_v8  ;;  %v251_v43 = vadd.f32 %v1528_v15, %v184_v16 }
  0x28   :  { %v436_v29 = vadd.f32 %v826_v24, %v244_v22  ;;  %v437_v44 = vadd.f32 %v827_v31, %v245_v13  ;;  %v438_v45 = vadd.f32 %v830_v32, %v246_v25  ;;  %v439_v52 = vadd.f32 %v831_v33, %v247_v26 }
  0x29   :  { %v440_v1 = vadd.f32 %v834_v34, %v248_v27  ;;  %v441_v58 = vadd.f32 %v835_v37, %v249_v28  ;;  %v442_v36 = vadd.f32 %v838_v38, %v250_v42  ;;  %v1966_v24 = vunpack.c.h.bf16 %v1305_v23 }
  0x2a   :  { %v500_v12 = vmax.f32 %v436_v29, 0.0  ;;  %v501_v31 = vmax.f32 %v437_v44, 0.0  ;;  %v502_v49 = vmax.f32 %v438_v45, 0.0  ;;  %v503_v30 = vmax.f32 %v439_v52, 0.0 }
  0x2b   :  { %v443_v2 = vadd.f32 %v1966_v24, %v251_v43  ;;  %v504_v32 = vmax.f32 %v440_v1, 0.0  ;;  %v505_v14 = vmax.f32 %v441_v58, 0.0  ;;  %v506_v17 = vmax.f32 %v442_v36, 0.0 }
  0x2c   :  { %v955_v8 = vpack.c.bf16 %v501_v31, %v500_v12  ;;  %v960_v16 = vpack.c.bf16 %v503_v30, %v502_v49  ;;  %v252_v34 = vadd.f32 %v1528_v15, %v185_v9  ;;  %v253_v18 = vadd.f32 %v1528_v15, %v186_v19 }
  0x2d   :  { %v507_v33 = vmax.f32 %v443_v2, 0.0  ;;  %v965_v37 = vpack.c.bf16 %v505_v14, %v504_v32  ;;  %v254_v38 = vadd.f32 %v1528_v15, %v187_v10  ;;  %v255_v23 = vadd.f32 %v1528_v15, %v188_v20 }
  0x2e   :  { %956 = vst [vmem:[%s1963_s6] sm:$0xff] %v955_v8   ;;  %v1967_v13 = vunpack.c.l.bf16 %v1340_v40  ;;  %v1968_v26 = vunpack.c.h.bf16 %v1340_v40  ;;  %v256_v9 = vadd.f32 %v1528_v15, %v189_v11  ;;  %v257_v19 = vadd.f32 %v1528_v15, %v190_v21 }
  0x2f   :  { %v970_v22 = vpack.c.bf16 %v507_v33, %v506_v17  ;;  %1174 = vst [vmem:[%s1963_s6 + $0x8] sm:$0xff] %v960_v16   ;;  %v1969_v10 = vunpack.c.l.bf16 %v1345_v41  ;;  %v1970_v28 = vunpack.c.h.bf16 %v1345_v41  ;;  %v1971_v43 = vunpack.c.l.bf16 %v1330_v35 }
  0x30   :  { %v444_v25 = vadd.f32 %v1967_v13, %v252_v34  ;;  %v445_v27 = vadd.f32 %v1968_v26, %v253_v18  ;;  %v1972_v40 = vunpack.c.h.bf16 %v1330_v35  ;;  %1175 = vst [vmem:[%s1963_s6 + $0x10] sm:$0xff] %v965_v37   ;;  %v1973_v45 = vunpack.c.l.bf16 %v1361_v48 }
  0x31   :  { %v446_v20 = vadd.f32 %v1969_v10, %v254_v38  ;;  %v447_v42 = vadd.f32 %v1970_v28, %v255_v23  ;;  %v191_v29 = vmul.f32 %v1971_v43, %v1494_v0  ;;  %v1974_v41 = vunpack.c.h.bf16 %v1361_v48  ;;  %1176 = vst [vmem:[%s1963_s6 + $0x18] sm:$0xff] %v970_v22  }
  0x32   :  { %v192_v11 = vmul.f32 %v1972_v40, %v1494_v0  ;;  %v508_v21 = vmax.f32 %v444_v25, 0.0  ;;  %v509_v44 = vmax.f32 %v445_v27, 0.0  ;;  %v448_v52 = vadd.f32 %v1973_v45, %v256_v9 }
  0x33   :  { %v449_v1 = vadd.f32 %v1974_v41, %v257_v19  ;;  %v510_v58 = vmax.f32 %v446_v20, 0.0  ;;  %v511_v36 = vmax.f32 %v447_v42, 0.0  ;;  %v258_v35 = vadd.f32 %v1528_v15, %v191_v29 }
  0x34   :  { %v259_v24 = vadd.f32 %v1528_v15, %v192_v11  ;;  %v975_v2 = vpack.c.bf16 %v509_v44, %v508_v21  ;;  %v512_v12 = vmax.f32 %v448_v52, 0.0  ;;  %v1975_v49 = vunpack.c.l.bf16 %v1354_v46 }
  0x35   :  { %v513_v31 = vmax.f32 %v449_v1, 0.0  ;;  %v980_v32 = vpack.c.bf16 %v511_v36, %v510_v58  ;;  %v1976_v48 = vunpack.c.l.bf16 %v1368_v51  ;;  %v1977_v17 = vunpack.c.h.bf16 %v1368_v51 }
  0x36   :  { %v193_v30 = vmul.f32 %v1975_v49, %v1494_v0  ;;  %v1978_v8 = vunpack.c.h.bf16 %v1354_v46  ;;  %1177 = vst [vmem:[%s1963_s6 + $0x20] sm:$0xff] %v975_v2   ;;  %v1979_v37 = vunpack.c.l.bf16 %v1377_v56  ;;  %v1980_v38 = vunpack.c.h.bf16 %v1377_v56 }
  0x37   :  { %v450_v14 = vadd.f32 %v1976_v48, %v258_v35  ;;  %v451_v33 = vadd.f32 %v1977_v17, %v259_v24  ;;  %v985_v34 = vpack.c.bf16 %v513_v31, %v512_v12  ;;  %1178 = vst [vmem:[%s1963_s6 + $0x28] sm:$0xff] %v980_v32   ;;  %v1981_v25 = vunpack.c.l.bf16 %v1382_v57 }
  0x38   :  { %v194_v16 = vmul.f32 %v1978_v8, %v1494_v0  ;;  %v260_v18 = vadd.f32 %v1528_v15, %v193_v30  ;;  %v195_v22 = vmul.f32 %v1979_v37, %v1494_v0  ;;  %v196_v51 = vmul.f32 %v1980_v38, %v1494_v0 }
  0x39   :  { %v514_v46 = vmax.f32 %v450_v14, 0.0  ;;  %v515_v23 = vmax.f32 %v451_v33, 0.0  ;;  %v197_v26 = vmul.f32 %v1981_v25, %v1494_v0  ;;  %1179 = vst [vmem:[%s1963_s6 + $0x30] sm:$0xff] %v985_v34   ;;  %v1982_v27 = vunpack.c.l.bf16 %v1390_v61 }
  0x3a   :  { %v261_v13 = vadd.f32 %v1528_v15, %v194_v16  ;;  %v262_v9 = vadd.f32 %v1528_v15, %v195_v22  ;;  %v263_v19 = vadd.f32 %v1528_v15, %v196_v51  ;;  %v1983_v10 = vunpack.c.h.bf16 %v1382_v57 }
  0x3b   :  { %v452_v56 = vadd.f32 %v1982_v27, %v260_v18  ;;  %v990_v28 = vpack.c.bf16 %v515_v23, %v514_v46  ;;  %v1984_v42 = vunpack.c.h.bf16 %v1390_v61  ;;  %v264_v29 = vadd.f32 %v1528_v15, %v197_v26 }
  0x3c   :  { %v198_v20 = vmul.f32 %v1983_v10, %v1494_v0  ;;  %v1985_v40 = vunpack.c.l.bf16 %v1395_v62  ;;  %v1986_v44 = vunpack.c.l.bf16 %v1404_v4  ;;  %v1987_v52 = vunpack.c.h.bf16 %v1404_v4 }
  0x3d   :  { %v453_v43 = vadd.f32 %v1984_v42, %v261_v13  ;;  %v516_v21 = vmax.f32 %v452_v56, 0.0  ;;  %1180 = vst [vmem:[%s1963_s6 + $0x38] sm:$0xff] %v990_v28   ;;  %v1988_v1 = vunpack.c.l.bf16 %v1412_v60  ;;  %v1989_v36 = vunpack.c.h.bf16 %v1395_v62 }
  0x3e   :  { %v199_v11 = vmul.f32 %v1985_v40, %v1494_v0  ;;  %v454_v45 = vadd.f32 %v1986_v44, %v262_v9  ;;  %v455_v41 = vadd.f32 %v1987_v52, %v263_v19  ;;  %v265_v57 = vadd.f32 %v1528_v15, %v198_v20 }
  0x3f   :  { %v517_v61 = vmax.f32 %v453_v43, 0.0  ;;  %v456_v58 = vadd.f32 %v1988_v1, %v264_v29  ;;  %v200_v35 = vmul.f32 %v1989_v36, %v1494_v0  ;;  %v1990_v4 = vunpack.c.h.bf16 %v1412_v60 }
  0x40   :  { %v266_v24 = vadd.f32 %v1528_v15, %v199_v11  ;;  %v518_v2 = vmax.f32 %v454_v45, 0.0  ;;  %v519_v12 = vmax.f32 %v455_v41, 0.0  ;;  %v1991_v49 = vunpack.c.l.bf16 %v1417_v3  ;;  %v1157_v11 = vld [vmem:[%s1960_s5 + $0x78] sm:$0xff]  }
  0x41   :  { %v457_v31 = vadd.f32 %v1990_v4, %v265_v57  ;;  %v995_v32 = vpack.c.bf16 %v517_v61, %v516_v21  ;;  %v520_v48 = vmax.f32 %v456_v58, 0.0  ;;  %v267_v14 = vadd.f32 %v1528_v15, %v200_v35 }
  0x42   :  { %v201_v30 = vmul.f32 %v1991_v49, %v1494_v0  ;;  %v1992_v17 = vunpack.c.l.bf16 %v1434_v59  ;;  %v1000_v62 = vpack.c.bf16 %v519_v12, %v518_v2  ;;  %v1993_v16 = vunpack.c.h.bf16 %v1417_v3  ;;  %v1128_v49 = vld [vmem:[%s1959_s0 + $0x88] sm:$0xff]  }
  0x43   :  { %v521_v8 = vmax.f32 %v457_v31, 0.0  ;;  %1181 = vst [vmem:[%s1963_s6 + $0x40] sm:$0xff] %v995_v32   ;;  %v1994_v18 = vunpack.c.h.bf16 %v1434_v59  ;;  %v1995_v38 = vunpack.c.l.bf16 %v1439_v7  ;;  %v1996_v46 = vunpack.c.h.bf16 %v1439_v7 }
  0x44   :  { %v458_v33 = vadd.f32 %v1992_v17, %v266_v24  ;;  %v202_v34 = vmul.f32 %v1993_v16, %v1494_v0  ;;  %v268_v60 = vadd.f32 %v1528_v15, %v201_v30  ;;  %1182 = vst [vmem:[%s1963_s6 + $0x48] sm:$0xff] %v1000_v62   ;;  %v1997_v25 = vunpack.c.l.bf16 %v1469_v50  ;;  %v1129_v16 = vld [vmem:[%s1959_s0 + $0x90] sm:$0xff]  }
  0x45   :  { %v459_v37 = vadd.f32 %v1994_v18, %v267_v14  ;;  %v203_v51 = vmul.f32 %v1995_v38, %v1494_v0  ;;  %v204_v23 = vmul.f32 %v1996_v46, %v1494_v0  ;;  %v1005_v3 = vpack.c.bf16 %v521_v8, %v520_v48  ;;  %v1159_v14 = vld [vmem:[%s1960_s5 + $0x88] sm:$0xff]   ;;  %v1160_v38 = vld [vmem:[%s1960_s5 + $0x90] sm:$0xff]  }
  0x46   :  { %v522_v22 = vmax.f32 %v458_v33, 0.0  ;;  %v269_v13 = vadd.f32 %v1528_v15, %v202_v34  ;;  %v460_v59 = vadd.f32 %v1997_v25, %v268_v60  ;;  %v1998_v26 = vunpack.c.l.bf16 %v1451_v63 }
  0x47   :  { %v523_v56 = vmax.f32 %v459_v37, 0.0  ;;  %v270_v9 = vadd.f32 %v1528_v15, %v203_v51  ;;  %v271_v7 = vadd.f32 %v1528_v15, %v204_v23  ;;  %v1999_v19 = vunpack.c.h.bf16 %v1451_v63  ;;  %1183 = vst [vmem:[%s1963_s6 + $0x50] sm:$0xff] %v1005_v3  }
  0x48   :  { %v205_v27 = vmul.f32 %v1998_v26, %v1494_v0  ;;  %v2000_v20 = vunpack.c.h.bf16 %v1469_v50  ;;  %v524_v42 = vmax.f32 %v460_v59, 0.0  ;;  %v2001_v29 = vunpack.c.l.bf16 %v1460_v6 }
  0x49   :  { %v206_v10 = vmul.f32 %v1999_v19, %v1494_v0  ;;  %v1010_v63 = vpack.c.bf16 %v523_v56, %v522_v22  ;;  %v2002_v21 = vunpack.c.l.bf16 %v1477_v53  ;;  %v2003_v45 = vunpack.c.h.bf16 %v1477_v53 }
  0x4a   :  { %v461_v28 = vadd.f32 %v2000_v20, %v269_v13  ;;  %v272_v43 = vadd.f32 %v1528_v15, %v205_v27  ;;  %v207_v40 = vmul.f32 %v2001_v29, %v1494_v0  ;;  %v2004_v61 = vunpack.c.h.bf16 %v1460_v6  ;;  %v1130_v27 = vld [vmem:[%s1959_s0 + $0x98] sm:$0xff]  }
  0x4b   :  { %v462_v44 = vadd.f32 %v2002_v21, %v270_v9  ;;  %v463_v52 = vadd.f32 %v2003_v45, %v271_v7  ;;  %v273_v50 = vadd.f32 %v1528_v15, %v206_v10  ;;  %1184 = vst [vmem:[%s1963_s6 + $0x58] sm:$0xff] %v1010_v63   ;;  %v2005_v53 = vunpack.c.h.bf16 %v1501_v55  ;;  %v1161_v10 = vld [vmem:[%s1960_s5 + $0x98] sm:$0xff]   ;;  %v1131_v21 = vld [vmem:[%s1959_s0 + $0xa0] sm:$0xff]  }
  0x4c   :  { %v525_v41 = vmax.f32 %v461_v28, 0.0  ;;  %v464_v57 = vadd.f32 %v882_v47, %v272_v43  ;;  %v208_v1 = vmul.f32 %v2004_v61, %v1494_v0  ;;  %v274_v58 = vadd.f32 %v1528_v15, %v207_v40  ;;  %v1158_v47 = vld [vmem:[%s1960_s5 + $0x80] sm:$0xff]  }
  0x4d   :  { %v526_v36 = vmax.f32 %v462_v44, 0.0  ;;  %v527_v35 = vmax.f32 %v463_v52, 0.0  ;;  %v465_v24 = vadd.f32 %v2005_v53, %v273_v50  ;;  %v886_v2 = vunpack.c.l.bf16 %v1157_v11 }
  0x4e   :  { %v1015_v12 = vpack.c.bf16 %v525_v41, %v524_v42  ;;  %v528_v4 = vmax.f32 %v464_v57, 0.0  ;;  %v275_v6 = vadd.f32 %v1528_v15, %v208_v1  ;;  %v887_v31 = vunpack.c.h.bf16 %v1157_v11 }
  0x4f   :  { %v1020_v30 = vpack.c.bf16 %v527_v35, %v526_v36  ;;  %v529_v32 = vmax.f32 %v465_v24, 0.0  ;;  %v466_v48 = vadd.f32 %v886_v2, %v274_v58  ;;  %v209_v55 = vmul.f32 %v762_v5, %v1494_v0  ;;  %v1162_v58 = vld [vmem:[%s1960_s5 + $0xa0] sm:$0xff]  }
  0x50   :  { %1185 = vst [vmem:[%s1963_s6 + $0x60] sm:$0xff] %v1015_v12   ;;  %v467_v17 = vadd.f32 %v887_v31, %v275_v6  ;;  %v210_v33 = vmul.f32 %v763_v39, %v1494_v0  ;;  %v890_v62 = vunpack.c.l.bf16 %v1158_v47  ;;  %v891_v8 = vunpack.c.h.bf16 %v1158_v47  ;;  %v1132_v6 = vld [vmem:[%s1959_s0 + $0xa8] sm:$0xff]  }
  0x51   :  { %1186 = vst [vmem:[%s1963_s6 + $0x68] sm:$0xff] %v1020_v30   ;;  %v1025_v5 = vpack.c.bf16 %v529_v32, %v528_v4  ;;  %v530_v34 = vmax.f32 %v466_v48, 0.0  ;;  %v276_v60 = vadd.f32 %v1528_v15, %v209_v55  ;;  %v766_v18 = vunpack.c.l.bf16 %v1128_v49  ;;  %v1163_v48 = vld [vmem:[%s1960_s5 + $0xa8] sm:$0xff]  }
  0x52   :  { %v531_v37 = vmax.f32 %v467_v17, 0.0  ;;  %v277_v22 = vadd.f32 %v1528_v15, %v210_v33  ;;  %v767_v54 = vunpack.c.h.bf16 %v1128_v49  ;;  %v894_v39 = vunpack.c.l.bf16 %v1159_v14 }
  0x53   :  { %1187 = vst [vmem:[%s1963_s6 + $0x70] sm:$0xff] %v1025_v5   ;;  %v468_v51 = vadd.f32 %v890_v62, %v276_v60  ;;  %v211_v46 = vmul.f32 %v766_v18, %v1494_v0  ;;  %v895_v23 = vunpack.c.h.bf16 %v1159_v14  ;;  %v770_v3 = vunpack.c.l.bf16 %v1129_v16 }
  0x54   :  { %v1030_v13 = vpack.c.bf16 %v531_v37, %v530_v34  ;;  %v469_v25 = vadd.f32 %v891_v8, %v277_v22  ;;  %v212_v59 = vmul.f32 %v767_v54, %v1494_v0  ;;  %v771_v26 = vunpack.c.h.bf16 %v1129_v16  ;;  %v1133_v34 = vld [vmem:[%s1959_s0 + $0xb0] sm:$0xff]  }
  0x55   :  { %v532_v56 = vmax.f32 %v468_v51, 0.0  ;;  %v278_v9 = vadd.f32 %v1528_v15, %v211_v46  ;;  %v213_v7 = vmul.f32 %v770_v3, %v1494_v0  ;;  %v898_v19 = vunpack.c.l.bf16 %v1160_v38  ;;  %v1164_v54 = vld [vmem:[%s1960_s5 + $0xb0] sm:$0xff]  }
  0x56   :  { %1188 = vst [vmem:[%s1963_s6 + $0x78] sm:$0xff] %v1030_v13   ;;  %v533_v20 = vmax.f32 %v469_v25, 0.0  ;;  %v279_v28 = vadd.f32 %v1528_v15, %v212_v59  ;;  %v214_v42 = vmul.f32 %v771_v26, %v1494_v0  ;;  %v899_v43 = vunpack.c.h.bf16 %v1160_v38  ;;  %v1134_v59 = vld [vmem:[%s1959_s0 + $0xb8] sm:$0xff]  }
  0x57   :  { %v470_v29 = vadd.f32 %v894_v39, %v278_v9  ;;  %v280_v40 = vadd.f32 %v1528_v15, %v213_v7  ;;  %v774_v11 = vunpack.c.l.bf16 %v1130_v27  ;;  %v775_v63 = vunpack.c.h.bf16 %v1130_v27  ;;  %v1165_v7 = vld [vmem:[%s1960_s5 + $0xb8] sm:$0xff]  }
  0x58   :  { %v1035_v44 = vpack.c.bf16 %v533_v20, %v532_v56  ;;  %v471_v45 = vadd.f32 %v895_v23, %v279_v28  ;;  %v281_v52 = vadd.f32 %v1528_v15, %v214_v42  ;;  %v902_v50 = vunpack.c.l.bf16 %v1161_v10 }
  0x59   :  { %v534_v41 = vmax.f32 %v470_v29, 0.0  ;;  %v472_v57 = vadd.f32 %v898_v19, %v280_v40  ;;  %v215_v61 = vmul.f32 %v774_v11, %v1494_v0  ;;  %v216_v1 = vmul.f32 %v775_v63, %v1494_v0  ;;  %v1135_v11 = vld [vmem:[%s1959_s0 + $0xc0] sm:$0xff]  }
  0x5a   :  { %1189 = vst [vmem:[%s1963_s6 + $0x80] sm:$0xff] %v1035_v44   ;;  %v535_v36 = vmax.f32 %v471_v45, 0.0  ;;  %v473_v35 = vadd.f32 %v899_v43, %v281_v52  ;;  %v903_v53 = vunpack.c.h.bf16 %v1161_v10  ;;  %v778_v24 = vunpack.c.l.bf16 %v1131_v21 }
  0x5b   :  { %v536_v2 = vmax.f32 %v472_v57, 0.0  ;;  %v282_v47 = vadd.f32 %v1528_v15, %v215_v61  ;;  %v283_v12 = vadd.f32 %v1528_v15, %v216_v1  ;;  %v779_v4 = vunpack.c.h.bf16 %v1131_v21  ;;  %v1166_v61 = vld [vmem:[%s1960_s5 + $0xc0] sm:$0xff]  }
  0x5c   :  { %v1040_v31 = vpack.c.bf16 %v535_v36, %v534_v41  ;;  %v537_v49 = vmax.f32 %v473_v35, 0.0  ;;  %v217_v30 = vmul.f32 %v778_v24, %v1494_v0  ;;  %v906_v32 = vunpack.c.l.bf16 %v1162_v58 }
  0x5d   :  { %v474_v55 = vadd.f32 %v902_v50, %v282_v47  ;;  %v475_v14 = vadd.f32 %v903_v53, %v283_v12  ;;  %v218_v17 = vmul.f32 %v779_v4, %v1494_v0  ;;  %v907_v33 = vunpack.c.h.bf16 %v1162_v58  ;;  %v1136_v12 = vld [vmem:[%s1959_s0 + $0xc8] sm:$0xff]  }
  0x5e   :  { %1190 = vst [vmem:[%s1963_s6 + $0x88] sm:$0xff] %v1040_v31   ;;  %v1045_v62 = vpack.c.bf16 %v537_v49, %v536_v2  ;;  %v284_v8 = vadd.f32 %v1528_v15, %v217_v30  ;;  %v782_v16 = vunpack.c.l.bf16 %v1132_v6  ;;  %v783_v5 = vunpack.c.h.bf16 %v1132_v6  ;;  %v1167_v30 = vld [vmem:[%s1960_s5 + $0xc8] sm:$0xff]  }
  0x5f   :  { %v538_v60 = vmax.f32 %v474_v55, 0.0  ;;  %v539_v18 = vmax.f32 %v475_v14, 0.0  ;;  %v285_v37 = vadd.f32 %v1528_v15, %v218_v17  ;;  %v910_v22 = vunpack.c.l.bf16 %v1163_v48 }
  0x60   :  { %1191 = vst [vmem:[%s1963_s6 + $0x90] sm:$0xff] %v1045_v62   ;;  %v476_v39 = vadd.f32 %v906_v32, %v284_v8  ;;  %v219_v38 = vmul.f32 %v782_v16, %v1494_v0  ;;  %v220_v51 = vmul.f32 %v783_v5, %v1494_v0  ;;  %v911_v46 = vunpack.c.h.bf16 %v1163_v48  ;;  %v1137_v16 = vld [vmem:[%s1959_s0 + $0xd0] sm:$0xff]  }
  0x61   :  { %v1050_v23 = vpack.c.bf16 %v539_v18, %v538_v60  ;;  %v477_v3 = vadd.f32 %v907_v33, %v285_v37  ;;  %v786_v13 = vunpack.c.l.bf16 %v1133_v34  ;;  %v787_v25 = vunpack.c.h.bf16 %v1133_v34  ;;  %v1168_v37 = vld [vmem:[%s1960_s5 + $0xd0] sm:$0xff]  }
  0x62   :  { %v540_v26 = vmax.f32 %v476_v39, 0.0  ;;  %v286_v27 = vadd.f32 %v1528_v15, %v219_v38  ;;  %v287_v56 = vadd.f32 %v1528_v15, %v220_v51  ;;  %v914_v9 = vunpack.c.l.bf16 %v1164_v54 }
  0x63   :  { %1192 = vst [vmem:[%s1963_s6 + $0x98] sm:$0xff] %v1050_v23   ;;  %v541_v19 = vmax.f32 %v477_v3, 0.0  ;;  %v221_v10 = vmul.f32 %v786_v13, %v1494_v0  ;;  %v222_v20 = vmul.f32 %v787_v25, %v1494_v0  ;;  %v915_v28 = vunpack.c.h.bf16 %v1164_v54  ;;  %v1138_v13 = vld [vmem:[%s1959_s0 + $0xd8] sm:$0xff]  }
  0x64   :  { %v478_v42 = vadd.f32 %v910_v22, %v286_v27  ;;  %v479_v43 = vadd.f32 %v911_v46, %v287_v56  ;;  %v790_v29 = vunpack.c.l.bf16 %v1134_v59  ;;  %v791_v40 = vunpack.c.h.bf16 %v1134_v59  ;;  %v1169_v56 = vld [vmem:[%s1960_s5 + $0xd8] sm:$0xff]  }
  0x65   :  { %v1055_v63 = vpack.c.bf16 %v541_v19, %v540_v26  ;;  %v288_v21 = vadd.f32 %v1528_v15, %v221_v10  ;;  %v289_v44 = vadd.f32 %v1528_v15, %v222_v20  ;;  %v918_v45 = vunpack.c.l.bf16 %v1165_v7 }
  0x66   :  { %v542_v52 = vmax.f32 %v478_v42, 0.0  ;;  %v543_v50 = vmax.f32 %v479_v43, 0.0  ;;  %v223_v41 = vmul.f32 %v790_v29, %v1494_v0  ;;  %v224_v57 = vmul.f32 %v791_v40, %v1494_v0  ;;  %v1139_v29 = vld [vmem:[%s1959_s0 + $0xe0] sm:$0xff]  }
  0x67   :  { %1193 = vst [vmem:[%s1963_s6 + $0xa0] sm:$0xff] %v1055_v63   ;;  %v480_v1 = vadd.f32 %v914_v9, %v288_v21  ;;  %v481_v58 = vadd.f32 %v915_v28, %v289_v44  ;;  %v919_v36 = vunpack.c.h.bf16 %v1165_v7  ;;  %v794_v35 = vunpack.c.l.bf16 %v1135_v11 }
  0x68   :  { %v1060_v53 = vpack.c.bf16 %v543_v50, %v542_v52  ;;  %v290_v24 = vadd.f32 %v1528_v15, %v223_v41  ;;  %v291_v2 = vadd.f32 %v1528_v15, %v224_v57  ;;  %v795_v47 = vunpack.c.h.bf16 %v1135_v11  ;;  %v1170_v41 = vld [vmem:[%s1960_s5 + $0xe0] sm:$0xff]  }
  0x69   :  { %v544_v4 = vmax.f32 %v480_v1, 0.0  ;;  %v545_v6 = vmax.f32 %v481_v58, 0.0  ;;  %v225_v31 = vmul.f32 %v794_v35, %v1494_v0  ;;  %v922_v49 = vunpack.c.l.bf16 %v1166_v61 }
  0x6a   :  { %1194 = vst [vmem:[%s1963_s6 + $0xa8] sm:$0xff] %v1060_v53   ;;  %v482_v32 = vadd.f32 %v918_v45, %v290_v24  ;;  %v483_v48 = vadd.f32 %v919_v36, %v291_v2  ;;  %v226_v55 = vmul.f32 %v795_v47, %v1494_v0  ;;  %v923_v14 = vunpack.c.h.bf16 %v1166_v61  ;;  %v1140_v2 = vld [vmem:[%s1959_s0 + $0xe8] sm:$0xff]  }
  0x6b   :  { %v1065_v17 = vpack.c.bf16 %v545_v6, %v544_v4  ;;  %v292_v33 = vadd.f32 %v1528_v15, %v225_v31  ;;  %v798_v62 = vunpack.c.l.bf16 %v1136_v12  ;;  %v799_v8 = vunpack.c.h.bf16 %v1136_v12  ;;  %v1171_v31 = vld [vmem:[%s1960_s5 + $0xe8] sm:$0xff]  }
  0x6c   :  { %v546_v5 = vmax.f32 %v482_v32, 0.0  ;;  %v547_v34 = vmax.f32 %v483_v48, 0.0  ;;  %v293_v60 = vadd.f32 %v1528_v15, %v226_v55  ;;  %v926_v18 = vunpack.c.l.bf16 %v1167_v30 }
  0x6d   :  { %1195 = vst [vmem:[%s1963_s6 + $0xb0] sm:$0xff] %v1065_v17   ;;  %v484_v22 = vadd.f32 %v922_v49, %v292_v33  ;;  %v227_v54 = vmul.f32 %v798_v62, %v1494_v0  ;;  %v228_v39 = vmul.f32 %v799_v8, %v1494_v0  ;;  %v927_v38 = vunpack.c.h.bf16 %v1167_v30  ;;  %v1141_v62 = vld [vmem:[%s1959_s0 + $0xf0] sm:$0xff]  }
  0x6e   :  { %v1070_v51 = vpack.c.bf16 %v547_v34, %v546_v5  ;;  %v485_v46 = vadd.f32 %v923_v14, %v293_v60  ;;  %v802_v23 = vunpack.c.l.bf16 %v1137_v16  ;;  %v803_v3 = vunpack.c.h.bf16 %v1137_v16  ;;  %v1172_v60 = vld [vmem:[%s1960_s5 + $0xf0] sm:$0xff]  }
  0x6f   :  { %v548_v25 = vmax.f32 %v484_v22, 0.0  ;;  %v294_v59 = vadd.f32 %v1528_v15, %v227_v54  ;;  %v295_v26 = vadd.f32 %v1528_v15, %v228_v39  ;;  %v930_v27 = vunpack.c.l.bf16 %v1168_v37 }
  0x70   :  { %1196 = vst [vmem:[%s1963_s6 + $0xb8] sm:$0xff] %v1070_v51   ;;  %v549_v9 = vmax.f32 %v485_v46, 0.0  ;;  %v229_v7 = vmul.f32 %v802_v23, %v1494_v0  ;;  %v230_v19 = vmul.f32 %v803_v3, %v1494_v0  ;;  %v931_v10 = vunpack.c.h.bf16 %v1168_v37  ;;  %v1142_v23 = vld [vmem:[%s1959_s0 + $0xf8] sm:$0xff]  }
  0x71   :  { %v486_v20 = vadd.f32 %v926_v18, %v294_v59  ;;  %v487_v28 = vadd.f32 %v927_v38, %v295_v26  ;;  %v806_v42 = vunpack.c.l.bf16 %v1138_v13  ;;  %v807_v43 = vunpack.c.h.bf16 %v1138_v13  ;;  %v1173_v26 = vld [vmem:[%s1960_s5 + $0xf8] sm:$0xff]  }
  0x72   :  { %v1075_v40 = vpack.c.bf16 %v549_v9, %v548_v25  ;;  %v296_v11 = vadd.f32 %v1528_v15, %v229_v7  ;;  %v297_v63 = vadd.f32 %v1528_v15, %v230_v19  ;;  %v934_v21 = vunpack.c.l.bf16 %v1169_v56 }
  0x73   :  { %v550_v44 = vmax.f32 %v486_v20, 0.0  ;;  %v551_v45 = vmax.f32 %v487_v28, 0.0  ;;  %v231_v52 = vmul.f32 %v806_v42, %v1494_v0  ;;  %v232_v50 = vmul.f32 %v807_v43, %v1494_v0 }
  0x74   :  { %1197 = vst [vmem:[%s1963_s6 + $0xc0] sm:$0xff] %v1075_v40   ;;  %v488_v57 = vadd.f32 %v930_v27, %v296_v11  ;;  %v489_v61 = vadd.f32 %v931_v10, %v297_v63  ;;  %v935_v1 = vunpack.c.h.bf16 %v1169_v56  ;;  %v810_v58 = vunpack.c.l.bf16 %v1139_v29 }
  0x75   :  { %v1080_v36 = vpack.c.bf16 %v551_v45, %v550_v44  ;;  %v298_v35 = vadd.f32 %v1528_v15, %v231_v52  ;;  %v299_v53 = vadd.f32 %v1528_v15, %v232_v50  ;;  %v811_v24 = vunpack.c.h.bf16 %v1139_v29 }
  0x76   :  { %v552_v47 = vmax.f32 %v488_v57, 0.0  ;;  %v553_v12 = vmax.f32 %v489_v61, 0.0  ;;  %v233_v4 = vmul.f32 %v810_v58, %v1494_v0  ;;  %v938_v6 = vunpack.c.l.bf16 %v1170_v41 }
  0x77   :  { %1198 = vst [vmem:[%s1963_s6 + $0xc8] sm:$0xff] %v1080_v36   ;;  %v490_v49 = vadd.f32 %v934_v21, %v298_v35  ;;  %v491_v30 = vadd.f32 %v935_v1, %v299_v53  ;;  %v234_v32 = vmul.f32 %v811_v24, %v1494_v0  ;;  %v939_v48 = vunpack.c.h.bf16 %v1170_v41 }
  0x78   :  { %v1085_v55 = vpack.c.bf16 %v553_v12, %v552_v47  ;;  %v300_v14 = vadd.f32 %v1528_v15, %v233_v4  ;;  %v814_v17 = vunpack.c.l.bf16 %v1140_v2  ;;  %v815_v33 = vunpack.c.h.bf16 %v1140_v2 }
  0x79   :  { %v554_v8 = vmax.f32 %v490_v49, 0.0  ;;  %v555_v16 = vmax.f32 %v491_v30, 0.0  ;;  %v301_v5 = vadd.f32 %v1528_v15, %v234_v32  ;;  %v942_v34 = vunpack.c.l.bf16 %v1171_v31 }
  0x7a   :  { %1199 = vst [vmem:[%s1963_s6 + $0xd0] sm:$0xff] %v1085_v55   ;;  %v492_v18 = vadd.f32 %v938_v6, %v300_v14  ;;  %v235_v37 = vmul.f32 %v814_v17, %v1494_v0  ;;  %v236_v22 = vmul.f32 %v815_v33, %v1494_v0  ;;  %v943_v54 = vunpack.c.h.bf16 %v1171_v31 }
  0x7b   :  { %v1090_v39 = vpack.c.bf16 %v555_v16, %v554_v8  ;;  %v493_v38 = vadd.f32 %v939_v48, %v301_v5  ;;  %v818_v51 = vunpack.c.l.bf16 %v1141_v62  ;;  %v819_v46 = vunpack.c.h.bf16 %v1141_v62 }
  0x7c   :  { %v556_v3 = vmax.f32 %v492_v18, 0.0  ;;  %v302_v13 = vadd.f32 %v1528_v15, %v235_v37  ;;  %v303_v25 = vadd.f32 %v1528_v15, %v236_v22  ;;  %v946_v59 = vunpack.c.l.bf16 %v1172_v60 }
  0x7d   :  { %1200 = vst [vmem:[%s1963_s6 + $0xd8] sm:$0xff] %v1090_v39   ;;  %v557_v27 = vmax.f32 %v493_v38, 0.0  ;;  %v237_v56 = vmul.f32 %v818_v51, %v1494_v0  ;;  %v238_v9 = vmul.f32 %v819_v46, %v1494_v0  ;;  %v947_v7 = vunpack.c.h.bf16 %v1172_v60 }
  0x7e   :  { %v494_v19 = vadd.f32 %v942_v34, %v302_v13  ;;  %v495_v10 = vadd.f32 %v943_v54, %v303_v25  ;;  %v822_v20 = vunpack.c.l.bf16 %v1142_v23  ;;  %v823_v28 = vunpack.c.h.bf16 %v1142_v23 }
  0x7f   :  { %v1095_v42 = vpack.c.bf16 %v557_v27, %v556_v3  ;;  %v304_v43 = vadd.f32 %v1528_v15, %v237_v56  ;;  %v305_v29 = vadd.f32 %v1528_v15, %v238_v9  ;;  %v950_v40 = vunpack.c.l.bf16 %v1173_v26 }
  0x80   :  { %v558_v11 = vmax.f32 %v494_v19, 0.0  ;;  %v559_v63 = vmax.f32 %v495_v10, 0.0  ;;  %v239_v21 = vmul.f32 %v822_v20, %v1494_v0  ;;  %v240_v44 = vmul.f32 %v823_v28, %v1494_v0 }
  0x81   :  { %1201 = vst [vmem:[%s1963_s6 + $0xe0] sm:$0xff] %v1095_v42   ;;  %v496_v45 = vadd.f32 %v946_v59, %v304_v43  ;;  %v497_v52 = vadd.f32 %v947_v7, %v305_v29  ;;  %v951_v50 = vunpack.c.h.bf16 %v1173_v26 }
  0x82   :  { %v1100_v41 = vpack.c.bf16 %v559_v63, %v558_v11  ;;  %v306_v57 = vadd.f32 %v1528_v15, %v239_v21  ;;  %v307_v61 = vadd.f32 %v1528_v15, %v240_v44 }
  0x83   :  { %v560_v1 = vmax.f32 %v496_v45, 0.0  ;;  %v561_v58 = vmax.f32 %v497_v52, 0.0 }
  0x84   :  { %1202 = vst [vmem:[%s1963_s6 + $0xe8] sm:$0xff] %v1100_v41   ;;  %v498_v36 = vadd.f32 %v950_v40, %v306_v57  ;;  %v499_v0 = vadd.f32 %v951_v50, %v307_v61 }
  0x85   :  { %v1105_v35 = vpack.c.bf16 %v561_v58, %v560_v1 }
  0x86   :  { %v562_v53 = vmax.f32 %v498_v36, 0.0  ;;  %v563_v24 = vmax.f32 %v499_v0, 0.0 }
  0x87   :  { %1203 = vst [vmem:[%s1963_s6 + $0xf0] sm:$0xff] %v1105_v35  }
  0x88   :  { %v1110_v2 = vpack.c.bf16 %v563_v24, %v562_v53 }
  0x8a   :  { %1204 = vst [vmem:[%s1963_s6 + $0xf8] sm:$0xff] %v1110_v2  }

// kernel: resnet_forward.46
= control target key start
LH: loop header
LB: loop body
LE: loop exit
PB: predicated region body
PF: predicated region fallthrough
CT: control target
= control target key end

     0   :  { %s347_s1 = inlined_call_operand.vmem [shape: f32[1,128], index: 1, kind: input, shape index: {}]   ;;  %s348_s2 = inlined_call_operand.vmem [shape: f32[1,128], index: 2, kind: input, shape index: {}]   ;;  %s349_s0 = inlined_call_operand.vmem [shape: bf16[128,128], index: 0, kind: input, shape index: {}]   ;;  %s350_s3 = inlined_call_operand.vmem [shape: f32[1,128], index: 3, kind: input, shape index: {}]   ;;  %s351_s4 = inlined_call_operand.vmem [shape: f32[1,128], index: 4, kind: input, shape index: {}]   ;;  %s352_s5 = inlined_call_operand.vmem [shape: bf16[128,128], index: 5, kind: output, shape index: {}]  }
   0x1   :  { %v20_v0 = vld [vmem:[%s347_s1] sm:$0x1]  ;;  %v237_v14 = vld [vmem:[%s349_s0 + $0x8] sm:$0xff]   ;;  %v238_v17 = vld [vmem:[%s349_s0 + $0x10] sm:$0xff]  }
   0x2   :  { %v22_v1 = vld [vmem:[%s348_s2] sm:$0x1]  ;;  %v21_v2 = vmul.f32 0.0078125, %v20_v0  ;;  %v239_v18 = vld [vmem:[%s349_s0 + $0x18] sm:$0xff]   ;;  %v171_v23 = vunpack.c.l.bf16 %v237_v14  ;;  %v241_v24 = vld [vmem:[%s349_s0 + $0x28] sm:$0xff]   ;;  %v172_v26 = vunpack.c.h.bf16 %v237_v14  ;;  %v175_v27 = vunpack.c.l.bf16 %v238_v17 }
   0x3   :  { %v23_v3 = vmul.f32 0.0078125, %v22_v1  ;;  %v166_v13 = vld [vmem:[%s349_s0] sm:$0xff]   ;;  %v176_v28 = vunpack.c.h.bf16 %v238_v17  ;;  %v242_v29 = vld [vmem:[%s349_s0 + $0x30] sm:$0xff]   ;;  %v316_v30 = vld [vmem:[%s349_s0 + $0x38] sm:$0xff]   ;;  %v179_v32 = vunpack.c.l.bf16 %v239_v18  ;;  %v180_v33 = vunpack.c.h.bf16 %v239_v18 }
   0x4   :  { %v24_v4 = vmul.f32 %v21_v2, %v21_v2  ;;  %v38_v16 = vld [vmem:[%s350_s3] sm:$0x1]  ;;  %v167_v21 = vunpack.c.l.bf16 %v166_v13  ;;  %v168_v22 = vunpack.c.h.bf16 %v166_v13  ;;  %v187_v38 = vunpack.c.l.bf16 %v241_v24 }
   0x5   :  { %v240_v19 = vld [vmem:[%s349_s0 + $0x20] sm:$0xff]   ;;  %v188_v39 = vunpack.c.h.bf16 %v241_v24  ;;  %v191_v40 = vunpack.c.l.bf16 %v242_v29  ;;  %v192_v41 = vunpack.c.h.bf16 %v242_v29  ;;  %v195_v42 = vunpack.c.l.bf16 %v316_v30 }
   0x6   :  { %v25_v5 = vsub.f32 %v23_v3, %v24_v4  ;;  %v40_v31 = vld [vmem:[%s351_s4] sm:$0x1]  ;;  %v183_v34 = vunpack.c.l.bf16 %v240_v19  ;;  %v184_v35 = vunpack.c.h.bf16 %v240_v19  ;;  %v196_v43 = vunpack.c.h.bf16 %v316_v30 }
   0x8   :  { %v26_v6 = vmax.f32 %v25_v5, 0.0 }
   0xa   :  { %v27_v7 = vadd.f32 1e-05, %v26_v6 }
   0xc   :  { %251 = vrsqrt.f32 %v27_v7  ;;  %vm34_vm0 = vweird.f32 %v27_v7 }
  0x12   :  { %v252_v8 = vpop.eup %251 }
  0x13   :  { %v29_v9 = vmul.f32 %v252_v8, %v27_v7  ;;  %vm35_vm1 = vweird.f32 %v252_v8 }
  0x14   :  { %vm36_vm2 = vmor %vm34_vm0, %vm35_vm1 }
  0x15   :  { %v30_v10 = vmul.f32 %v252_v8, %v29_v9 }
  0x17   :  { %v31_v11 = vmul.f32 0.5, %v30_v10 }
  0x19   :  { %v32_v12 = vsub.f32 1.5, %v31_v11 }
  0x1b   :  { %v33_v15 = vmul.f32 %v252_v8, %v32_v12 }
  0x1d   :  { %v37_v20 = vsel %vm36_vm2, %v252_v8, %v33_v15 }
  0x1e   :  { %v39_v25 = vmul.f32 %v38_v16, %v37_v20 }
  0x20   :  { %v41_v36 = vmul.f32 %v39_v25, %v21_v2  ;;  %v76_v37 = vperm.slane %v39_v25, 0 }
  0x22   :  { %v42_v44 = vsub.f32 %v40_v31, %v41_v36  ;;  %v78_v45 = vmul.f32 %v167_v21, %v76_v37  ;;  %v79_v46 = vmul.f32 %v168_v22, %v76_v37  ;;  %v80_v47 = vmul.f32 %v171_v23, %v76_v37 }
  0x23   :  { %v81_v48 = vmul.f32 %v172_v26, %v76_v37  ;;  %v82_v49 = vmul.f32 %v175_v27, %v76_v37  ;;  %v83_v50 = vmul.f32 %v176_v28, %v76_v37  ;;  %v84_v51 = vmul.f32 %v179_v32, %v76_v37 }
  0x24   :  { %v95_v52 = vperm.slane %v42_v44, 0  ;;  %v85_v53 = vmul.f32 %v180_v33, %v76_v37  ;;  %v86_v54 = vmul.f32 %v183_v34, %v76_v37  ;;  %v87_v55 = vmul.f32 %v184_v35, %v76_v37 }
  0x25   :  { %v88_v56 = vmul.f32 %v187_v38, %v76_v37  ;;  %v89_v57 = vmul.f32 %v188_v39, %v76_v37  ;;  %v90_v58 = vmul.f32 %v191_v40, %v76_v37  ;;  %v91_v59 = vmul.f32 %v192_v41, %v76_v37 }
  0x26   :  { %v97_v60 = vadd.f32 %v95_v52, %v78_v45  ;;  %v98_v61 = vadd.f32 %v95_v52, %v79_v46  ;;  %v99_v62 = vadd.f32 %v95_v52, %v80_v47  ;;  %v100_v63 = vadd.f32 %v95_v52, %v81_v48 }
  0x27   :  { %v101_v0 = vadd.f32 %v95_v52, %v82_v49  ;;  %v102_v1 = vadd.f32 %v95_v52, %v83_v50  ;;  %v103_v2 = vadd.f32 %v95_v52, %v84_v51  ;;  %v104_v3 = vadd.f32 %v95_v52, %v85_v53 }
  0x28   :  { %v113_v4 = vmax.f32 %v97_v60, 0.0  ;;  %v114_v5 = vmax.f32 %v98_v61, 0.0  ;;  %v115_v6 = vmax.f32 %v99_v62, 0.0  ;;  %v116_v7 = vmax.f32 %v100_v63, 0.0 }
  0x29   :  { %v117_v8 = vmax.f32 %v101_v0, 0.0  ;;  %v118_v9 = vmax.f32 %v102_v1, 0.0  ;;  %v119_v10 = vmax.f32 %v103_v2, 0.0  ;;  %v120_v11 = vmax.f32 %v104_v3, 0.0 }
  0x2a   :  { %v200_v12 = vpack.c.bf16 %v114_v5, %v113_v4  ;;  %v205_v13 = vpack.c.bf16 %v116_v7, %v115_v6  ;;  %v105_v14 = vadd.f32 %v95_v52, %v86_v54  ;;  %v106_v15 = vadd.f32 %v95_v52, %v87_v55 }
  0x2b   :  { %v210_v16 = vpack.c.bf16 %v118_v9, %v117_v8  ;;  %v215_v17 = vpack.c.bf16 %v120_v11, %v119_v10  ;;  %v107_v18 = vadd.f32 %v95_v52, %v88_v56  ;;  %v108_v19 = vadd.f32 %v95_v52, %v89_v57 }
  0x2c   :  { %201 = vst [vmem:[%s352_s5] sm:$0xff] %v200_v12   ;;  %v121_v20 = vmax.f32 %v105_v14, 0.0  ;;  %v122_v21 = vmax.f32 %v106_v15, 0.0  ;;  %v109_v22 = vadd.f32 %v95_v52, %v90_v58  ;;  %v110_v23 = vadd.f32 %v95_v52, %v91_v59 }
  0x2d   :  { %244 = vst [vmem:[%s352_s5 + $0x8] sm:$0xff] %v205_v13   ;;  %v123_v24 = vmax.f32 %v107_v18, 0.0  ;;  %v124_v25 = vmax.f32 %v108_v19, 0.0  ;;  %v92_v26 = vmul.f32 %v195_v42, %v76_v37  ;;  %v93_v27 = vmul.f32 %v196_v43, %v76_v37 }
  0x2e   :  { %245 = vst [vmem:[%s352_s5 + $0x10] sm:$0xff] %v210_v16   ;;  %v220_v28 = vpack.c.bf16 %v122_v21, %v121_v20  ;;  %v125_v29 = vmax.f32 %v109_v22, 0.0  ;;  %v126_v30 = vmax.f32 %v110_v23, 0.0 }
  0x2f   :  { %246 = vst [vmem:[%s352_s5 + $0x18] sm:$0xff] %v215_v17   ;;  %v225_v31 = vpack.c.bf16 %v124_v25, %v123_v24  ;;  %v111_v32 = vadd.f32 %v95_v52, %v92_v26  ;;  %v112_v33 = vadd.f32 %v95_v52, %v93_v27 }
  0x30   :  { %247 = vst [vmem:[%s352_s5 + $0x20] sm:$0xff] %v220_v28   ;;  %v230_v34 = vpack.c.bf16 %v126_v30, %v125_v29 }
  0x31   :  { %248 = vst [vmem:[%s352_s5 + $0x28] sm:$0xff] %v225_v31   ;;  %v127_v35 = vmax.f32 %v111_v32, 0.0  ;;  %v128_v36 = vmax.f32 %v112_v33, 0.0 }
  0x32   :  { %249 = vst [vmem:[%s352_s5 + $0x30] sm:$0xff] %v230_v34  }
  0x33   :  { %v235_v37 = vpack.c.bf16 %v128_v36, %v127_v35 }
  0x35   :  { %250 = vst [vmem:[%s352_s5 + $0x38] sm:$0xff] %v235_v37  }

// kernel: resnet_forward.45
= control target key start
LH: loop header
LB: loop body
LE: loop exit
PB: predicated region body
PF: predicated region fallthrough
CT: control target
= control target key end

     0   :  { %vm138_vm0 = vcmask 1043456   ;;  %vm113_vm1 = vcmask 588800   ;;  %v437_v33 = vmov 0.0   ;;  %s546_s1 = inlined_call_operand.vmem [shape: bf16[72,128], index: 1, kind: input, shape index: {}]   ;;  %s547_s0 = inlined_call_operand.vmem [shape: bf16[128,72], index: 0, kind: input, shape index: {}]   ;;  %s548_s2 = inlined_call_operand.vmem [shape: bf16[128,128], index: 2, kind: output, shape index: {0}]   ;;  %s549_s3 = inlined_call_operand.vmem [shape: f32[1,128], index: 3, kind: output, shape index: {1}]   ;;  %s550_s4 = inlined_call_operand.vmem [shape: f32[1,128], index: 4, kind: output, shape index: {2}]  }
   0x1   :  { %v45_v0 = vld [vmem:[%s546_s1 + $0x20] sm:$0xf]  ;;  %v373_v4 = vld [vmem:[%s546_s1 + $0x18] sm:$0xff]  ;;  %v372_v5 = vld [vmem:[%s546_s1 + $0x10] sm:$0xff]  ;;  %19 = vst [vmem:[#allocation2] sm:$0x1] %v437_v33 }
   0x2   :  { %v103_v1 = vunpack.c.l.b16 %v45_v0  ;;  %v371_v6 = vld [vmem:[%s546_s1 + $0x8] sm:$0xff]  ;;  %v370_v7 = vld [vmem:[%s546_s1] sm:$0xff]  ;;  %v364_v9 = vld [vmem:[%s547_s0 + $0x10] sm:$0xff]  ;;  %20 = vst [vmem:[#allocation3] sm:$0x1] %v437_v33 }
   0x3   :  { %v362_v8 = vld [vmem:[%s547_s0] sm:$0xff]  ;;  %v368_v11 = vld [vmem:[%s547_s0 + $0x30] sm:$0xff]  ;;  %v363_v12 = vld [vmem:[%s547_s0 + $0x8] sm:$0xff] }
   0x4   :  { %v108_v2 = vpack.c.b16 %v103_v1, %v103_v1  ;;  %v366_v10 = vld [vmem:[%s547_s0 + $0x20] sm:$0xff]  ;;  %v365_v13 = vld [vmem:[%s547_s0 + $0x18] sm:$0xff]  ;;  %v367_v14 = vld [vmem:[%s547_s0 + $0x28] sm:$0xff] }
   0x5   :  { %v369_v15 = vld [vmem:[%s547_s0 + $0x38] sm:$0xff] }
   0x6   :  { %v140_v3 = vsel %vm138_vm0, %v108_v2, 0 }
   0x7   :  { %145 = vmatpush.bf16.msra.mxu0 %v140_v3  ;;  %421 = vmatpush.bf16.msra.mxu1 %v140_v3 }
   0x8   :  { %422 = vmatpush.bf16.msra.mxu2 %v140_v3  ;;  %423 = vmatpush.bf16.msra.mxu3 %v140_v3  ;;  %v223_v33 = vld [vmem:[#allocation2] sm:$0x1] }
   0xb   :  { %146 = vmatpush.bf16.msra.mxu0 %v373_v4  ;;  %424 = vmatpush.bf16.msra.mxu1 %v373_v4 }
   0xc   :  { %425 = vmatpush.bf16.msra.mxu2 %v373_v4  ;;  %426 = vmatpush.bf16.msra.mxu3 %v373_v4 }
   0xf   :  { %147 = vmatpush.bf16.msra.mxu0 %v372_v5  ;;  %427 = vmatpush.bf16.msra.mxu1 %v372_v5 }
  0x10   :  { %428 = vmatpush.bf16.msra.mxu2 %v372_v5  ;;  %429 = vmatpush.bf16.msra.mxu3 %v372_v5 }
  0x13   :  { %148 = vmatpush.bf16.msra.mxu0 %v371_v6  ;;  %430 = vmatpush.bf16.msra.mxu1 %v371_v6 }
  0x14   :  { %431 = vmatpush.bf16.msra.mxu2 %v371_v6  ;;  %432 = vmatpush.bf16.msra.mxu3 %v371_v6 }
  0x17   :  { %149 = vmatpush.bf16.msra.mxu0 %v370_v7  ;;  %433 = vmatpush.bf16.msra.mxu1 %v370_v7 }
  0x18   :  { %434 = vmatpush.bf16.msra.mxu2 %v370_v7  ;;  %435 = vmatpush.bf16.msra.mxu3 %v370_v7 }
  0x1a   :  { %354 = vmatmul.msk.bf16.vlgmr.msra.gmra.mxu0 %vm113_vm1, %v362_v8  ;;  %356 = vmatmul.msk.bf16.vlgmr.msra.gmra.mxu1 %vm113_vm1, %v364_v9 }
  0x1b   :  { %358 = vmatmul.msk.bf16.vlgmr.msra.gmra.mxu2 %vm113_vm1, %v366_v10  ;;  %360 = vmatmul.msk.bf16.vlgmr.msra.gmra.mxu3 %vm113_vm1, %v368_v11 }
  0x2a   :  { %355 = vmatmul.msk.bf16.gmra.mxu0 %vm113_vm1, %v363_v12  ;;  %357 = vmatmul.msk.bf16.gmra.mxu1 %vm113_vm1, %v365_v13 }
  0x2b   :  { %359 = vmatmul.msk.bf16.gmra.mxu2 %vm113_vm1, %v367_v14  ;;  %361 = vmatmul.msk.bf16.gmra.mxu3 %vm113_vm1, %v369_v15 }
  0x97   :  { %v151_v16 = vpop.f32.mrf.mxu0  ;;  %v161_v17 = vpop.f32.mrf.mxu1 }
  0x98   :  { %v248_v31 = vmul.f32 %v151_v16, %v151_v16  ;;  %v252_v46 = vmul.f32 %v161_v17, %v161_v17 }
  0x9e   :  { %v171_v18 = vpop.f32.mrf.mxu2  ;;  %v510_v19 = vpop.f32.mrf.mxu3 }
  0x9f   :  { %v153_v20 = vpop.f32.mrf.mxu0  ;;  %v163_v21 = vpop.f32.mrf.mxu1  ;;  %v256_v62 = vmul.f32 %v171_v18, %v171_v18  ;;  %v260_v10 = vmul.f32 %v510_v19, %v510_v19 }
  0xa0   :  { %v377_v22 = vpack.c.bf16 %v153_v20, %v151_v16  ;;  %v387_v23 = vpack.c.bf16 %v163_v21, %v161_v17  ;;  %v249_v30 = vmul.f32 %v153_v20, %v153_v20  ;;  %v224_v34 = vadd.f32 %v153_v20, %v151_v16 }
  0xa1   :  { %v253_v49 = vmul.f32 %v163_v21, %v163_v21 }
  0xa2   :  { %378 = vst [vmem:[%s548_s2] sm:$0xff] %v377_v22   ;;  %v264_v35 = vadd.f32 %v249_v30, %v248_v31 }
  0xa3   :  { %415 = vst [vmem:[%s548_s2 + $0x10] sm:$0xff] %v387_v23  }
  0xa6   :  { %v173_v24 = vpop.f32.mrf.mxu2  ;;  %v183_v25 = vpop.f32.mrf.mxu3 }
  0xa7   :  { %v156_v26 = vpop.f32.mrf.mxu0  ;;  %v166_v27 = vpop.f32.mrf.mxu1  ;;  %v397_v28 = vpack.c.bf16 %v173_v24, %v171_v18  ;;  %v407_v29 = vpack.c.bf16 %v183_v25, %v510_v19  ;;  %v257_v1 = vmul.f32 %v173_v24, %v173_v24  ;;  %v261_v13 = vmul.f32 %v183_v25, %v183_v25 }
  0xa8   :  { %v250_v32 = vmul.f32 %v156_v26, %v156_v26  ;;  %v225_v36 = vadd.f32 %v224_v34, %v156_v26  ;;  %v254_v52 = vmul.f32 %v166_v27, %v166_v27 }
  0xa9   :  { %417 = vst [vmem:[%s548_s2 + $0x20] sm:$0xff] %v397_v28  }
  0xaa   :  { %419 = vst [vmem:[%s548_s2 + $0x30] sm:$0xff] %v407_v29   ;;  %v265_v39 = vadd.f32 %v264_v35, %v250_v32 }
  0xae   :  { %v176_v37 = vpop.f32.mrf.mxu2  ;;  %v186_v38 = vpop.f32.mrf.mxu3 }
  0xaf   :  { %v158_v40 = vpop.f32.mrf.mxu0  ;;  %v168_v41 = vpop.f32.mrf.mxu1  ;;  %v258_v5 = vmul.f32 %v176_v37, %v176_v37 }
  0xb0   :  { %v382_v42 = vpack.c.bf16 %v158_v40, %v156_v26  ;;  %v226_v43 = vadd.f32 %v225_v36, %v158_v40  ;;  %v251_v44 = vmul.f32 %v158_v40, %v158_v40  ;;  %v392_v45 = vpack.c.bf16 %v168_v41, %v166_v27 }
  0xb1   :  { %v255_v60 = vmul.f32 %v168_v41, %v168_v41 }
  0xb2   :  { %414 = vst [vmem:[%s548_s2 + $0x8] sm:$0xff] %v382_v42   ;;  %v227_v47 = vadd.f32 %v226_v43, %v161_v17  ;;  %v266_v48 = vadd.f32 %v265_v39, %v251_v44  ;;  %v262_v17 = vmul.f32 %v186_v38, %v186_v38 }
  0xb3   :  { %416 = vst [vmem:[%s548_s2 + $0x18] sm:$0xff] %v392_v45  }
  0xb4   :  { %v267_v50 = vadd.f32 %v266_v48, %v252_v46  ;;  %v228_v51 = vadd.f32 %v227_v47, %v163_v21 }
  0xb6   :  { %v229_v53 = vadd.f32 %v228_v51, %v166_v27  ;;  %v268_v54 = vadd.f32 %v267_v50, %v253_v49  ;;  %v178_v55 = vpop.f32.mrf.mxu2  ;;  %v188_v56 = vpop.f32.mrf.mxu3 }
  0xb7   :  { %v402_v57 = vpack.c.bf16 %v178_v55, %v176_v37  ;;  %v412_v58 = vpack.c.bf16 %v188_v56, %v186_v38  ;;  %v259_v9 = vmul.f32 %v178_v55, %v178_v55  ;;  %v263_v22 = vmul.f32 %v188_v56, %v188_v56 }
  0xb8   :  { %v230_v59 = vadd.f32 %v229_v53, %v168_v41  ;;  %v269_v61 = vadd.f32 %v268_v54, %v254_v52 }
  0xb9   :  { %418 = vst [vmem:[%s548_s2 + $0x28] sm:$0xff] %v402_v57  }
  0xba   :  { %v231_v63 = vadd.f32 %v230_v59, %v171_v18  ;;  %v270_v0 = vadd.f32 %v269_v61, %v255_v60  ;;  %420 = vst [vmem:[%s548_s2 + $0x38] sm:$0xff] %v412_v58  }
  0xbc   :  { %v271_v2 = vadd.f32 %v270_v0, %v256_v62  ;;  %v232_v3 = vadd.f32 %v231_v63, %v173_v24 }
  0xbe   :  { %v233_v4 = vadd.f32 %v232_v3, %v176_v37  ;;  %v272_v6 = vadd.f32 %v271_v2, %v257_v1 }
  0xc0   :  { %v273_v7 = vadd.f32 %v272_v6, %v258_v5  ;;  %v234_v8 = vadd.f32 %v233_v4, %v178_v55 }
  0xc2   :  { %v235_v11 = vadd.f32 %v234_v8, %v510_v19  ;;  %v274_v12 = vadd.f32 %v273_v7, %v259_v9 }
  0xc4   :  { %v275_v14 = vadd.f32 %v274_v12, %v260_v10  ;;  %v236_v15 = vadd.f32 %v235_v11, %v183_v25  ;;  %v247_v25 = vld [vmem:[#allocation3] sm:$0x1] }
  0xc6   :  { %v237_v16 = vadd.f32 %v236_v15, %v186_v38  ;;  %v276_v18 = vadd.f32 %v275_v14, %v261_v13 }
  0xc8   :  { %v277_v20 = vadd.f32 %v276_v18, %v262_v17  ;;  %v238_v21 = vadd.f32 %v237_v16, %v188_v56 }
  0xca   :  { %v239_v23 = vrot.slane %v238_v21, 4  ;;  %v278_v24 = vadd.f32 %v277_v20, %v263_v22 }
  0xcc   :  { %v240_v26 = vadd.f32 %v239_v23, %v238_v21  ;;  %v279_v27 = vrot.slane %v278_v24, 4 }
  0xce   :  { %v241_v28 = vrot.slane %v240_v26, 2  ;;  %v280_v29 = vadd.f32 %v279_v27, %v278_v24 }
  0xd0   :  { %v242_v30 = vadd.f32 %v241_v28, %v240_v26  ;;  %v281_v31 = vrot.slane %v280_v29, 2 }
  0xd2   :  { %v243_v32 = vrot.slane %v242_v30, 1  ;;  %v282_v19 = vadd.f32 %v281_v31, %v280_v29 }
  0xd4   :  { %v244_v34 = vadd.f32 %v243_v32, %v242_v30  ;;  %v283_v35 = vrot.slane %v282_v19, 1 }
  0xd6   :  { %v245_v36 = vadd.f32 %v244_v34, %v223_v33  ;;  %v284_v37 = vadd.f32 %v283_v35, %v282_v19 }
  0xd8   :  { %246 = vst [vmem:[#allocation2] sm:$0x1] %v245_v36  ;;  %v285_v38 = vadd.f32 %v284_v37, %v247_v25 }
  0xda   :  { %286 = vst [vmem:[#allocation3] sm:$0x1] %v285_v38 }
  0xdf   :  { %v290_v39 = vld [vmem:[#allocation2] sm:$0x1] }
  0xe0   :  { %291 = vst [vmem:[%s549_s3] sm:$0x1] %v290_v39 }
  0xe1   :  { %v292_v40 = vld [vmem:[#allocation3] sm:$0x1] }
  0xe2   :  { %293 = vst [vmem:[%s550_s4] sm:$0x1] %v292_v40 }

// kernel: resnet_forward.49
= control target key start
LH: loop header
LB: loop body
LE: loop exit
PB: predicated region body
PF: predicated region fallthrough
CT: control target
= control target key end

     0   :  { %vm181_vm0 = vcmask 130048   ;;  %s808_s1 = inlined_call_operand.vmem [shape: bf16[144,128], index: 1, kind: input, shape index: {}]   ;;  %s809_s0 = inlined_call_operand.vmem [shape: bf16[128,144], index: 0, kind: input, shape index: {}]   ;;  %s810_s2 = inlined_call_operand.vmem [shape: bf16[128,128], index: 2, kind: output, shape index: {0}]   ;;  %s811_s3 = inlined_call_operand.vmem [shape: f32[1,128], index: 3, kind: output, shape index: {1}]   ;;  %s812_s4 = inlined_call_operand.vmem [shape: f32[1,128], index: 4, kind: output, shape index: {2}]  }
   0x1   :  { %v550_v0 = vld [vmem:[%s808_s1 + $0x38] sm:$0xff]  ;;  %v551_v1 = vld [vmem:[%s808_s1 + $0x40] sm:$0xff]  ;;  %v423_v3 = vld [vmem:[%s809_s0 + $0x8] sm:$0xf0] }
   0x2   :  { %v527_v2 = vld [vmem:[%s809_s0 + $0x4] sm:$0xf]  ;;  %206 = vmatpush.bf16.msra.mxu0 %v550_v0  ;;  %262 = vmatpush.bf16.msra.mxu1 %v551_v1  ;;  %v549_v5 = vld [vmem:[%s808_s1 + $0x30] sm:$0xff]  ;;  %v548_v6 = vld [vmem:[%s808_s1 + $0x28] sm:$0xff] }
   0x3   :  { %v426_v4 = vor.u32 %v527_v2, %v423_v3  ;;  %599 = vmatpush.bf16.msra.mxu2 %v550_v0  ;;  %607 = vmatpush.bf16.msra.mxu3 %v551_v1  ;;  %v547_v7 = vld [vmem:[%s808_s1 + $0x20] sm:$0xff]  ;;  %v546_v8 = vld [vmem:[%s808_s1 + $0x18] sm:$0xff]  ;;  %v529_v9 = vld [vmem:[%s809_s0 + $0x14] sm:$0xf] }
   0x4   :  { %v431_v10 = vld [vmem:[%s809_s0 + $0x18] sm:$0xf0]  ;;  %v537_v11 = vld [vmem:[%s809_s0 + $0x54] sm:$0xf]  ;;  %v544_v16 = vld [vmem:[%s808_s1 + $0x8] sm:$0xff] }
   0x5   :  { %519 = vmatmul.msk.bf16.vlgmr.msra.gmra.mxu1 %vm181_vm0, %v426_v4  ;;  %v434_v12 = vor.u32 %v529_v9, %v431_v10  ;;  %v463_v13 = vld [vmem:[%s809_s0 + $0x58] sm:$0xf0]  ;;  %v545_v14 = vld [vmem:[%s808_s1 + $0x10] sm:$0xff]  ;;  %v543_v17 = vld [vmem:[%s808_s1] sm:$0xff] }
   0x6   :  { %207 = vmatpush.bf16.msra.mxu0 %v549_v5  ;;  %v466_v15 = vor.u32 %v537_v11, %v463_v13  ;;  %v421_v18 = vld [vmem:[%s809_s0] sm:$0xf]  ;;  %v528_v19 = vld [vmem:[%s809_s0 + $0x4] sm:$0xf0]  ;;  %v531_v24 = vld [vmem:[%s809_s0 + $0x24] sm:$0xf] }
   0x7   :  { %600 = vmatpush.bf16.msra.mxu2 %v549_v5  ;;  %v453_v20 = vld [vmem:[%s809_s0 + $0x40] sm:$0xf]  ;;  %v536_v21 = vld [vmem:[%s809_s0 + $0x44] sm:$0xf0]  ;;  %v422_v22 = vor.u32 %v528_v19, %v421_v18  ;;  %v439_v25 = vld [vmem:[%s809_s0 + $0x28] sm:$0xf0] }
   0x8   :  { %524 = vmatmul.msk.bf16.vlgmr.msra.gmra.mxu3 %vm181_vm0, %v466_v15  ;;  %v454_v23 = vor.u32 %v536_v21, %v453_v20  ;;  %v539_v26 = vld [vmem:[%s809_s0 + $0x64] sm:$0xf]  ;;  %v442_v27 = vor.u32 %v531_v24, %v439_v25  ;;  %v471_v28 = vld [vmem:[%s809_s0 + $0x68] sm:$0xf0]  ;;  %v429_v30 = vld [vmem:[%s809_s0 + $0x10] sm:$0xf] }
   0x9   :  { %v474_v29 = vor.u32 %v539_v26, %v471_v28  ;;  %v530_v31 = vld [vmem:[%s809_s0 + $0x14] sm:$0xf0]  ;;  %v461_v32 = vld [vmem:[%s809_s0 + $0x50] sm:$0xf]  ;;  %v533_v36 = vld [vmem:[%s809_s0 + $0x34] sm:$0xf] }
   0xa   :  { %208 = vmatpush.bf16.msra.mxu0 %v548_v6  ;;  %v538_v33 = vld [vmem:[%s809_s0 + $0x54] sm:$0xf0]  ;;  %v430_v34 = vor.u32 %v530_v31, %v429_v30  ;;  %v447_v37 = vld [vmem:[%s809_s0 + $0x38] sm:$0xf0]  ;;  %v541_v38 = vld [vmem:[%s809_s0 + $0x74] sm:$0xf] }
   0xb   :  { %601 = vmatpush.bf16.msra.mxu2 %v548_v6  ;;  %v462_v35 = vor.u32 %v538_v33, %v461_v32  ;;  %v450_v39 = vor.u32 %v533_v36, %v447_v37  ;;  %v479_v40 = vld [vmem:[%s809_s0 + $0x78] sm:$0xf0]  ;;  %v437_v42 = vld [vmem:[%s809_s0 + $0x20] sm:$0xf]  ;;  %v532_v43 = vld [vmem:[%s809_s0 + $0x24] sm:$0xf0] }
   0xc   :  { %v482_v41 = vor.u32 %v541_v38, %v479_v40  ;;  %v469_v44 = vld [vmem:[%s809_s0 + $0x60] sm:$0xf]  ;;  %v540_v45 = vld [vmem:[%s809_s0 + $0x64] sm:$0xf0]  ;;  %v438_v46 = vor.u32 %v532_v43, %v437_v42  ;;  %v535_v48 = vld [vmem:[%s809_s0 + $0x44] sm:$0xf] }
   0xd   :  { %v470_v47 = vor.u32 %v540_v45, %v469_v44  ;;  %v455_v49 = vld [vmem:[%s809_s0 + $0x48] sm:$0xf0]  ;;  %v445_v51 = vld [vmem:[%s809_s0 + $0x30] sm:$0xf]  ;;  %v534_v52 = vld [vmem:[%s809_s0 + $0x34] sm:$0xf0] }
   0xe   :  { %209 = vmatpush.bf16.msra.mxu0 %v547_v7  ;;  %v458_v50 = vor.u32 %v535_v48, %v455_v49  ;;  %v477_v53 = vld [vmem:[%s809_s0 + $0x70] sm:$0xf]  ;;  %v542_v54 = vld [vmem:[%s809_s0 + $0x74] sm:$0xf0]  ;;  %v446_v55 = vor.u32 %v534_v52, %v445_v51  ;;  %v609_v30 = vmov 0.0  }
   0xf   :  { %602 = vmatpush.bf16.msra.mxu2 %v547_v7  ;;  %v478_v56 = vor.u32 %v542_v54, %v477_v53  ;;  %19 = vst [vmem:[#allocation2] sm:$0x1] %v609_v30 }
  0x10   :  { %20 = vst [vmem:[#allocation3] sm:$0x1] %v609_v30 }
  0x12   :  { %210 = vmatpush.bf16.msra.mxu0 %v546_v8 }
  0x13   :  { %603 = vmatpush.bf16.msra.mxu2 %v546_v8 }
  0x15   :  { %520 = vmatmul.msk.bf16.gmra.mxu1 %vm181_vm0, %v434_v12 }
  0x16   :  { %211 = vmatpush.bf16.msra.mxu0 %v545_v14 }
  0x17   :  { %604 = vmatpush.bf16.msra.mxu2 %v545_v14 }
  0x18   :  { %525 = vmatmul.msk.bf16.gmra.mxu3 %vm181_vm0, %v474_v29 }
  0x1a   :  { %212 = vmatpush.bf16.msra.mxu0 %v544_v16 }
  0x1b   :  { %605 = vmatpush.bf16.msra.mxu2 %v544_v16 }
  0x1e   :  { %213 = vmatpush.bf16.msra.mxu0 %v543_v17 }
  0x1f   :  { %606 = vmatpush.bf16.msra.mxu2 %v543_v17 }
  0x21   :  { %214 = vmatmul.bf16.vlgmr.msra.gmra.mxu0 %v422_v22 }
  0x22   :  { %234 = vmatmul.bf16.vlgmr.msra.gmra.mxu2 %v454_v23 }
  0x25   :  { %521 = vmatmul.msk.bf16.gmra.mxu1 %vm181_vm0, %v442_v27 }
  0x28   :  { %526 = vmatmul.msk.bf16.gmra.mxu3 %vm181_vm0, %v482_v41 }
  0x31   :  { %219 = vmatmul.bf16.gmra.mxu0 %v430_v34 }
  0x32   :  { %239 = vmatmul.bf16.gmra.mxu2 %v462_v35 }
  0x35   :  { %522 = vmatmul.msk.bf16.gmra.mxu1 %vm181_vm0, %v450_v39 }
  0x41   :  { %224 = vmatmul.bf16.gmra.mxu0 %v438_v46 }
  0x42   :  { %244 = vmatmul.bf16.gmra.mxu2 %v470_v47 }
  0x45   :  { %523 = vmatmul.msk.bf16.gmra.mxu1 %vm181_vm0, %v458_v50 }
  0x51   :  { %229 = vmatmul.bf16.gmra.mxu0 %v446_v55 }
  0x52   :  { %249 = vmatmul.bf16.gmra.mxu2 %v478_v56 }
  0x82   :  { %v264_v57 = vpop.f32.mrf.mxu1 }
  0x8a   :  { %v266_v58 = vpop.f32.mrf.mxu1 }
  0x8b   :  { %v289_v4 = vpop.f32.mrf.mxu3 }
  0x92   :  { %v269_v59 = vpop.f32.mrf.mxu1 }
  0x93   :  { %v291_v9 = vpop.f32.mrf.mxu3 }
  0x9a   :  { %v271_v60 = vpop.f32.mrf.mxu1 }
  0x9b   :  { %v294_v18 = vpop.f32.mrf.mxu3 }
  0x9e   :  { %v215_v61 = vpop.f32.mrf.mxu0 }
  0x9f   :  { %v265_v1 = vadd.f32 %v264_v57, %v215_v61 }
  0xa1   :  { %v361_v35 = vmul.f32 %v265_v1, %v265_v1 }
  0xa2   :  { %v274_v62 = vpop.f32.mrf.mxu1 }
  0xa3   :  { %v296_v27 = vpop.f32.mrf.mxu3 }
  0xa5   :  { %v235_v63 = vpop.f32.mrf.mxu2 }
  0xa6   :  { %v217_v0 = vpop.f32.mrf.mxu0 }
  0xa7   :  { %v267_v2 = vadd.f32 %v266_v58, %v217_v0 }
  0xa9   :  { %v555_v3 = vpack.c.bf16 %v267_v2, %v265_v1  ;;  %v362_v31 = vmul.f32 %v267_v2, %v267_v2  ;;  %v337_v36 = vadd.f32 %v267_v2, %v265_v1 }
  0xaa   :  { %v276_v5 = vpop.f32.mrf.mxu1 }
  0xab   :  { %556 = vst [vmem:[%s810_s2] sm:$0xff] %v555_v3   ;;  %v377_v42 = vadd.f32 %v362_v31, %v361_v35  ;;  %v299_v50 = vpop.f32.mrf.mxu3 }
  0xad   :  { %v237_v6 = vpop.f32.mrf.mxu2 }
  0xae   :  { %v220_v7 = vpop.f32.mrf.mxu0 }
  0xaf   :  { %v270_v12 = vadd.f32 %v269_v59, %v220_v7 }
  0xb1   :  { %v363_v37 = vmul.f32 %v270_v12, %v270_v12  ;;  %v338_v43 = vadd.f32 %v337_v36, %v270_v12 }
  0xb2   :  { %v279_v8 = vpop.f32.mrf.mxu1 }
  0xb3   :  { %v378_v46 = vadd.f32 %v377_v42, %v363_v37  ;;  %v336_v42 = vld [vmem:[#allocation2] sm:$0x1] }
  0xb5   :  { %v240_v10 = vpop.f32.mrf.mxu2 }
  0xb6   :  { %v222_v11 = vpop.f32.mrf.mxu0  ;;  %v772_v16 = vadd.f32 %v289_v4, %v240_v10 }
  0xb7   :  { %v272_v13 = vadd.f32 %v271_v60, %v222_v11 }
  0xb9   :  { %v560_v14 = vpack.c.bf16 %v272_v13, %v270_v12  ;;  %v364_v44 = vmul.f32 %v272_v13, %v272_v13  ;;  %v339_v47 = vadd.f32 %v338_v43, %v272_v13  ;;  %v371_v12 = vmul.f32 %v772_v16, %v772_v16 }
  0xba   :  { %v281_v15 = vpop.f32.mrf.mxu1 }
  0xbb   :  { %592 = vst [vmem:[%s810_s2 + $0x8] sm:$0xff] %v560_v14   ;;  %v379_v51 = vadd.f32 %v378_v46, %v364_v44  ;;  %v360_v44 = vld [vmem:[#allocation3] sm:$0x1] }
  0xbd   :  { %v242_v17 = vpop.f32.mrf.mxu2 }
  0xbe   :  { %v225_v19 = vpop.f32.mrf.mxu0  ;;  %v774_v20 = vadd.f32 %v291_v9, %v242_v17 }
  0xbf   :  { %v275_v25 = vadd.f32 %v274_v62, %v225_v19 }
  0xc0   :  { %v580_v21 = vpack.c.bf16 %v774_v20, %v772_v16  ;;  %v372_v17 = vmul.f32 %v774_v20, %v774_v20 }
  0xc1   :  { %v365_v48 = vmul.f32 %v275_v25, %v275_v25  ;;  %v340_v52 = vadd.f32 %v339_v47, %v275_v25 }
  0xc2   :  { %596 = vst [vmem:[%s810_s2 + $0x28] sm:$0xff] %v580_v21   ;;  %v284_v22 = vpop.f32.mrf.mxu1 }
  0xc3   :  { %v285_v32 = vadd.f32 %v284_v22, %v235_v63  ;;  %v380_v54 = vadd.f32 %v379_v51, %v365_v48 }
  0xc5   :  { %v245_v23 = vpop.f32.mrf.mxu2  ;;  %v369_v2 = vmul.f32 %v285_v32, %v285_v32 }
  0xc6   :  { %v227_v24 = vpop.f32.mrf.mxu0  ;;  %v295_v34 = vadd.f32 %v294_v18, %v245_v23 }
  0xc7   :  { %v277_v26 = vadd.f32 %v276_v5, %v227_v24  ;;  %v301_v5 = vpop.f32.mrf.mxu3 }
  0xc8   :  { %v373_v21 = vmul.f32 %v295_v34, %v295_v34 }
  0xc9   :  { %v565_v28 = vpack.c.bf16 %v277_v26, %v275_v25  ;;  %v366_v53 = vmul.f32 %v277_v26, %v277_v26  ;;  %v341_v55 = vadd.f32 %v340_v52, %v277_v26 }
  0xca   :  { %v286_v29 = vpop.f32.mrf.mxu1 }
  0xcb   :  { %593 = vst [vmem:[%s810_s2 + $0x10] sm:$0xff] %v565_v28   ;;  %v287_v33 = vadd.f32 %v286_v29, %v237_v6  ;;  %v381_v59 = vadd.f32 %v380_v54, %v366_v53 }
  0xcd   :  { %v575_v38 = vpack.c.bf16 %v287_v33, %v285_v32  ;;  %v247_v39 = vpop.f32.mrf.mxu2  ;;  %v370_v7 = vmul.f32 %v287_v33, %v287_v33 }
  0xce   :  { %v230_v40 = vpop.f32.mrf.mxu0  ;;  %v297_v41 = vadd.f32 %v296_v27, %v247_v39 }
  0xcf   :  { %595 = vst [vmem:[%s810_s2 + $0x20] sm:$0xff] %v575_v38   ;;  %v280_v49 = vadd.f32 %v279_v8, %v230_v40 }
  0xd0   :  { %v585_v45 = vpack.c.bf16 %v297_v41, %v295_v34  ;;  %v374_v24 = vmul.f32 %v297_v41, %v297_v41 }
  0xd1   :  { %v367_v56 = vmul.f32 %v280_v49, %v280_v49  ;;  %v342_v60 = vadd.f32 %v341_v55, %v280_v49 }
  0xd2   :  { %597 = vst [vmem:[%s810_s2 + $0x30] sm:$0xff] %v585_v45  }
  0xd3   :  { %v382_v62 = vadd.f32 %v381_v59, %v367_v56 }
  0xd5   :  { %v250_v57 = vpop.f32.mrf.mxu2 }
  0xd6   :  { %v232_v58 = vpop.f32.mrf.mxu0  ;;  %v300_v6 = vadd.f32 %v299_v50, %v250_v57 }
  0xd7   :  { %v282_v61 = vadd.f32 %v281_v15, %v232_v58 }
  0xd9   :  { %v570_v63 = vpack.c.bf16 %v282_v61, %v280_v49  ;;  %v343_v0 = vadd.f32 %v342_v60, %v282_v61  ;;  %v368_v1 = vmul.f32 %v282_v61, %v282_v61 }
  0xdb   :  { %594 = vst [vmem:[%s810_s2 + $0x18] sm:$0xff] %v570_v63   ;;  %v344_v3 = vadd.f32 %v343_v0, %v285_v32  ;;  %v383_v4 = vadd.f32 %v382_v62, %v368_v1 }
  0xdd   :  { %v345_v8 = vadd.f32 %v344_v3, %v287_v33  ;;  %v384_v9 = vadd.f32 %v383_v4, %v369_v2  ;;  %v252_v10 = vpop.f32.mrf.mxu2 }
  0xde   :  { %v302_v11 = vadd.f32 %v301_v5, %v252_v10 }
  0xdf   :  { %v346_v13 = vadd.f32 %v345_v8, %v772_v16  ;;  %v385_v14 = vadd.f32 %v384_v9, %v370_v7  ;;  %v375_v16 = vmul.f32 %v300_v6, %v300_v6 }
  0xe0   :  { %v590_v15 = vpack.c.bf16 %v302_v11, %v300_v6  ;;  %v376_v31 = vmul.f32 %v302_v11, %v302_v11 }
  0xe1   :  { %v386_v18 = vadd.f32 %v385_v14, %v371_v12  ;;  %v347_v19 = vadd.f32 %v346_v13, %v774_v20 }
  0xe2   :  { %598 = vst [vmem:[%s810_s2 + $0x38] sm:$0xff] %v590_v15  }
  0xe3   :  { %v348_v22 = vadd.f32 %v347_v19, %v295_v34  ;;  %v387_v23 = vadd.f32 %v386_v18, %v372_v17 }
  0xe5   :  { %v349_v25 = vadd.f32 %v348_v22, %v297_v41  ;;  %v388_v26 = vadd.f32 %v387_v23, %v373_v21 }
  0xe7   :  { %v350_v27 = vadd.f32 %v349_v25, %v300_v6  ;;  %v389_v28 = vadd.f32 %v388_v26, %v374_v24 }
  0xe9   :  { %v390_v29 = vadd.f32 %v389_v28, %v375_v16  ;;  %v351_v30 = vadd.f32 %v350_v27, %v302_v11 }
  0xeb   :  { %v352_v32 = vrot.slane %v351_v30, 4  ;;  %v391_v33 = vadd.f32 %v390_v29, %v376_v31 }
  0xed   :  { %v353_v35 = vadd.f32 %v352_v32, %v351_v30  ;;  %v392_v20 = vrot.slane %v391_v33, 4 }
  0xef   :  { %v354_v36 = vrot.slane %v353_v35, 2  ;;  %v393_v37 = vadd.f32 %v392_v20, %v391_v33 }
  0xf1   :  { %v355_v38 = vadd.f32 %v354_v36, %v353_v35  ;;  %v394_v39 = vrot.slane %v393_v37, 2 }
  0xf3   :  { %v356_v40 = vrot.slane %v355_v38, 1  ;;  %v395_v34 = vadd.f32 %v394_v39, %v393_v37 }
  0xf5   :  { %v357_v43 = vadd.f32 %v356_v40, %v355_v38  ;;  %v396_v41 = vrot.slane %v395_v34, 1 }
  0xf7   :  { %v358_v45 = vadd.f32 %v357_v43, %v336_v42  ;;  %v397_v46 = vadd.f32 %v396_v41, %v395_v34 }
  0xf9   :  { %359 = vst [vmem:[#allocation2] sm:$0x1] %v358_v45  ;;  %v398_v47 = vadd.f32 %v397_v46, %v360_v44 }
  0xfb   :  { %399 = vst [vmem:[#allocation3] sm:$0x1] %v398_v47 }
 0x100   :  { %v403_v48 = vld [vmem:[#allocation2] sm:$0x1] }
 0x101   :  { %404 = vst [vmem:[%s811_s3] sm:$0x1] %v403_v48 }
 0x102   :  { %v405_v49 = vld [vmem:[#allocation3] sm:$0x1] }
 0x103   :  { %406 = vst [vmem:[%s812_s4] sm:$0x1] %v405_v49 }

// kernel: resnet_forward.48
= control target key start
LH: loop header
LB: loop body
LE: loop exit
PB: predicated region body
PF: predicated region fallthrough
CT: control target
= control target key end

     0   :  { %s797_s1 = inlined_call_operand.vmem [shape: f32[1,128], index: 1, kind: input, shape index: {}]   ;;  %s798_s2 = inlined_call_operand.vmem [shape: f32[1,128], index: 2, kind: input, shape index: {}]   ;;  %s799_s6 = inlined_call_operand.vmem [shape: f32[1,128], index: 6, kind: input, shape index: {}]   ;;  %s800_s7 = inlined_call_operand.vmem [shape: f32[1,128], index: 7, kind: input, shape index: {}]   ;;  %s801_s0 = inlined_call_operand.vmem [shape: bf16[128,128], index: 0, kind: input, shape index: {}]   ;;  %s802_s5 = inlined_call_operand.vmem [shape: bf16[128,128], index: 5, kind: input, shape index: {}]   ;;  %s803_s3 = inlined_call_operand.vmem [shape: f32[1,128], index: 3, kind: input, shape index: {}]   ;;  %s804_s8 = inlined_call_operand.vmem [shape: f32[1,128], index: 8, kind: input, shape index: {}]   ;;  %s805_s4 = inlined_call_operand.vmem [shape: f32[1,128], index: 4, kind: input, shape index: {}]   ;;  %s806_s9 = inlined_call_operand.vmem [shape: f32[1,128], index: 9, kind: input, shape index: {}]   ;;  %s807_s10 = inlined_call_operand.vmem [shape: bf16[128,128], index: 10, kind: output, shape index: {}]  }
   0x1   :  { %v35_v0 = vld [vmem:[%s797_s1] sm:$0x1]  ;;  %v506_v20 = vld [vmem:[%s801_s0 + $0x8] sm:$0xff]   ;;  %v520_v26 = vld [vmem:[%s801_s0 + $0x10] sm:$0xff]  }
   0x2   :  { %v37_v1 = vld [vmem:[%s798_s2] sm:$0x1]  ;;  %v479_v2 = vmul.f32 0.0078125, %v35_v0  ;;  %v515_v25 = vld [vmem:[%s802_s5 + $0x8] sm:$0xff]   ;;  %v295_v30 = vunpack.c.l.bf16 %v506_v20  ;;  %v530_v33 = vld [vmem:[%s802_s5 + $0x10] sm:$0xff]   ;;  %v296_v35 = vunpack.c.h.bf16 %v506_v20  ;;  %v299_v38 = vunpack.c.l.bf16 %v520_v26 }
   0x3   :  { %v38_v3 = vmul.f32 0.0078125, %v37_v1  ;;  %v128_v4 = vld [vmem:[%s799_s6] sm:$0x1]  ;;  %v535_v34 = vld [vmem:[%s801_s0 + $0x18] sm:$0xff]   ;;  %v327_v36 = vunpack.c.l.bf16 %v515_v25  ;;  %v328_v37 = vunpack.c.h.bf16 %v515_v25  ;;  %v300_v45 = vunpack.c.h.bf16 %v520_v26  ;;  %v570_v49 = vld [vmem:[%s801_s0 + $0x28] sm:$0xff]  }
   0x4   :  { %v130_v5 = vld [vmem:[%s800_s7] sm:$0x1]  ;;  %v39_v6 = vmul.f32 %v479_v2, %v479_v2  ;;  %v489_v7 = vmul.f32 0.0078125, %v128_v4  ;;  %v544_v39 = vld [vmem:[%s802_s5 + $0x18] sm:$0xff]   ;;  %v331_v46 = vunpack.c.l.bf16 %v530_v33  ;;  %v332_v47 = vunpack.c.h.bf16 %v530_v33  ;;  %v580_v55 = vld [vmem:[%s802_s5 + $0x28] sm:$0xff]  }
   0x5   :  { %v131_v8 = vmul.f32 0.0078125, %v130_v5  ;;  %v496_v17 = vld [vmem:[%s801_s0] sm:$0xff]   ;;  %v303_v48 = vunpack.c.l.bf16 %v535_v34  ;;  %v304_v53 = vunpack.c.h.bf16 %v535_v34  ;;  %v335_v54 = vunpack.c.l.bf16 %v544_v39  ;;  %v596_v61 = vld [vmem:[%s801_s0 + $0x30] sm:$0xff]  }
   0x6   :  { %v40_v9 = vsub.f32 %v38_v3, %v39_v6  ;;  %v132_v10 = vmul.f32 %v489_v7, %v489_v7  ;;  %v501_v19 = vld [vmem:[%s802_s5] sm:$0xff]   ;;  %v291_v23 = vunpack.c.l.bf16 %v496_v17  ;;  %v292_v27 = vunpack.c.h.bf16 %v496_v17  ;;  %v601_v62 = vld [vmem:[%s802_s5 + $0x30] sm:$0xff]  }
   0x7   :  { %v323_v28 = vunpack.c.l.bf16 %v501_v19  ;;  %v324_v29 = vunpack.c.h.bf16 %v501_v19  ;;  %v550_v42 = vld [vmem:[%s801_s0 + $0x20] sm:$0xff]   ;;  %v336_v57 = vunpack.c.h.bf16 %v544_v39  ;;  %v311_v4 = vunpack.c.l.bf16 %v570_v49 }
   0x8   :  { %v41_v11 = vmax.f32 %v40_v9, 0.0  ;;  %v133_v12 = vsub.f32 %v131_v8, %v132_v10  ;;  %v555_v43 = vld [vmem:[%s802_s5 + $0x20] sm:$0xff]   ;;  %v307_v58 = vunpack.c.l.bf16 %v550_v42  ;;  %v308_v59 = vunpack.c.h.bf16 %v550_v42  ;;  %v617_v10 = vld [vmem:[%s801_s0 + $0x38] sm:$0xff]  }
   0x9   :  { %v53_v51 = vld [vmem:[%s803_s3] sm:$0x1]  ;;  %v339_v60 = vunpack.c.l.bf16 %v555_v43  ;;  %v340_v3 = vunpack.c.h.bf16 %v555_v43  ;;  %v312_v6 = vunpack.c.h.bf16 %v570_v49  ;;  %v343_v8 = vunpack.c.l.bf16 %v580_v55 }
   0xa   :  { %v42_v13 = vadd.f32 1e-05, %v41_v11  ;;  %v134_v14 = vmax.f32 %v133_v12, 0.0  ;;  %v146_v1 = vld [vmem:[%s804_s8] sm:$0x1]  ;;  %v344_v9 = vunpack.c.h.bf16 %v580_v55  ;;  %v622_v11 = vld [vmem:[%s802_s5 + $0x38] sm:$0xff]   ;;  %v348_v26 = vunpack.c.h.bf16 %v601_v62 }
   0xb   :  { %v55_v12 = vld [vmem:[%s805_s4] sm:$0x1] }
   0xc   :  { %414 = vrsqrt.f32 %v42_v13  ;;  %v135_v15 = vadd.f32 1e-05, %v134_v14  ;;  %vm49_vm0 = vweird.f32 %v42_v13  ;;  %v315_v14 = vunpack.c.l.bf16 %v596_v61 }
   0xe   :  { %416 = vrsqrt.f32 %v135_v15  ;;  %vm142_vm2 = vweird.f32 %v135_v15 }
  0x12   :  { %v415_v16 = vpop.eup %414 }
  0x13   :  { %v44_v18 = vmul.f32 %v415_v16, %v42_v13  ;;  %vm50_vm1 = vweird.f32 %v415_v16 }
  0x14   :  { %v508_v21 = vpop.eup %416  ;;  %vm559_vm4 = vmor %vm49_vm0, %vm50_vm1 }
  0x15   :  { %v45_v22 = vmul.f32 %v415_v16, %v44_v18  ;;  %v137_v24 = vmul.f32 %v508_v21, %v135_v15  ;;  %vm143_vm3 = vweird.f32 %v508_v21  ;;  %v316_v15 = vunpack.c.h.bf16 %v596_v61 }
  0x16   :  { %vm585_vm5 = vmor %vm142_vm2, %vm143_vm3 }
  0x17   :  { %v46_v31 = vmul.f32 0.5, %v45_v22  ;;  %v138_v32 = vmul.f32 %v508_v21, %v137_v24 }
  0x19   :  { %v47_v40 = vsub.f32 1.5, %v46_v31  ;;  %v139_v41 = vmul.f32 0.5, %v138_v32  ;;  %v148_v31 = vld [vmem:[%s806_s9] sm:$0x1]  ;;  %v319_v32 = vunpack.c.l.bf16 %v617_v10 }
  0x1b   :  { %v48_v50 = vmul.f32 %v415_v16, %v47_v40  ;;  %v140_v52 = vsub.f32 1.5, %v139_v41  ;;  %v351_v40 = vunpack.c.l.bf16 %v622_v11  ;;  %v352_v41 = vunpack.c.h.bf16 %v622_v11 }
  0x1d   :  { %v52_v63 = vsel %vm559_vm4, %v415_v16, %v48_v50  ;;  %v141_v0 = vmul.f32 %v508_v21, %v140_v52  ;;  %v347_v16 = vunpack.c.l.bf16 %v601_v62 }
  0x1e   :  { %v54_v5 = vmul.f32 %v53_v51, %v52_v63 }
  0x1f   :  { %v145_v13 = vsel %vm585_vm5, %v508_v21, %v141_v0  ;;  %v320_v21 = vunpack.c.h.bf16 %v617_v10 }
  0x20   :  { %v56_v18 = vmul.f32 %v54_v5, %v479_v2  ;;  %v634_v22 = vperm.slane %v54_v5, 0  ;;  %v147_v24 = vmul.f32 %v146_v1, %v145_v13 }
  0x22   :  { %v57_v44 = vsub.f32 %v55_v12, %v56_v18  ;;  %v93_v2 = vmul.f32 %v291_v23, %v634_v22  ;;  %v94_v50 = vmul.f32 %v292_v27, %v634_v22  ;;  %v149_v51 = vmul.f32 %v147_v24, %v489_v7 }
  0x23   :  { %v651_v52 = vperm.slane %v147_v24, 0  ;;  %v95_v56 = vmul.f32 %v295_v30, %v634_v22  ;;  %v96_v63 = vmul.f32 %v296_v35, %v634_v22  ;;  %v97_v0 = vmul.f32 %v299_v38, %v634_v22 }
  0x24   :  { %v660_v1 = vperm.slane %v57_v44, 0  ;;  %v150_v23 = vsub.f32 %v148_v31, %v149_v51  ;;  %v98_v17 = vmul.f32 %v300_v45, %v634_v22  ;;  %v99_v27 = vmul.f32 %v303_v48, %v634_v22 }
  0x25   :  { %v186_v7 = vmul.f32 %v323_v28, %v651_v52  ;;  %v187_v30 = vmul.f32 %v324_v29, %v651_v52  ;;  %v188_v20 = vmul.f32 %v327_v36, %v651_v52  ;;  %v189_v35 = vmul.f32 %v328_v37, %v651_v52 }
  0x26   :  { %v112_v38 = vadd.f32 %v660_v1, %v93_v2  ;;  %v113_v45 = vadd.f32 %v660_v1, %v94_v50  ;;  %v678_v48 = vperm.slane %v150_v23, 0  ;;  %v114_v28 = vadd.f32 %v660_v1, %v95_v56 }
  0x27   :  { %v115_v5 = vadd.f32 %v660_v1, %v96_v63  ;;  %v116_v19 = vadd.f32 %v660_v1, %v97_v0  ;;  %v117_v29 = vadd.f32 %v660_v1, %v98_v17  ;;  %v190_v36 = vmul.f32 %v331_v46, %v651_v52 }
  0x28   :  { %v205_v25 = vadd.f32 %v678_v48, %v186_v7  ;;  %v206_v37 = vadd.f32 %v678_v48, %v187_v30  ;;  %v207_v12 = vadd.f32 %v678_v48, %v188_v20  ;;  %v208_v13 = vadd.f32 %v678_v48, %v189_v35 }
  0x29   :  { %v191_v18 = vmul.f32 %v332_v47, %v651_v52  ;;  %v209_v24 = vadd.f32 %v678_v48, %v190_v36  ;;  %v100_v31 = vmul.f32 %v304_v53, %v634_v22  ;;  %v118_v46 = vadd.f32 %v660_v1, %v99_v27 }
  0x2a   :  { %v221_v44 = vadd.f32 %v205_v25, %v112_v38  ;;  %v222_v2 = vadd.f32 %v206_v37, %v113_v45  ;;  %v223_v50 = vadd.f32 %v207_v12, %v114_v28  ;;  %v224_v51 = vadd.f32 %v208_v13, %v115_v5 }
  0x2b   :  { %v210_v56 = vadd.f32 %v678_v48, %v191_v18  ;;  %v225_v63 = vadd.f32 %v209_v24, %v116_v19  ;;  %v119_v0 = vadd.f32 %v660_v1, %v100_v31  ;;  %v192_v33 = vmul.f32 %v335_v54, %v651_v52 }
  0x2c   :  { %v237_v47 = vmax.f32 %v221_v44, 0.0  ;;  %v238_v23 = vmax.f32 %v222_v2, 0.0  ;;  %v239_v17 = vmax.f32 %v223_v50, 0.0  ;;  %v240_v34 = vmax.f32 %v224_v51, 0.0 }
  0x2d   :  { %v226_v53 = vadd.f32 %v210_v56, %v117_v29  ;;  %v241_v7 = vmax.f32 %v225_v63, 0.0  ;;  %v193_v27 = vmul.f32 %v336_v57, %v651_v52  ;;  %v211_v30 = vadd.f32 %v678_v48, %v192_v33 }
  0x2e   :  { %v356_v20 = vpack.c.bf16 %v238_v23, %v237_v47  ;;  %v361_v35 = vpack.c.bf16 %v240_v34, %v239_v17  ;;  %v101_v38 = vmul.f32 %v307_v58, %v634_v22  ;;  %v102_v54 = vmul.f32 %v308_v59, %v634_v22 }
  0x2f   :  { %v242_v45 = vmax.f32 %v226_v53, 0.0  ;;  %v212_v28 = vadd.f32 %v678_v48, %v193_v27  ;;  %v227_v5 = vadd.f32 %v211_v30, %v118_v46  ;;  %v194_v39 = vmul.f32 %v339_v60, %v651_v52 }
  0x30   :  { %357 = vst [vmem:[%s807_s10] sm:$0xff] %v356_v20   ;;  %v120_v57 = vadd.f32 %v660_v1, %v101_v38  ;;  %v121_v58 = vadd.f32 %v660_v1, %v102_v54  ;;  %v195_v42 = vmul.f32 %v340_v3, %v651_v52  ;;  %v103_v59 = vmul.f32 %v311_v4, %v634_v22 }
  0x31   :  { %407 = vst [vmem:[%s807_s10 + $0x8] sm:$0xff] %v361_v35   ;;  %v366_v60 = vpack.c.bf16 %v242_v45, %v241_v7  ;;  %v228_v19 = vadd.f32 %v212_v28, %v119_v0  ;;  %v243_v29 = vmax.f32 %v227_v5, 0.0  ;;  %v213_v36 = vadd.f32 %v678_v48, %v194_v39 }
  0x32   :  { %v214_v25 = vadd.f32 %v678_v48, %v195_v42  ;;  %v104_v43 = vmul.f32 %v312_v6, %v634_v22  ;;  %v122_v3 = vadd.f32 %v660_v1, %v103_v59  ;;  %v196_v4 = vmul.f32 %v343_v8, %v651_v52 }
  0x33   :  { %408 = vst [vmem:[%s807_s10 + $0x10] sm:$0xff] %v366_v60   ;;  %v244_v37 = vmax.f32 %v228_v19, 0.0  ;;  %v229_v12 = vadd.f32 %v213_v36, %v120_v57  ;;  %v197_v13 = vmul.f32 %v344_v9, %v651_v52  ;;  %v105_v49 = vmul.f32 %v315_v14, %v634_v22 }
  0x34   :  { %v230_v6 = vadd.f32 %v214_v25, %v121_v58  ;;  %v123_v18 = vadd.f32 %v660_v1, %v104_v43  ;;  %v215_v24 = vadd.f32 %v678_v48, %v196_v4  ;;  %v106_v8 = vmul.f32 %v316_v15, %v634_v22 }
  0x35   :  { %v371_v31 = vpack.c.bf16 %v244_v37, %v243_v29  ;;  %v245_v46 = vmax.f32 %v229_v12, 0.0  ;;  %v216_v44 = vadd.f32 %v678_v48, %v197_v13  ;;  %v124_v55 = vadd.f32 %v660_v1, %v105_v49 }
  0x36   :  { %v246_v9 = vmax.f32 %v230_v6, 0.0  ;;  %v231_v2 = vadd.f32 %v215_v24, %v122_v3  ;;  %v125_v50 = vadd.f32 %v660_v1, %v106_v8  ;;  %v198_v14 = vmul.f32 %v347_v16, %v651_v52 }
  0x37   :  { %409 = vst [vmem:[%s807_s10 + $0x18] sm:$0xff] %v371_v31   ;;  %v232_v61 = vadd.f32 %v216_v44, %v123_v18  ;;  %v199_v15 = vmul.f32 %v348_v26, %v651_v52  ;;  %v107_v51 = vmul.f32 %v319_v32, %v634_v22  ;;  %v108_v56 = vmul.f32 %v320_v21, %v634_v22 }
  0x38   :  { %v376_v63 = vpack.c.bf16 %v246_v9, %v245_v46  ;;  %v247_v0 = vmax.f32 %v231_v2, 0.0  ;;  %v217_v16 = vadd.f32 %v678_v48, %v198_v14  ;;  %v200_v33 = vmul.f32 %v351_v40, %v651_v52 }
  0x39   :  { %v248_v47 = vmax.f32 %v232_v61, 0.0  ;;  %v218_v62 = vadd.f32 %v678_v48, %v199_v15  ;;  %v126_v26 = vadd.f32 %v660_v1, %v107_v51  ;;  %v127_v10 = vadd.f32 %v660_v1, %v108_v56 }
  0x3a   :  { %410 = vst [vmem:[%s807_s10 + $0x20] sm:$0xff] %v376_v63   ;;  %v233_v32 = vadd.f32 %v217_v16, %v124_v55  ;;  %v201_v22 = vmul.f32 %v352_v41, %v651_v52  ;;  %v219_v21 = vadd.f32 %v678_v48, %v200_v33 }
  0x3b   :  { %v381_v23 = vpack.c.bf16 %v248_v47, %v247_v0  ;;  %v234_v40 = vadd.f32 %v218_v62, %v125_v50 }
  0x3c   :  { %v249_v17 = vmax.f32 %v233_v32, 0.0  ;;  %v220_v34 = vadd.f32 %v678_v48, %v201_v22  ;;  %v235_v53 = vadd.f32 %v219_v21, %v126_v26 }
  0x3d   :  { %411 = vst [vmem:[%s807_s10 + $0x28] sm:$0xff] %v381_v23   ;;  %v250_v7 = vmax.f32 %v234_v40, 0.0 }
  0x3e   :  { %v236_v27 = vadd.f32 %v220_v34, %v127_v10  ;;  %v251_v30 = vmax.f32 %v235_v53, 0.0 }
  0x3f   :  { %v386_v1 = vpack.c.bf16 %v250_v7, %v249_v17 }
  0x40   :  { %v252_v20 = vmax.f32 %v236_v27, 0.0 }
  0x41   :  { %412 = vst [vmem:[%s807_s10 + $0x30] sm:$0xff] %v386_v1  }
  0x42   :  { %v391_v11 = vpack.c.bf16 %v252_v20, %v251_v30 }
  0x44   :  { %413 = vst [vmem:[%s807_s10 + $0x38] sm:$0xff] %v391_v11  }

// kernel: resnet_forward.47
= control target key start
LH: loop header
LB: loop body
LE: loop exit
PB: predicated region body
PF: predicated region fallthrough
CT: control target
= control target key end

     0   :  { %vm493_vm0 = vcmask 1043456   ;;  %vm468_vm1 = vcmask 64512   ;;  %vm192_vm2 = vcmask 130048   ;;  %s1339_s3 = inlined_call_operand.vmem [shape: bf16[8,128], index: 3, kind: input, shape index: {}]   ;;  %s1340_s1 = inlined_call_operand.vmem [shape: bf16[144,128], index: 1, kind: input, shape index: {}]   ;;  %s1341_s2 = inlined_call_operand.vmem [shape: bf16[128,8], index: 2, kind: input, shape index: {}]   ;;  %s1342_s0 = inlined_call_operand.vmem [shape: bf16[128,144], index: 0, kind: input, shape index: {}]   ;;  %s1343_s7 = inlined_call_operand.vmem [shape: bf16[128,128], index: 7, kind: output, shape index: {3}]   ;;  %s1344_s4 = inlined_call_operand.vmem [shape: bf16[128,128], index: 4, kind: output, shape index: {0}]   ;;  %s1345_s8 = inlined_call_operand.vmem [shape: f32[1,128], index: 8, kind: output, shape index: {4}]   ;;  %s1346_s9 = inlined_call_operand.vmem [shape: f32[1,128], index: 9, kind: output, shape index: {5}]   ;;  %s1347_s5 = inlined_call_operand.vmem [shape: f32[1,128], index: 5, kind: output, shape index: {1}]   ;;  %s1348_s6 = inlined_call_operand.vmem [shape: f32[1,128], index: 6, kind: output, shape index: {2}]  }
   0x1   :  { %v427_v0 = vld [vmem:[%s1339_s3] sm:$0xf]  ;;  %v848_v1 = vld [vmem:[%s1340_s1 + $0x38] sm:$0xff]  ;;  %v825_v5 = vld [vmem:[%s1342_s0 + $0x4] sm:$0xf] }
   0x2   :  { %v849_v2 = vld [vmem:[%s1340_s1 + $0x40] sm:$0xff]  ;;  %v495_v3 = vsel %vm493_vm0, %v427_v0, 0  ;;  %v681_v6 = vld [vmem:[%s1342_s0 + $0x8] sm:$0xf0]  ;;  %217 = vmatpush.bf16.msra.mxu0 %v848_v1  ;;  %v847_v8 = vld [vmem:[%s1340_s1 + $0x30] sm:$0xff]  ;;  %952 = vmatpush.bf16.msra.mxu3 %v848_v1 }
   0x3   :  { %v850_v4 = vld [vmem:[%s1341_s2] sm:$0xff]  ;;  %504 = vmatpush.bf16.msra.mxu2 %v495_v3  ;;  %v684_v7 = vor.u32 %v825_v5, %v681_v6  ;;  %273 = vmatpush.bf16.msra.mxu1 %v849_v2  ;;  %v846_v9 = vld [vmem:[%s1340_s1 + $0x28] sm:$0xff]  ;;  %v844_v11 = vld [vmem:[%s1340_s1 + $0x18] sm:$0xff] }
   0x4   :  { %v845_v10 = vld [vmem:[%s1340_s1 + $0x20] sm:$0xff]  ;;  %v827_v12 = vld [vmem:[%s1342_s0 + $0x14] sm:$0xf]  ;;  %v689_v13 = vld [vmem:[%s1342_s0 + $0x18] sm:$0xf0] }
   0x5   :  { %v851_v14 = vld [vmem:[%s1341_s2 + $0x8] sm:$0xff]  ;;  %v692_v15 = vor.u32 %v827_v12, %v689_v13  ;;  %v843_v16 = vld [vmem:[%s1340_s1 + $0x10] sm:$0xff]  ;;  %v841_v18 = vld [vmem:[%s1340_s1] sm:$0xff] }
   0x6   :  { %817 = vmatmul.msk.bf16.vlgmr.msra.gmra.mxu2 %vm468_vm1, %v850_v4  ;;  %777 = vmatmul.msk.bf16.vlgmr.msra.gmra.mxu1 %vm192_vm2, %v684_v7  ;;  %v842_v17 = vld [vmem:[%s1340_s1 + $0x8] sm:$0xff]  ;;  %v679_v19 = vld [vmem:[%s1342_s0] sm:$0xf]  ;;  %v829_v25 = vld [vmem:[%s1342_s0 + $0x24] sm:$0xf] }
   0x7   :  { %218 = vmatpush.bf16.msra.mxu0 %v847_v8  ;;  %953 = vmatpush.bf16.msra.mxu3 %v847_v8  ;;  %v826_v20 = vld [vmem:[%s1342_s0 + $0x4] sm:$0xf0]  ;;  %v727_v21 = vld [vmem:[%s1342_s0 + $0x60] sm:$0xf]  ;;  %v697_v26 = vld [vmem:[%s1342_s0 + $0x28] sm:$0xf0] }
   0x8   :  { %v838_v22 = vld [vmem:[%s1342_s0 + $0x64] sm:$0xf0]  ;;  %v680_v23 = vor.u32 %v826_v20, %v679_v19  ;;  %v852_v27 = vld [vmem:[%s1341_s2 + $0x10] sm:$0xff]  ;;  %v700_v28 = vor.u32 %v829_v25, %v697_v26  ;;  %v828_v30 = vld [vmem:[%s1342_s0 + $0x14] sm:$0xf0] }
   0x9   :  { %v728_v24 = vor.u32 %v838_v22, %v727_v21  ;;  %v687_v29 = vld [vmem:[%s1342_s0 + $0x10] sm:$0xf]  ;;  %v840_v32 = vld [vmem:[%s1342_s0 + $0x74] sm:$0xf0]  ;;  %v831_v35 = vld [vmem:[%s1342_s0 + $0x34] sm:$0xf] }
   0xa   :  { %v735_v31 = vld [vmem:[%s1342_s0 + $0x70] sm:$0xf]  ;;  %v688_v33 = vor.u32 %v828_v30, %v687_v29  ;;  %v705_v36 = vld [vmem:[%s1342_s0 + $0x38] sm:$0xf0]  ;;  %v695_v39 = vld [vmem:[%s1342_s0 + $0x20] sm:$0xf] }
   0xb   :  { %219 = vmatpush.bf16.msra.mxu0 %v846_v9  ;;  %954 = vmatpush.bf16.msra.mxu3 %v846_v9  ;;  %v736_v34 = vor.u32 %v840_v32, %v735_v31  ;;  %v853_v37 = vld [vmem:[%s1341_s2 + $0x18] sm:$0xff]  ;;  %v708_v38 = vor.u32 %v831_v35, %v705_v36  ;;  %v830_v40 = vld [vmem:[%s1342_s0 + $0x24] sm:$0xf0]  ;;  %v839_v41 = vld [vmem:[%s1342_s0 + $0x74] sm:$0xf] }
   0xc   :  { %v737_v42 = vld [vmem:[%s1342_s0 + $0x78] sm:$0xf0]  ;;  %v696_v43 = vor.u32 %v830_v40, %v695_v39  ;;  %v833_v45 = vld [vmem:[%s1342_s0 + $0x44] sm:$0xf]  ;;  %v713_v46 = vld [vmem:[%s1342_s0 + $0x48] sm:$0xf0] }
   0xd   :  { %v740_v44 = vor.u32 %v839_v41, %v737_v42  ;;  %v854_v47 = vld [vmem:[%s1341_s2 + $0x20] sm:$0xff]  ;;  %v716_v48 = vor.u32 %v833_v45, %v713_v46  ;;  %v703_v49 = vld [vmem:[%s1342_s0 + $0x30] sm:$0xf]  ;;  %v832_v50 = vld [vmem:[%s1342_s0 + $0x34] sm:$0xf0] }
   0xe   :  { %v704_v51 = vor.u32 %v832_v50, %v703_v49  ;;  %v857_v52 = vld [vmem:[%s1341_s2 + $0x38] sm:$0xff]  ;;  %v835_v53 = vld [vmem:[%s1342_s0 + $0x54] sm:$0xf]  ;;  %v855_v55 = vld [vmem:[%s1341_s2 + $0x28] sm:$0xff] }
   0xf   :  { %220 = vmatpush.bf16.msra.mxu0 %v845_v10  ;;  %955 = vmatpush.bf16.msra.mxu3 %v845_v10  ;;  %v721_v54 = vld [vmem:[%s1342_s0 + $0x58] sm:$0xf0]  ;;  %v711_v57 = vld [vmem:[%s1342_s0 + $0x40] sm:$0xf]  ;;  %v834_v58 = vld [vmem:[%s1342_s0 + $0x44] sm:$0xf0] }
  0x10   :  { %v724_v56 = vor.u32 %v835_v53, %v721_v54  ;;  %v712_v59 = vor.u32 %v834_v58, %v711_v57  ;;  %v837_v60 = vld [vmem:[%s1342_s0 + $0x64] sm:$0xf]  ;;  %v729_v61 = vld [vmem:[%s1342_s0 + $0x68] sm:$0xf0]  ;;  %v856_v62 = vld [vmem:[%s1341_s2 + $0x30] sm:$0xff] }
  0x11   :  { %v732_v63 = vor.u32 %v837_v60, %v729_v61  ;;  %v719_v0 = vld [vmem:[%s1342_s0 + $0x50] sm:$0xf]  ;;  %v836_v1 = vld [vmem:[%s1342_s0 + $0x54] sm:$0xf0] }
  0x13   :  { %221 = vmatpush.bf16.msra.mxu0 %v844_v11  ;;  %956 = vmatpush.bf16.msra.mxu3 %v844_v11 }
  0x16   :  { %818 = vmatmul.msk.bf16.gmra.mxu2 %vm468_vm1, %v851_v14  ;;  %778 = vmatmul.msk.bf16.gmra.mxu1 %vm192_vm2, %v692_v15 }
  0x17   :  { %222 = vmatpush.bf16.msra.mxu0 %v843_v16  ;;  %957 = vmatpush.bf16.msra.mxu3 %v843_v16 }
  0x1b   :  { %223 = vmatpush.bf16.msra.mxu0 %v842_v17  ;;  %958 = vmatpush.bf16.msra.mxu3 %v842_v17 }
  0x1f   :  { %224 = vmatpush.bf16.msra.mxu0 %v841_v18  ;;  %959 = vmatpush.bf16.msra.mxu3 %v841_v18 }
  0x22   :  { %225 = vmatmul.bf16.vlgmr.msra.gmra.mxu0 %v680_v23  ;;  %255 = vmatmul.bf16.vlgmr.msra.gmra.mxu3 %v728_v24 }
  0x23   :  { %960 = vmatpush.bf16.msrb.mxu3 %v849_v2  ;;  %v720_v2 = vor.u32 %v836_v1, %v719_v0 }
  0x26   :  { %819 = vmatmul.msk.bf16.gmra.mxu2 %vm468_vm1, %v852_v27  ;;  %779 = vmatmul.msk.bf16.gmra.mxu1 %vm192_vm2, %v700_v28 }
  0x27   :  { %961 = vmatpush.bf16.msra.mxu3 %v495_v3 }
  0x32   :  { %230 = vmatmul.bf16.gmra.mxu0 %v688_v33  ;;  %260 = vmatmul.bf16.gmra.mxu3 %v736_v34 }
  0x36   :  { %820 = vmatmul.msk.bf16.gmra.mxu2 %vm468_vm1, %v853_v37  ;;  %780 = vmatmul.msk.bf16.gmra.mxu1 %vm192_vm2, %v708_v38 }
  0x42   :  { %235 = vmatmul.bf16.gmra.mxu0 %v696_v43  ;;  %784 = vmatmul.msk.bf16.vlgmr.msrb.gmra.mxu3 %vm192_vm2, %v740_v44 }
  0x46   :  { %821 = vmatmul.msk.bf16.gmra.mxu2 %vm468_vm1, %v854_v47  ;;  %781 = vmatmul.msk.bf16.gmra.mxu1 %vm192_vm2, %v716_v48 }
  0x52   :  { %240 = vmatmul.bf16.gmra.mxu0 %v704_v51  ;;  %824 = vmatmul.msk.bf16.vlgmr.msra.gmra.mxu3 %vm468_vm1, %v857_v52 }
  0x56   :  { %822 = vmatmul.msk.bf16.gmra.mxu2 %vm468_vm1, %v855_v55  ;;  %782 = vmatmul.msk.bf16.gmra.mxu1 %vm192_vm2, %v724_v56 }
  0x62   :  { %245 = vmatmul.bf16.gmra.mxu0 %v712_v59 }
  0x66   :  { %823 = vmatmul.msk.bf16.gmra.mxu2 %vm468_vm1, %v856_v62  ;;  %783 = vmatmul.msk.bf16.gmra.mxu1 %vm192_vm2, %v732_v63  ;;  %v963_v62 = vmov 0.0  }
  0x67   :  { %28 = vst [vmem:[#allocation2] sm:$0x1] %v963_v62 }
  0x68   :  { %29 = vst [vmem:[#allocation3] sm:$0x1] %v963_v62 }
  0x69   :  { %30 = vst [vmem:[#allocation4] sm:$0x1] %v963_v62 }
  0x6a   :  { %31 = vst [vmem:[#allocation5] sm:$0x1] %v963_v62 }
  0x72   :  { %250 = vmatmul.bf16.gmra.mxu0 %v720_v2 }
  0x83   :  { %v275_v3 = vpop.f32.mrf.mxu1 }
  0x89   :  { %v506_v4 = vpop.f32.mrf.mxu2 }
  0x8a   :  { %v603_v6 = vmul.f32 %v506_v4, %v506_v4 }
  0x8b   :  { %v277_v5 = vpop.f32.mrf.mxu1 }
  0x91   :  { %v508_v7 = vpop.f32.mrf.mxu2 }
  0x92   :  { %v901_v8 = vpack.c.bf16 %v508_v7, %v506_v4  ;;  %v579_v9 = vadd.f32 %v508_v7, %v506_v4  ;;  %v604_v10 = vmul.f32 %v508_v7, %v508_v7 }
  0x93   :  { %v280_v12 = vpop.f32.mrf.mxu1 }
  0x94   :  { %902 = vst [vmem:[%s1343_s7] sm:$0xff] %v901_v8   ;;  %v619_v11 = vadd.f32 %v604_v10, %v603_v6 }
  0x99   :  { %v511_v13 = vpop.f32.mrf.mxu2 }
  0x9a   :  { %v1183_v14 = vadd.f32 %v579_v9, %v511_v13  ;;  %v605_v15 = vmul.f32 %v511_v13, %v511_v13 }
  0x9b   :  { %v282_v17 = vpop.f32.mrf.mxu1 }
  0x9c   :  { %v1185_v16 = vadd.f32 %v619_v11, %v605_v15 }
  0x9f   :  { %v226_v18 = vpop.f32.mrf.mxu0 }
  0xa0   :  { %v1195_v24 = vadd.f32 %v275_v3, %v226_v18 }
  0xa1   :  { %v1187_v19 = vpop.f32.mrf.mxu2 }
  0xa2   :  { %v906_v20 = vpack.c.bf16 %v1187_v19, %v511_v13  ;;  %v581_v6 = vadd.f32 %v1183_v14, %v1187_v19 }
  0xa3   :  { %v285_v21 = vpop.f32.mrf.mxu1 }
  0xa4   :  { %945 = vst [vmem:[%s1343_s7 + $0x8] sm:$0xff] %v906_v20  }
  0xa5   :  { %v1193_v22 = vpop.f32.mrf.mxu3 }
  0xa7   :  { %v228_v23 = vpop.f32.mrf.mxu0 }
  0xa8   :  { %v1197_v25 = vadd.f32 %v277_v5, %v228_v23  ;;  %v606_v5 = vmul.f32 %v1187_v19, %v1187_v19  ;;  %v372_v19 = vmul.f32 %v1195_v24, %v1195_v24 }
  0xa9   :  { %v516_v26 = vpop.f32.mrf.mxu2 }
  0xaa   :  { %v861_v27 = vpack.c.bf16 %v1197_v25, %v1195_v24  ;;  %v607_v8 = vmul.f32 %v516_v26, %v516_v26  ;;  %v582_v11 = vadd.f32 %v581_v6, %v516_v26  ;;  %v373_v13 = vmul.f32 %v1197_v25, %v1197_v25 }
  0xab   :  { %v287_v28 = vpop.f32.mrf.mxu1 }
  0xac   :  { %862 = vst [vmem:[%s1344_s4] sm:$0xff] %v861_v27   ;;  %v348_v27 = vadd.f32 %v1197_v25, %v1195_v24 }
  0xad   :  { %v1204_v29 = vpop.f32.mrf.mxu3 }
  0xaf   :  { %v231_v30 = vpop.f32.mrf.mxu0 }
  0xb0   :  { %v1209_v36 = vadd.f32 %v280_v12, %v231_v30  ;;  %v621_v12 = vadd.f32 %v1185_v16, %v606_v5 }
  0xb1   :  { %v518_v31 = vpop.f32.mrf.mxu2 }
  0xb2   :  { %v911_v32 = vpack.c.bf16 %v518_v31, %v516_v26  ;;  %v608_v15 = vmul.f32 %v518_v31, %v518_v31  ;;  %v583_v14 = vadd.f32 %v582_v11, %v518_v31  ;;  %v622_v20 = vadd.f32 %v621_v12, %v607_v8 }
  0xb3   :  { %v290_v33 = vpop.f32.mrf.mxu1 }
  0xb4   :  { %946 = vst [vmem:[%s1343_s7 + $0x10] sm:$0xff] %v911_v32   ;;  %v623_v30 = vadd.f32 %v622_v20, %v608_v15 }
  0xb5   :  { %v261_v34 = vpop.f32.mrf.mxu3 }
  0xb7   :  { %v233_v35 = vpop.f32.mrf.mxu0 }
  0xb8   :  { %v1211_v37 = vadd.f32 %v282_v17, %v233_v35 }
  0xb9   :  { %v521_v38 = vpop.f32.mrf.mxu2 }
  0xba   :  { %v866_v39 = vpack.c.bf16 %v1211_v37, %v1209_v36  ;;  %v609_v23 = vmul.f32 %v521_v38, %v521_v38  ;;  %v584_v16 = vadd.f32 %v583_v14, %v521_v38  ;;  %v375_v32 = vmul.f32 %v1211_v37, %v1211_v37 }
  0xbb   :  { %v292_v40 = vpop.f32.mrf.mxu1 }
  0xbc   :  { %938 = vst [vmem:[%s1344_s4 + $0x8] sm:$0xff] %v866_v39   ;;  %v624_v39 = vadd.f32 %v623_v30, %v609_v23 }
  0xbd   :  { %v263_v41 = vpop.f32.mrf.mxu3 }
  0xbf   :  { %v236_v42 = vpop.f32.mrf.mxu0 }
  0xc0   :  { %v1223_v48 = vadd.f32 %v285_v21, %v236_v42  ;;  %v374_v21 = vmul.f32 %v1209_v36, %v1209_v36 }
  0xc1   :  { %v523_v43 = vpop.f32.mrf.mxu2 }
  0xc2   :  { %v916_v44 = vpack.c.bf16 %v523_v43, %v521_v38  ;;  %v610_v31 = vmul.f32 %v523_v43, %v523_v43 }
  0xc3   :  { %v1221_v45 = vpop.f32.mrf.mxu1 }
  0xc4   :  { %947 = vst [vmem:[%s1343_s7 + $0x18] sm:$0xff] %v916_v44  }
  0xc5   :  { %v310_v46 = vpop.f32.mrf.mxu3 }
  0xc6   :  { %v1232_v53 = vadd.f32 %v310_v46, %v261_v34  ;;  %v349_v34 = vadd.f32 %v348_v27, %v1209_v36  ;;  %v625_v46 = vadd.f32 %v624_v39, %v610_v31 }
  0xc7   :  { %v238_v47 = vpop.f32.mrf.mxu0 }
  0xc8   :  { %v1225_v49 = vadd.f32 %v287_v28, %v238_v47  ;;  %v388_v28 = vadd.f32 %v373_v13, %v372_v19  ;;  %v350_v25 = vadd.f32 %v349_v34, %v1211_v37 }
  0xc9   :  { %v526_v50 = vpop.f32.mrf.mxu2 }
  0xca   :  { %v871_v51 = vpack.c.bf16 %v1225_v49, %v1223_v48  ;;  %v389_v35 = vadd.f32 %v388_v28, %v374_v21  ;;  %v611_v38 = vmul.f32 %v526_v50, %v526_v50  ;;  %v377_v36 = vmul.f32 %v1225_v49, %v1225_v49 }
  0xcb   :  { %v297_v52 = vpop.f32.mrf.mxu1  ;;  %v351_v62 = vadd.f32 %v350_v25, %v1223_v48 }
  0xcc   :  { %939 = vst [vmem:[%s1344_s4 + $0x10] sm:$0xff] %v871_v51  }
  0xcd   :  { %v312_v54 = vpop.f32.mrf.mxu3  ;;  %v352_v6 = vadd.f32 %v351_v62, %v1225_v49 }
  0xce   :  { %v1234_v56 = vadd.f32 %v312_v54, %v263_v41  ;;  %v376_v41 = vmul.f32 %v1223_v48, %v1223_v48  ;;  %v390_v54 = vadd.f32 %v389_v35, %v375_v32 }
  0xcf   :  { %v241_v55 = vpop.f32.mrf.mxu0 }
  0xd0   :  { %v896_v58 = vpack.c.bf16 %v1234_v56, %v1232_v53  ;;  %v1248_v0 = vadd.f32 %v290_v33, %v241_v55  ;;  %v585_v33 = vadd.f32 %v584_v16, %v523_v43 }
  0xd1   :  { %v528_v57 = vpop.f32.mrf.mxu2 }
  0xd2   :  { %v921_v59 = vpack.c.bf16 %v528_v57, %v526_v50  ;;  %944 = vst [vmem:[%s1344_s4 + $0x38] sm:$0xff] %v896_v58   ;;  %v586_v42 = vadd.f32 %v585_v33, %v526_v50  ;;  %v612_v47 = vmul.f32 %v528_v57, %v528_v57  ;;  %v626_v58 = vadd.f32 %v625_v46, %v611_v38 }
  0xd3   :  { %v1244_v60 = vpop.f32.mrf.mxu1  ;;  %v353_v13 = vadd.f32 %v352_v6, %v1248_v0  ;;  %v387_v6 = vmul.f32 %v1234_v56, %v1234_v56 }
  0xd4   :  { %948 = vst [vmem:[%s1343_s7 + $0x20] sm:$0xff] %v921_v59   ;;  %v587_v43 = vadd.f32 %v586_v42, %v528_v57 }
  0xd5   :  { %v1246_v61 = vpop.f32.mrf.mxu3 }
  0xd7   :  { %v243_v63 = vpop.f32.mrf.mxu0 }
  0xd8   :  { %v1250_v1 = vadd.f32 %v292_v40, %v243_v63  ;;  %v391_v63 = vadd.f32 %v390_v54, %v376_v41 }
  0xd9   :  { %v531_v2 = vpop.f32.mrf.mxu2 }
  0xda   :  { %v876_v3 = vpack.c.bf16 %v1250_v1, %v1248_v0  ;;  %v613_v59 = vmul.f32 %v531_v2, %v531_v2  ;;  %v588_v50 = vadd.f32 %v587_v43, %v531_v2  ;;  %v392_v8 = vadd.f32 %v391_v63, %v377_v36 }
  0xdb   :  { %v1257_v4 = vpop.f32.mrf.mxu1  ;;  %v354_v49 = vadd.f32 %v353_v13, %v1250_v1  ;;  %v386_v63 = vmul.f32 %v1232_v53, %v1232_v53 }
  0xdc   :  { %940 = vst [vmem:[%s1344_s4 + $0x18] sm:$0xff] %v876_v3  }
  0xdd   :  { %v1263_v7 = vpop.f32.mrf.mxu3 }
  0xde   :  { %v936_v10 = vpack.c.bf16 %v1263_v7, %v1246_v61 }
  0xdf   :  { %v246_v9 = vpop.f32.mrf.mxu0 }
  0xe0   :  { %951 = vst [vmem:[%s1343_s7 + $0x38] sm:$0xff] %v936_v10   ;;  %v296_v44 = vadd.f32 %v1221_v45, %v246_v9  ;;  %v378_v45 = vmul.f32 %v1248_v0, %v1248_v0  ;;  %v379_v9 = vmul.f32 %v1250_v1, %v1250_v1  ;;  %v618_v1 = vmul.f32 %v1263_v7, %v1263_v7 }
  0xe1   :  { %v533_v17 = vpop.f32.mrf.mxu2 }
  0xe2   :  { %v926_v18 = vpack.c.bf16 %v533_v17, %v531_v2  ;;  %v614_v3 = vmul.f32 %v533_v17, %v533_v17  ;;  %v589_v48 = vadd.f32 %v588_v50, %v533_v17  ;;  %v393_v14 = vadd.f32 %v392_v8, %v378_v45 }
  0xe3   :  { %v305_v26 = vpop.f32.mrf.mxu1  ;;  %v617_v17 = vmul.f32 %v1246_v61, %v1246_v61  ;;  %v355_v27 = vadd.f32 %v354_v49, %v296_v44 }
  0xe4   :  { %949 = vst [vmem:[%s1343_s7 + $0x28] sm:$0xff] %v926_v18   ;;  %v306_v5 = vadd.f32 %v305_v26, %v1193_v22  ;;  %v380_v18 = vmul.f32 %v296_v44, %v296_v44  ;;  %v394_v23 = vadd.f32 %v393_v14, %v379_v9 }
  0xe6   :  { %v384_v54 = vmul.f32 %v306_v5, %v306_v5 }
  0xe7   :  { %v248_v40 = vpop.f32.mrf.mxu0 }
  0xe8   :  { %v298_v24 = vadd.f32 %v297_v52, %v248_v40  ;;  %v627_v52 = vadd.f32 %v626_v58, %v612_v47 }
  0xe9   :  { %v536_v51 = vpop.f32.mrf.mxu2 }
  0xea   :  { %v881_v55 = vpack.c.bf16 %v298_v24, %v296_v44  ;;  %v628_v10 = vadd.f32 %v627_v52, %v613_v59  ;;  %v615_v2 = vmul.f32 %v536_v51, %v536_v51  ;;  %v590_v15 = vadd.f32 %v589_v48, %v536_v51  ;;  %v578_v52 = vld [vmem:[#allocation4] sm:$0x1] }
  0xeb   :  { %v307_v37 = vpop.f32.mrf.mxu1  ;;  %v381_v0 = vmul.f32 %v298_v24, %v298_v24  ;;  %v356_v32 = vadd.f32 %v355_v27, %v298_v24 }
  0xec   :  { %941 = vst [vmem:[%s1344_s4 + $0x20] sm:$0xff] %v881_v55   ;;  %v308_v57 = vadd.f32 %v307_v37, %v1204_v29  ;;  %v629_v19 = vadd.f32 %v628_v10, %v614_v3  ;;  %v602_v10 = vld [vmem:[#allocation5] sm:$0x1] }
  0xee   :  { %v891_v11 = vpack.c.bf16 %v308_v57, %v306_v5  ;;  %v630_v16 = vadd.f32 %v629_v19, %v615_v2  ;;  %v385_v55 = vmul.f32 %v308_v57, %v308_v57 }
  0xef   :  { %v251_v12 = vpop.f32.mrf.mxu0 }
  0xf0   :  { %943 = vst [vmem:[%s1344_s4 + $0x30] sm:$0xff] %v891_v11   ;;  %v301_v22 = vadd.f32 %v1244_v60, %v251_v12  ;;  %v395_v60 = vadd.f32 %v394_v23, %v380_v18  ;;  %v371_v23 = vld [vmem:[#allocation3] sm:$0x1] }
  0xf1   :  { %v538_v29 = vpop.f32.mrf.mxu2 }
  0xf2   :  { %v931_v20 = vpack.c.bf16 %v538_v29, %v536_v51  ;;  %v591_v21 = vadd.f32 %v590_v15, %v538_v29  ;;  %v616_v26 = vmul.f32 %v538_v29, %v538_v29  ;;  %v382_v30 = vmul.f32 %v301_v22, %v301_v22 }
  0xf3   :  { %v396_v34 = vadd.f32 %v395_v60, %v381_v0  ;;  %v357_v38 = vadd.f32 %v356_v32, %v301_v22 }
  0xf4   :  { %950 = vst [vmem:[%s1343_s7 + $0x30] sm:$0xff] %v931_v20   ;;  %v592_v28 = vadd.f32 %v591_v21, %v1246_v61  ;;  %v631_v31 = vadd.f32 %v630_v16, %v616_v26 }
  0xf5   :  { %v397_v42 = vadd.f32 %v396_v34, %v382_v30 }
  0xf6   :  { %v593_v33 = vadd.f32 %v592_v28, %v1263_v7  ;;  %v632_v35 = vadd.f32 %v631_v31, %v617_v17 }
  0xf7   :  { %v253_v39 = vpop.f32.mrf.mxu0 }
  0xf8   :  { %v594_v40 = vrot.slane %v593_v33, 4  ;;  %v303_v41 = vadd.f32 %v1257_v4, %v253_v39  ;;  %v633_v44 = vadd.f32 %v632_v35, %v618_v1 }
  0xfa   :  { %v595_v25 = vadd.f32 %v594_v40, %v593_v33  ;;  %v886_v61 = vpack.c.bf16 %v303_v41, %v301_v22  ;;  %v358_v46 = vadd.f32 %v357_v38, %v303_v41  ;;  %v383_v47 = vmul.f32 %v303_v41, %v303_v41 }
  0xfb   :  { %v634_v51 = vrot.slane %v633_v44, 4 }
  0xfc   :  { %v596_v36 = vrot.slane %v595_v25, 2  ;;  %942 = vst [vmem:[%s1344_s4 + $0x28] sm:$0xff] %v886_v61   ;;  %v359_v7 = vadd.f32 %v358_v46, %v306_v5  ;;  %v398_v24 = vadd.f32 %v397_v42, %v383_v47 }
  0xfd   :  { %v635_v43 = vadd.f32 %v634_v51, %v633_v44 }
  0xfe   :  { %v597_v58 = vadd.f32 %v596_v36, %v595_v25  ;;  %v360_v59 = vadd.f32 %v359_v7, %v308_v57  ;;  %v399_v4 = vadd.f32 %v398_v24, %v384_v54 }
  0xff   :  { %v636_v62 = vrot.slane %v635_v43, 2 }
 0x100   :  { %v598_v45 = vrot.slane %v597_v58, 1  ;;  %v361_v50 = vadd.f32 %v360_v59, %v1232_v53  ;;  %v400_v37 = vadd.f32 %v399_v4, %v385_v55 }
 0x101   :  { %v637_v3 = vadd.f32 %v636_v62, %v635_v43 }
 0x102   :  { %v599_v5 = vadd.f32 %v598_v45, %v597_v58  ;;  %v362_v8 = vadd.f32 %v361_v50, %v1234_v56  ;;  %v401_v48 = vadd.f32 %v400_v37, %v386_v63  ;;  %v347_v56 = vld [vmem:[#allocation2] sm:$0x1] }
 0x103   :  { %v638_v9 = vrot.slane %v637_v3, 1 }
 0x104   :  { %v600_v57 = vadd.f32 %v599_v5, %v578_v52  ;;  %v363_v2 = vrot.slane %v362_v8, 4  ;;  %v402_v11 = vadd.f32 %v401_v48, %v387_v6 }
 0x105   :  { %v639_v12 = vadd.f32 %v638_v9, %v637_v3 }
 0x106   :  { %601 = vst [vmem:[#allocation4] sm:$0x1] %v600_v57  ;;  %v364_v13 = vadd.f32 %v363_v2, %v362_v8  ;;  %v403_v15 = vrot.slane %v402_v11, 4 }
 0x107   :  { %v640_v53 = vadd.f32 %v639_v12, %v602_v10 }
 0x108   :  { %v365_v14 = vrot.slane %v364_v13, 2  ;;  %v404_v18 = vadd.f32 %v403_v15, %v402_v11 }
 0x109   :  { %641 = vst [vmem:[#allocation5] sm:$0x1] %v640_v53 }
 0x10a   :  { %v366_v19 = vadd.f32 %v365_v14, %v364_v13  ;;  %v405_v22 = vrot.slane %v404_v18, 2 }
 0x10c   :  { %v367_v29 = vrot.slane %v366_v19, 1  ;;  %v406_v49 = vadd.f32 %v405_v22, %v404_v18 }
 0x10d   :  { %v649_v17 = vld [vmem:[#allocation4] sm:$0x1] }
 0x10e   :  { %650 = vst [vmem:[%s1345_s8] sm:$0x1] %v649_v17  ;;  %v368_v20 = vadd.f32 %v367_v29, %v366_v19  ;;  %v407_v21 = vrot.slane %v406_v49, 1 }
 0x110   :  { %v651_v0 = vld [vmem:[#allocation5] sm:$0x1]  ;;  %v369_v16 = vadd.f32 %v368_v20, %v347_v56  ;;  %v408_v26 = vadd.f32 %v407_v21, %v406_v49 }
 0x111   :  { %652 = vst [vmem:[%s1346_s9] sm:$0x1] %v651_v0 }
 0x112   :  { %370 = vst [vmem:[#allocation2] sm:$0x1] %v369_v16  ;;  %v409_v27 = vadd.f32 %v408_v26, %v371_v23 }
 0x114   :  { %410 = vst [vmem:[#allocation3] sm:$0x1] %v409_v27 }
 0x119   :  { %v645_v28 = vld [vmem:[#allocation2] sm:$0x1] }
 0x11a   :  { %646 = vst [vmem:[%s1347_s5] sm:$0x1] %v645_v28 }
 0x11b   :  { %v647_v60 = vld [vmem:[#allocation3] sm:$0x1] }
 0x11c   :  { %648 = vst [vmem:[%s1348_s6] sm:$0x1] %v647_v60 }

// kernel: resnet_forward.52
= control target key start
LH: loop header
LB: loop body
LE: loop exit
PB: predicated region body
PF: predicated region fallthrough
CT: control target
= control target key end

     0   :  { %s559_s1 = inlined_call_operand.vmem [shape: f32[1,128], index: 1, kind: input, shape index: {}]   ;;  %s560_s2 = inlined_call_operand.vmem [shape: f32[1,128], index: 2, kind: input, shape index: {}]   ;;  %s561_s0 = inlined_call_operand.vmem [shape: bf16[128,128], index: 0, kind: input, shape index: {}]   ;;  %s562_s5 = inlined_call_operand.vmem [shape: bf16[128,128], index: 5, kind: input, shape index: {}]   ;;  %s563_s3 = inlined_call_operand.vmem [shape: f32[1,128], index: 3, kind: input, shape index: {}]   ;;  %s564_s4 = inlined_call_operand.vmem [shape: f32[1,128], index: 4, kind: input, shape index: {}]   ;;  %s565_s6 = inlined_call_operand.vmem [shape: bf16[128,128], index: 6, kind: output, shape index: {}]  }
   0x1   :  { %v23_v0 = vld [vmem:[%s559_s1] sm:$0x1]  ;;  %v396_v12 = vld [vmem:[%s561_s0 + $0x8] sm:$0xff]   ;;  %v401_v13 = vld [vmem:[%s561_s0 + $0x10] sm:$0xff]  }
   0x2   :  { %v25_v1 = vld [vmem:[%s560_s2] sm:$0x1]  ;;  %v384_v2 = vmul.f32 0.0078125, %v23_v0  ;;  %v406_v15 = vld [vmem:[%s561_s0 + $0x18] sm:$0xff]   ;;  %v222_v21 = vunpack.c.l.bf16 %v396_v12  ;;  %v223_v22 = vunpack.c.h.bf16 %v396_v12  ;;  %v425_v23 = vld [vmem:[%s562_s5 + $0x8] sm:$0xff]   ;;  %v226_v24 = vunpack.c.l.bf16 %v401_v13 }
   0x3   :  { %v26_v3 = vmul.f32 0.0078125, %v25_v1  ;;  %v391_v11 = vld [vmem:[%s561_s0] sm:$0xff]   ;;  %v431_v25 = vld [vmem:[%s562_s5 + $0x10] sm:$0xff]   ;;  %v227_v27 = vunpack.c.h.bf16 %v401_v13  ;;  %v230_v28 = vunpack.c.l.bf16 %v406_v15  ;;  %v231_v29 = vunpack.c.h.bf16 %v406_v15  ;;  %v443_v30 = vld [vmem:[%s562_s5 + $0x18] sm:$0xff]  }
   0x4   :  { %v27_v4 = vmul.f32 %v384_v2, %v384_v2  ;;  %v411_v16 = vld [vmem:[%s561_s0 + $0x20] sm:$0xff]   ;;  %v218_v17 = vunpack.c.l.bf16 %v391_v11  ;;  %v219_v18 = vunpack.c.h.bf16 %v391_v11  ;;  %v324_v32 = vld [vmem:[%s561_s0 + $0x28] sm:$0xff]   ;;  %v325_v38 = vld [vmem:[%s561_s0 + $0x30] sm:$0xff]   ;;  %v254_v39 = vunpack.c.l.bf16 %v425_v23 }
   0x5   :  { %v418_v19 = vld [vmem:[%s562_s5] sm:$0xff]   ;;  %v234_v31 = vunpack.c.l.bf16 %v411_v16  ;;  %v235_v37 = vunpack.c.h.bf16 %v411_v16  ;;  %v255_v40 = vunpack.c.h.bf16 %v425_v23  ;;  %v258_v41 = vunpack.c.l.bf16 %v431_v25  ;;  %v470_v44 = vld [vmem:[%s561_s0 + $0x38] sm:$0xff]   ;;  %v479_v49 = vld [vmem:[%s562_s5 + $0x28] sm:$0xff]  }
   0x6   :  { %v28_v5 = vsub.f32 %v26_v3, %v27_v4  ;;  %v41_v34 = vld [vmem:[%s563_s3] sm:$0x1]  ;;  %v250_v35 = vunpack.c.l.bf16 %v418_v19  ;;  %v251_v36 = vunpack.c.h.bf16 %v418_v19  ;;  %v259_v42 = vunpack.c.h.bf16 %v431_v25  ;;  %v484_v54 = vld [vmem:[%s562_s5 + $0x30] sm:$0xff]   ;;  %v489_v55 = vld [vmem:[%s562_s5 + $0x38] sm:$0xff]  }
   0x7   :  { %v465_v43 = vld [vmem:[%s562_s5 + $0x20] sm:$0xff]   ;;  %v262_v46 = vunpack.c.l.bf16 %v443_v30  ;;  %v263_v47 = vunpack.c.h.bf16 %v443_v30  ;;  %v238_v48 = vunpack.c.l.bf16 %v324_v32  ;;  %v239_v51 = vunpack.c.h.bf16 %v324_v32 }
   0x8   :  { %v29_v6 = vmax.f32 %v28_v5, 0.0  ;;  %v242_v52 = vunpack.c.l.bf16 %v325_v38  ;;  %v243_v53 = vunpack.c.h.bf16 %v325_v38  ;;  %v43_v56 = vld [vmem:[%s564_s4] sm:$0x1]  ;;  %v266_v57 = vunpack.c.l.bf16 %v465_v43 }
   0x9   :  { %v267_v58 = vunpack.c.h.bf16 %v465_v43  ;;  %v246_v59 = vunpack.c.l.bf16 %v470_v44  ;;  %v247_v60 = vunpack.c.h.bf16 %v470_v44  ;;  %v270_v63 = vunpack.c.l.bf16 %v479_v49 }
   0xa   :  { %v30_v7 = vadd.f32 1e-05, %v29_v6  ;;  %v271_v0 = vunpack.c.h.bf16 %v479_v49  ;;  %v274_v1 = vunpack.c.l.bf16 %v484_v54  ;;  %v275_v3 = vunpack.c.h.bf16 %v484_v54 }
   0xb   :  { %v278_v4 = vunpack.c.l.bf16 %v489_v55  ;;  %v279_v5 = vunpack.c.h.bf16 %v489_v55 }
   0xc   :  { %341 = vrsqrt.f32 %v30_v7  ;;  %vm37_vm0 = vweird.f32 %v30_v7 }
  0x12   :  { %v342_v8 = vpop.eup %341 }
  0x13   :  { %v32_v9 = vmul.f32 %v342_v8, %v30_v7  ;;  %vm38_vm1 = vweird.f32 %v342_v8 }
  0x14   :  { %vm433_vm2 = vmor %vm37_vm0, %vm38_vm1 }
  0x15   :  { %v33_v10 = vmul.f32 %v342_v8, %v32_v9 }
  0x17   :  { %v34_v14 = vmul.f32 0.5, %v33_v10 }
  0x19   :  { %v35_v20 = vsub.f32 1.5, %v34_v14 }
  0x1b   :  { %v36_v33 = vmul.f32 %v342_v8, %v35_v20 }
  0x1d   :  { %v40_v45 = vsel %vm433_vm2, %v342_v8, %v36_v33 }
  0x1e   :  { %v42_v50 = vmul.f32 %v41_v34, %v40_v45 }
  0x20   :  { %v44_v61 = vmul.f32 %v42_v50, %v384_v2  ;;  %v499_v62 = vperm.slane %v42_v50, 0 }
  0x22   :  { %v45_v6 = vsub.f32 %v43_v56, %v44_v61  ;;  %v81_v7 = vmul.f32 %v218_v17, %v499_v62  ;;  %v82_v8 = vmul.f32 %v219_v18, %v499_v62  ;;  %v83_v2 = vmul.f32 %v222_v21, %v499_v62 }
  0x23   :  { %v84_v9 = vmul.f32 %v223_v22, %v499_v62  ;;  %v85_v10 = vmul.f32 %v226_v24, %v499_v62  ;;  %v86_v11 = vmul.f32 %v227_v27, %v499_v62  ;;  %v87_v12 = vmul.f32 %v230_v28, %v499_v62 }
  0x24   :  { %v98_v13 = vperm.slane %v45_v6, 0  ;;  %v88_v14 = vmul.f32 %v231_v29, %v499_v62  ;;  %v89_v15 = vmul.f32 %v234_v31, %v499_v62  ;;  %v90_v16 = vmul.f32 %v235_v37, %v499_v62 }
  0x25   :  { %v91_v17 = vmul.f32 %v238_v48, %v499_v62  ;;  %v92_v18 = vmul.f32 %v239_v51, %v499_v62  ;;  %v93_v19 = vmul.f32 %v242_v52, %v499_v62  ;;  %v94_v20 = vmul.f32 %v243_v53, %v499_v62 }
  0x26   :  { %v100_v21 = vadd.f32 %v98_v13, %v81_v7  ;;  %v101_v22 = vadd.f32 %v98_v13, %v82_v8  ;;  %v102_v23 = vadd.f32 %v98_v13, %v83_v2  ;;  %v103_v24 = vadd.f32 %v98_v13, %v84_v9 }
  0x27   :  { %v104_v25 = vadd.f32 %v98_v13, %v85_v10  ;;  %v105_v26 = vadd.f32 %v98_v13, %v86_v11  ;;  %v106_v27 = vadd.f32 %v98_v13, %v87_v12  ;;  %v107_v28 = vadd.f32 %v98_v13, %v88_v14 }
  0x28   :  { %v148_v29 = vadd.f32 %v250_v35, %v100_v21  ;;  %v149_v30 = vadd.f32 %v251_v36, %v101_v22  ;;  %v150_v31 = vadd.f32 %v254_v39, %v102_v23  ;;  %v151_v32 = vadd.f32 %v255_v40, %v103_v24 }
  0x29   :  { %v152_v33 = vadd.f32 %v258_v41, %v104_v25  ;;  %v153_v34 = vadd.f32 %v259_v42, %v105_v26  ;;  %v154_v37 = vadd.f32 %v262_v46, %v106_v27  ;;  %v155_v38 = vadd.f32 %v263_v47, %v107_v28 }
  0x2a   :  { %v164_v43 = vmax.f32 %v148_v29, 0.0  ;;  %v165_v45 = vmax.f32 %v149_v30, 0.0  ;;  %v166_v48 = vmax.f32 %v150_v31, 0.0  ;;  %v167_v49 = vmax.f32 %v151_v32, 0.0 }
  0x2b   :  { %v168_v50 = vmax.f32 %v152_v33, 0.0  ;;  %v169_v51 = vmax.f32 %v153_v34, 0.0  ;;  %v170_v52 = vmax.f32 %v154_v37, 0.0  ;;  %v171_v53 = vmax.f32 %v155_v38, 0.0 }
  0x2c   :  { %v283_v56 = vpack.c.bf16 %v165_v45, %v164_v43  ;;  %v288_v61 = vpack.c.bf16 %v167_v49, %v166_v48  ;;  %v108_v6 = vadd.f32 %v98_v13, %v89_v15  ;;  %v109_v7 = vadd.f32 %v98_v13, %v90_v16 }
  0x2d   :  { %v293_v35 = vpack.c.bf16 %v169_v51, %v168_v50  ;;  %v298_v36 = vpack.c.bf16 %v171_v53, %v170_v52  ;;  %v110_v39 = vadd.f32 %v98_v13, %v91_v17  ;;  %v111_v40 = vadd.f32 %v98_v13, %v92_v18 }
  0x2e   :  { %284 = vst [vmem:[%s565_s6] sm:$0xff] %v283_v56   ;;  %v156_v41 = vadd.f32 %v266_v57, %v108_v6  ;;  %v157_v42 = vadd.f32 %v267_v58, %v109_v7  ;;  %v112_v46 = vadd.f32 %v98_v13, %v93_v19  ;;  %v113_v47 = vadd.f32 %v98_v13, %v94_v20 }
  0x2f   :  { %334 = vst [vmem:[%s565_s6 + $0x8] sm:$0xff] %v288_v61   ;;  %v158_v8 = vadd.f32 %v270_v63, %v110_v39  ;;  %v159_v2 = vadd.f32 %v271_v0, %v111_v40  ;;  %v95_v9 = vmul.f32 %v246_v59, %v499_v62  ;;  %v96_v10 = vmul.f32 %v247_v60, %v499_v62 }
  0x30   :  { %335 = vst [vmem:[%s565_s6 + $0x10] sm:$0xff] %v293_v35   ;;  %v172_v57 = vmax.f32 %v156_v41, 0.0  ;;  %v173_v58 = vmax.f32 %v157_v42, 0.0  ;;  %v160_v11 = vadd.f32 %v274_v1, %v112_v46  ;;  %v161_v63 = vadd.f32 %v275_v3, %v113_v47 }
  0x31   :  { %336 = vst [vmem:[%s565_s6 + $0x18] sm:$0xff] %v298_v36   ;;  %v174_v59 = vmax.f32 %v158_v8, 0.0  ;;  %v175_v0 = vmax.f32 %v159_v2, 0.0  ;;  %v114_v44 = vadd.f32 %v98_v13, %v95_v9  ;;  %v115_v60 = vadd.f32 %v98_v13, %v96_v10 }
  0x32   :  { %v303_v62 = vpack.c.bf16 %v173_v58, %v172_v57  ;;  %v176_v12 = vmax.f32 %v160_v11, 0.0  ;;  %v177_v14 = vmax.f32 %v161_v63, 0.0 }
  0x33   :  { %v308_v15 = vpack.c.bf16 %v175_v0, %v174_v59  ;;  %v162_v16 = vadd.f32 %v278_v4, %v114_v44  ;;  %v163_v1 = vadd.f32 %v279_v5, %v115_v60 }
  0x34   :  { %337 = vst [vmem:[%s565_s6 + $0x20] sm:$0xff] %v303_v62   ;;  %v313_v54 = vpack.c.bf16 %v177_v14, %v176_v12 }
  0x35   :  { %338 = vst [vmem:[%s565_s6 + $0x28] sm:$0xff] %v308_v15   ;;  %v178_v3 = vmax.f32 %v162_v16, 0.0  ;;  %v179_v13 = vmax.f32 %v163_v1, 0.0 }
  0x36   :  { %339 = vst [vmem:[%s565_s6 + $0x30] sm:$0xff] %v313_v54  }
  0x37   :  { %v318_v17 = vpack.c.bf16 %v179_v13, %v178_v3 }
  0x39   :  { %340 = vst [vmem:[%s565_s6 + $0x38] sm:$0xff] %v318_v17  }

// kernel: resnet_forward.54
= control target key start
LH: loop header
LB: loop body
LE: loop exit
PB: predicated region body
PF: predicated region fallthrough
CT: control target
= control target key end

     0   :  { %s157_s1 = inlined_call_operand.vmem [shape: f32[1,128], index: 1, kind: input, shape index: {}]   ;;  %s158_s2 = inlined_call_operand.vmem [shape: f32[1,128], index: 2, kind: input, shape index: {}]   ;;  %s159_s0 = inlined_call_operand.vmem [shape: bf16[32,128], index: 0, kind: input, shape index: {}]   ;;  %s160_s3 = inlined_call_operand.vmem [shape: f32[1,128], index: 3, kind: input, shape index: {}]   ;;  %s161_s4 = inlined_call_operand.vmem [shape: f32[1,128], index: 4, kind: input, shape index: {}]   ;;  %s162_s5 = inlined_call_operand.vmem [shape: bf16[32,128], index: 5, kind: output, shape index: {}]  }
   0x1   :  { %v20_v0 = vld [vmem:[%s157_s1] sm:$0x1]  ;;  %v99_v16 = vld [vmem:[%s159_s0 + $0x8] sm:$0xff]  }
   0x2   :  { %v22_v1 = vld [vmem:[%s158_s2] sm:$0x1]  ;;  %v21_v2 = vmul.f32 0.03125, %v20_v0  ;;  %v87_v21 = vunpack.c.l.bf16 %v99_v16  ;;  %v88_v23 = vunpack.c.h.bf16 %v99_v16 }
   0x3   :  { %v23_v3 = vmul.f32 0.03125, %v22_v1  ;;  %v38_v14 = vld [vmem:[%s160_s3] sm:$0x1] }
   0x4   :  { %v24_v4 = vmul.f32 %v21_v2, %v21_v2  ;;  %v82_v15 = vld [vmem:[%s159_s0] sm:$0xff]  }
   0x5   :  { %v83_v19 = vunpack.c.l.bf16 %v82_v15  ;;  %v84_v20 = vunpack.c.h.bf16 %v82_v15  ;;  %v40_v22 = vld [vmem:[%s161_s4] sm:$0x1] }
   0x6   :  { %v25_v5 = vsub.f32 %v23_v3, %v24_v4 }
   0x8   :  { %v26_v6 = vmax.f32 %v25_v5, 0.0 }
   0xa   :  { %v27_v7 = vadd.f32 1e-05, %v26_v6 }
   0xc   :  { %101 = vrsqrt.f32 %v27_v7  ;;  %vm34_vm0 = vweird.f32 %v27_v7 }
  0x12   :  { %v102_v8 = vpop.eup %101 }
  0x13   :  { %v29_v9 = vmul.f32 %v102_v8, %v27_v7  ;;  %vm35_vm1 = vweird.f32 %v102_v8 }
  0x14   :  { %vm36_vm2 = vmor %vm34_vm0, %vm35_vm1 }
  0x15   :  { %v30_v10 = vmul.f32 %v102_v8, %v29_v9 }
  0x17   :  { %v31_v11 = vmul.f32 0.5, %v30_v10 }
  0x19   :  { %v32_v12 = vsub.f32 1.5, %v31_v11 }
  0x1b   :  { %v33_v13 = vmul.f32 %v102_v8, %v32_v12 }
  0x1d   :  { %v37_v17 = vsel %vm36_vm2, %v102_v8, %v33_v13 }
  0x1e   :  { %v39_v18 = vmul.f32 %v38_v14, %v37_v17 }
  0x20   :  { %v41_v24 = vmul.f32 %v39_v18, %v21_v2  ;;  %v52_v25 = vperm.slane %v39_v18, 0 }
  0x22   :  { %v42_v26 = vsub.f32 %v40_v22, %v41_v24  ;;  %v54_v27 = vmul.f32 %v83_v19, %v52_v25  ;;  %v55_v28 = vmul.f32 %v84_v20, %v52_v25  ;;  %v56_v29 = vmul.f32 %v87_v21, %v52_v25 }
  0x23   :  { %v57_v30 = vmul.f32 %v88_v23, %v52_v25 }
  0x24   :  { %v59_v31 = vperm.slane %v42_v26, 0 }
  0x26   :  { %v61_v32 = vadd.f32 %v59_v31, %v54_v27  ;;  %v62_v33 = vadd.f32 %v59_v31, %v55_v28  ;;  %v63_v34 = vadd.f32 %v59_v31, %v56_v29  ;;  %v64_v35 = vadd.f32 %v59_v31, %v57_v30 }
  0x28   :  { %v65_v36 = vmax.f32 %v61_v32, 0.0  ;;  %v66_v37 = vmax.f32 %v62_v33, 0.0  ;;  %v67_v38 = vmax.f32 %v63_v34, 0.0  ;;  %v68_v39 = vmax.f32 %v64_v35, 0.0 }
  0x2a   :  { %v92_v40 = vpack.c.bf16 %v66_v37, %v65_v36  ;;  %v97_v41 = vpack.c.bf16 %v68_v39, %v67_v38 }
  0x2c   :  { %93 = vst [vmem:[%s162_s5] sm:$0xff] %v92_v40  }
  0x2d   :  { %100 = vst [vmem:[%s162_s5 + $0x8] sm:$0xff] %v97_v41  }

// kernel: resnet_forward.53
= control target key start
LH: loop header
LB: loop body
LE: loop exit
PB: predicated region body
PF: predicated region fallthrough
CT: control target
= control target key end

     0   :  { %vm115_vm0 = vcmask 130048   ;;  %v302_v21 = vmov 0.0   ;;  %s393_s1 = inlined_call_operand.vmem [shape: bf16[144,128], index: 1, kind: input, shape index: {}]   ;;  %s394_s0 = inlined_call_operand.vmem [shape: bf16[32,144], index: 0, kind: input, shape index: {}]   ;;  %s395_s2 = inlined_call_operand.vmem [shape: bf16[32,128], index: 2, kind: output, shape index: {0}]   ;;  %s396_s3 = inlined_call_operand.vmem [shape: f32[1,128], index: 3, kind: output, shape index: {1}]   ;;  %s397_s4 = inlined_call_operand.vmem [shape: f32[1,128], index: 4, kind: output, shape index: {2}]  }
   0x1   :  { %v280_v0 = vld [vmem:[%s393_s1 + $0x38] sm:$0xff]  ;;  %v281_v1 = vld [vmem:[%s393_s1 + $0x40] sm:$0xff]  ;;  %v279_v3 = vld [vmem:[%s393_s1 + $0x30] sm:$0xff]  ;;  %19 = vst [vmem:[#allocation2] sm:$0x1] %v302_v21 }
   0x2   :  { %v269_v2 = vld [vmem:[%s394_s0 + $0x4] sm:$0xf]  ;;  %122 = vmatpush.bf16.msra.mxu0 %v280_v0  ;;  %293 = vmatpush.bf16.msra.mxu2 %v280_v0  ;;  %v219_v4 = vld [vmem:[%s394_s0 + $0x8] sm:$0xf0]  ;;  %v276_v8 = vld [vmem:[%s393_s1 + $0x18] sm:$0xff] }
   0x3   :  { %148 = vmatpush.bf16.msra.mxu1 %v281_v1  ;;  %v222_v5 = vor.u32 %v269_v2, %v219_v4  ;;  %v278_v6 = vld [vmem:[%s393_s1 + $0x28] sm:$0xff]  ;;  %v277_v7 = vld [vmem:[%s393_s1 + $0x20] sm:$0xff]  ;;  %v271_v9 = vld [vmem:[%s394_s0 + $0x14] sm:$0xf]  ;;  %20 = vst [vmem:[#allocation3] sm:$0x1] %v302_v21 }
   0x4   :  { %v227_v10 = vld [vmem:[%s394_s0 + $0x18] sm:$0xf0]  ;;  %v275_v11 = vld [vmem:[%s393_s1 + $0x10] sm:$0xff]  ;;  %v274_v13 = vld [vmem:[%s393_s1 + $0x8] sm:$0xff] }
   0x5   :  { %v230_v12 = vor.u32 %v271_v9, %v227_v10  ;;  %v273_v14 = vld [vmem:[%s393_s1] sm:$0xff]  ;;  %v270_v16 = vld [vmem:[%s394_s0 + $0x4] sm:$0xf0]  ;;  %v225_v17 = vld [vmem:[%s394_s0 + $0x10] sm:$0xf] }
   0x6   :  { %123 = vmatpush.bf16.msra.mxu0 %v279_v3  ;;  %294 = vmatpush.bf16.msra.mxu2 %v279_v3  ;;  %v217_v15 = vld [vmem:[%s394_s0] sm:$0xf]  ;;  %v272_v18 = vld [vmem:[%s394_s0 + $0x14] sm:$0xf0] }
   0x7   :  { %267 = vmatmul.msk.bf16.vlgmr.msra.gmra.mxu1 %vm115_vm0, %v222_v5  ;;  %v218_v19 = vor.u32 %v270_v16, %v217_v15  ;;  %v226_v20 = vor.u32 %v272_v18, %v225_v17 }
   0x8   :  { %v168_v55 = vld [vmem:[#allocation2] sm:$0x1] }
   0xa   :  { %124 = vmatpush.bf16.msra.mxu0 %v278_v6  ;;  %295 = vmatpush.bf16.msra.mxu2 %v278_v6  ;;  %v180_v58 = vld [vmem:[#allocation3] sm:$0x1] }
   0xe   :  { %125 = vmatpush.bf16.msra.mxu0 %v277_v7  ;;  %296 = vmatpush.bf16.msra.mxu2 %v277_v7 }
  0x12   :  { %126 = vmatpush.bf16.msra.mxu0 %v276_v8  ;;  %297 = vmatpush.bf16.msra.mxu2 %v276_v8 }
  0x16   :  { %127 = vmatpush.bf16.msra.mxu0 %v275_v11  ;;  %298 = vmatpush.bf16.msra.mxu2 %v275_v11 }
  0x17   :  { %268 = vmatmul.msk.bf16.gmra.mxu1 %vm115_vm0, %v230_v12 }
  0x1a   :  { %128 = vmatpush.bf16.msra.mxu0 %v274_v13  ;;  %299 = vmatpush.bf16.msra.mxu2 %v274_v13 }
  0x1e   :  { %129 = vmatpush.bf16.msra.mxu0 %v273_v14  ;;  %300 = vmatpush.bf16.msra.mxu2 %v273_v14 }
  0x21   :  { %130 = vmatmul.bf16.vlgmr.msra.gmra.mxu0 %v218_v19  ;;  %135 = vmatmul.bf16.vlgmr.msra.gmra.mxu2 %v226_v20 }
  0x84   :  { %v150_v22 = vpop.f32.mrf.mxu1 }
  0x8c   :  { %v152_v23 = vpop.f32.mrf.mxu1 }
  0x94   :  { %v155_v25 = vpop.f32.mrf.mxu1 }
  0x9c   :  { %v157_v36 = vpop.f32.mrf.mxu1 }
  0x9e   :  { %v131_v24 = vpop.f32.mrf.mxu0 }
  0x9f   :  { %v151_v26 = vadd.f32 %v150_v22, %v131_v24 }
  0xa1   :  { %v181_v30 = vmul.f32 %v151_v26, %v151_v26 }
  0xa4   :  { %v136_v27 = vpop.f32.mrf.mxu2 }
  0xa5   :  { %v156_v31 = vadd.f32 %v155_v25, %v136_v27 }
  0xa6   :  { %v133_v28 = vpop.f32.mrf.mxu0 }
  0xa7   :  { %v153_v29 = vadd.f32 %v152_v23, %v133_v28  ;;  %v183_v38 = vmul.f32 %v156_v31, %v156_v31 }
  0xa9   :  { %v285_v32 = vpack.c.bf16 %v153_v29, %v151_v26  ;;  %v169_v33 = vadd.f32 %v153_v29, %v151_v26  ;;  %v182_v34 = vmul.f32 %v153_v29, %v153_v29 }
  0xab   :  { %286 = vst [vmem:[%s395_s2] sm:$0xff] %v285_v32   ;;  %v185_v35 = vadd.f32 %v182_v34, %v181_v30  ;;  %v170_v40 = vadd.f32 %v169_v33, %v156_v31 }
  0xac   :  { %v138_v37 = vpop.f32.mrf.mxu2 }
  0xad   :  { %v158_v39 = vadd.f32 %v157_v36, %v138_v37  ;;  %v186_v44 = vadd.f32 %v185_v35, %v183_v38 }
  0xaf   :  { %v290_v41 = vpack.c.bf16 %v158_v39, %v156_v31  ;;  %v171_v42 = vadd.f32 %v170_v40, %v158_v39  ;;  %v184_v43 = vmul.f32 %v158_v39, %v158_v39 }
  0xb1   :  { %292 = vst [vmem:[%s395_s2 + $0x8] sm:$0xff] %v290_v41   ;;  %v172_v45 = vrot.slane %v171_v42, 4  ;;  %v187_v46 = vadd.f32 %v186_v44, %v184_v43 }
  0xb3   :  { %v173_v47 = vadd.f32 %v172_v45, %v171_v42  ;;  %v188_v48 = vrot.slane %v187_v46, 4 }
  0xb5   :  { %v174_v49 = vrot.slane %v173_v47, 2  ;;  %v189_v50 = vadd.f32 %v188_v48, %v187_v46 }
  0xb7   :  { %v175_v51 = vadd.f32 %v174_v49, %v173_v47  ;;  %v190_v52 = vrot.slane %v189_v50, 2 }
  0xb9   :  { %v176_v53 = vrot.slane %v175_v51, 1  ;;  %v191_v54 = vadd.f32 %v190_v52, %v189_v50 }
  0xbb   :  { %v177_v56 = vadd.f32 %v176_v53, %v175_v51  ;;  %v192_v57 = vrot.slane %v191_v54, 1 }
  0xbd   :  { %v178_v59 = vadd.f32 %v177_v56, %v168_v55  ;;  %v193_v60 = vadd.f32 %v192_v57, %v191_v54 }
  0xbf   :  { %179 = vst [vmem:[#allocation2] sm:$0x1] %v178_v59  ;;  %v194_v61 = vadd.f32 %v193_v60, %v180_v58 }
  0xc1   :  { %195 = vst [vmem:[#allocation3] sm:$0x1] %v194_v61 }
  0xc6   :  { %v199_v62 = vld [vmem:[#allocation2] sm:$0x1] }
  0xc7   :  { %200 = vst [vmem:[%s396_s3] sm:$0x1] %v199_v62 }
  0xc8   :  { %v201_v63 = vld [vmem:[#allocation3] sm:$0x1] }
  0xc9   :  { %202 = vst [vmem:[%s397_s4] sm:$0x1] %v201_v63 }

// kernel: resnet_forward.56
= control target key start
LH: loop header
LB: loop body
LE: loop exit
PB: predicated region body
PF: predicated region fallthrough
CT: control target
= control target key end

     0   :  { %s281_s1 = inlined_call_operand.vmem [shape: f32[1,128], index: 1, kind: input, shape index: {}]   ;;  %s282_s2 = inlined_call_operand.vmem [shape: f32[1,128], index: 2, kind: input, shape index: {}]   ;;  %s283_s6 = inlined_call_operand.vmem [shape: f32[1,128], index: 6, kind: input, shape index: {}]   ;;  %s284_s7 = inlined_call_operand.vmem [shape: f32[1,128], index: 7, kind: input, shape index: {}]   ;;  %s285_s0 = inlined_call_operand.vmem [shape: bf16[32,128], index: 0, kind: input, shape index: {}]   ;;  %s286_s3 = inlined_call_operand.vmem [shape: f32[1,128], index: 3, kind: input, shape index: {}]   ;;  %s287_s8 = inlined_call_operand.vmem [shape: f32[1,128], index: 8, kind: input, shape index: {}]   ;;  %s288_s5 = inlined_call_operand.vmem [shape: bf16[32,128], index: 5, kind: input, shape index: {}]   ;;  %s289_s4 = inlined_call_operand.vmem [shape: f32[1,128], index: 4, kind: input, shape index: {}]   ;;  %s290_s9 = inlined_call_operand.vmem [shape: f32[1,128], index: 9, kind: input, shape index: {}]   ;;  %s291_s10 = inlined_call_operand.vmem [shape: bf16[32,128], index: 10, kind: output, shape index: {}]  }
   0x1   :  { %v35_v0 = vld [vmem:[%s281_s1] sm:$0x1]  ;;  %v171_v30 = vld [vmem:[%s285_s0 + $0x8] sm:$0xff]  }
   0x2   :  { %v37_v1 = vld [vmem:[%s282_s2] sm:$0x1]  ;;  %v36_v2 = vmul.f32 0.03125, %v35_v0  ;;  %v172_v38 = vld [vmem:[%s288_s5 + $0x8] sm:$0xff]   ;;  %v151_v41 = vunpack.c.l.bf16 %v171_v30  ;;  %v152_v42 = vunpack.c.h.bf16 %v171_v30 }
   0x3   :  { %v38_v3 = vmul.f32 0.03125, %v37_v1  ;;  %v80_v4 = vld [vmem:[%s283_s6] sm:$0x1]  ;;  %v159_v49 = vunpack.c.l.bf16 %v172_v38  ;;  %v160_v50 = vunpack.c.h.bf16 %v172_v38 }
   0x4   :  { %v82_v5 = vld [vmem:[%s284_s7] sm:$0x1]  ;;  %v39_v6 = vmul.f32 %v36_v2, %v36_v2  ;;  %v81_v7 = vmul.f32 0.03125, %v80_v4 }
   0x5   :  { %v83_v8 = vmul.f32 0.03125, %v82_v5  ;;  %v53_v26 = vld [vmem:[%s286_s3] sm:$0x1] }
   0x6   :  { %v40_v9 = vsub.f32 %v38_v3, %v39_v6  ;;  %v84_v10 = vmul.f32 %v81_v7, %v81_v7  ;;  %v146_v27 = vld [vmem:[%s285_s0] sm:$0xff]  }
   0x7   :  { %v98_v33 = vld [vmem:[%s287_s8] sm:$0x1]  ;;  %v147_v35 = vunpack.c.l.bf16 %v146_v27  ;;  %v148_v36 = vunpack.c.h.bf16 %v146_v27 }
   0x8   :  { %v41_v11 = vmax.f32 %v40_v9, 0.0  ;;  %v85_v12 = vsub.f32 %v83_v8, %v84_v10  ;;  %v154_v37 = vld [vmem:[%s288_s5] sm:$0xff]  }
   0x9   :  { %v55_v39 = vld [vmem:[%s289_s4] sm:$0x1]  ;;  %v155_v47 = vunpack.c.l.bf16 %v154_v37  ;;  %v156_v48 = vunpack.c.h.bf16 %v154_v37 }
   0xa   :  { %v42_v13 = vadd.f32 1e-05, %v41_v11  ;;  %v86_v14 = vmax.f32 %v85_v12, 0.0  ;;  %v100_v46 = vld [vmem:[%s290_s9] sm:$0x1] }
   0xc   :  { %174 = vrsqrt.f32 %v42_v13  ;;  %v87_v15 = vadd.f32 1e-05, %v86_v14  ;;  %vm49_vm0 = vweird.f32 %v42_v13 }
   0xe   :  { %176 = vrsqrt.f32 %v87_v15  ;;  %vm94_vm2 = vweird.f32 %v87_v15 }
  0x12   :  { %v175_v16 = vpop.eup %174 }
  0x13   :  { %v44_v17 = vmul.f32 %v175_v16, %v42_v13  ;;  %vm50_vm1 = vweird.f32 %v175_v16 }
  0x14   :  { %v177_v18 = vpop.eup %176  ;;  %vm51_vm4 = vmor %vm49_vm0, %vm50_vm1 }
  0x15   :  { %v45_v19 = vmul.f32 %v175_v16, %v44_v17  ;;  %v89_v20 = vmul.f32 %v177_v18, %v87_v15  ;;  %vm95_vm3 = vweird.f32 %v177_v18 }
  0x16   :  { %vm251_vm5 = vmor %vm94_vm2, %vm95_vm3 }
  0x17   :  { %v46_v21 = vmul.f32 0.5, %v45_v19  ;;  %v90_v22 = vmul.f32 %v177_v18, %v89_v20 }
  0x19   :  { %v47_v23 = vsub.f32 1.5, %v46_v21  ;;  %v91_v24 = vmul.f32 0.5, %v90_v22 }
  0x1b   :  { %v48_v25 = vmul.f32 %v175_v16, %v47_v23  ;;  %v92_v28 = vsub.f32 1.5, %v91_v24 }
  0x1d   :  { %v52_v31 = vsel %vm51_vm4, %v175_v16, %v48_v25  ;;  %v93_v32 = vmul.f32 %v177_v18, %v92_v28 }
  0x1e   :  { %v54_v34 = vmul.f32 %v53_v26, %v52_v31 }
  0x1f   :  { %v97_v40 = vsel %vm251_vm5, %v177_v18, %v93_v32 }
  0x20   :  { %v56_v43 = vmul.f32 %v54_v34, %v36_v2  ;;  %v67_v44 = vperm.slane %v54_v34, 0  ;;  %v99_v45 = vmul.f32 %v98_v33, %v97_v40 }
  0x22   :  { %v57_v51 = vsub.f32 %v55_v39, %v56_v43  ;;  %v69_v52 = vmul.f32 %v147_v35, %v67_v44  ;;  %v70_v53 = vmul.f32 %v148_v36, %v67_v44  ;;  %v101_v54 = vmul.f32 %v99_v45, %v81_v7 }
  0x23   :  { %v112_v55 = vperm.slane %v99_v45, 0  ;;  %v71_v56 = vmul.f32 %v151_v41, %v67_v44  ;;  %v72_v57 = vmul.f32 %v152_v42, %v67_v44 }
  0x24   :  { %v74_v58 = vperm.slane %v57_v51, 0  ;;  %v102_v59 = vsub.f32 %v100_v46, %v101_v54 }
  0x25   :  { %v114_v60 = vmul.f32 %v155_v47, %v112_v55  ;;  %v115_v61 = vmul.f32 %v156_v48, %v112_v55  ;;  %v116_v62 = vmul.f32 %v159_v49, %v112_v55  ;;  %v117_v63 = vmul.f32 %v160_v50, %v112_v55 }
  0x26   :  { %v76_v0 = vadd.f32 %v74_v58, %v69_v52  ;;  %v77_v1 = vadd.f32 %v74_v58, %v70_v53  ;;  %v119_v2 = vperm.slane %v102_v59, 0  ;;  %v78_v3 = vadd.f32 %v74_v58, %v71_v56 }
  0x27   :  { %v79_v4 = vadd.f32 %v74_v58, %v72_v57 }
  0x28   :  { %v121_v5 = vadd.f32 %v119_v2, %v114_v60  ;;  %v122_v6 = vadd.f32 %v119_v2, %v115_v61  ;;  %v123_v8 = vadd.f32 %v119_v2, %v116_v62  ;;  %v124_v9 = vadd.f32 %v119_v2, %v117_v63 }
  0x2a   :  { %v125_v10 = vadd.f32 %v121_v5, %v76_v0  ;;  %v126_v7 = vadd.f32 %v122_v6, %v77_v1  ;;  %v127_v11 = vadd.f32 %v123_v8, %v78_v3  ;;  %v128_v12 = vadd.f32 %v124_v9, %v79_v4 }
  0x2c   :  { %v129_v13 = vmax.f32 %v125_v10, 0.0  ;;  %v130_v14 = vmax.f32 %v126_v7, 0.0  ;;  %v131_v15 = vmax.f32 %v127_v11, 0.0  ;;  %v132_v16 = vmax.f32 %v128_v12, 0.0 }
  0x2e   :  { %v164_v17 = vpack.c.bf16 %v130_v14, %v129_v13  ;;  %v169_v18 = vpack.c.bf16 %v132_v16, %v131_v15 }
  0x30   :  { %165 = vst [vmem:[%s291_s10] sm:$0xff] %v164_v17  }
  0x31   :  { %173 = vst [vmem:[%s291_s10 + $0x8] sm:$0xff] %v169_v18  }

// kernel: resnet_forward.60
= control target key start
LH: loop header
LB: loop body
LE: loop exit
PB: predicated region body
PF: predicated region fallthrough
CT: control target
= control target key end

     0   :  { %s192_s1 = inlined_call_operand.vmem [shape: f32[1,128], index: 1, kind: input, shape index: {}]   ;;  %s193_s2 = inlined_call_operand.vmem [shape: f32[1,128], index: 2, kind: input, shape index: {}]   ;;  %s194_s0 = inlined_call_operand.vmem [shape: bf16[32,128], index: 0, kind: input, shape index: {}]   ;;  %s195_s3 = inlined_call_operand.vmem [shape: f32[1,128], index: 3, kind: input, shape index: {}]   ;;  %s196_s4 = inlined_call_operand.vmem [shape: f32[1,128], index: 4, kind: input, shape index: {}]   ;;  %s197_s5 = inlined_call_operand.vmem [shape: bf16[32,128], index: 5, kind: input, shape index: {}]   ;;  %s198_s6 = inlined_call_operand.vmem [shape: bf16[32,128], index: 6, kind: output, shape index: {}]  }
   0x1   :  { %v23_v0 = vld [vmem:[%s192_s1] sm:$0x1]  ;;  %v122_v16 = vld [vmem:[%s194_s0 + $0x8] sm:$0xff]  }
   0x2   :  { %v25_v1 = vld [vmem:[%s193_s2] sm:$0x1]  ;;  %v24_v2 = vmul.f32 0.03125, %v23_v0  ;;  %v102_v21 = vunpack.c.l.bf16 %v122_v16  ;;  %v103_v23 = vunpack.c.h.bf16 %v122_v16  ;;  %v123_v27 = vld [vmem:[%s197_s5 + $0x8] sm:$0xff]  }
   0x3   :  { %v26_v3 = vmul.f32 0.03125, %v25_v1  ;;  %v41_v14 = vld [vmem:[%s195_s3] sm:$0x1]  ;;  %v110_v36 = vunpack.c.l.bf16 %v123_v27  ;;  %v111_v37 = vunpack.c.h.bf16 %v123_v27 }
   0x4   :  { %v27_v4 = vmul.f32 %v24_v2, %v24_v2  ;;  %v97_v15 = vld [vmem:[%s194_s0] sm:$0xff]  }
   0x5   :  { %v98_v19 = vunpack.c.l.bf16 %v97_v15  ;;  %v99_v20 = vunpack.c.h.bf16 %v97_v15  ;;  %v43_v22 = vld [vmem:[%s196_s4] sm:$0x1] }
   0x6   :  { %v28_v5 = vsub.f32 %v26_v3, %v27_v4  ;;  %v105_v26 = vld [vmem:[%s197_s5] sm:$0xff]  }
   0x7   :  { %v106_v32 = vunpack.c.l.bf16 %v105_v26  ;;  %v107_v35 = vunpack.c.h.bf16 %v105_v26 }
   0x8   :  { %v29_v6 = vmax.f32 %v28_v5, 0.0 }
   0xa   :  { %v30_v7 = vadd.f32 1e-05, %v29_v6 }
   0xc   :  { %125 = vrsqrt.f32 %v30_v7  ;;  %vm37_vm0 = vweird.f32 %v30_v7 }
  0x12   :  { %v126_v8 = vpop.eup %125 }
  0x13   :  { %v32_v9 = vmul.f32 %v126_v8, %v30_v7  ;;  %vm38_vm1 = vweird.f32 %v126_v8 }
  0x14   :  { %vm39_vm2 = vmor %vm37_vm0, %vm38_vm1 }
  0x15   :  { %v33_v10 = vmul.f32 %v126_v8, %v32_v9 }
  0x17   :  { %v34_v11 = vmul.f32 0.5, %v33_v10 }
  0x19   :  { %v35_v12 = vsub.f32 1.5, %v34_v11 }
  0x1b   :  { %v36_v13 = vmul.f32 %v126_v8, %v35_v12 }
  0x1d   :  { %v40_v17 = vsel %vm39_vm2, %v126_v8, %v36_v13 }
  0x1e   :  { %v42_v18 = vmul.f32 %v41_v14, %v40_v17 }
  0x20   :  { %v44_v24 = vmul.f32 %v42_v18, %v24_v2  ;;  %v55_v25 = vperm.slane %v42_v18, 0 }
  0x22   :  { %v45_v28 = vsub.f32 %v43_v22, %v44_v24  ;;  %v57_v29 = vmul.f32 %v98_v19, %v55_v25  ;;  %v58_v30 = vmul.f32 %v99_v20, %v55_v25  ;;  %v59_v31 = vmul.f32 %v102_v21, %v55_v25 }
  0x23   :  { %v60_v33 = vmul.f32 %v103_v23, %v55_v25 }
  0x24   :  { %v62_v34 = vperm.slane %v45_v28, 0 }
  0x26   :  { %v64_v38 = vadd.f32 %v62_v34, %v57_v29  ;;  %v65_v39 = vadd.f32 %v62_v34, %v58_v30  ;;  %v66_v40 = vadd.f32 %v62_v34, %v59_v31  ;;  %v67_v41 = vadd.f32 %v62_v34, %v60_v33 }
  0x28   :  { %v76_v42 = vadd.f32 %v106_v32, %v64_v38  ;;  %v77_v43 = vadd.f32 %v107_v35, %v65_v39  ;;  %v78_v44 = vadd.f32 %v110_v36, %v66_v40  ;;  %v79_v45 = vadd.f32 %v111_v37, %v67_v41 }
  0x2a   :  { %v80_v46 = vmax.f32 %v76_v42, 0.0  ;;  %v81_v47 = vmax.f32 %v77_v43, 0.0  ;;  %v82_v48 = vmax.f32 %v78_v44, 0.0  ;;  %v83_v49 = vmax.f32 %v79_v45, 0.0 }
  0x2c   :  { %v115_v50 = vpack.c.bf16 %v81_v47, %v80_v46  ;;  %v120_v51 = vpack.c.bf16 %v83_v49, %v82_v48 }
  0x2e   :  { %116 = vst [vmem:[%s198_s6] sm:$0xff] %v115_v50  }
  0x2f   :  { %124 = vst [vmem:[%s198_s6 + $0x8] sm:$0xff] %v120_v51  }

// kernel: resnet_forward.57
= control target key start
LH: loop header
LB: loop body
LE: loop exit
PB: predicated region body
PF: predicated region fallthrough
CT: control target
= control target key end

     0   :  { %vm203_vm0 = vcmask 261120   ;;  %v464_v36 = vmov 0.0   ;;  %s594_s1 = inlined_call_operand.vmem [shape: bf16[288,128], index: 1, kind: input, shape index: {}]   ;;  %s595_s0 = inlined_call_operand.vmem [shape: bf16[32,288], index: 0, kind: input, shape index: {}]   ;;  %s596_s2 = inlined_call_operand.vmem [shape: bf16[32,128], index: 2, kind: output, shape index: {0}]   ;;  %s597_s3 = inlined_call_operand.vmem [shape: f32[1,128], index: 3, kind: output, shape index: {1}]   ;;  %s598_s4 = inlined_call_operand.vmem [shape: f32[1,128], index: 4, kind: output, shape index: {2}]  }
   0x1   :  { %v433_v0 = vld [vmem:[%s594_s1 + $0x38] sm:$0xff]  ;;  %v432_v2 = vld [vmem:[%s594_s1 + $0x30] sm:$0xff]  ;;  %v443_v4 = vld [vmem:[%s594_s1 + $0x88] sm:$0xff]  ;;  %19 = vst [vmem:[#allocation2] sm:$0x1] %v464_v36 }
   0x2   :  { %v441_v1 = vld [vmem:[%s594_s1 + $0x78] sm:$0xff]  ;;  %210 = vmatpush.bf16.msra.mxu0 %v433_v0  ;;  %v440_v3 = vld [vmem:[%s594_s1 + $0x70] sm:$0xff]  ;;  %455 = vmatpush.bf16.msra.mxu3 %v433_v0  ;;  %v442_v5 = vld [vmem:[%s594_s1 + $0x80] sm:$0xff]  ;;  %20 = vst [vmem:[#allocation3] sm:$0x1] %v464_v36 }
   0x3   :  { %229 = vmatpush.bf16.msra.mxu1 %v441_v1  ;;  %254 = vmatpush.bf16.msra.mxu2 %v443_v4  ;;  %v332_v6 = vld [vmem:[%s595_s0 + $0x8] sm:$0xf]  ;;  %v422_v7 = vld [vmem:[%s595_s0 + $0x10] sm:$0xf0]  ;;  %v430_v11 = vld [vmem:[%s594_s1 + $0x20] sm:$0xff] }
   0x4   :  { %v431_v8 = vld [vmem:[%s594_s1 + $0x28] sm:$0xff]  ;;  %v333_v10 = vor.u32 %v422_v7, %v332_v6  ;;  %v438_v12 = vld [vmem:[%s594_s1 + $0x60] sm:$0xff]  ;;  %v429_v13 = vld [vmem:[%s594_s1 + $0x18] sm:$0xff] }
   0x5   :  { %v439_v9 = vld [vmem:[%s594_s1 + $0x68] sm:$0xff]  ;;  %v437_v14 = vld [vmem:[%s594_s1 + $0x58] sm:$0xff]  ;;  %v428_v15 = vld [vmem:[%s594_s1 + $0x10] sm:$0xff] }
   0x6   :  { %211 = vmatpush.bf16.msra.mxu0 %v432_v2  ;;  %456 = vmatpush.bf16.msra.mxu3 %v432_v2  ;;  %v436_v16 = vld [vmem:[%s594_s1 + $0x50] sm:$0xff]  ;;  %v344_v17 = vld [vmem:[%s595_s0 + $0x20] sm:$0xf]  ;;  %v425_v18 = vld [vmem:[%s595_s0 + $0x28] sm:$0xf0] }
   0x7   :  { %230 = vmatpush.bf16.msra.mxu1 %v440_v3  ;;  %255 = vmatpush.bf16.msra.mxu2 %v442_v5  ;;  %v427_v19 = vld [vmem:[%s594_s1 + $0x8] sm:$0xff]  ;;  %v345_v21 = vor.u32 %v425_v18, %v344_v17  ;;  %v426_v22 = vld [vmem:[%s594_s1] sm:$0xff]  ;;  %v326_v27 = vld [vmem:[%s595_s0 + $0xc] sm:$0xf0] }
   0x8   :  { %v435_v20 = vld [vmem:[%s594_s1 + $0x48] sm:$0xff]  ;;  %v434_v23 = vld [vmem:[%s594_s1 + $0x40] sm:$0xff]  ;;  %v336_v28 = vld [vmem:[%s595_s0 + $0x18] sm:$0xf] }
   0x9   :  { %v324_v24 = vld [vmem:[%s595_s0] sm:$0xf]  ;;  %v421_v25 = vld [vmem:[%s595_s0 + $0x8] sm:$0xf0]  ;;  %v420_v26 = vld [vmem:[%s595_s0 + $0x4] sm:$0xf] }
   0xa   :  { %212 = vmatpush.bf16.msra.mxu0 %v431_v8  ;;  %457 = vmatpush.bf16.msra.mxu3 %v431_v8  ;;  %v424_v29 = vld [vmem:[%s595_s0 + $0x20] sm:$0xf0]  ;;  %v325_v30 = vor.u32 %v421_v25, %v324_v24  ;;  %v329_v31 = vor.u32 %v420_v26, %v326_v27  ;;  %v423_v33 = vld [vmem:[%s595_s0 + $0x1c] sm:$0xf]  ;;  %v338_v34 = vld [vmem:[%s595_s0 + $0x24] sm:$0xf0] }
   0xb   :  { %231 = vmatpush.bf16.msra.mxu1 %v439_v9  ;;  %418 = vmatmul.msk.bf16.vlgmr.msra.gmra.mxu2 %vm203_vm0, %v333_v10  ;;  %v337_v32 = vor.u32 %v424_v29, %v336_v28  ;;  %v341_v35 = vor.u32 %v423_v33, %v338_v34  ;;  %v287_v17 = vld [vmem:[#allocation3] sm:$0x1] }
   0xe   :  { %213 = vmatpush.bf16.msra.mxu0 %v430_v11  ;;  %458 = vmatpush.bf16.msra.mxu3 %v430_v11 }
   0xf   :  { %232 = vmatpush.bf16.msra.mxu1 %v438_v12 }
  0x12   :  { %214 = vmatpush.bf16.msra.mxu0 %v429_v13  ;;  %459 = vmatpush.bf16.msra.mxu3 %v429_v13 }
  0x13   :  { %233 = vmatpush.bf16.msra.mxu1 %v437_v14  ;;  %v275_v14 = vld [vmem:[#allocation2] sm:$0x1] }
  0x16   :  { %215 = vmatpush.bf16.msra.mxu0 %v428_v15  ;;  %460 = vmatpush.bf16.msra.mxu3 %v428_v15 }
  0x17   :  { %234 = vmatpush.bf16.msra.mxu1 %v436_v16 }
  0x1a   :  { %216 = vmatpush.bf16.msra.mxu0 %v427_v19  ;;  %461 = vmatpush.bf16.msra.mxu3 %v427_v19 }
  0x1b   :  { %235 = vmatpush.bf16.msra.mxu1 %v435_v20  ;;  %419 = vmatmul.msk.bf16.gmra.mxu2 %vm203_vm0, %v345_v21 }
  0x1e   :  { %217 = vmatpush.bf16.msra.mxu0 %v426_v22  ;;  %462 = vmatpush.bf16.msra.mxu3 %v426_v22 }
  0x1f   :  { %236 = vmatpush.bf16.msra.mxu1 %v434_v23 }
  0x21   :  { %218 = vmatmul.bf16.vlgmr.msra.gmra.mxu0 %v325_v30  ;;  %223 = vmatmul.bf16.vlgmr.msra.gmra.mxu3 %v337_v32 }
  0x22   :  { %237 = vmatmul.bf16.vlgmr.msra.gmra.mxu1 %v329_v31 }
  0x32   :  { %242 = vmatmul.bf16.gmra.mxu1 %v341_v35 }
  0x8e   :  { %v257_v37 = vpop.f32.mrf.mxu2 }
  0x96   :  { %v259_v40 = vpop.f32.mrf.mxu2 }
  0x9e   :  { %v219_v38 = vpop.f32.mrf.mxu0  ;;  %v262_v49 = vpop.f32.mrf.mxu2 }
  0x9f   :  { %v238_v39 = vpop.f32.mrf.mxu1 }
  0xa0   :  { %v239_v41 = vadd.f32 %v238_v39, %v219_v38 }
  0xa2   :  { %v258_v45 = vadd.f32 %v257_v37, %v239_v41 }
  0xa4   :  { %v224_v48 = vpop.f32.mrf.mxu3  ;;  %v288_v56 = vmul.f32 %v258_v45, %v258_v45 }
  0xa6   :  { %v221_v42 = vpop.f32.mrf.mxu0  ;;  %v264_v60 = vpop.f32.mrf.mxu2 }
  0xa7   :  { %v240_v43 = vpop.f32.mrf.mxu1 }
  0xa8   :  { %v241_v44 = vadd.f32 %v240_v43, %v221_v42 }
  0xaa   :  { %v260_v46 = vadd.f32 %v259_v40, %v241_v44 }
  0xac   :  { %v447_v47 = vpack.c.bf16 %v260_v46, %v258_v45  ;;  %v289_v53 = vmul.f32 %v260_v46, %v260_v46  ;;  %v226_v54 = vpop.f32.mrf.mxu3  ;;  %v276_v57 = vadd.f32 %v260_v46, %v258_v45 }
  0xae   :  { %448 = vst [vmem:[%s596_s2] sm:$0xff] %v447_v47   ;;  %v292_v61 = vadd.f32 %v289_v53, %v288_v56 }
  0xaf   :  { %v243_v50 = vpop.f32.mrf.mxu1 }
  0xb0   :  { %v244_v51 = vadd.f32 %v243_v50, %v224_v48 }
  0xb2   :  { %v263_v52 = vadd.f32 %v262_v49, %v244_v51 }
  0xb4   :  { %v290_v58 = vmul.f32 %v263_v52, %v263_v52  ;;  %v277_v62 = vadd.f32 %v276_v57, %v263_v52 }
  0xb6   :  { %v293_v0 = vadd.f32 %v292_v61, %v290_v58 }
  0xb7   :  { %v245_v55 = vpop.f32.mrf.mxu1 }
  0xb8   :  { %v246_v59 = vadd.f32 %v245_v55, %v226_v54 }
  0xba   :  { %v265_v63 = vadd.f32 %v264_v60, %v246_v59 }
  0xbc   :  { %v452_v1 = vpack.c.bf16 %v265_v63, %v263_v52  ;;  %v278_v2 = vadd.f32 %v277_v62, %v265_v63  ;;  %v291_v3 = vmul.f32 %v265_v63, %v265_v63 }
  0xbe   :  { %454 = vst [vmem:[%s596_s2 + $0x8] sm:$0xff] %v452_v1   ;;  %v279_v4 = vrot.slane %v278_v2, 4  ;;  %v294_v5 = vadd.f32 %v293_v0, %v291_v3 }
  0xc0   :  { %v280_v6 = vadd.f32 %v279_v4, %v278_v2  ;;  %v295_v7 = vrot.slane %v294_v5, 4 }
  0xc2   :  { %v281_v8 = vrot.slane %v280_v6, 2  ;;  %v296_v9 = vadd.f32 %v295_v7, %v294_v5 }
  0xc4   :  { %v282_v10 = vadd.f32 %v281_v8, %v280_v6  ;;  %v297_v11 = vrot.slane %v296_v9, 2 }
  0xc6   :  { %v283_v12 = vrot.slane %v282_v10, 1  ;;  %v298_v13 = vadd.f32 %v297_v11, %v296_v9 }
  0xc8   :  { %v284_v15 = vadd.f32 %v283_v12, %v282_v10  ;;  %v299_v16 = vrot.slane %v298_v13, 1 }
  0xca   :  { %v285_v18 = vadd.f32 %v284_v15, %v275_v14  ;;  %v300_v19 = vadd.f32 %v299_v16, %v298_v13 }
  0xcc   :  { %286 = vst [vmem:[#allocation2] sm:$0x1] %v285_v18  ;;  %v301_v20 = vadd.f32 %v300_v19, %v287_v17 }
  0xce   :  { %302 = vst [vmem:[#allocation3] sm:$0x1] %v301_v20 }
  0xd3   :  { %v306_v21 = vld [vmem:[#allocation2] sm:$0x1] }
  0xd4   :  { %307 = vst [vmem:[%s597_s3] sm:$0x1] %v306_v21 }
  0xd5   :  { %v308_v22 = vld [vmem:[#allocation3] sm:$0x1] }
  0xd6   :  { %309 = vst [vmem:[%s598_s4] sm:$0x1] %v308_v22 }

// kernel: resnet_forward.55
= control target key start
LH: loop header
LB: loop body
LE: loop exit
PB: predicated region body
PF: predicated region fallthrough
CT: control target
= control target key end

     0   :  { %vm336_vm0 = vcmask 130048   ;;  %vm214_vm1 = vcmask 261120   ;;  %v595_v39 = vmov 0.0   ;;  %s773_s1 = inlined_call_operand.vmem [shape: bf16[288,128], index: 1, kind: input, shape index: {}]   ;;  %s774_s3 = inlined_call_operand.vmem [shape: bf16[16,128], index: 3, kind: input, shape index: {}]   ;;  %s775_s2 = inlined_call_operand.vmem [shape: bf16[32,16], index: 2, kind: input, shape index: {}]   ;;  %s776_s0 = inlined_call_operand.vmem [shape: bf16[32,288], index: 0, kind: input, shape index: {}]   ;;  %s777_s7 = inlined_call_operand.vmem [shape: bf16[32,128], index: 7, kind: output, shape index: {3}]   ;;  %s778_s4 = inlined_call_operand.vmem [shape: bf16[32,128], index: 4, kind: output, shape index: {0}]   ;;  %s779_s8 = inlined_call_operand.vmem [shape: f32[1,128], index: 8, kind: output, shape index: {4}]   ;;  %s780_s9 = inlined_call_operand.vmem [shape: f32[1,128], index: 9, kind: output, shape index: {5}]   ;;  %s781_s5 = inlined_call_operand.vmem [shape: f32[1,128], index: 5, kind: output, shape index: {1}]   ;;  %s782_s6 = inlined_call_operand.vmem [shape: f32[1,128], index: 6, kind: output, shape index: {2}]  }
   0x1   :  { %v558_v0 = vld [vmem:[%s773_s1 + $0x38] sm:$0xff]  ;;  %v571_v2 = vld [vmem:[%s774_s3] sm:$0xff]  ;;  %v557_v4 = vld [vmem:[%s773_s1 + $0x30] sm:$0xff]  ;;  %30 = vst [vmem:[#allocation4] sm:$0x1] %v595_v39 }
   0x2   :  { %v566_v1 = vld [vmem:[%s773_s1 + $0x78] sm:$0xff]  ;;  %221 = vmatpush.bf16.msra.mxu0 %v558_v0  ;;  %v569_v3 = vld [vmem:[%s775_s2] sm:$0xff]  ;;  %350 = vmatpush.bf16.msra.mxu3 %v571_v2  ;;  %v565_v5 = vld [vmem:[%s773_s1 + $0x70] sm:$0xff]  ;;  %31 = vst [vmem:[#allocation5] sm:$0x1] %v595_v39 }
   0x3   :  { %240 = vmatpush.bf16.msra.mxu1 %v566_v1  ;;  %v568_v6 = vld [vmem:[%s773_s1 + $0x88] sm:$0xff]  ;;  %v567_v7 = vld [vmem:[%s773_s1 + $0x80] sm:$0xff]  ;;  %v547_v9 = vld [vmem:[%s776_s0 + $0x10] sm:$0xf0]  ;;  %28 = vst [vmem:[#allocation2] sm:$0x1] %v595_v39 }
   0x4   :  { %265 = vmatpush.bf16.msra.mxu2 %v568_v6  ;;  %v443_v8 = vld [vmem:[%s776_s0 + $0x8] sm:$0xf]  ;;  %v555_v13 = vld [vmem:[%s773_s1 + $0x20] sm:$0xff]  ;;  %v554_v15 = vld [vmem:[%s773_s1 + $0x18] sm:$0xff]  ;;  %29 = vst [vmem:[#allocation3] sm:$0x1] %v595_v39 }
   0x5   :  { %543 = vmatmul.msk.bf16.vlgmr.msra.gmra.mxu3 %vm336_vm0, %v569_v3  ;;  %v556_v10 = vld [vmem:[%s773_s1 + $0x28] sm:$0xff]  ;;  %v444_v12 = vor.u32 %v547_v9, %v443_v8  ;;  %v563_v14 = vld [vmem:[%s773_s1 + $0x60] sm:$0xff]  ;;  %v562_v16 = vld [vmem:[%s773_s1 + $0x58] sm:$0xff] }
   0x6   :  { %222 = vmatpush.bf16.msra.mxu0 %v557_v4  ;;  %v564_v11 = vld [vmem:[%s773_s1 + $0x68] sm:$0xff]  ;;  %v553_v18 = vld [vmem:[%s773_s1 + $0x10] sm:$0xff]  ;;  %v455_v20 = vld [vmem:[%s776_s0 + $0x20] sm:$0xf] }
   0x7   :  { %241 = vmatpush.bf16.msra.mxu1 %v565_v5  ;;  %v570_v17 = vld [vmem:[%s775_s2 + $0x8] sm:$0xff]  ;;  %v561_v19 = vld [vmem:[%s773_s1 + $0x50] sm:$0xff]  ;;  %v551_v25 = vld [vmem:[%s773_s1] sm:$0xff] }
   0x8   :  { %266 = vmatpush.bf16.msra.mxu2 %v567_v7  ;;  %v550_v21 = vld [vmem:[%s776_s0 + $0x28] sm:$0xf0]  ;;  %v435_v26 = vld [vmem:[%s776_s0] sm:$0xf]  ;;  %v545_v29 = vld [vmem:[%s776_s0 + $0x4] sm:$0xf] }
   0x9   :  { %v552_v22 = vld [vmem:[%s773_s1 + $0x8] sm:$0xff]  ;;  %v456_v24 = vor.u32 %v550_v21, %v455_v20  ;;  %v559_v28 = vld [vmem:[%s773_s1 + $0x40] sm:$0xff]  ;;  %v437_v30 = vld [vmem:[%s776_s0 + $0xc] sm:$0xf0] }
   0xa   :  { %223 = vmatpush.bf16.msra.mxu0 %v556_v10  ;;  %v560_v23 = vld [vmem:[%s773_s1 + $0x48] sm:$0xff]  ;;  %v440_v32 = vor.u32 %v545_v29, %v437_v30  ;;  %v447_v33 = vld [vmem:[%s776_s0 + $0x18] sm:$0xf]  ;;  %v549_v34 = vld [vmem:[%s776_s0 + $0x20] sm:$0xf0] }
   0xb   :  { %242 = vmatpush.bf16.msra.mxu1 %v564_v11  ;;  %529 = vmatmul.msk.bf16.vlgmr.msra.gmra.mxu2 %vm214_vm1, %v444_v12  ;;  %v546_v27 = vld [vmem:[%s776_s0 + $0x8] sm:$0xf0]  ;;  %v548_v35 = vld [vmem:[%s776_s0 + $0x1c] sm:$0xf]  ;;  %v449_v36 = vld [vmem:[%s776_s0 + $0x24] sm:$0xf0]  ;;  %v448_v37 = vor.u32 %v549_v34, %v447_v33 }
   0xc   :  { %v436_v31 = vor.u32 %v546_v27, %v435_v26  ;;  %v452_v38 = vor.u32 %v548_v35, %v449_v36  ;;  %v370_v12 = vld [vmem:[#allocation4] sm:$0x1] }
   0xe   :  { %224 = vmatpush.bf16.msra.mxu0 %v555_v13 }
   0xf   :  { %243 = vmatpush.bf16.msra.mxu1 %v563_v14 }
  0x12   :  { %225 = vmatpush.bf16.msra.mxu0 %v554_v15 }
  0x13   :  { %244 = vmatpush.bf16.msra.mxu1 %v562_v16  ;;  %v382_v16 = vld [vmem:[#allocation5] sm:$0x1] }
  0x15   :  { %544 = vmatmul.msk.bf16.gmra.mxu3 %vm336_vm0, %v570_v17 }
  0x16   :  { %226 = vmatpush.bf16.msra.mxu0 %v553_v18 }
  0x17   :  { %245 = vmatpush.bf16.msra.mxu1 %v561_v19 }
  0x1a   :  { %227 = vmatpush.bf16.msra.mxu0 %v552_v22 }
  0x1b   :  { %246 = vmatpush.bf16.msra.mxu1 %v560_v23  ;;  %530 = vmatmul.msk.bf16.gmra.mxu2 %vm214_vm1, %v456_v24 }
  0x1e   :  { %228 = vmatpush.bf16.msra.mxu0 %v551_v25 }
  0x1f   :  { %247 = vmatpush.bf16.msra.mxu1 %v559_v28 }
  0x21   :  { %229 = vmatmul.bf16.vlgmr.msra.gmra.mxu0 %v436_v31 }
  0x22   :  { %248 = vmatmul.bf16.vlgmr.msra.gmra.mxu1 %v440_v32 }
  0x31   :  { %234 = vmatmul.bf16.gmra.mxu0 %v448_v37 }
  0x32   :  { %253 = vmatmul.bf16.gmra.mxu1 %v452_v38 }
  0x88   :  { %v352_v40 = vpop.f32.mrf.mxu3 }
  0x89   :  { %v383_v43 = vmul.f32 %v352_v40, %v352_v40 }
  0x8e   :  { %v268_v47 = vpop.f32.mrf.mxu2 }
  0x90   :  { %v354_v41 = vpop.f32.mrf.mxu3 }
  0x91   :  { %v585_v42 = vpack.c.bf16 %v354_v41, %v352_v40  ;;  %v384_v44 = vmul.f32 %v354_v41, %v354_v41  ;;  %v371_v46 = vadd.f32 %v354_v41, %v352_v40 }
  0x93   :  { %586 = vst [vmem:[%s777_s7] sm:$0xff] %v585_v42   ;;  %v387_v48 = vadd.f32 %v384_v44, %v383_v43 }
  0x96   :  { %v270_v60 = vpop.f32.mrf.mxu2 }
  0x98   :  { %v357_v45 = vpop.f32.mrf.mxu3 }
  0x99   :  { %v385_v49 = vmul.f32 %v357_v45, %v357_v45  ;;  %v372_v50 = vadd.f32 %v371_v46, %v357_v45 }
  0x9b   :  { %v388_v53 = vadd.f32 %v387_v48, %v385_v49 }
  0x9e   :  { %v230_v51 = vpop.f32.mrf.mxu0  ;;  %v273_v17 = vpop.f32.mrf.mxu2 }
  0x9f   :  { %v249_v52 = vpop.f32.mrf.mxu1 }
  0xa0   :  { %v359_v54 = vpop.f32.mrf.mxu3  ;;  %v250_v61 = vadd.f32 %v249_v52, %v230_v51  ;;  %v286_v51 = vld [vmem:[#allocation2] sm:$0x1] }
  0xa1   :  { %v590_v55 = vpack.c.bf16 %v359_v54, %v357_v45  ;;  %v373_v56 = vadd.f32 %v372_v50, %v359_v54  ;;  %v386_v57 = vmul.f32 %v359_v54, %v359_v54  ;;  %v298_v54 = vld [vmem:[#allocation3] sm:$0x1] }
  0xa2   :  { %v269_v5 = vadd.f32 %v268_v47, %v250_v61 }
  0xa3   :  { %593 = vst [vmem:[%s777_s7 + $0x8] sm:$0xff] %v590_v55   ;;  %v374_v58 = vrot.slane %v373_v56, 4  ;;  %v389_v59 = vadd.f32 %v388_v53, %v386_v57 }
  0xa4   :  { %v299_v27 = vmul.f32 %v269_v5, %v269_v5 }
  0xa5   :  { %v375_v62 = vadd.f32 %v374_v58, %v373_v56  ;;  %v390_v63 = vrot.slane %v389_v59, 4 }
  0xa6   :  { %v232_v0 = vpop.f32.mrf.mxu0  ;;  %v275_v32 = vpop.f32.mrf.mxu2 }
  0xa7   :  { %v251_v1 = vpop.f32.mrf.mxu1  ;;  %v376_v2 = vrot.slane %v375_v62, 2  ;;  %v391_v3 = vadd.f32 %v390_v63, %v389_v59 }
  0xa8   :  { %v252_v4 = vadd.f32 %v251_v1, %v232_v0 }
  0xa9   :  { %v377_v6 = vadd.f32 %v376_v2, %v375_v62  ;;  %v392_v7 = vrot.slane %v391_v3, 2 }
  0xaa   :  { %v271_v8 = vadd.f32 %v270_v60, %v252_v4 }
  0xab   :  { %v378_v9 = vrot.slane %v377_v6, 1  ;;  %v393_v10 = vadd.f32 %v392_v7, %v391_v3 }
  0xac   :  { %v575_v11 = vpack.c.bf16 %v271_v8, %v269_v5  ;;  %v300_v24 = vmul.f32 %v271_v8, %v271_v8  ;;  %v287_v28 = vadd.f32 %v271_v8, %v269_v5 }
  0xad   :  { %v379_v13 = vadd.f32 %v378_v9, %v377_v6  ;;  %v394_v14 = vrot.slane %v393_v10, 1 }
  0xae   :  { %576 = vst [vmem:[%s778_s4] sm:$0xff] %v575_v11   ;;  %v235_v15 = vpop.f32.mrf.mxu0  ;;  %v303_v33 = vadd.f32 %v300_v24, %v299_v27 }
  0xaf   :  { %v254_v18 = vpop.f32.mrf.mxu1  ;;  %v380_v19 = vadd.f32 %v379_v13, %v370_v12  ;;  %v395_v20 = vadd.f32 %v394_v14, %v393_v10 }
  0xb0   :  { %v255_v21 = vadd.f32 %v254_v18, %v235_v15 }
  0xb1   :  { %381 = vst [vmem:[#allocation4] sm:$0x1] %v380_v19  ;;  %v396_v22 = vadd.f32 %v395_v20, %v382_v16 }
  0xb2   :  { %v274_v23 = vadd.f32 %v273_v17, %v255_v21 }
  0xb3   :  { %397 = vst [vmem:[#allocation5] sm:$0x1] %v396_v22 }
  0xb4   :  { %v301_v29 = vmul.f32 %v274_v23, %v274_v23  ;;  %v288_v34 = vadd.f32 %v287_v28, %v274_v23 }
  0xb6   :  { %v237_v25 = vpop.f32.mrf.mxu0  ;;  %v304_v37 = vadd.f32 %v303_v33, %v301_v29 }
  0xb7   :  { %v256_v26 = vpop.f32.mrf.mxu1 }
  0xb8   :  { %v257_v30 = vadd.f32 %v256_v26, %v237_v25  ;;  %v405_v31 = vld [vmem:[#allocation4] sm:$0x1] }
  0xb9   :  { %406 = vst [vmem:[%s779_s8] sm:$0x1] %v405_v31 }
  0xba   :  { %v276_v35 = vadd.f32 %v275_v32, %v257_v30  ;;  %v407_v36 = vld [vmem:[#allocation5] sm:$0x1] }
  0xbb   :  { %408 = vst [vmem:[%s780_s9] sm:$0x1] %v407_v36 }
  0xbc   :  { %v580_v38 = vpack.c.bf16 %v276_v35, %v274_v23  ;;  %v289_v39 = vadd.f32 %v288_v34, %v276_v35  ;;  %v302_v40 = vmul.f32 %v276_v35, %v276_v35 }
  0xbe   :  { %592 = vst [vmem:[%s778_s4 + $0x8] sm:$0xff] %v580_v38   ;;  %v290_v41 = vrot.slane %v289_v39, 4  ;;  %v305_v42 = vadd.f32 %v304_v37, %v302_v40 }
  0xc0   :  { %v291_v43 = vadd.f32 %v290_v41, %v289_v39  ;;  %v306_v44 = vrot.slane %v305_v42, 4 }
  0xc2   :  { %v292_v45 = vrot.slane %v291_v43, 2  ;;  %v307_v46 = vadd.f32 %v306_v44, %v305_v42 }
  0xc4   :  { %v293_v47 = vadd.f32 %v292_v45, %v291_v43  ;;  %v308_v48 = vrot.slane %v307_v46, 2 }
  0xc6   :  { %v294_v49 = vrot.slane %v293_v47, 1  ;;  %v309_v50 = vadd.f32 %v308_v48, %v307_v46 }
  0xc8   :  { %v295_v52 = vadd.f32 %v294_v49, %v293_v47  ;;  %v310_v53 = vrot.slane %v309_v50, 1 }
  0xca   :  { %v296_v55 = vadd.f32 %v295_v52, %v286_v51  ;;  %v311_v56 = vadd.f32 %v310_v53, %v309_v50 }
  0xcc   :  { %297 = vst [vmem:[#allocation2] sm:$0x1] %v296_v55  ;;  %v312_v57 = vadd.f32 %v311_v56, %v298_v54 }
  0xce   :  { %313 = vst [vmem:[#allocation3] sm:$0x1] %v312_v57 }
  0xd3   :  { %v401_v58 = vld [vmem:[#allocation2] sm:$0x1] }
  0xd4   :  { %402 = vst [vmem:[%s781_s5] sm:$0x1] %v401_v58 }
  0xd5   :  { %v403_v59 = vld [vmem:[#allocation3] sm:$0x1] }
  0xd6   :  { %404 = vst [vmem:[%s782_s6] sm:$0x1] %v403_v59 }

// kernel: resnet_forward.62
= control target key start
LH: loop header
LB: loop body
LE: loop exit
PB: predicated region body
PF: predicated region fallthrough
CT: control target
= control target key end

     0   :  { %s110_s1 = inlined_call_operand.vmem [shape: f32[1,128], index: 1, kind: input, shape index: {}]   ;;  %s111_s2 = inlined_call_operand.vmem [shape: f32[1,128], index: 2, kind: input, shape index: {}]   ;;  %s112_s0 = inlined_call_operand.vmem [shape: bf16[8,128], index: 0, kind: input, shape index: {}]   ;;  %s113_s3 = inlined_call_operand.vmem [shape: f32[1,128], index: 3, kind: input, shape index: {}]   ;;  %s114_s4 = inlined_call_operand.vmem [shape: f32[1,128], index: 4, kind: input, shape index: {}]   ;;  %s115_s5 = inlined_call_operand.vmem [shape: bf16[8,128], index: 5, kind: output, shape index: {}]  }
   0x1   :  { %v20_v0 = vld [vmem:[%s110_s1] sm:$0x1] }
   0x2   :  { %v22_v1 = vld [vmem:[%s111_s2] sm:$0x1]  ;;  %v21_v2 = vmul.f32 0.125, %v20_v0 }
   0x3   :  { %v23_v3 = vmul.f32 0.125, %v22_v1  ;;  %v38_v14 = vld [vmem:[%s113_s3] sm:$0x1] }
   0x4   :  { %v24_v4 = vmul.f32 %v21_v2, %v21_v2  ;;  %v43_v15 = vld [vmem:[%s112_s0] sm:$0xf] }
   0x5   :  { %v44_v18 = vunpack.c.l.bf16 %v43_v15  ;;  %v40_v19 = vld [vmem:[%s114_s4] sm:$0x1] }
   0x6   :  { %v25_v5 = vsub.f32 %v23_v3, %v24_v4 }
   0x8   :  { %v26_v6 = vmax.f32 %v25_v5, 0.0 }
   0xa   :  { %v27_v7 = vadd.f32 1e-05, %v26_v6 }
   0xc   :  { %60 = vrsqrt.f32 %v27_v7  ;;  %vm34_vm0 = vweird.f32 %v27_v7 }
  0x12   :  { %v61_v8 = vpop.eup %60 }
  0x13   :  { %v29_v9 = vmul.f32 %v61_v8, %v27_v7  ;;  %vm35_vm1 = vweird.f32 %v61_v8 }
  0x14   :  { %vm36_vm2 = vmor %vm34_vm0, %vm35_vm1 }
  0x15   :  { %v30_v10 = vmul.f32 %v61_v8, %v29_v9 }
  0x17   :  { %v31_v11 = vmul.f32 0.5, %v30_v10 }
  0x19   :  { %v32_v12 = vsub.f32 1.5, %v31_v11 }
  0x1b   :  { %v33_v13 = vmul.f32 %v61_v8, %v32_v12 }
  0x1d   :  { %v37_v16 = vsel %vm36_vm2, %v61_v8, %v33_v13 }
  0x1e   :  { %v39_v17 = vmul.f32 %v38_v14, %v37_v16 }
  0x20   :  { %v41_v20 = vmul.f32 %v39_v17, %v21_v2  ;;  %v46_v21 = vperm.slane %v39_v17, 0 }
  0x22   :  { %v42_v22 = vsub.f32 %v40_v19, %v41_v20  ;;  %v48_v23 = vmul.f32 %v46_v21, %v44_v18 }
  0x24   :  { %v50_v24 = vperm.slane %v42_v22, 0 }
  0x26   :  { %v52_v25 = vadd.f32 %v50_v24, %v48_v23 }
  0x28   :  { %v53_v26 = vmax.f32 %v52_v25, 0.0 }
  0x2a   :  { %v54_v27 = vpack.c.bf16 %v53_v26, %v53_v26 }
  0x2c   :  { %55 = vst [vmem:[%s115_s5] sm:$0xf] %v54_v27 }

// kernel: resnet_forward.61
= control target key start
LH: loop header
LB: loop body
LE: loop exit
PB: predicated region body
PF: predicated region fallthrough
CT: control target
= control target key end

     0   :  { %vm177_vm0 = vcmask 261120   ;;  %v352_v26 = vmov 0.0   ;;  %s447_s1 = inlined_call_operand.vmem [shape: bf16[288,128], index: 1, kind: input, shape index: {}]   ;;  %s448_s0 = inlined_call_operand.vmem [shape: bf16[8,288], index: 0, kind: input, shape index: {}]   ;;  %s449_s2 = inlined_call_operand.vmem [shape: bf16[8,128], index: 2, kind: output, shape index: {0}]   ;;  %s450_s3 = inlined_call_operand.vmem [shape: f32[1,128], index: 3, kind: output, shape index: {1}]   ;;  %s451_s4 = inlined_call_operand.vmem [shape: f32[1,128], index: 4, kind: output, shape index: {2}]  }
   0x1   :  { %v340_v0 = vld [vmem:[%s447_s1 + $0x38] sm:$0xff]  ;;  %v339_v2 = vld [vmem:[%s447_s1 + $0x30] sm:$0xff]  ;;  %v350_v4 = vld [vmem:[%s447_s1 + $0x88] sm:$0xff]  ;;  %19 = vst [vmem:[#allocation2] sm:$0x1] %v352_v26 }
   0x2   :  { %v348_v1 = vld [vmem:[%s447_s1 + $0x78] sm:$0xff]  ;;  %181 = vmatpush.bf16.msra.mxu0 %v340_v0  ;;  %v347_v3 = vld [vmem:[%s447_s1 + $0x70] sm:$0xff]  ;;  %213 = vmatpush.bf16.msra.mxu2 %v350_v4  ;;  %v349_v5 = vld [vmem:[%s447_s1 + $0x80] sm:$0xff]  ;;  %20 = vst [vmem:[#allocation3] sm:$0x1] %v352_v26 }
   0x3   :  { %194 = vmatpush.bf16.msra.mxu1 %v348_v1  ;;  %v22_v6 = vld [vmem:[%s448_s0 + $0x8] sm:$0xf]  ;;  %v337_v11 = vld [vmem:[%s447_s1 + $0x20] sm:$0xff]  ;;  %v336_v13 = vld [vmem:[%s447_s1 + $0x18] sm:$0xff] }
   0x4   :  { %v63_v7 = vunpack.c.l.b16 %v22_v6  ;;  %v338_v8 = vld [vmem:[%s447_s1 + $0x28] sm:$0xff]  ;;  %v345_v12 = vld [vmem:[%s447_s1 + $0x60] sm:$0xff]  ;;  %v344_v14 = vld [vmem:[%s447_s1 + $0x58] sm:$0xff] }
   0x5   :  { %v346_v9 = vld [vmem:[%s447_s1 + $0x68] sm:$0xff]  ;;  %v335_v15 = vld [vmem:[%s447_s1 + $0x10] sm:$0xff]  ;;  %v21_v19 = vld [vmem:[%s448_s0] sm:$0xff] }
   0x6   :  { %182 = vmatpush.bf16.msra.mxu0 %v339_v2  ;;  %v66_v10 = vpack.c.b16 %v63_v7, %v63_v7  ;;  %214 = vmatpush.bf16.msra.mxu2 %v349_v5  ;;  %v343_v16 = vld [vmem:[%s447_s1 + $0x50] sm:$0xff]  ;;  %v334_v17 = vld [vmem:[%s447_s1 + $0x8] sm:$0xff]  ;;  %v61_v20 = vunpack.c.l.b16 %v21_v19  ;;  %v62_v21 = vunpack.c.h.b16 %v21_v19  ;;  %v333_v22 = vld [vmem:[%s447_s1] sm:$0xff] }
   0x7   :  { %195 = vmatpush.bf16.msra.mxu1 %v347_v3  ;;  %v342_v18 = vld [vmem:[%s447_s1 + $0x48] sm:$0xff]  ;;  %v341_v23 = vld [vmem:[%s447_s1 + $0x40] sm:$0xff] }
   0x8   :  { %v64_v24 = vpack.c.b16 %v61_v20, %v61_v20  ;;  %v65_v25 = vpack.c.b16 %v62_v21, %v62_v21  ;;  %v222_v46 = vld [vmem:[#allocation2] sm:$0x1] }
   0x9   :  { %332 = vmatmul.msk.bf16.vlgmr.msra.gmra.mxu2 %vm177_vm0, %v66_v10  ;;  %v231_v49 = vld [vmem:[#allocation3] sm:$0x1] }
   0xa   :  { %183 = vmatpush.bf16.msra.mxu0 %v338_v8 }
   0xb   :  { %196 = vmatpush.bf16.msra.mxu1 %v346_v9 }
   0xe   :  { %184 = vmatpush.bf16.msra.mxu0 %v337_v11 }
   0xf   :  { %197 = vmatpush.bf16.msra.mxu1 %v345_v12 }
  0x12   :  { %185 = vmatpush.bf16.msra.mxu0 %v336_v13 }
  0x13   :  { %198 = vmatpush.bf16.msra.mxu1 %v344_v14 }
  0x16   :  { %186 = vmatpush.bf16.msra.mxu0 %v335_v15 }
  0x17   :  { %199 = vmatpush.bf16.msra.mxu1 %v343_v16 }
  0x1a   :  { %187 = vmatpush.bf16.msra.mxu0 %v334_v17 }
  0x1b   :  { %200 = vmatpush.bf16.msra.mxu1 %v342_v18 }
  0x1e   :  { %188 = vmatpush.bf16.msra.mxu0 %v333_v22 }
  0x1f   :  { %201 = vmatpush.bf16.msra.mxu1 %v341_v23 }
  0x21   :  { %189 = vmatmul.bf16.vlgmr.msra.gmra.mxu0 %v64_v24 }
  0x22   :  { %202 = vmatmul.bf16.vlgmr.msra.gmra.mxu1 %v65_v25 }
  0x8c   :  { %v216_v27 = vpop.f32.mrf.mxu2 }
  0x94   :  { %v218_v28 = vpop.f32.mrf.mxu2 }
  0x9e   :  { %v190_v29 = vpop.f32.mrf.mxu0 }
  0x9f   :  { %v203_v30 = vpop.f32.mrf.mxu1 }
  0xa0   :  { %v204_v31 = vadd.f32 %v203_v30, %v190_v29 }
  0xa2   :  { %v217_v32 = vadd.f32 %v216_v27, %v204_v31 }
  0xa4   :  { %v220_v33 = vpack.c.bf16 %v217_v32, %v217_v32  ;;  %v223_v34 = vrot.slane %v217_v32, 4  ;;  %v232_v35 = vmul.f32 %v217_v32, %v217_v32 }
  0xa6   :  { %221 = vst [vmem:[%s449_s2] sm:$0xf] %v220_v33  ;;  %v224_v36 = vadd.f32 %v223_v34, %v217_v32  ;;  %v233_v37 = vrot.slane %v232_v35, 4  ;;  %v192_v38 = vpop.f32.mrf.mxu0 }
  0xa7   :  { %v205_v39 = vpop.f32.mrf.mxu1 }
  0xa8   :  { %v225_v40 = vrot.slane %v224_v36, 2  ;;  %v234_v41 = vadd.f32 %v233_v37, %v232_v35 }
  0xaa   :  { %v226_v42 = vadd.f32 %v225_v40, %v224_v36  ;;  %v235_v43 = vrot.slane %v234_v41, 2 }
  0xac   :  { %v227_v44 = vrot.slane %v226_v42, 1  ;;  %v236_v45 = vadd.f32 %v235_v43, %v234_v41 }
  0xae   :  { %v228_v47 = vadd.f32 %v227_v44, %v226_v42  ;;  %v237_v48 = vrot.slane %v236_v45, 1 }
  0xb0   :  { %v229_v50 = vadd.f32 %v228_v47, %v222_v46  ;;  %v238_v51 = vadd.f32 %v237_v48, %v236_v45 }
  0xb2   :  { %230 = vst [vmem:[#allocation2] sm:$0x1] %v229_v50  ;;  %v239_v52 = vadd.f32 %v238_v51, %v231_v49 }
  0xb4   :  { %240 = vst [vmem:[#allocation3] sm:$0x1] %v239_v52 }
  0xb9   :  { %v244_v53 = vld [vmem:[#allocation2] sm:$0x1] }
  0xba   :  { %245 = vst [vmem:[%s450_s3] sm:$0x1] %v244_v53 }
  0xbb   :  { %v246_v54 = vld [vmem:[#allocation3] sm:$0x1] }
  0xbc   :  { %247 = vst [vmem:[%s451_s4] sm:$0x1] %v246_v54 }

// kernel: resnet_forward.68
= control target key start
LH: loop header
LB: loop body
LE: loop exit
PB: predicated region body
PF: predicated region fallthrough
CT: control target
= control target key end

     0   :  { %s124_s1 = inlined_call_operand.vmem [shape: f32[1,128], index: 1, kind: input, shape index: {}]   ;;  %s125_s2 = inlined_call_operand.vmem [shape: f32[1,128], index: 2, kind: input, shape index: {}]   ;;  %s126_s0 = inlined_call_operand.vmem [shape: bf16[8,128], index: 0, kind: input, shape index: {}]   ;;  %s127_s3 = inlined_call_operand.vmem [shape: f32[1,128], index: 3, kind: input, shape index: {}]   ;;  %s128_s4 = inlined_call_operand.vmem [shape: f32[1,128], index: 4, kind: input, shape index: {}]   ;;  %s129_s5 = inlined_call_operand.vmem [shape: bf16[8,128], index: 5, kind: input, shape index: {}]   ;;  %s130_s6 = inlined_call_operand.vmem [shape: bf16[8,128], index: 6, kind: output, shape index: {}]  }
   0x1   :  { %v23_v0 = vld [vmem:[%s124_s1] sm:$0x1] }
   0x2   :  { %v25_v1 = vld [vmem:[%s125_s2] sm:$0x1]  ;;  %v24_v2 = vmul.f32 0.125, %v23_v0 }
   0x3   :  { %v26_v3 = vmul.f32 0.125, %v25_v1  ;;  %v41_v14 = vld [vmem:[%s127_s3] sm:$0x1] }
   0x4   :  { %v27_v4 = vmul.f32 %v24_v2, %v24_v2  ;;  %v46_v15 = vld [vmem:[%s126_s0] sm:$0xf] }
   0x5   :  { %v47_v18 = vunpack.c.l.bf16 %v46_v15  ;;  %v43_v19 = vld [vmem:[%s128_s4] sm:$0x1] }
   0x6   :  { %v28_v5 = vsub.f32 %v26_v3, %v27_v4  ;;  %v56_v22 = vld [vmem:[%s129_s5] sm:$0xf] }
   0x7   :  { %v57_v26 = vunpack.c.l.bf16 %v56_v22 }
   0x8   :  { %v29_v6 = vmax.f32 %v28_v5, 0.0 }
   0xa   :  { %v30_v7 = vadd.f32 1e-05, %v29_v6 }
   0xc   :  { %66 = vrsqrt.f32 %v30_v7  ;;  %vm37_vm0 = vweird.f32 %v30_v7 }
  0x12   :  { %v67_v8 = vpop.eup %66 }
  0x13   :  { %v32_v9 = vmul.f32 %v67_v8, %v30_v7  ;;  %vm38_vm1 = vweird.f32 %v67_v8 }
  0x14   :  { %vm39_vm2 = vmor %vm37_vm0, %vm38_vm1 }
  0x15   :  { %v33_v10 = vmul.f32 %v67_v8, %v32_v9 }
  0x17   :  { %v34_v11 = vmul.f32 0.5, %v33_v10 }
  0x19   :  { %v35_v12 = vsub.f32 1.5, %v34_v11 }
  0x1b   :  { %v36_v13 = vmul.f32 %v67_v8, %v35_v12 }
  0x1d   :  { %v40_v16 = vsel %vm39_vm2, %v67_v8, %v36_v13 }
  0x1e   :  { %v42_v17 = vmul.f32 %v41_v14, %v40_v16 }
  0x20   :  { %v44_v20 = vmul.f32 %v42_v17, %v24_v2  ;;  %v49_v21 = vperm.slane %v42_v17, 0 }
  0x22   :  { %v45_v23 = vsub.f32 %v43_v19, %v44_v20  ;;  %v51_v24 = vmul.f32 %v49_v21, %v47_v18 }
  0x24   :  { %v53_v25 = vperm.slane %v45_v23, 0 }
  0x26   :  { %v55_v27 = vadd.f32 %v53_v25, %v51_v24 }
  0x28   :  { %v58_v28 = vadd.f32 %v57_v26, %v55_v27 }
  0x2a   :  { %v59_v29 = vmax.f32 %v58_v28, 0.0 }
  0x2c   :  { %v60_v30 = vpack.c.bf16 %v59_v29, %v59_v29 }
  0x2e   :  { %61 = vst [vmem:[%s130_s6] sm:$0xf] %v60_v30 }

// kernel: resnet_forward.64
= control target key start
LH: loop header
LB: loop body
LE: loop exit
PB: predicated region body
PF: predicated region fallthrough
CT: control target
= control target key end

     0   :  { %s201_s1 = inlined_call_operand.vmem [shape: f32[1,128], index: 1, kind: input, shape index: {}]   ;;  %s202_s2 = inlined_call_operand.vmem [shape: f32[1,128], index: 2, kind: input, shape index: {}]   ;;  %s203_s6 = inlined_call_operand.vmem [shape: f32[1,128], index: 6, kind: input, shape index: {}]   ;;  %s204_s7 = inlined_call_operand.vmem [shape: f32[1,128], index: 7, kind: input, shape index: {}]   ;;  %s205_s0 = inlined_call_operand.vmem [shape: bf16[8,128], index: 0, kind: input, shape index: {}]   ;;  %s206_s3 = inlined_call_operand.vmem [shape: f32[1,128], index: 3, kind: input, shape index: {}]   ;;  %s207_s5 = inlined_call_operand.vmem [shape: bf16[8,128], index: 5, kind: input, shape index: {}]   ;;  %s208_s8 = inlined_call_operand.vmem [shape: f32[1,128], index: 8, kind: input, shape index: {}]   ;;  %s209_s4 = inlined_call_operand.vmem [shape: f32[1,128], index: 4, kind: input, shape index: {}]   ;;  %s210_s9 = inlined_call_operand.vmem [shape: f32[1,128], index: 9, kind: input, shape index: {}]   ;;  %s211_s10 = inlined_call_operand.vmem [shape: bf16[8,128], index: 10, kind: output, shape index: {}]  }
   0x1   :  { %v35_v0 = vld [vmem:[%s201_s1] sm:$0x1] }
   0x2   :  { %v37_v1 = vld [vmem:[%s202_s2] sm:$0x1]  ;;  %v36_v2 = vmul.f32 0.125, %v35_v0 }
   0x3   :  { %v38_v3 = vmul.f32 0.125, %v37_v1  ;;  %v68_v4 = vld [vmem:[%s203_s6] sm:$0x1] }
   0x4   :  { %v70_v5 = vld [vmem:[%s204_s7] sm:$0x1]  ;;  %v39_v6 = vmul.f32 %v36_v2, %v36_v2  ;;  %v69_v7 = vmul.f32 0.125, %v68_v4 }
   0x5   :  { %v71_v8 = vmul.f32 0.125, %v70_v5  ;;  %v53_v26 = vld [vmem:[%s206_s3] sm:$0x1] }
   0x6   :  { %v40_v9 = vsub.f32 %v38_v3, %v39_v6  ;;  %v72_v10 = vmul.f32 %v69_v7, %v69_v7  ;;  %v58_v27 = vld [vmem:[%s205_s0] sm:$0xf] }
   0x7   :  { %v86_v31 = vld [vmem:[%s208_s8] sm:$0x1]  ;;  %v59_v34 = vunpack.c.l.bf16 %v58_v27 }
   0x8   :  { %v41_v11 = vmax.f32 %v40_v9, 0.0  ;;  %v73_v12 = vsub.f32 %v71_v8, %v72_v10  ;;  %v91_v32 = vld [vmem:[%s207_s5] sm:$0xf] }
   0x9   :  { %v55_v35 = vld [vmem:[%s209_s4] sm:$0x1]  ;;  %v92_v40 = vunpack.c.l.bf16 %v91_v32 }
   0xa   :  { %v42_v13 = vadd.f32 1e-05, %v41_v11  ;;  %v74_v14 = vmax.f32 %v73_v12, 0.0  ;;  %v88_v41 = vld [vmem:[%s210_s9] sm:$0x1] }
   0xc   :  { %109 = vrsqrt.f32 %v42_v13  ;;  %v75_v15 = vadd.f32 1e-05, %v74_v14  ;;  %vm49_vm0 = vweird.f32 %v42_v13 }
   0xe   :  { %111 = vrsqrt.f32 %v75_v15  ;;  %vm82_vm2 = vweird.f32 %v75_v15 }
  0x12   :  { %v110_v16 = vpop.eup %109 }
  0x13   :  { %v44_v17 = vmul.f32 %v110_v16, %v42_v13  ;;  %vm50_vm1 = vweird.f32 %v110_v16 }
  0x14   :  { %v112_v18 = vpop.eup %111  ;;  %vm51_vm4 = vmor %vm49_vm0, %vm50_vm1 }
  0x15   :  { %v45_v19 = vmul.f32 %v110_v16, %v44_v17  ;;  %v77_v20 = vmul.f32 %v112_v18, %v75_v15  ;;  %vm83_vm3 = vweird.f32 %v112_v18 }
  0x16   :  { %vm84_vm5 = vmor %vm82_vm2, %vm83_vm3 }
  0x17   :  { %v46_v21 = vmul.f32 0.5, %v45_v19  ;;  %v78_v22 = vmul.f32 %v112_v18, %v77_v20 }
  0x19   :  { %v47_v23 = vsub.f32 1.5, %v46_v21  ;;  %v79_v24 = vmul.f32 0.5, %v78_v22 }
  0x1b   :  { %v48_v25 = vmul.f32 %v110_v16, %v47_v23  ;;  %v80_v28 = vsub.f32 1.5, %v79_v24 }
  0x1d   :  { %v52_v29 = vsel %vm51_vm4, %v110_v16, %v48_v25  ;;  %v81_v30 = vmul.f32 %v112_v18, %v80_v28 }
  0x1e   :  { %v54_v33 = vmul.f32 %v53_v26, %v52_v29 }
  0x1f   :  { %v85_v36 = vsel %vm84_vm5, %v112_v18, %v81_v30 }
  0x20   :  { %v56_v37 = vmul.f32 %v54_v33, %v36_v2  ;;  %v61_v38 = vperm.slane %v54_v33, 0  ;;  %v87_v39 = vmul.f32 %v86_v31, %v85_v36 }
  0x22   :  { %v57_v42 = vsub.f32 %v55_v35, %v56_v37  ;;  %v63_v43 = vmul.f32 %v61_v38, %v59_v34  ;;  %v89_v44 = vmul.f32 %v87_v39, %v69_v7  ;;  %v94_v45 = vperm.slane %v87_v39, 0 }
  0x24   :  { %v65_v46 = vperm.slane %v57_v42, 0  ;;  %v90_v47 = vsub.f32 %v88_v41, %v89_v44  ;;  %v96_v48 = vmul.f32 %v94_v45, %v92_v40 }
  0x26   :  { %v67_v49 = vadd.f32 %v65_v46, %v63_v43  ;;  %v98_v50 = vperm.slane %v90_v47, 0 }
  0x28   :  { %v100_v51 = vadd.f32 %v98_v50, %v96_v48 }
  0x2a   :  { %v101_v52 = vadd.f32 %v100_v51, %v67_v49 }
  0x2c   :  { %v102_v53 = vmax.f32 %v101_v52, 0.0 }
  0x2e   :  { %v103_v54 = vpack.c.bf16 %v102_v53, %v102_v53 }
  0x30   :  { %104 = vst [vmem:[%s211_s10] sm:$0xf] %v103_v54 }

// kernel: resnet_forward.65
= control target key start
LH: loop header
LB: loop body
LE: loop exit
PB: predicated region body
PF: predicated region fallthrough
CT: control target
= control target key end

     0   :  { %vm329_vm0 = vcmask 523264   ;;  %v620_v49 = vmov 0.0   ;;  %s772_s1 = inlined_call_operand.vmem [shape: bf16[576,128], index: 1, kind: input, shape index: {}]   ;;  %s773_s0 = inlined_call_operand.vmem [shape: bf16[8,576], index: 0, kind: input, shape index: {}]   ;;  %s774_s2 = inlined_call_operand.vmem [shape: bf16[8,128], index: 2, kind: output, shape index: {0}]   ;;  %s775_s3 = inlined_call_operand.vmem [shape: f32[1,128], index: 3, kind: output, shape index: {1}]   ;;  %s776_s4 = inlined_call_operand.vmem [shape: f32[1,128], index: 4, kind: output, shape index: {2}]  }
   0x1   :  { %v590_v0 = vld [vmem:[%s772_s1 + $0x38] sm:$0xff]  ;;  %v589_v4 = vld [vmem:[%s772_s1 + $0x30] sm:$0xff]  ;;  %v588_v8 = vld [vmem:[%s772_s1 + $0x28] sm:$0xff]  ;;  %19 = vst [vmem:[#allocation2] sm:$0x1] %v620_v49 }
   0x2   :  { %v598_v1 = vld [vmem:[%s772_s1 + $0x78] sm:$0xff]  ;;  %333 = vmatpush.bf16.msra.mxu0 %v590_v0  ;;  %v597_v5 = vld [vmem:[%s772_s1 + $0x70] sm:$0xff]  ;;  %v596_v9 = vld [vmem:[%s772_s1 + $0x68] sm:$0xff]  ;;  %20 = vst [vmem:[#allocation3] sm:$0x1] %v620_v49 }
   0x3   :  { %v606_v2 = vld [vmem:[%s772_s1 + $0xb8] sm:$0xff]  ;;  %346 = vmatpush.bf16.msra.mxu1 %v598_v1  ;;  %v605_v6 = vld [vmem:[%s772_s1 + $0xb0] sm:$0xff]  ;;  %v604_v10 = vld [vmem:[%s772_s1 + $0xa8] sm:$0xff] }
   0x4   :  { %v614_v3 = vld [vmem:[%s772_s1 + $0xf8] sm:$0xff]  ;;  %359 = vmatpush.bf16.msra.mxu2 %v606_v2  ;;  %v613_v7 = vld [vmem:[%s772_s1 + $0xf0] sm:$0xff]  ;;  %v612_v11 = vld [vmem:[%s772_s1 + $0xe8] sm:$0xff] }
   0x5   :  { %372 = vmatpush.bf16.msra.mxu3 %v614_v3  ;;  %v587_v12 = vld [vmem:[%s772_s1 + $0x20] sm:$0xff]  ;;  %v586_v16 = vld [vmem:[%s772_s1 + $0x18] sm:$0xff]  ;;  %v585_v20 = vld [vmem:[%s772_s1 + $0x10] sm:$0xff] }
   0x6   :  { %334 = vmatpush.bf16.msra.mxu0 %v589_v4  ;;  %v595_v13 = vld [vmem:[%s772_s1 + $0x60] sm:$0xff]  ;;  %v594_v17 = vld [vmem:[%s772_s1 + $0x58] sm:$0xff]  ;;  %v593_v21 = vld [vmem:[%s772_s1 + $0x50] sm:$0xff] }
   0x7   :  { %347 = vmatpush.bf16.msra.mxu1 %v597_v5  ;;  %v603_v14 = vld [vmem:[%s772_s1 + $0xa0] sm:$0xff]  ;;  %v602_v18 = vld [vmem:[%s772_s1 + $0x98] sm:$0xff]  ;;  %v601_v22 = vld [vmem:[%s772_s1 + $0x90] sm:$0xff] }
   0x8   :  { %360 = vmatpush.bf16.msra.mxu2 %v605_v6  ;;  %v611_v15 = vld [vmem:[%s772_s1 + $0xe0] sm:$0xff]  ;;  %v610_v19 = vld [vmem:[%s772_s1 + $0xd8] sm:$0xff]  ;;  %v609_v23 = vld [vmem:[%s772_s1 + $0xd0] sm:$0xff] }
   0x9   :  { %373 = vmatpush.bf16.msra.mxu3 %v613_v7  ;;  %v584_v24 = vld [vmem:[%s772_s1 + $0x8] sm:$0xff]  ;;  %v21_v26 = vld [vmem:[%s773_s0] sm:$0xff]  ;;  %v618_v38 = vld [vmem:[%s772_s1 + $0x118] sm:$0xff] }
   0xa   :  { %335 = vmatpush.bf16.msra.mxu0 %v588_v8  ;;  %v592_v25 = vld [vmem:[%s772_s1 + $0x48] sm:$0xff]  ;;  %v99_v30 = vunpack.c.l.b16 %v21_v26  ;;  %v100_v31 = vunpack.c.h.b16 %v21_v26  ;;  %v583_v32 = vld [vmem:[%s772_s1] sm:$0xff]  ;;  %v617_v43 = vld [vmem:[%s772_s1 + $0x110] sm:$0xff] }
   0xb   :  { %348 = vmatpush.bf16.msra.mxu1 %v596_v9  ;;  %v600_v27 = vld [vmem:[%s772_s1 + $0x88] sm:$0xff]  ;;  %v591_v33 = vld [vmem:[%s772_s1 + $0x40] sm:$0xff]  ;;  %v23_v45 = vld [vmem:[%s773_s0 + $0x10] sm:$0xf] }
   0xc   :  { %361 = vmatpush.bf16.msra.mxu2 %v604_v10  ;;  %v608_v28 = vld [vmem:[%s772_s1 + $0xc8] sm:$0xff]  ;;  %v599_v36 = vld [vmem:[%s772_s1 + $0x80] sm:$0xff]  ;;  %v104_v39 = vpack.c.b16 %v99_v30, %v99_v30  ;;  %v105_v40 = vpack.c.b16 %v100_v31, %v100_v31  ;;  %v103_v47 = vunpack.c.l.b16 %v23_v45 }
   0xd   :  { %374 = vmatpush.bf16.msra.mxu3 %v612_v11  ;;  %v22_v29 = vld [vmem:[%s773_s0 + $0x8] sm:$0xff]  ;;  %v607_v37 = vld [vmem:[%s772_s1 + $0xc0] sm:$0xff] }
   0xe   :  { %336 = vmatpush.bf16.msra.mxu0 %v587_v12  ;;  %v101_v34 = vunpack.c.l.b16 %v22_v29  ;;  %v102_v35 = vunpack.c.h.b16 %v22_v29  ;;  %v616_v44 = vld [vmem:[%s772_s1 + $0x108] sm:$0xff]  ;;  %v615_v46 = vld [vmem:[%s772_s1 + $0x100] sm:$0xff]  ;;  %v108_v48 = vpack.c.b16 %v103_v47, %v103_v47 }
   0xf   :  { %349 = vmatpush.bf16.msra.mxu1 %v595_v13  ;;  %v400_v11 = vld [vmem:[#allocation2] sm:$0x1] }
  0x10   :  { %362 = vmatpush.bf16.msra.mxu2 %v603_v14  ;;  %v106_v41 = vpack.c.b16 %v101_v34, %v101_v34  ;;  %v107_v42 = vpack.c.b16 %v102_v35, %v102_v35  ;;  %v409_v14 = vld [vmem:[#allocation3] sm:$0x1] }
  0x11   :  { %375 = vmatpush.bf16.msra.mxu3 %v611_v15 }
  0x12   :  { %337 = vmatpush.bf16.msra.mxu0 %v586_v16 }
  0x13   :  { %350 = vmatpush.bf16.msra.mxu1 %v594_v17 }
  0x14   :  { %363 = vmatpush.bf16.msra.mxu2 %v602_v18 }
  0x15   :  { %376 = vmatpush.bf16.msra.mxu3 %v610_v19 }
  0x16   :  { %338 = vmatpush.bf16.msra.mxu0 %v585_v20 }
  0x17   :  { %351 = vmatpush.bf16.msra.mxu1 %v593_v21 }
  0x18   :  { %364 = vmatpush.bf16.msra.mxu2 %v601_v22 }
  0x19   :  { %377 = vmatpush.bf16.msra.mxu3 %v609_v23 }
  0x1a   :  { %339 = vmatpush.bf16.msra.mxu0 %v584_v24 }
  0x1b   :  { %352 = vmatpush.bf16.msra.mxu1 %v592_v25 }
  0x1c   :  { %365 = vmatpush.bf16.msra.mxu2 %v600_v27 }
  0x1d   :  { %378 = vmatpush.bf16.msra.mxu3 %v608_v28 }
  0x1e   :  { %340 = vmatpush.bf16.msra.mxu0 %v583_v32 }
  0x1f   :  { %353 = vmatpush.bf16.msra.mxu1 %v591_v33 }
  0x20   :  { %366 = vmatpush.bf16.msra.mxu2 %v599_v36 }
  0x21   :  { %379 = vmatpush.bf16.msra.mxu3 %v607_v37  ;;  %341 = vmatmul.bf16.vlgmr.msra.gmra.mxu0 %v104_v39 }
  0x22   :  { %389 = vmatpush.bf16.msrb.mxu0 %v618_v38  ;;  %354 = vmatmul.bf16.vlgmr.msra.gmra.mxu1 %v105_v40 }
  0x23   :  { %367 = vmatmul.bf16.vlgmr.msra.gmra.mxu2 %v106_v41 }
  0x24   :  { %380 = vmatmul.bf16.vlgmr.msra.gmra.mxu3 %v107_v42 }
  0x26   :  { %390 = vmatpush.bf16.msrb.mxu0 %v617_v43 }
  0x2a   :  { %391 = vmatpush.bf16.msrb.mxu0 %v616_v44 }
  0x2e   :  { %392 = vmatpush.bf16.msrb.mxu0 %v615_v46 }
  0x31   :  { %582 = vmatmul.msk.bf16.vlgmr.msrb.gmra.mxu0 %vm329_vm0, %v108_v48 }
  0x9e   :  { %v342_v50 = vpop.f32.mrf.mxu0 }
  0x9f   :  { %v355_v51 = vpop.f32.mrf.mxu1 }
  0xa0   :  { %v356_v56 = vadd.f32 %v355_v51, %v342_v50 }
  0xa6   :  { %v368_v52 = vpop.f32.mrf.mxu2  ;;  %v344_v54 = vpop.f32.mrf.mxu0 }
  0xa7   :  { %v381_v53 = vpop.f32.mrf.mxu3  ;;  %v357_v55 = vpop.f32.mrf.mxu1  ;;  %v369_v57 = vadd.f32 %v368_v52, %v356_v56 }
  0xa9   :  { %v382_v58 = vadd.f32 %v381_v53, %v369_v57 }
  0xae   :  { %v370_v59 = vpop.f32.mrf.mxu2  ;;  %v394_v61 = vpop.f32.mrf.mxu0 }
  0xaf   :  { %v383_v60 = vpop.f32.mrf.mxu3  ;;  %v395_v62 = vadd.f32 %v394_v61, %v382_v58 }
  0xb1   :  { %v398_v63 = vpack.c.bf16 %v395_v62, %v395_v62  ;;  %v401_v0 = vrot.slane %v395_v62, 4  ;;  %v410_v1 = vmul.f32 %v395_v62, %v395_v62 }
  0xb3   :  { %399 = vst [vmem:[%s774_s2] sm:$0xf] %v398_v63  ;;  %v402_v2 = vadd.f32 %v401_v0, %v395_v62  ;;  %v411_v3 = vrot.slane %v410_v1, 4 }
  0xb5   :  { %v403_v4 = vrot.slane %v402_v2, 2  ;;  %v412_v5 = vadd.f32 %v411_v3, %v410_v1 }
  0xb6   :  { %v396_v6 = vpop.f32.mrf.mxu0 }
  0xb7   :  { %v404_v7 = vadd.f32 %v403_v4, %v402_v2  ;;  %v413_v8 = vrot.slane %v412_v5, 2 }
  0xb9   :  { %v405_v9 = vrot.slane %v404_v7, 1  ;;  %v414_v10 = vadd.f32 %v413_v8, %v412_v5 }
  0xbb   :  { %v406_v12 = vadd.f32 %v405_v9, %v404_v7  ;;  %v415_v13 = vrot.slane %v414_v10, 1 }
  0xbd   :  { %v407_v15 = vadd.f32 %v406_v12, %v400_v11  ;;  %v416_v16 = vadd.f32 %v415_v13, %v414_v10 }
  0xbf   :  { %408 = vst [vmem:[#allocation2] sm:$0x1] %v407_v15  ;;  %v417_v17 = vadd.f32 %v416_v16, %v409_v14 }
  0xc1   :  { %418 = vst [vmem:[#allocation3] sm:$0x1] %v417_v17 }
  0xc6   :  { %v422_v18 = vld [vmem:[#allocation2] sm:$0x1] }
  0xc7   :  { %423 = vst [vmem:[%s775_s3] sm:$0x1] %v422_v18 }
  0xc8   :  { %v424_v19 = vld [vmem:[#allocation3] sm:$0x1] }
  0xc9   :  { %425 = vst [vmem:[%s776_s4] sm:$0x1] %v424_v19 }

// kernel: resnet_forward.63
= control target key start
LH: loop header
LB: loop body
LE: loop exit
PB: predicated region body
PF: predicated region fallthrough
CT: control target
= control target key end

     0   :  { %vm340_vm0 = vcmask 523264   ;;  %vm447_vm1 = vcmask 261120   ;;  %v713_v52 = vmov 0.0   ;;  %s908_s1 = inlined_call_operand.vmem [shape: bf16[576,128], index: 1, kind: input, shape index: {}]   ;;  %s909_s0 = inlined_call_operand.vmem [shape: bf16[8,576], index: 0, kind: input, shape index: {}]   ;;  %s910_s3 = inlined_call_operand.vmem [shape: bf16[32,128], index: 3, kind: input, shape index: {}]   ;;  %s911_s2 = inlined_call_operand.vmem [shape: bf16[8,32], index: 2, kind: input, shape index: {}]   ;;  %s912_s7 = inlined_call_operand.vmem [shape: bf16[8,128], index: 7, kind: output, shape index: {3}]   ;;  %s913_s4 = inlined_call_operand.vmem [shape: bf16[8,128], index: 4, kind: output, shape index: {0}]   ;;  %s914_s8 = inlined_call_operand.vmem [shape: f32[1,128], index: 8, kind: output, shape index: {4}]   ;;  %s915_s5 = inlined_call_operand.vmem [shape: f32[1,128], index: 5, kind: output, shape index: {1}]   ;;  %s916_s9 = inlined_call_operand.vmem [shape: f32[1,128], index: 9, kind: output, shape index: {5}]   ;;  %s917_s6 = inlined_call_operand.vmem [shape: f32[1,128], index: 6, kind: output, shape index: {2}]  }
   0x1   :  { %v681_v0 = vld [vmem:[%s908_s1 + $0x38] sm:$0xff]  ;;  %v680_v4 = vld [vmem:[%s908_s1 + $0x30] sm:$0xff]  ;;  %v679_v8 = vld [vmem:[%s908_s1 + $0x28] sm:$0xff]  ;;  %28 = vst [vmem:[#allocation2] sm:$0x1] %v713_v52 }
   0x2   :  { %v689_v1 = vld [vmem:[%s908_s1 + $0x78] sm:$0xff]  ;;  %344 = vmatpush.bf16.msra.mxu0 %v681_v0  ;;  %v688_v5 = vld [vmem:[%s908_s1 + $0x70] sm:$0xff]  ;;  %v687_v9 = vld [vmem:[%s908_s1 + $0x68] sm:$0xff]  ;;  %29 = vst [vmem:[#allocation3] sm:$0x1] %v713_v52 }
   0x3   :  { %v697_v2 = vld [vmem:[%s908_s1 + $0xb8] sm:$0xff]  ;;  %357 = vmatpush.bf16.msra.mxu1 %v689_v1  ;;  %v696_v6 = vld [vmem:[%s908_s1 + $0xb0] sm:$0xff]  ;;  %v695_v10 = vld [vmem:[%s908_s1 + $0xa8] sm:$0xff]  ;;  %30 = vst [vmem:[#allocation4] sm:$0x1] %v713_v52 }
   0x4   :  { %v705_v3 = vld [vmem:[%s908_s1 + $0xf8] sm:$0xff]  ;;  %370 = vmatpush.bf16.msra.mxu2 %v697_v2  ;;  %v704_v7 = vld [vmem:[%s908_s1 + $0xf0] sm:$0xff]  ;;  %v703_v11 = vld [vmem:[%s908_s1 + $0xe8] sm:$0xff]  ;;  %31 = vst [vmem:[#allocation5] sm:$0x1] %v713_v52 }
   0x5   :  { %383 = vmatpush.bf16.msra.mxu3 %v705_v3  ;;  %v678_v12 = vld [vmem:[%s908_s1 + $0x20] sm:$0xff]  ;;  %v677_v16 = vld [vmem:[%s908_s1 + $0x18] sm:$0xff]  ;;  %v676_v20 = vld [vmem:[%s908_s1 + $0x10] sm:$0xff] }
   0x6   :  { %345 = vmatpush.bf16.msra.mxu0 %v680_v4  ;;  %v686_v13 = vld [vmem:[%s908_s1 + $0x60] sm:$0xff]  ;;  %v685_v17 = vld [vmem:[%s908_s1 + $0x58] sm:$0xff]  ;;  %v684_v21 = vld [vmem:[%s908_s1 + $0x50] sm:$0xff] }
   0x7   :  { %358 = vmatpush.bf16.msra.mxu1 %v688_v5  ;;  %v694_v14 = vld [vmem:[%s908_s1 + $0xa0] sm:$0xff]  ;;  %v693_v18 = vld [vmem:[%s908_s1 + $0x98] sm:$0xff]  ;;  %v692_v22 = vld [vmem:[%s908_s1 + $0x90] sm:$0xff] }
   0x8   :  { %371 = vmatpush.bf16.msra.mxu2 %v696_v6  ;;  %v702_v15 = vld [vmem:[%s908_s1 + $0xe0] sm:$0xff]  ;;  %v701_v19 = vld [vmem:[%s908_s1 + $0xd8] sm:$0xff]  ;;  %v700_v23 = vld [vmem:[%s908_s1 + $0xd0] sm:$0xff] }
   0x9   :  { %384 = vmatpush.bf16.msra.mxu3 %v704_v7  ;;  %v675_v24 = vld [vmem:[%s908_s1 + $0x8] sm:$0xff]  ;;  %v32_v26 = vld [vmem:[%s909_s0] sm:$0xff]  ;;  %v709_v38 = vld [vmem:[%s908_s1 + $0x118] sm:$0xff] }
   0xa   :  { %346 = vmatpush.bf16.msra.mxu0 %v679_v8  ;;  %v683_v25 = vld [vmem:[%s908_s1 + $0x48] sm:$0xff]  ;;  %v110_v30 = vunpack.c.l.b16 %v32_v26  ;;  %v111_v31 = vunpack.c.h.b16 %v32_v26  ;;  %v674_v32 = vld [vmem:[%s908_s1] sm:$0xff]  ;;  %v708_v44 = vld [vmem:[%s908_s1 + $0x110] sm:$0xff] }
   0xb   :  { %359 = vmatpush.bf16.msra.mxu1 %v687_v9  ;;  %v691_v27 = vld [vmem:[%s908_s1 + $0x88] sm:$0xff]  ;;  %v682_v33 = vld [vmem:[%s908_s1 + $0x40] sm:$0xff]  ;;  %v34_v47 = vld [vmem:[%s909_s0 + $0x10] sm:$0xf] }
   0xc   :  { %372 = vmatpush.bf16.msra.mxu2 %v695_v10  ;;  %v699_v28 = vld [vmem:[%s908_s1 + $0xc8] sm:$0xff]  ;;  %v690_v36 = vld [vmem:[%s908_s1 + $0x80] sm:$0xff]  ;;  %v115_v40 = vpack.c.b16 %v110_v30, %v110_v30  ;;  %v116_v41 = vpack.c.b16 %v111_v31, %v111_v31  ;;  %v114_v49 = vunpack.c.l.b16 %v34_v47 }
   0xd   :  { %385 = vmatpush.bf16.msra.mxu3 %v703_v11  ;;  %v33_v29 = vld [vmem:[%s909_s0 + $0x8] sm:$0xff]  ;;  %v698_v37 = vld [vmem:[%s908_s1 + $0xc0] sm:$0xff] }
   0xe   :  { %347 = vmatpush.bf16.msra.mxu0 %v678_v12  ;;  %v112_v34 = vunpack.c.l.b16 %v33_v29  ;;  %v113_v35 = vunpack.c.h.b16 %v33_v29  ;;  %v711_v39 = vld [vmem:[%s910_s3 + $0x8] sm:$0xff]  ;;  %v710_v45 = vld [vmem:[%s910_s3] sm:$0xff]  ;;  %v119_v50 = vpack.c.b16 %v114_v49, %v114_v49 }
   0xf   :  { %360 = vmatpush.bf16.msra.mxu1 %v686_v13  ;;  %v707_v46 = vld [vmem:[%s908_s1 + $0x108] sm:$0xff]  ;;  %v706_v48 = vld [vmem:[%s908_s1 + $0x100] sm:$0xff] }
  0x10   :  { %373 = vmatpush.bf16.msra.mxu2 %v694_v14  ;;  %v117_v42 = vpack.c.b16 %v112_v34, %v112_v34  ;;  %v118_v43 = vpack.c.b16 %v113_v35, %v113_v35  ;;  %v430_v51 = vld [vmem:[%s911_s2] sm:$0xf] }
  0x11   :  { %386 = vmatpush.bf16.msra.mxu3 %v702_v15  ;;  %v411_v29 = vld [vmem:[#allocation2] sm:$0x1]  ;;  %v475_v34 = vld [vmem:[#allocation5] sm:$0x1]  ;;  %v420_v35 = vld [vmem:[#allocation3] sm:$0x1] }
  0x12   :  { %348 = vmatpush.bf16.msra.mxu0 %v677_v16 }
  0x13   :  { %361 = vmatpush.bf16.msra.mxu1 %v685_v17 }
  0x14   :  { %374 = vmatpush.bf16.msra.mxu2 %v693_v18 }
  0x15   :  { %387 = vmatpush.bf16.msra.mxu3 %v701_v19 }
  0x16   :  { %349 = vmatpush.bf16.msra.mxu0 %v676_v20 }
  0x17   :  { %362 = vmatpush.bf16.msra.mxu1 %v684_v21 }
  0x18   :  { %375 = vmatpush.bf16.msra.mxu2 %v692_v22 }
  0x19   :  { %388 = vmatpush.bf16.msra.mxu3 %v700_v23 }
  0x1a   :  { %350 = vmatpush.bf16.msra.mxu0 %v675_v24  ;;  %v466_v24 = vld [vmem:[#allocation4] sm:$0x1] }
  0x1b   :  { %363 = vmatpush.bf16.msra.mxu1 %v683_v25 }
  0x1c   :  { %376 = vmatpush.bf16.msra.mxu2 %v691_v27 }
  0x1d   :  { %389 = vmatpush.bf16.msra.mxu3 %v699_v28 }
  0x1e   :  { %351 = vmatpush.bf16.msra.mxu0 %v674_v32 }
  0x1f   :  { %364 = vmatpush.bf16.msra.mxu1 %v682_v33 }
  0x20   :  { %377 = vmatpush.bf16.msra.mxu2 %v690_v36 }
  0x21   :  { %390 = vmatpush.bf16.msra.mxu3 %v698_v37  ;;  %352 = vmatmul.bf16.vlgmr.msra.gmra.mxu0 %v115_v40 }
  0x22   :  { %400 = vmatpush.bf16.msrb.mxu0 %v709_v38  ;;  %365 = vmatmul.bf16.vlgmr.msra.gmra.mxu1 %v116_v41 }
  0x23   :  { %457 = vmatpush.bf16.msrb.mxu1 %v711_v39  ;;  %378 = vmatmul.bf16.vlgmr.msra.gmra.mxu2 %v117_v42 }
  0x24   :  { %391 = vmatmul.bf16.vlgmr.msra.gmra.mxu3 %v118_v43 }
  0x26   :  { %401 = vmatpush.bf16.msrb.mxu0 %v708_v44 }
  0x27   :  { %458 = vmatpush.bf16.msrb.mxu1 %v710_v45 }
  0x2a   :  { %402 = vmatpush.bf16.msrb.mxu0 %v707_v46 }
  0x2e   :  { %403 = vmatpush.bf16.msrb.mxu0 %v706_v48 }
  0x31   :  { %664 = vmatmul.msk.bf16.vlgmr.msrb.gmra.mxu0 %vm340_vm0, %v119_v50 }
  0x32   :  { %673 = vmatmul.msk.bf16.vlgmr.msrb.gmra.mxu1 %vm447_vm1, %v430_v51 }
  0x9e   :  { %v353_v53 = vpop.f32.mrf.mxu0 }
  0x9f   :  { %v366_v54 = vpop.f32.mrf.mxu1 }
  0xa0   :  { %v367_v59 = vadd.f32 %v366_v54, %v353_v53 }
  0xa6   :  { %v379_v55 = vpop.f32.mrf.mxu2  ;;  %v355_v57 = vpop.f32.mrf.mxu0 }
  0xa7   :  { %v392_v56 = vpop.f32.mrf.mxu3  ;;  %v368_v58 = vpop.f32.mrf.mxu1  ;;  %v380_v60 = vadd.f32 %v379_v55, %v367_v59 }
  0xa9   :  { %v393_v61 = vadd.f32 %v392_v56, %v380_v60 }
  0xae   :  { %v381_v62 = vpop.f32.mrf.mxu2  ;;  %v405_v0 = vpop.f32.mrf.mxu0 }
  0xaf   :  { %v394_v63 = vpop.f32.mrf.mxu3  ;;  %v460_v1 = vpop.f32.mrf.mxu1  ;;  %v406_v2 = vadd.f32 %v405_v0, %v393_v61 }
  0xb0   :  { %v464_v3 = vpack.c.bf16 %v460_v1, %v460_v1  ;;  %v467_v4 = vrot.slane %v460_v1, 4  ;;  %v476_v5 = vmul.f32 %v460_v1, %v460_v1 }
  0xb1   :  { %v409_v6 = vpack.c.bf16 %v406_v2, %v406_v2  ;;  %v412_v7 = vrot.slane %v406_v2, 4  ;;  %v421_v8 = vmul.f32 %v406_v2, %v406_v2 }
  0xb2   :  { %465 = vst [vmem:[%s912_s7] sm:$0xf] %v464_v3  ;;  %v468_v9 = vadd.f32 %v467_v4, %v460_v1  ;;  %v477_v10 = vrot.slane %v476_v5, 4 }
  0xb3   :  { %410 = vst [vmem:[%s913_s4] sm:$0xf] %v409_v6  ;;  %v413_v11 = vadd.f32 %v412_v7, %v406_v2  ;;  %v422_v12 = vrot.slane %v421_v8, 4 }
  0xb4   :  { %v469_v13 = vrot.slane %v468_v9, 2  ;;  %v478_v14 = vadd.f32 %v477_v10, %v476_v5 }
  0xb5   :  { %v414_v15 = vrot.slane %v413_v11, 2  ;;  %v423_v16 = vadd.f32 %v422_v12, %v421_v8 }
  0xb6   :  { %v470_v17 = vadd.f32 %v469_v13, %v468_v9  ;;  %v479_v18 = vrot.slane %v478_v14, 2  ;;  %v407_v19 = vpop.f32.mrf.mxu0 }
  0xb7   :  { %v462_v20 = vpop.f32.mrf.mxu1  ;;  %v415_v21 = vadd.f32 %v414_v15, %v413_v11  ;;  %v424_v22 = vrot.slane %v423_v16, 2 }
  0xb8   :  { %v471_v23 = vrot.slane %v470_v17, 1  ;;  %v480_v25 = vadd.f32 %v479_v18, %v478_v14 }
  0xb9   :  { %v416_v26 = vrot.slane %v415_v21, 1  ;;  %v425_v27 = vadd.f32 %v424_v22, %v423_v16 }
  0xba   :  { %v472_v28 = vadd.f32 %v471_v23, %v470_v17  ;;  %v481_v30 = vrot.slane %v480_v25, 1 }
  0xbb   :  { %v417_v31 = vadd.f32 %v416_v26, %v415_v21  ;;  %v426_v32 = vrot.slane %v425_v27, 1 }
  0xbc   :  { %v473_v33 = vadd.f32 %v472_v28, %v466_v24  ;;  %v482_v36 = vadd.f32 %v481_v30, %v480_v25 }
  0xbd   :  { %v418_v37 = vadd.f32 %v417_v31, %v411_v29  ;;  %v427_v38 = vadd.f32 %v426_v32, %v425_v27 }
  0xbe   :  { %474 = vst [vmem:[#allocation4] sm:$0x1] %v473_v33  ;;  %v483_v39 = vadd.f32 %v482_v36, %v475_v34 }
  0xbf   :  { %419 = vst [vmem:[#allocation2] sm:$0x1] %v418_v37  ;;  %v428_v40 = vadd.f32 %v427_v38, %v420_v35 }
  0xc0   :  { %484 = vst [vmem:[#allocation5] sm:$0x1] %v483_v39 }
  0xc1   :  { %429 = vst [vmem:[#allocation3] sm:$0x1] %v428_v40 }
  0xc5   :  { %v492_v41 = vld [vmem:[#allocation4] sm:$0x1] }
  0xc6   :  { %493 = vst [vmem:[%s914_s8] sm:$0x1] %v492_v41  ;;  %v488_v42 = vld [vmem:[#allocation2] sm:$0x1] }
  0xc7   :  { %489 = vst [vmem:[%s915_s5] sm:$0x1] %v488_v42  ;;  %v494_v43 = vld [vmem:[#allocation5] sm:$0x1] }
  0xc8   :  { %v490_v44 = vld [vmem:[#allocation3] sm:$0x1]  ;;  %495 = vst [vmem:[%s916_s9] sm:$0x1] %v494_v43 }
  0xc9   :  { %491 = vst [vmem:[%s917_s6] sm:$0x1] %v490_v44 }

// kernel: resnet_forward.69
= control target key start
LH: loop header
LB: loop body
LE: loop exit
PB: predicated region body
PF: predicated region fallthrough
CT: control target
= control target key end

     0   :  { %vm30_vm0 = vcmask 519168   ;;  %vm115_vm1 = vcmask 1041409   ;;  %vm117_vm2 = vcmask 1042434   ;;  %vm119_vm3 = vcmask 1043459   ;;  %s243_s1 = inlined_call_operand.vmem [shape: f32[64,128], index: 1, kind: input, shape index: {}]   ;;  %s244_s0 = inlined_call_operand.vmem [shape: bf16[8,4,64], index: 0, kind: input, shape index: {}]   ;;  %s245_s2 = inlined_call_operand.vmem [shape: f32[1,128], index: 2, kind: input, shape index: {}]   ;;  %s246_s3 = inlined_call_operand.vmem [shape: f32[8,128], index: 3, kind: output, shape index: {}]  }
   0x1   :  { %v102_v0 = vld [vmem:[%s243_s1 + $0x38] sm:$0xff]  ;;  %v101_v1 = vld [vmem:[%s243_s1 + $0x30] sm:$0xff]  ;;  %v100_v2 = vld [vmem:[%s243_s1 + $0x28] sm:$0xff]  ;;  %vm121_vm4 = vcmask 1044484   ;;  %vm123_vm5 = vcmask 1045509   ;;  %vm125_vm6 = vcmask 1046534  }
   0x2   :  { %140 = vmatpush.msra.mxu0 %v102_v0  ;;  %v99_v3 = vld [vmem:[%s243_s1 + $0x20] sm:$0xff]  ;;  %v18_v9 = vld [vmem:[%s244_s0 + $0x8] sm:$0x3]  ;;  %v19_v10 = vld [vmem:[%s244_s0 + $0xa] sm:$0x3]  ;;  %vm127_vm7 = vcmask 1047559  }
   0x3   :  { %v14_v4 = vld [vmem:[%s244_s0] sm:$0x3]  ;;  %v15_v5 = vld [vmem:[%s244_s0 + $0x2] sm:$0x3]  ;;  %v16_v6 = vld [vmem:[%s244_s0 + $0x4] sm:$0x3]  ;;  %v26_v16 = vunpack.c.l.bf16 %v18_v9  ;;  %v27_v17 = vunpack.c.l.bf16 %v19_v10 }
   0x4   :  { %141 = vmatpush.msra.mxu0 %v101_v1  ;;  %v17_v7 = vld [vmem:[%s244_s0 + $0x6] sm:$0x3]  ;;  %v22_v8 = vunpack.c.l.bf16 %v14_v4  ;;  %v20_v11 = vld [vmem:[%s244_s0 + $0xc] sm:$0x3]  ;;  %v23_v12 = vunpack.c.l.bf16 %v15_v5  ;;  %v24_v13 = vunpack.c.l.bf16 %v16_v6  ;;  %v21_v15 = vld [vmem:[%s244_s0 + $0xe] sm:$0x3] }
   0x5   :  { %v25_v14 = vunpack.c.l.bf16 %v17_v7  ;;  %v28_v18 = vunpack.c.l.bf16 %v20_v11  ;;  %v98_v20 = vld [vmem:[%s243_s1 + $0x18] sm:$0xff]  ;;  %v29_v21 = vunpack.c.l.bf16 %v21_v15  ;;  %v59_v28 = vsel %vm30_vm0, %v26_v16, 0.0  ;;  %v97_v29 = vld [vmem:[%s243_s1 + $0x10] sm:$0xff]  ;;  %v96_v38 = vld [vmem:[%s243_s1 + $0x8] sm:$0xff] }
   0x6   :  { %142 = vmatpush.msra.mxu0 %v100_v2  ;;  %v31_v19 = vsel %vm30_vm0, %v22_v8, 0.0  ;;  %v38_v23 = vsel %vm30_vm0, %v23_v12, 0.0  ;;  %v45_v24 = vsel %vm30_vm0, %v24_v13, 0.0  ;;  %v60_v32 = vrot.slane %v59_v28, 4  ;;  %v95_v47 = vld [vmem:[%s243_s1] sm:$0xff] }
   0x7   :  { %v32_v22 = vrot.slane %v31_v19, 4  ;;  %v39_v25 = vrot.slane %v38_v23, 4  ;;  %v46_v26 = vrot.slane %v45_v24, 4  ;;  %v52_v27 = vsel %vm30_vm0, %v25_v14, 0.0 }
   0x8   :  { %143 = vmatpush.msra.mxu0 %v99_v3  ;;  %v53_v31 = vrot.slane %v52_v27, 4  ;;  %v66_v33 = vsel %vm30_vm0, %v27_v17, 0.0  ;;  %v73_v37 = vsel %vm30_vm0, %v28_v18, 0.0  ;;  %v61_v41 = vadd.f32 %v60_v32, %v59_v28 }
   0x9   :  { %v33_v30 = vadd.f32 %v32_v22, %v31_v19  ;;  %v40_v34 = vadd.f32 %v39_v25, %v38_v23  ;;  %v47_v35 = vadd.f32 %v46_v26, %v45_v24  ;;  %v67_v36 = vrot.slane %v66_v33, 4 }
   0xa   :  { %144 = vmatpush.msra.mxu0 %v98_v20  ;;  %v54_v40 = vadd.f32 %v53_v31, %v52_v27  ;;  %v74_v42 = vrot.slane %v73_v37, 4  ;;  %v80_v46 = vsel %vm30_vm0, %v29_v21, 0.0  ;;  %v62_v50 = vrot.slane %v61_v41, 2  ;;  %v158_v31 = vld [vmem:[%s245_s2] ss:$0 sm:$0xff] }
   0xb   :  { %v34_v39 = vrot.slane %v33_v30, 2  ;;  %v41_v43 = vrot.slane %v40_v34, 2  ;;  %v48_v44 = vrot.slane %v47_v35, 2  ;;  %v68_v45 = vadd.f32 %v67_v36, %v66_v33 }
   0xc   :  { %145 = vmatpush.msra.mxu0 %v97_v29  ;;  %v55_v49 = vrot.slane %v54_v40, 2  ;;  %v75_v51 = vadd.f32 %v74_v42, %v73_v37  ;;  %v81_v55 = vrot.slane %v80_v46, 4  ;;  %v63_v58 = vadd.f32 %v62_v50, %v61_v41 }
   0xd   :  { %v35_v48 = vadd.f32 %v34_v39, %v33_v30  ;;  %v42_v52 = vadd.f32 %v41_v43, %v40_v34  ;;  %v49_v53 = vadd.f32 %v48_v44, %v47_v35  ;;  %v69_v54 = vrot.slane %v68_v45, 2 }
   0xe   :  { %146 = vmatpush.msra.mxu0 %v96_v38  ;;  %v56_v57 = vadd.f32 %v55_v49, %v54_v40  ;;  %v76_v59 = vrot.slane %v75_v51, 2  ;;  %v82_v63 = vadd.f32 %v81_v55, %v80_v46  ;;  %v64_v2 = vrot.slane %v63_v58, 1 }
   0xf   :  { %v36_v56 = vrot.slane %v35_v48, 1  ;;  %v43_v60 = vrot.slane %v42_v52, 1  ;;  %v50_v61 = vrot.slane %v49_v53, 1  ;;  %v70_v62 = vadd.f32 %v69_v54, %v68_v45 }
  0x10   :  { %147 = vmatpush.msra.mxu0 %v95_v47  ;;  %v57_v1 = vrot.slane %v56_v57, 1  ;;  %v77_v3 = vadd.f32 %v76_v59, %v75_v51  ;;  %v83_v7 = vrot.slane %v82_v63, 2  ;;  %v65_v9 = vadd.f32 %v64_v2, %v63_v58 }
  0x11   :  { %v37_v0 = vadd.f32 %v36_v56, %v35_v48  ;;  %v44_v4 = vadd.f32 %v43_v60, %v42_v52  ;;  %v51_v5 = vadd.f32 %v50_v61, %v49_v53  ;;  %v71_v6 = vrot.slane %v70_v62, 1 }
  0x12   :  { %v58_v8 = vadd.f32 %v57_v1, %v56_v57  ;;  %v78_v10 = vrot.slane %v77_v3, 1  ;;  %v84_v13 = vadd.f32 %v83_v7, %v82_v63  ;;  %v91_v18 = vmul.f32 0.25, %v65_v9 }
  0x13   :  { %v87_v11 = vmul.f32 0.25, %v37_v0  ;;  %v72_v12 = vadd.f32 %v71_v6, %v70_v62  ;;  %v88_v14 = vmul.f32 0.25, %v44_v4  ;;  %v89_v15 = vmul.f32 0.25, %v51_v5 }
  0x14   :  { %v79_v16 = vadd.f32 %v78_v10, %v77_v3  ;;  %v90_v17 = vmul.f32 0.25, %v58_v8  ;;  %v85_v19 = vrot.slane %v84_v13, 1  ;;  %vm129_vm8 = vcmask 523264  }
  0x15   :  { %v92_v20 = vmul.f32 0.25, %v72_v12  ;;  %v116_v21 = vsel %vm115_vm1, %v88_v14, %v87_v11 }
  0x16   :  { %v93_v22 = vmul.f32 0.25, %v79_v16  ;;  %v118_v23 = vsel %vm117_vm2, %v89_v15, %v116_v21  ;;  %v86_v24 = vadd.f32 %v85_v19, %v84_v13 }
  0x17   :  { %v120_v25 = vsel %vm119_vm3, %v90_v17, %v118_v23 }
  0x18   :  { %v122_v26 = vsel %vm121_vm4, %v91_v18, %v120_v25  ;;  %v94_v27 = vmul.f32 0.25, %v86_v24 }
  0x19   :  { %v124_v28 = vsel %vm123_vm5, %v92_v20, %v122_v26 }
  0x1a   :  { %v126_v29 = vsel %vm125_vm6, %v93_v22, %v124_v28 }
  0x1b   :  { %v128_v30 = vsel %vm127_vm7, %v94_v27, %v126_v29 }
  0x1c   :  { %157 = vmatmul.msk.f32.vlgmr.msra.gmra.mxu0 %vm129_vm8, %v128_v30 }
  0x99   :  { %v149_v32 = vpop.f32.mrf.mxu0 }
  0x9a   :  { %v150_v33 = vadd.f32 %v158_v31, %v149_v32 }
  0x9c   :  { %152 = vst [vmem:[%s246_s3] sm:$0xff] %v150_v33 }

</bundles_post_ra>
